<compile_context>
chip_gen: v6e
topology: v6e:2x2x1
jax: 0.10.0
libtpu: 0.0.40
codegen_flags: <defaults>
</compile_context>

<pallas_src>
import math
import jax
import jax.numpy as jnp
from jax.experimental import pallas as pl
from jax.experimental.pallas import tpu as pltpu

# ----------------------------- configuration --------------------------------
B = 2          # batch
S = 16         # seq_length (module default)
D = 128        # embed_dim (small but lane-aligned)
H = 8          # n_head
HD = D // 8    # head_size = embed_dim // 8 (power of two)
E = 4          # num_experts (small)
TOPK = 2
HID = 4 * D    # expert hidden size (embed_dim * 4)
VOCAB = 100
NCLS = 10
BS = B * S


# ------------------------------ fused kernel --------------------------------
def _fused_kernel(x_ref, pos_ref, lng_ref, lnb_ref,
                  wqkv_ref, bqkv_ref, wo_ref, bo_ref,
                  cos_ref, sin_ref, rel_ref,
                  rw_ref, rb_ref, w1_ref, b1_ref, w2_ref, b2_ref,
                  pool_ref, clsw_ref, clsb_ref,
                  # outputs
                  attn_ref, eo1_ref, acts1_ref, gates1_ref, probs1_ref,
                  eo2_ref, gates2_ref, probs2_ref, aux_ref,
                  feat_ref, logits_ref):
    # token embeddings + learnable positional embedding
    x3 = x_ref[...] + pos_ref[...][None]                  # (B, S, D)
    x0 = x3.reshape(BS, D)                                # (BS, D)

    lng = lng_ref[...]                                    # (3, D)
    lnb = lnb_ref[...]                                    # (3, D)

    def ln(t, i):
        mu = jnp.mean(t, axis=-1, keepdims=True)
        var = jnp.mean(jnp.square(t - mu), axis=-1, keepdims=True)
        return (t - mu) * jax.lax.rsqrt(var + 1e-5) * lng[i:i + 1, :] + lnb[i:i + 1, :]

    # ------------------------------ attention --------------------------------
    h1 = ln(x0, 0)
    qkv = jnp.dot(h1.astype(jnp.bfloat16), wqkv_ref[...],
                  preferred_element_type=jnp.float32) + bqkv_ref[...]   # (BS, 3D)
    q = qkv[:, 0:D].reshape(B, S, D)
    k = qkv[:, D:2 * D].reshape(B, S, D)
    v = qkv[:, 2 * D:3 * D].reshape(B, S, D)

    cos = cos_ref[...][None]                              # (1, S, D)
    sin = sin_ref[...][None]
    lane = jax.lax.broadcasted_iota(jnp.int32, (1, 1, D), 2)
    # offset within each head chunk (HD is a power of two)
    first_half = jnp.bitwise_and(lane, HD - 1) < (HD // 2)

    def rope(t):
        # rotate-half within each concatenated head chunk using XLU rolls
        r_prev = pltpu.roll(t, shift=HD // 2, axis=2)      # t[j - HD/2]
        r_next = pltpu.roll(t, shift=D - HD // 2, axis=2)  # t[j + HD/2]
        t_rot = jnp.where(first_half, -r_next, r_prev)
        return t * cos + t_rot * sin

    qr = rope(q)
    kr = rope(k)
    rel = rel_ref[...]                                    # (H, S, S)
    scale = 1.0 / math.sqrt(HD)

    attn_heads = []
    ctx_heads = []
    for hh in range(H):
        sl = slice(hh * HD, (hh + 1) * HD)
        qh = qr[:, :, sl]                                 # (B, S, HD)
        kh = kr[:, :, sl]
        vh = v[:, :, sl]
        sc = jnp.einsum('bse,bte->bst', qh, kh,
                        preferred_element_type=jnp.float32) * scale
        sc = sc + rel[hh][None]
        sc = sc - jnp.max(sc, axis=-1, keepdims=True)
        pexp = jnp.exp(sc)
        a = pexp / jnp.sum(pexp, axis=-1, keepdims=True)  # (B, S, S)
        ctx = jnp.einsum('bst,bte->bse', a, vh,
                         preferred_element_type=jnp.float32)
        attn_heads.append(a)
        ctx_heads.append(ctx)

    # lane-dense attention-weight store: (B, S, H*S=128)
    attn_ref[...] = jnp.concatenate(attn_heads, axis=-1)
    ctx_all = jnp.concatenate(ctx_heads, axis=-1).reshape(BS, D)
    sa = jnp.dot(ctx_all.astype(jnp.bfloat16), wo_ref[...],
                 preferred_element_type=jnp.float32) + bo_ref[...]
    x1 = x0 + sa                                          # residual; dropout = identity

    # ------------------------------- MoE blocks ------------------------------
    eidx = jax.lax.broadcasted_iota(jnp.int32, (BS, E), 1)

    def moe_layer(xin, l, eo_ref, acts_ref, gates_ref, probs_ref):
        # router (softmax probs = "router attention")
        rlog = jnp.dot(xin, rw_ref[l], preferred_element_type=jnp.float32) + rb_ref[l]
        m = jnp.max(rlog, axis=-1, keepdims=True)
        pe = jnp.exp(rlog - m)
        probs = pe / jnp.sum(pe, axis=-1, keepdims=True)          # (BS, E)

        # top-k selection by rank (strictly-greater count, index tie-break)
        rank = jnp.zeros((BS, E), jnp.float32)
        for j in range(E):
            lj = rlog[:, j:j + 1]
            beats = jnp.logical_or(lj > rlog,
                                   jnp.logical_and(lj == rlog, j < eidx))
            rank = rank + beats.astype(jnp.float32)
        sel = rank < float(TOPK)
        slog = jnp.where(sel, rlog, jnp.float32(-1e9))
        m2 = jnp.max(slog, axis=-1, keepdims=True)
        pe2 = jnp.exp(slog - m2)
        gates = pe2 / jnp.sum(pe2, axis=-1, keepdims=True)        # (BS, E)

        # Switch-style load-balancing aux components (finished in wrapper)
        importance = jnp.mean(probs, axis=0, keepdims=True)       # (1, E)
        load = jnp.mean(sel.astype(jnp.float32), axis=0, keepdims=True)
        aux_ref[l] = importance * load
        gates_ref[...] = gates.reshape(B, S, E)
        probs_ref[...] = probs.reshape(B, S, E)

        # experts: first matmul fused across experts, second per-expert
        hexp = jnp.dot(xin.astype(jnp.bfloat16), w1_ref[l],
                       preferred_element_type=jnp.float32) + b1_ref[l]   # (BS, E*HID)
        hexp = jnp.maximum(hexp, 0.0).astype(jnp.bfloat16)
        total = jnp.zeros((BS, D), jnp.float32)
        for e in range(E):
            he = hexp[:, e * HID:(e + 1) * HID]                   # (BS, HID)
            ye = jnp.dot(he, w2_ref[l * E + e],
                         preferred_element_type=jnp.float32) + b2_ref[l * E + e]
            me = ye * gates[:, e:e + 1]                           # gated expert output
            eo_ref[e] = me.reshape(B, S, D)
            if acts_ref is not None:
                acts_ref[e] = jnp.mean(ye, axis=-1, keepdims=True)  # (BS, 1)
            total = total + me
        return total

    out1 = moe_layer(ln(x1, 1), 0, eo1_ref, acts1_ref, gates1_ref, probs1_ref)
    out2 = moe_layer(ln(out1, 2), 1, eo2_ref, None, gates2_ref, probs2_ref)

    # mean over sequence via a tiny pooling matmul, then classification head
    feat = jnp.dot(pool_ref[...], out2, preferred_element_type=jnp.float32)  # (B, D)
    feat_ref[...] = feat
    logits_ref[...] = jnp.dot(feat, clsw_ref[...],
                              preferred_element_type=jnp.float32) + clsb_ref[...]


def fused_forward(x_emb, p):
    def fs(shape):
        nd = len(shape)
        return pl.BlockSpec(shape, lambda i, _n=nd: (0,) * _n)

    out_shape = (
        jax.ShapeDtypeStruct((B, S, H * S), jnp.float32),   # attn (lane-dense packed)
        jax.ShapeDtypeStruct((E, B, S, D), jnp.float32),    # moe1 expert outputs
        jax.ShapeDtypeStruct((E, BS, 1), jnp.float32),      # moe1 expert activations
        jax.ShapeDtypeStruct((B, S, E), jnp.float32),       # moe1 gates
        jax.ShapeDtypeStruct((B, S, E), jnp.float32),       # moe1 router probs
        jax.ShapeDtypeStruct((E, B, S, D), jnp.float32),    # moe2 expert outputs
        jax.ShapeDtypeStruct((B, S, E), jnp.float32),       # moe2 gates
        jax.ShapeDtypeStruct((B, S, E), jnp.float32),       # moe2 router probs
        jax.ShapeDtypeStruct((2, 1, E), jnp.float32),       # aux loss components
        jax.ShapeDtypeStruct((B, D), jnp.float32),          # feature vector
        jax.ShapeDtypeStruct((B, NCLS), jnp.float32),       # class logits
    )
    in_arrays = (x_emb, p['pos'], p['ln_g'], p['ln_b'],
                 p['wqkv'], p['bqkv'], p['wo'], p['bo'],
                 p['cos'], p['sin'], p['rel_bias'],
                 p['router_w'], p['router_b'],
                 p['w1'], p['b1'], p['w2'], p['b2'],
                 p['pool'], p['cls_w'], p['cls_b'])

    return pl.pallas_call(
        _fused_kernel,
        out_shape=out_shape,
        grid=(1,),
        in_specs=[fs(a.shape) for a in in_arrays],
        out_specs=tuple(fs(s.shape) for s in out_shape),
        compiler_params=pltpu.CompilerParams(
            dimension_semantics=("arbitrary",),
            vmem_limit_bytes=32 * 1024 * 1024),
    )(*in_arrays)


# ------------------------------- parameters ---------------------------------
def init_params(key):
    keys = iter(jax.random.split(key, 32))
    std = 0.02

    def nrm(shape):
        return std * jax.random.normal(next(keys), shape, dtype=jnp.float32)

    p = {}
    p['embed'] = nrm((VOCAB, D))
    p['pos'] = nrm((S, D))
    p['ln_g'] = jnp.ones((3, D), jnp.float32)
    p['ln_b'] = jnp.zeros((3, D), jnp.float32)

    # fused QKV projection (heads concatenated along the output dim) — bf16 weights
    p['wqkv'] = nrm((D, 3 * D)).astype(jnp.bfloat16)
    p['bqkv'] = jnp.zeros((1, 3 * D), jnp.float32)
    p['wo'] = nrm((D, D)).astype(jnp.bfloat16)
    p['bo'] = jnp.zeros((1, D), jnp.float32)

    # rotary tables, tiled over heads so they apply in the concatenated layout
    pos = jnp.arange(S, dtype=jnp.float32)[:, None]
    inv = 1.0 / (10000.0 ** (jnp.arange(0, HD, 2, dtype=jnp.float32) / HD))
    ang = pos * inv[None, :]
    cos_hd = jnp.concatenate([jnp.cos(ang), jnp.cos(ang)], axis=-1)   # (S, HD)
    sin_hd = jnp.concatenate([jnp.sin(ang), jnp.sin(ang)], axis=-1)
    p['cos'] = jnp.tile(cos_hd, (1, H))                               # (S, D)
    p['sin'] = jnp.tile(sin_hd, (1, H))

    # learnable relative position bias
    rel_table = nrm((H, 2 * S - 1))
    rel_idx = jnp.arange(S)[:, None] - jnp.arange(S)[None, :] + (S - 1)
    p['rel_bias'] = rel_table[:, rel_idx]                             # (H, S, S)

    # two MoE layers, stacked along the leading axis
    p['router_w'] = nrm((2, D, E))
    p['router_b'] = jnp.zeros((2, 1, E), jnp.float32)
    p['w1'] = nrm((2, D, E * HID)).astype(jnp.bfloat16)               # experts fused on N
    p['b1'] = jnp.zeros((2, 1, E * HID), jnp.float32)
    p['w2'] = nrm((2 * E, HID, D)).astype(jnp.bfloat16)               # [layer*E + e]
    p['b2'] = jnp.zeros((2 * E, 1, D), jnp.float32)

    # mean-over-sequence pooling matrix and classifier head
    p['pool'] = jnp.kron(jnp.eye(B, dtype=jnp.float32),
                         jnp.ones((1, S), jnp.float32)) / S           # (B, B*S)
    p['cls_w'] = nrm((D, NCLS))
    p['cls_b'] = jnp.zeros((1, NCLS), jnp.float32)
    return p


# --------------------------------- forward ----------------------------------
@jax.jit
def text_moe_forward(params, input_ids):
    x_emb = params['embed'][input_ids]                      # (B, S, D) gather in XLA
    (attn_cat, eo1, acts1, gates1, probs1,
     eo2, gates2, probs2, aux, feat, logits) = fused_forward(x_emb, params)

    attn_w = attn_cat.reshape(B, S, H, S).transpose(0, 2, 1, 3)       # (B, H, S, S)
    acts1 = acts1.reshape(E, B, S)
    router_loss = jnp.float32(E) * jnp.sum(aux)             # sum of both layers' aux

    return {
        'feature_vector': feat,
        'logits': logits,
        'router_loss': router_loss,
        'attention_weights': attn_w,
        'expert_outputs': acts1,
        'first_expert_outputs': eo1,
        'second_expert_outputs': eo2,
        'first_gating_output': gates1,
        'second_gating_output': gates2,
        'first_router_attention': probs1,
        'second_router_attention': probs2,
    }


if __name__ == "__main__":
    key = jax.random.PRNGKey(0)
    pkey, dkey = jax.random.split(key)
    params = init_params(pkey)
    input_ids = jax.random.randint(dkey, (B, S), 0, VOCAB, dtype=jnp.int32)
    attention_mask = jnp.ones((B, S), jnp.int32)  # unused (matches reference forward)

    out = text_moe_forward(params, input_ids)
    jax.block_until_ready(out)

    assert out['logits'].shape == (B, NCLS)
    assert out['feature_vector'].shape == (B, D)
    assert out['attention_weights'].shape == (B, H, S, S)
    assert out['expert_outputs'].shape == (E, B, S)
    assert out['first_expert_outputs'].shape == (E, B, S, D)
    assert out['second_expert_outputs'].shape == (E, B, S, D)
    assert out['first_gating_output'].shape == (B, S, E)
    assert out['first_router_attention'].shape == (B, S, E)
    assert jnp.all(jnp.isfinite(out['logits']))
    assert jnp.all(jnp.isfinite(out['attention_weights']))
    print("KERNEL_OK")
</pallas_src>

<mosaic_0001>
module attributes {stable_mosaic.version = 11 : i64} {
  func.func @_fused_kernel(%arg0: i32, %arg1: memref<2x16x128xf32, #tpu.memory_space<vmem>>, %arg2: memref<16x128xf32, #tpu.memory_space<vmem>>, %arg3: memref<3x128xf32, #tpu.memory_space<vmem>>, %arg4: memref<3x128xf32, #tpu.memory_space<vmem>>, %arg5: memref<128x384xbf16, #tpu.memory_space<vmem>>, %arg6: memref<1x384xf32, #tpu.memory_space<vmem>>, %arg7: memref<128x128xbf16, #tpu.memory_space<vmem>>, %arg8: memref<1x128xf32, #tpu.memory_space<vmem>>, %arg9: memref<16x128xf32, #tpu.memory_space<vmem>>, %arg10: memref<16x128xf32, #tpu.memory_space<vmem>>, %arg11: memref<8x16x16xf32, #tpu.memory_space<vmem>>, %arg12: memref<2x128x4xf32, #tpu.memory_space<vmem>>, %arg13: memref<2x1x4xf32, #tpu.memory_space<vmem>>, %arg14: memref<2x128x2048xbf16, #tpu.memory_space<vmem>>, %arg15: memref<2x1x2048xf32, #tpu.memory_space<vmem>>, %arg16: memref<8x512x128xbf16, #tpu.memory_space<vmem>>, %arg17: memref<8x1x128xf32, #tpu.memory_space<vmem>>, %arg18: memref<2x32xf32, #tpu.memory_space<vmem>>, %arg19: memref<128x10xf32, #tpu.memory_space<vmem>>, %arg20: memref<1x10xf32, #tpu.memory_space<vmem>>, %arg21: memref<2x16x128xf32, #tpu.memory_space<vmem>>, %arg22: memref<4x2x16x128xf32, #tpu.memory_space<vmem>>, %arg23: memref<4x32x1xf32, #tpu.memory_space<vmem>>, %arg24: memref<2x16x4xf32, #tpu.memory_space<vmem>>, %arg25: memref<2x16x4xf32, #tpu.memory_space<vmem>>, %arg26: memref<4x2x16x128xf32, #tpu.memory_space<vmem>>, %arg27: memref<2x16x4xf32, #tpu.memory_space<vmem>>, %arg28: memref<2x16x4xf32, #tpu.memory_space<vmem>>, %arg29: memref<2x1x4xf32, #tpu.memory_space<vmem>>, %arg30: memref<2x128xf32, #tpu.memory_space<vmem>>, %arg31: memref<2x10xf32, #tpu.memory_space<vmem>>) attributes {dimension_semantics = [#tpu.dimension_semantics<arbitrary>], iteration_bounds = array<i64: 1>, scalar_prefetch = 0 : i64, scratch_operands = 0 : i64, tpu.core_type = #tpu.core_type<tc>, window_params = [{pipeline_mode = #tpu.pipeline_mode<synchronous>, transform_indices = @transform_0, window_bounds = array<i64: 2, 16, 128>}, {pipeline_mode = #tpu.pipeline_mode<synchronous>, transform_indices = @transform_1, window_bounds = array<i64: 16, 128>}, {pipeline_mode = #tpu.pipeline_mode<synchronous>, transform_indices = @transform_2, window_bounds = array<i64: 3, 128>}, {pipeline_mode = #tpu.pipeline_mode<synchronous>, transform_indices = @transform_3, window_bounds = array<i64: 3, 128>}, {pipeline_mode = #tpu.pipeline_mode<synchronous>, transform_indices = @transform_4, window_bounds = array<i64: 128, 384>}, {pipeline_mode = #tpu.pipeline_mode<synchronous>, transform_indices = @transform_5, window_bounds = array<i64: 1, 384>}, {pipeline_mode = #tpu.pipeline_mode<synchronous>, transform_indices = @transform_6, window_bounds = array<i64: 128, 128>}, {pipeline_mode = #tpu.pipeline_mode<synchronous>, transform_indices = @transform_7, window_bounds = array<i64: 1, 128>}, {pipeline_mode = #tpu.pipeline_mode<synchronous>, transform_indices = @transform_8, window_bounds = array<i64: 16, 128>}, {pipeline_mode = #tpu.pipeline_mode<synchronous>, transform_indices = @transform_9, window_bounds = array<i64: 16, 128>}, {pipeline_mode = #tpu.pipeline_mode<synchronous>, transform_indices = @transform_10, window_bounds = array<i64: 8, 16, 16>}, {pipeline_mode = #tpu.pipeline_mode<synchronous>, transform_indices = @transform_11, window_bounds = array<i64: 2, 128, 4>}, {pipeline_mode = #tpu.pipeline_mode<synchronous>, transform_indices = @transform_12, window_bounds = array<i64: 2, 1, 4>}, {pipeline_mode = #tpu.pipeline_mode<synchronous>, transform_indices = @transform_13, window_bounds = array<i64: 2, 128, 2048>}, {pipeline_mode = #tpu.pipeline_mode<synchronous>, transform_indices = @transform_14, window_bounds = array<i64: 2, 1, 2048>}, {pipeline_mode = #tpu.pipeline_mode<synchronous>, transform_indices = @transform_15, window_bounds = array<i64: 8, 512, 128>}, {pipeline_mode = #tpu.pipeline_mode<synchronous>, transform_indices = @transform_16, window_bounds = array<i64: 8, 1, 128>}, {pipeline_mode = #tpu.pipeline_mode<synchronous>, transform_indices = @transform_17, window_bounds = array<i64: 2, 32>}, {pipeline_mode = #tpu.pipeline_mode<synchronous>, transform_indices = @transform_18, window_bounds = array<i64: 128, 10>}, {pipeline_mode = #tpu.pipeline_mode<synchronous>, transform_indices = @transform_19, window_bounds = array<i64: 1, 10>}, {pipeline_mode = #tpu.pipeline_mode<synchronous>, transform_indices = @transform_20, window_bounds = array<i64: 2, 16, 128>}, {pipeline_mode = #tpu.pipeline_mode<synchronous>, transform_indices = @transform_21, window_bounds = array<i64: 4, 2, 16, 128>}, {pipeline_mode = #tpu.pipeline_mode<synchronous>, transform_indices = @transform_22, window_bounds = array<i64: 4, 32, 1>}, {pipeline_mode = #tpu.pipeline_mode<synchronous>, transform_indices = @transform_23, window_bounds = array<i64: 2, 16, 4>}, {pipeline_mode = #tpu.pipeline_mode<synchronous>, transform_indices = @transform_24, window_bounds = array<i64: 2, 16, 4>}, {pipeline_mode = #tpu.pipeline_mode<synchronous>, transform_indices = @transform_25, window_bounds = array<i64: 4, 2, 16, 128>}, {pipeline_mode = #tpu.pipeline_mode<synchronous>, transform_indices = @transform_26, window_bounds = array<i64: 2, 16, 4>}, {pipeline_mode = #tpu.pipeline_mode<synchronous>, transform_indices = @transform_27, window_bounds = array<i64: 2, 16, 4>}, {pipeline_mode = #tpu.pipeline_mode<synchronous>, transform_indices = @transform_28, window_bounds = array<i64: 2, 1, 4>}, {pipeline_mode = #tpu.pipeline_mode<synchronous>, transform_indices = @transform_29, window_bounds = array<i64: 2, 128>}, {pipeline_mode = #tpu.pipeline_mode<synchronous>, transform_indices = @transform_30, window_bounds = array<i64: 2, 10>}]} {
    %c0 = arith.constant 0 : index
    %c0_0 = arith.constant 0 : index
    %c0_1 = arith.constant 0 : index
    %0 = vector.load %arg1[%c0, %c0_0, %c0_1] : memref<2x16x128xf32, #tpu.memory_space<vmem>>, vector<2x16x128xf32>
    %c0_2 = arith.constant 0 : index
    %c0_3 = arith.constant 0 : index
    %1 = vector.load %arg2[%c0_2, %c0_3] : memref<16x128xf32, #tpu.memory_space<vmem>>, vector<16x128xf32>
    %2 = vector.shape_cast %1 : vector<16x128xf32> to vector<1x16x128xf32>
    %3 = vector.broadcast %2 : vector<1x16x128xf32> to vector<2x16x128xf32>
    %4 = arith.addf %0, %3 : vector<2x16x128xf32>
    %5 = vector.shape_cast %4 : vector<2x16x128xf32> to vector<32x128xf32>
    %c0_4 = arith.constant 0 : index
    %c0_5 = arith.constant 0 : index
    %6 = vector.load %arg3[%c0_4, %c0_5] : memref<3x128xf32, #tpu.memory_space<vmem>>, vector<3x128xf32>
    %c0_6 = arith.constant 0 : index
    %c0_7 = arith.constant 0 : index
    %7 = vector.load %arg4[%c0_6, %c0_7] : memref<3x128xf32, #tpu.memory_space<vmem>>, vector<3x128xf32>
    %cst = arith.constant dense<0.000000e+00> : vector<32xf32>
    %8 = vector.multi_reduction <add>, %5, %cst [1] : vector<32x128xf32> to vector<32xf32>
    %9 = vector.shape_cast %8 : vector<32xf32> to vector<32x1xf32>
    %cst_8 = arith.constant 1.280000e+02 : f32
    %10 = vector.broadcast %cst_8 : f32 to vector<32x1xf32>
    %11 = arith.divf %9, %10 : vector<32x1xf32>
    %12 = vector.broadcast %11 : vector<32x1xf32> to vector<32x128xf32>
    %13 = arith.subf %5, %12 : vector<32x128xf32>
    %14 = arith.mulf %13, %13 : vector<32x128xf32>
    %cst_9 = arith.constant dense<0.000000e+00> : vector<32xf32>
    %15 = vector.multi_reduction <add>, %14, %cst_9 [1] : vector<32x128xf32> to vector<32xf32>
    %16 = vector.shape_cast %15 : vector<32xf32> to vector<32x1xf32>
    %cst_10 = arith.constant 1.280000e+02 : f32
    %17 = vector.broadcast %cst_10 : f32 to vector<32x1xf32>
    %18 = arith.divf %16, %17 : vector<32x1xf32>
    %19 = vector.broadcast %11 : vector<32x1xf32> to vector<32x128xf32>
    %20 = arith.subf %5, %19 : vector<32x128xf32>
    %cst_11 = arith.constant 9.99999974E-6 : f32
    %21 = vector.broadcast %cst_11 : f32 to vector<32x1xf32>
    %22 = arith.addf %18, %21 : vector<32x1xf32>
    %23 = math.rsqrt %22 : vector<32x1xf32>
    %24 = vector.broadcast %23 : vector<32x1xf32> to vector<32x128xf32>
    %25 = arith.mulf %20, %24 : vector<32x128xf32>
    %26 = vector.extract_strided_slice %6 {offsets = [0, 0], sizes = [1, 128], strides = [1, 1]} : vector<3x128xf32> to vector<1x128xf32>
    %27 = vector.broadcast %26 : vector<1x128xf32> to vector<32x128xf32>
    %28 = arith.mulf %25, %27 : vector<32x128xf32>
    %29 = vector.extract_strided_slice %7 {offsets = [0, 0], sizes = [1, 128], strides = [1, 1]} : vector<3x128xf32> to vector<1x128xf32>
    %30 = vector.broadcast %29 : vector<1x128xf32> to vector<32x128xf32>
    %31 = arith.addf %28, %30 : vector<32x128xf32>
    %32 = arith.truncf %31 : vector<32x128xf32> to vector<32x128xbf16>
    %c0_12 = arith.constant 0 : index
    %c0_13 = arith.constant 0 : index
    %33 = vector.load %arg5[%c0_12, %c0_13] : memref<128x384xbf16, #tpu.memory_space<vmem>>, vector<128x384xbf16>
    %cst_14 = arith.constant dense<0.000000e+00> : vector<32x384xf32>
    %34 = tpu.matmul %32, %33, %cst_14 {dimension_numbers = #tpu.dot_dimension_numbers<[1], [0], [0], [1], [0, 0, 1, 1], [], []>} : vector<32x128xbf16>, vector<128x384xbf16>, vector<32x384xf32> -> vector<32x384xf32>
    %c0_15 = arith.constant 0 : index
    %c0_16 = arith.constant 0 : index
    %35 = vector.load %arg6[%c0_15, %c0_16] : memref<1x384xf32, #tpu.memory_space<vmem>>, vector<1x384xf32>
    %36 = vector.broadcast %35 : vector<1x384xf32> to vector<32x384xf32>
    %37 = arith.addf %34, %36 : vector<32x384xf32>
    %38 = vector.extract_strided_slice %37 {offsets = [0, 0], sizes = [32, 128], strides = [1, 1]} : vector<32x384xf32> to vector<32x128xf32>
    %39 = vector.shape_cast %38 : vector<32x128xf32> to vector<2x16x128xf32>
    %40 = vector.extract_strided_slice %37 {offsets = [0, 128], sizes = [32, 128], strides = [1, 1]} : vector<32x384xf32> to vector<32x128xf32>
    %41 = vector.shape_cast %40 : vector<32x128xf32> to vector<2x16x128xf32>
    %42 = vector.extract_strided_slice %37 {offsets = [0, 256], sizes = [32, 128], strides = [1, 1]} : vector<32x384xf32> to vector<32x128xf32>
    %43 = vector.shape_cast %42 : vector<32x128xf32> to vector<2x16x128xf32>
    %c0_17 = arith.constant 0 : index
    %c0_18 = arith.constant 0 : index
    %44 = vector.load %arg9[%c0_17, %c0_18] : memref<16x128xf32, #tpu.memory_space<vmem>>, vector<16x128xf32>
    %45 = vector.shape_cast %44 : vector<16x128xf32> to vector<1x16x128xf32>
    %c0_19 = arith.constant 0 : index
    %c0_20 = arith.constant 0 : index
    %46 = vector.load %arg10[%c0_19, %c0_20] : memref<16x128xf32, #tpu.memory_space<vmem>>, vector<16x128xf32>
    %47 = vector.shape_cast %46 : vector<16x128xf32> to vector<1x16x128xf32>
    %48 = tpu.iota {dimensions = array<i32: 2>} : vector<1x1x128xi32>
    %c15_i32 = arith.constant 15 : i32
    %49 = vector.broadcast %c15_i32 : i32 to vector<1x1x128xi32>
    %50 = arith.andi %48, %49 : vector<1x1x128xi32>
    %c8_i32 = arith.constant 8 : i32
    %51 = vector.broadcast %c8_i32 : i32 to vector<1x1x128xi32>
    %52 = arith.cmpi slt, %50, %51 : vector<1x1x128xi32>
    %c8_i32_21 = arith.constant 8 : i32
    %53 = tpu.dynamic_rotate %39 by %c8_i32_21 dim 2 : vector<2x16x128xf32>, i32 -> vector<2x16x128xf32>
    %c120_i32 = arith.constant 120 : i32
    %54 = tpu.dynamic_rotate %39 by %c120_i32 dim 2 : vector<2x16x128xf32>, i32 -> vector<2x16x128xf32>
    %cst_22 = arith.constant 0.000000e+00 : f32
    %55 = vector.broadcast %cst_22 : f32 to vector<2x16x128xf32>
    %56 = arith.subf %55, %54 : vector<2x16x128xf32>
    %57 = vector.shape_cast %52 : vector<1x1x128xi1> to vector<1x1x128xi1>
    %58 = vector.broadcast %57 : vector<1x1x128xi1> to vector<2x16x128xi1>
    %59 = arith.select %58, %56, %53 : vector<2x16x128xi1>, vector<2x16x128xf32>
    %60 = vector.broadcast %45 : vector<1x16x128xf32> to vector<2x16x128xf32>
    %61 = arith.mulf %39, %60 : vector<2x16x128xf32>
    %62 = vector.broadcast %47 : vector<1x16x128xf32> to vector<2x16x128xf32>
    %63 = arith.mulf %59, %62 : vector<2x16x128xf32>
    %64 = arith.addf %61, %63 : vector<2x16x128xf32>
    %c8_i32_23 = arith.constant 8 : i32
    %65 = tpu.dynamic_rotate %41 by %c8_i32_23 dim 2 : vector<2x16x128xf32>, i32 -> vector<2x16x128xf32>
    %c120_i32_24 = arith.constant 120 : i32
    %66 = tpu.dynamic_rotate %41 by %c120_i32_24 dim 2 : vector<2x16x128xf32>, i32 -> vector<2x16x128xf32>
    %cst_25 = arith.constant 0.000000e+00 : f32
    %67 = vector.broadcast %cst_25 : f32 to vector<2x16x128xf32>
    %68 = arith.subf %67, %66 : vector<2x16x128xf32>
    %69 = vector.shape_cast %52 : vector<1x1x128xi1> to vector<1x1x128xi1>
    %70 = vector.broadcast %69 : vector<1x1x128xi1> to vector<2x16x128xi1>
    %71 = arith.select %70, %68, %65 : vector<2x16x128xi1>, vector<2x16x128xf32>
    %72 = vector.broadcast %45 : vector<1x16x128xf32> to vector<2x16x128xf32>
    %73 = arith.mulf %41, %72 : vector<2x16x128xf32>
    %74 = vector.broadcast %47 : vector<1x16x128xf32> to vector<2x16x128xf32>
    %75 = arith.mulf %71, %74 : vector<2x16x128xf32>
    %76 = arith.addf %73, %75 : vector<2x16x128xf32>
    %c0_26 = arith.constant 0 : index
    %c0_27 = arith.constant 0 : index
    %c0_28 = arith.constant 0 : index
    %77 = vector.load %arg11[%c0_26, %c0_27, %c0_28] : memref<8x16x16xf32, #tpu.memory_space<vmem>>, vector<8x16x16xf32>
    %78 = vector.extract_strided_slice %64 {offsets = [0, 0, 0], sizes = [2, 16, 16], strides = [1, 1, 1]} : vector<2x16x128xf32> to vector<2x16x16xf32>
    %79 = vector.extract_strided_slice %76 {offsets = [0, 0, 0], sizes = [2, 16, 16], strides = [1, 1, 1]} : vector<2x16x128xf32> to vector<2x16x16xf32>
    %80 = vector.extract_strided_slice %43 {offsets = [0, 0, 0], sizes = [2, 16, 16], strides = [1, 1, 1]} : vector<2x16x128xf32> to vector<2x16x16xf32>
    "tpu.trace_start"() <{level = 10 : i32, message = "bse,bte->bst"}> : () -> ()
    %cst_29 = arith.constant dense<0.000000e+00> : vector<2x16x16xf32>
    %81 = tpu.matmul %78, %79, %cst_29 {dimension_numbers = #tpu.dot_dimension_numbers<[2], [2], [1], [1], [0, 0, 0, 1, 1, 1], [0], [0]>} : vector<2x16x16xf32>, vector<2x16x16xf32>, vector<2x16x16xf32> -> vector<2x16x16xf32>
    "tpu.trace_stop"() : () -> ()
    %cst_30 = arith.constant 2.500000e-01 : f32
    %82 = vector.broadcast %cst_30 : f32 to vector<2x16x16xf32>
    %83 = arith.mulf %81, %82 : vector<2x16x16xf32>
    %84 = vector.extract_strided_slice %77 {offsets = [0, 0, 0], sizes = [1, 16, 16], strides = [1, 1, 1]} : vector<8x16x16xf32> to vector<1x16x16xf32>
    %85 = vector.shape_cast %84 : vector<1x16x16xf32> to vector<16x16xf32>
    %86 = vector.shape_cast %85 : vector<16x16xf32> to vector<1x16x16xf32>
    %87 = vector.broadcast %86 : vector<1x16x16xf32> to vector<2x16x16xf32>
    %88 = arith.addf %83, %87 : vector<2x16x16xf32>
    %cst_31 = arith.constant dense<0xFF800000> : vector<2x16xf32>
    %89 = vector.multi_reduction <maximumf>, %88, %cst_31 [2] : vector<2x16x16xf32> to vector<2x16xf32>
    %90 = vector.shape_cast %89 : vector<2x16xf32> to vector<2x16x1xf32>
    %91 = vector.broadcast %90 : vector<2x16x1xf32> to vector<2x16x16xf32>
    %92 = arith.subf %88, %91 : vector<2x16x16xf32>
    %93 = math.exp %92 : vector<2x16x16xf32>
    %cst_32 = arith.constant dense<0.000000e+00> : vector<2x16xf32>
    %94 = vector.multi_reduction <add>, %93, %cst_32 [2] : vector<2x16x16xf32> to vector<2x16xf32>
    %95 = vector.shape_cast %94 : vector<2x16xf32> to vector<2x16x1xf32>
    %96 = vector.broadcast %95 : vector<2x16x1xf32> to vector<2x16x16xf32>
    %97 = arith.divf %93, %96 : vector<2x16x16xf32>
    "tpu.trace_start"() <{level = 10 : i32, message = "bst,bte->bse"}> : () -> ()
    %cst_33 = arith.constant dense<0.000000e+00> : vector<2x16x16xf32>
    %98 = tpu.matmul %97, %80, %cst_33 {dimension_numbers = #tpu.dot_dimension_numbers<[2], [1], [1], [2], [0, 0, 0, 1, 1, 2], [0], [0]>} : vector<2x16x16xf32>, vector<2x16x16xf32>, vector<2x16x16xf32> -> vector<2x16x16xf32>
    "tpu.trace_stop"() : () -> ()
    %99 = vector.extract_strided_slice %64 {offsets = [0, 0, 16], sizes = [2, 16, 16], strides = [1, 1, 1]} : vector<2x16x128xf32> to vector<2x16x16xf32>
    %100 = vector.extract_strided_slice %76 {offsets = [0, 0, 16], sizes = [2, 16, 16], strides = [1, 1, 1]} : vector<2x16x128xf32> to vector<2x16x16xf32>
    %101 = vector.extract_strided_slice %43 {offsets = [0, 0, 16], sizes = [2, 16, 16], strides = [1, 1, 1]} : vector<2x16x128xf32> to vector<2x16x16xf32>
    "tpu.trace_start"() <{level = 10 : i32, message = "bse,bte->bst"}> : () -> ()
    %cst_34 = arith.constant dense<0.000000e+00> : vector<2x16x16xf32>
    %102 = tpu.matmul %99, %100, %cst_34 {dimension_numbers = #tpu.dot_dimension_numbers<[2], [2], [1], [1], [0, 0, 0, 1, 1, 1], [0], [0]>} : vector<2x16x16xf32>, vector<2x16x16xf32>, vector<2x16x16xf32> -> vector<2x16x16xf32>
    "tpu.trace_stop"() : () -> ()
    %cst_35 = arith.constant 2.500000e-01 : f32
    %103 = vector.broadcast %cst_35 : f32 to vector<2x16x16xf32>
    %104 = arith.mulf %102, %103 : vector<2x16x16xf32>
    %105 = vector.extract_strided_slice %77 {offsets = [1, 0, 0], sizes = [1, 16, 16], strides = [1, 1, 1]} : vector<8x16x16xf32> to vector<1x16x16xf32>
    %106 = vector.shape_cast %105 : vector<1x16x16xf32> to vector<16x16xf32>
    %107 = vector.shape_cast %106 : vector<16x16xf32> to vector<1x16x16xf32>
    %108 = vector.broadcast %107 : vector<1x16x16xf32> to vector<2x16x16xf32>
    %109 = arith.addf %104, %108 : vector<2x16x16xf32>
    %cst_36 = arith.constant dense<0xFF800000> : vector<2x16xf32>
    %110 = vector.multi_reduction <maximumf>, %109, %cst_36 [2] : vector<2x16x16xf32> to vector<2x16xf32>
    %111 = vector.shape_cast %110 : vector<2x16xf32> to vector<2x16x1xf32>
    %112 = vector.broadcast %111 : vector<2x16x1xf32> to vector<2x16x16xf32>
    %113 = arith.subf %109, %112 : vector<2x16x16xf32>
    %114 = math.exp %113 : vector<2x16x16xf32>
    %cst_37 = arith.constant dense<0.000000e+00> : vector<2x16xf32>
    %115 = vector.multi_reduction <add>, %114, %cst_37 [2] : vector<2x16x16xf32> to vector<2x16xf32>
    %116 = vector.shape_cast %115 : vector<2x16xf32> to vector<2x16x1xf32>
    %117 = vector.broadcast %116 : vector<2x16x1xf32> to vector<2x16x16xf32>
    %118 = arith.divf %114, %117 : vector<2x16x16xf32>
    "tpu.trace_start"() <{level = 10 : i32, message = "bst,bte->bse"}> : () -> ()
    %cst_38 = arith.constant dense<0.000000e+00> : vector<2x16x16xf32>
    %119 = tpu.matmul %118, %101, %cst_38 {dimension_numbers = #tpu.dot_dimension_numbers<[2], [1], [1], [2], [0, 0, 0, 1, 1, 2], [0], [0]>} : vector<2x16x16xf32>, vector<2x16x16xf32>, vector<2x16x16xf32> -> vector<2x16x16xf32>
    "tpu.trace_stop"() : () -> ()
    %120 = vector.extract_strided_slice %64 {offsets = [0, 0, 32], sizes = [2, 16, 16], strides = [1, 1, 1]} : vector<2x16x128xf32> to vector<2x16x16xf32>
    %121 = vector.extract_strided_slice %76 {offsets = [0, 0, 32], sizes = [2, 16, 16], strides = [1, 1, 1]} : vector<2x16x128xf32> to vector<2x16x16xf32>
    %122 = vector.extract_strided_slice %43 {offsets = [0, 0, 32], sizes = [2, 16, 16], strides = [1, 1, 1]} : vector<2x16x128xf32> to vector<2x16x16xf32>
    "tpu.trace_start"() <{level = 10 : i32, message = "bse,bte->bst"}> : () -> ()
    %cst_39 = arith.constant dense<0.000000e+00> : vector<2x16x16xf32>
    %123 = tpu.matmul %120, %121, %cst_39 {dimension_numbers = #tpu.dot_dimension_numbers<[2], [2], [1], [1], [0, 0, 0, 1, 1, 1], [0], [0]>} : vector<2x16x16xf32>, vector<2x16x16xf32>, vector<2x16x16xf32> -> vector<2x16x16xf32>
    "tpu.trace_stop"() : () -> ()
    %cst_40 = arith.constant 2.500000e-01 : f32
    %124 = vector.broadcast %cst_40 : f32 to vector<2x16x16xf32>
    %125 = arith.mulf %123, %124 : vector<2x16x16xf32>
    %126 = vector.extract_strided_slice %77 {offsets = [2, 0, 0], sizes = [1, 16, 16], strides = [1, 1, 1]} : vector<8x16x16xf32> to vector<1x16x16xf32>
    %127 = vector.shape_cast %126 : vector<1x16x16xf32> to vector<16x16xf32>
    %128 = vector.shape_cast %127 : vector<16x16xf32> to vector<1x16x16xf32>
    %129 = vector.broadcast %128 : vector<1x16x16xf32> to vector<2x16x16xf32>
    %130 = arith.addf %125, %129 : vector<2x16x16xf32>
    %cst_41 = arith.constant dense<0xFF800000> : vector<2x16xf32>
    %131 = vector.multi_reduction <maximumf>, %130, %cst_41 [2] : vector<2x16x16xf32> to vector<2x16xf32>
    %132 = vector.shape_cast %131 : vector<2x16xf32> to vector<2x16x1xf32>
    %133 = vector.broadcast %132 : vector<2x16x1xf32> to vector<2x16x16xf32>
    %134 = arith.subf %130, %133 : vector<2x16x16xf32>
    %135 = math.exp %134 : vector<2x16x16xf32>
    %cst_42 = arith.constant dense<0.000000e+00> : vector<2x16xf32>
    %136 = vector.multi_reduction <add>, %135, %cst_42 [2] : vector<2x16x16xf32> to vector<2x16xf32>
    %137 = vector.shape_cast %136 : vector<2x16xf32> to vector<2x16x1xf32>
    %138 = vector.broadcast %137 : vector<2x16x1xf32> to vector<2x16x16xf32>
    %139 = arith.divf %135, %138 : vector<2x16x16xf32>
    "tpu.trace_start"() <{level = 10 : i32, message = "bst,bte->bse"}> : () -> ()
    %cst_43 = arith.constant dense<0.000000e+00> : vector<2x16x16xf32>
    %140 = tpu.matmul %139, %122, %cst_43 {dimension_numbers = #tpu.dot_dimension_numbers<[2], [1], [1], [2], [0, 0, 0, 1, 1, 2], [0], [0]>} : vector<2x16x16xf32>, vector<2x16x16xf32>, vector<2x16x16xf32> -> vector<2x16x16xf32>
    "tpu.trace_stop"() : () -> ()
    %141 = vector.extract_strided_slice %64 {offsets = [0, 0, 48], sizes = [2, 16, 16], strides = [1, 1, 1]} : vector<2x16x128xf32> to vector<2x16x16xf32>
    %142 = vector.extract_strided_slice %76 {offsets = [0, 0, 48], sizes = [2, 16, 16], strides = [1, 1, 1]} : vector<2x16x128xf32> to vector<2x16x16xf32>
    %143 = vector.extract_strided_slice %43 {offsets = [0, 0, 48], sizes = [2, 16, 16], strides = [1, 1, 1]} : vector<2x16x128xf32> to vector<2x16x16xf32>
    "tpu.trace_start"() <{level = 10 : i32, message = "bse,bte->bst"}> : () -> ()
    %cst_44 = arith.constant dense<0.000000e+00> : vector<2x16x16xf32>
    %144 = tpu.matmul %141, %142, %cst_44 {dimension_numbers = #tpu.dot_dimension_numbers<[2], [2], [1], [1], [0, 0, 0, 1, 1, 1], [0], [0]>} : vector<2x16x16xf32>, vector<2x16x16xf32>, vector<2x16x16xf32> -> vector<2x16x16xf32>
    "tpu.trace_stop"() : () -> ()
    %cst_45 = arith.constant 2.500000e-01 : f32
    %145 = vector.broadcast %cst_45 : f32 to vector<2x16x16xf32>
    %146 = arith.mulf %144, %145 : vector<2x16x16xf32>
    %147 = vector.extract_strided_slice %77 {offsets = [3, 0, 0], sizes = [1, 16, 16], strides = [1, 1, 1]} : vector<8x16x16xf32> to vector<1x16x16xf32>
    %148 = vector.shape_cast %147 : vector<1x16x16xf32> to vector<16x16xf32>
    %149 = vector.shape_cast %148 : vector<16x16xf32> to vector<1x16x16xf32>
    %150 = vector.broadcast %149 : vector<1x16x16xf32> to vector<2x16x16xf32>
    %151 = arith.addf %146, %150 : vector<2x16x16xf32>
    %cst_46 = arith.constant dense<0xFF800000> : vector<2x16xf32>
    %152 = vector.multi_reduction <maximumf>, %151, %cst_46 [2] : vector<2x16x16xf32> to vector<2x16xf32>
    %153 = vector.shape_cast %152 : vector<2x16xf32> to vector<2x16x1xf32>
    %154 = vector.broadcast %153 : vector<2x16x1xf32> to vector<2x16x16xf32>
    %155 = arith.subf %151, %154 : vector<2x16x16xf32>
    %156 = math.exp %155 : vector<2x16x16xf32>
    %cst_47 = arith.constant dense<0.000000e+00> : vector<2x16xf32>
    %157 = vector.multi_reduction <add>, %156, %cst_47 [2] : vector<2x16x16xf32> to vector<2x16xf32>
    %158 = vector.shape_cast %157 : vector<2x16xf32> to vector<2x16x1xf32>
    %159 = vector.broadcast %158 : vector<2x16x1xf32> to vector<2x16x16xf32>
    %160 = arith.divf %156, %159 : vector<2x16x16xf32>
    "tpu.trace_start"() <{level = 10 : i32, message = "bst,bte->bse"}> : () -> ()
    %cst_48 = arith.constant dense<0.000000e+00> : vector<2x16x16xf32>
    %161 = tpu.matmul %160, %143, %cst_48 {dimension_numbers = #tpu.dot_dimension_numbers<[2], [1], [1], [2], [0, 0, 0, 1, 1, 2], [0], [0]>} : vector<2x16x16xf32>, vector<2x16x16xf32>, vector<2x16x16xf32> -> vector<2x16x16xf32>
    "tpu.trace_stop"() : () -> ()
    %162 = vector.extract_strided_slice %64 {offsets = [0, 0, 64], sizes = [2, 16, 16], strides = [1, 1, 1]} : vector<2x16x128xf32> to vector<2x16x16xf32>
    %163 = vector.extract_strided_slice %76 {offsets = [0, 0, 64], sizes = [2, 16, 16], strides = [1, 1, 1]} : vector<2x16x128xf32> to vector<2x16x16xf32>
    %164 = vector.extract_strided_slice %43 {offsets = [0, 0, 64], sizes = [2, 16, 16], strides = [1, 1, 1]} : vector<2x16x128xf32> to vector<2x16x16xf32>
    "tpu.trace_start"() <{level = 10 : i32, message = "bse,bte->bst"}> : () -> ()
    %cst_49 = arith.constant dense<0.000000e+00> : vector<2x16x16xf32>
    %165 = tpu.matmul %162, %163, %cst_49 {dimension_numbers = #tpu.dot_dimension_numbers<[2], [2], [1], [1], [0, 0, 0, 1, 1, 1], [0], [0]>} : vector<2x16x16xf32>, vector<2x16x16xf32>, vector<2x16x16xf32> -> vector<2x16x16xf32>
    "tpu.trace_stop"() : () -> ()
    %cst_50 = arith.constant 2.500000e-01 : f32
    %166 = vector.broadcast %cst_50 : f32 to vector<2x16x16xf32>
    %167 = arith.mulf %165, %166 : vector<2x16x16xf32>
    %168 = vector.extract_strided_slice %77 {offsets = [4, 0, 0], sizes = [1, 16, 16], strides = [1, 1, 1]} : vector<8x16x16xf32> to vector<1x16x16xf32>
    %169 = vector.shape_cast %168 : vector<1x16x16xf32> to vector<16x16xf32>
    %170 = vector.shape_cast %169 : vector<16x16xf32> to vector<1x16x16xf32>
    %171 = vector.broadcast %170 : vector<1x16x16xf32> to vector<2x16x16xf32>
    %172 = arith.addf %167, %171 : vector<2x16x16xf32>
    %cst_51 = arith.constant dense<0xFF800000> : vector<2x16xf32>
    %173 = vector.multi_reduction <maximumf>, %172, %cst_51 [2] : vector<2x16x16xf32> to vector<2x16xf32>
    %174 = vector.shape_cast %173 : vector<2x16xf32> to vector<2x16x1xf32>
    %175 = vector.broadcast %174 : vector<2x16x1xf32> to vector<2x16x16xf32>
    %176 = arith.subf %172, %175 : vector<2x16x16xf32>
    %177 = math.exp %176 : vector<2x16x16xf32>
    %cst_52 = arith.constant dense<0.000000e+00> : vector<2x16xf32>
    %178 = vector.multi_reduction <add>, %177, %cst_52 [2] : vector<2x16x16xf32> to vector<2x16xf32>
    %179 = vector.shape_cast %178 : vector<2x16xf32> to vector<2x16x1xf32>
    %180 = vector.broadcast %179 : vector<2x16x1xf32> to vector<2x16x16xf32>
    %181 = arith.divf %177, %180 : vector<2x16x16xf32>
    "tpu.trace_start"() <{level = 10 : i32, message = "bst,bte->bse"}> : () -> ()
    %cst_53 = arith.constant dense<0.000000e+00> : vector<2x16x16xf32>
    %182 = tpu.matmul %181, %164, %cst_53 {dimension_numbers = #tpu.dot_dimension_numbers<[2], [1], [1], [2], [0, 0, 0, 1, 1, 2], [0], [0]>} : vector<2x16x16xf32>, vector<2x16x16xf32>, vector<2x16x16xf32> -> vector<2x16x16xf32>
    "tpu.trace_stop"() : () -> ()
    %183 = vector.extract_strided_slice %64 {offsets = [0, 0, 80], sizes = [2, 16, 16], strides = [1, 1, 1]} : vector<2x16x128xf32> to vector<2x16x16xf32>
    %184 = vector.extract_strided_slice %76 {offsets = [0, 0, 80], sizes = [2, 16, 16], strides = [1, 1, 1]} : vector<2x16x128xf32> to vector<2x16x16xf32>
    %185 = vector.extract_strided_slice %43 {offsets = [0, 0, 80], sizes = [2, 16, 16], strides = [1, 1, 1]} : vector<2x16x128xf32> to vector<2x16x16xf32>
    "tpu.trace_start"() <{level = 10 : i32, message = "bse,bte->bst"}> : () -> ()
    %cst_54 = arith.constant dense<0.000000e+00> : vector<2x16x16xf32>
    %186 = tpu.matmul %183, %184, %cst_54 {dimension_numbers = #tpu.dot_dimension_numbers<[2], [2], [1], [1], [0, 0, 0, 1, 1, 1], [0], [0]>} : vector<2x16x16xf32>, vector<2x16x16xf32>, vector<2x16x16xf32> -> vector<2x16x16xf32>
    "tpu.trace_stop"() : () -> ()
    %cst_55 = arith.constant 2.500000e-01 : f32
    %187 = vector.broadcast %cst_55 : f32 to vector<2x16x16xf32>
    %188 = arith.mulf %186, %187 : vector<2x16x16xf32>
    %189 = vector.extract_strided_slice %77 {offsets = [5, 0, 0], sizes = [1, 16, 16], strides = [1, 1, 1]} : vector<8x16x16xf32> to vector<1x16x16xf32>
    %190 = vector.shape_cast %189 : vector<1x16x16xf32> to vector<16x16xf32>
    %191 = vector.shape_cast %190 : vector<16x16xf32> to vector<1x16x16xf32>
    %192 = vector.broadcast %191 : vector<1x16x16xf32> to vector<2x16x16xf32>
    %193 = arith.addf %188, %192 : vector<2x16x16xf32>
    %cst_56 = arith.constant dense<0xFF800000> : vector<2x16xf32>
    %194 = vector.multi_reduction <maximumf>, %193, %cst_56 [2] : vector<2x16x16xf32> to vector<2x16xf32>
    %195 = vector.shape_cast %194 : vector<2x16xf32> to vector<2x16x1xf32>
    %196 = vector.broadcast %195 : vector<2x16x1xf32> to vector<2x16x16xf32>
    %197 = arith.subf %193, %196 : vector<2x16x16xf32>
    %198 = math.exp %197 : vector<2x16x16xf32>
    %cst_57 = arith.constant dense<0.000000e+00> : vector<2x16xf32>
    %199 = vector.multi_reduction <add>, %198, %cst_57 [2] : vector<2x16x16xf32> to vector<2x16xf32>
    %200 = vector.shape_cast %199 : vector<2x16xf32> to vector<2x16x1xf32>
    %201 = vector.broadcast %200 : vector<2x16x1xf32> to vector<2x16x16xf32>
    %202 = arith.divf %198, %201 : vector<2x16x16xf32>
    "tpu.trace_start"() <{level = 10 : i32, message = "bst,bte->bse"}> : () -> ()
    %cst_58 = arith.constant dense<0.000000e+00> : vector<2x16x16xf32>
    %203 = tpu.matmul %202, %185, %cst_58 {dimension_numbers = #tpu.dot_dimension_numbers<[2], [1], [1], [2], [0, 0, 0, 1, 1, 2], [0], [0]>} : vector<2x16x16xf32>, vector<2x16x16xf32>, vector<2x16x16xf32> -> vector<2x16x16xf32>
    "tpu.trace_stop"() : () -> ()
    %204 = vector.extract_strided_slice %64 {offsets = [0, 0, 96], sizes = [2, 16, 16], strides = [1, 1, 1]} : vector<2x16x128xf32> to vector<2x16x16xf32>
    %205 = vector.extract_strided_slice %76 {offsets = [0, 0, 96], sizes = [2, 16, 16], strides = [1, 1, 1]} : vector<2x16x128xf32> to vector<2x16x16xf32>
    %206 = vector.extract_strided_slice %43 {offsets = [0, 0, 96], sizes = [2, 16, 16], strides = [1, 1, 1]} : vector<2x16x128xf32> to vector<2x16x16xf32>
    "tpu.trace_start"() <{level = 10 : i32, message = "bse,bte->bst"}> : () -> ()
    %cst_59 = arith.constant dense<0.000000e+00> : vector<2x16x16xf32>
    %207 = tpu.matmul %204, %205, %cst_59 {dimension_numbers = #tpu.dot_dimension_numbers<[2], [2], [1], [1], [0, 0, 0, 1, 1, 1], [0], [0]>} : vector<2x16x16xf32>, vector<2x16x16xf32>, vector<2x16x16xf32> -> vector<2x16x16xf32>
    "tpu.trace_stop"() : () -> ()
    %cst_60 = arith.constant 2.500000e-01 : f32
    %208 = vector.broadcast %cst_60 : f32 to vector<2x16x16xf32>
    %209 = arith.mulf %207, %208 : vector<2x16x16xf32>
    %210 = vector.extract_strided_slice %77 {offsets = [6, 0, 0], sizes = [1, 16, 16], strides = [1, 1, 1]} : vector<8x16x16xf32> to vector<1x16x16xf32>
    %211 = vector.shape_cast %210 : vector<1x16x16xf32> to vector<16x16xf32>
    %212 = vector.shape_cast %211 : vector<16x16xf32> to vector<1x16x16xf32>
    %213 = vector.broadcast %212 : vector<1x16x16xf32> to vector<2x16x16xf32>
    %214 = arith.addf %209, %213 : vector<2x16x16xf32>
    %cst_61 = arith.constant dense<0xFF800000> : vector<2x16xf32>
    %215 = vector.multi_reduction <maximumf>, %214, %cst_61 [2] : vector<2x16x16xf32> to vector<2x16xf32>
    %216 = vector.shape_cast %215 : vector<2x16xf32> to vector<2x16x1xf32>
    %217 = vector.broadcast %216 : vector<2x16x1xf32> to vector<2x16x16xf32>
    %218 = arith.subf %214, %217 : vector<2x16x16xf32>
    %219 = math.exp %218 : vector<2x16x16xf32>
    %cst_62 = arith.constant dense<0.000000e+00> : vector<2x16xf32>
    %220 = vector.multi_reduction <add>, %219, %cst_62 [2] : vector<2x16x16xf32> to vector<2x16xf32>
    %221 = vector.shape_cast %220 : vector<2x16xf32> to vector<2x16x1xf32>
    %222 = vector.broadcast %221 : vector<2x16x1xf32> to vector<2x16x16xf32>
    %223 = arith.divf %219, %222 : vector<2x16x16xf32>
    "tpu.trace_start"() <{level = 10 : i32, message = "bst,bte->bse"}> : () -> ()
    %cst_63 = arith.constant dense<0.000000e+00> : vector<2x16x16xf32>
    %224 = tpu.matmul %223, %206, %cst_63 {dimension_numbers = #tpu.dot_dimension_numbers<[2], [1], [1], [2], [0, 0, 0, 1, 1, 2], [0], [0]>} : vector<2x16x16xf32>, vector<2x16x16xf32>, vector<2x16x16xf32> -> vector<2x16x16xf32>
    "tpu.trace_stop"() : () -> ()
    %225 = vector.extract_strided_slice %64 {offsets = [0, 0, 112], sizes = [2, 16, 16], strides = [1, 1, 1]} : vector<2x16x128xf32> to vector<2x16x16xf32>
    %226 = vector.extract_strided_slice %76 {offsets = [0, 0, 112], sizes = [2, 16, 16], strides = [1, 1, 1]} : vector<2x16x128xf32> to vector<2x16x16xf32>
    %227 = vector.extract_strided_slice %43 {offsets = [0, 0, 112], sizes = [2, 16, 16], strides = [1, 1, 1]} : vector<2x16x128xf32> to vector<2x16x16xf32>
    "tpu.trace_start"() <{level = 10 : i32, message = "bse,bte->bst"}> : () -> ()
    %cst_64 = arith.constant dense<0.000000e+00> : vector<2x16x16xf32>
    %228 = tpu.matmul %225, %226, %cst_64 {dimension_numbers = #tpu.dot_dimension_numbers<[2], [2], [1], [1], [0, 0, 0, 1, 1, 1], [0], [0]>} : vector<2x16x16xf32>, vector<2x16x16xf32>, vector<2x16x16xf32> -> vector<2x16x16xf32>
    "tpu.trace_stop"() : () -> ()
    %cst_65 = arith.constant 2.500000e-01 : f32
    %229 = vector.broadcast %cst_65 : f32 to vector<2x16x16xf32>
    %230 = arith.mulf %228, %229 : vector<2x16x16xf32>
    %231 = vector.extract_strided_slice %77 {offsets = [7, 0, 0], sizes = [1, 16, 16], strides = [1, 1, 1]} : vector<8x16x16xf32> to vector<1x16x16xf32>
    %232 = vector.shape_cast %231 : vector<1x16x16xf32> to vector<16x16xf32>
    %233 = vector.shape_cast %232 : vector<16x16xf32> to vector<1x16x16xf32>
    %234 = vector.broadcast %233 : vector<1x16x16xf32> to vector<2x16x16xf32>
    %235 = arith.addf %230, %234 : vector<2x16x16xf32>
    %cst_66 = arith.constant dense<0xFF800000> : vector<2x16xf32>
    %236 = vector.multi_reduction <maximumf>, %235, %cst_66 [2] : vector<2x16x16xf32> to vector<2x16xf32>
    %237 = vector.shape_cast %236 : vector<2x16xf32> to vector<2x16x1xf32>
    %238 = vector.broadcast %237 : vector<2x16x1xf32> to vector<2x16x16xf32>
    %239 = arith.subf %235, %238 : vector<2x16x16xf32>
    %240 = math.exp %239 : vector<2x16x16xf32>
    %cst_67 = arith.constant dense<0.000000e+00> : vector<2x16xf32>
    %241 = vector.multi_reduction <add>, %240, %cst_67 [2] : vector<2x16x16xf32> to vector<2x16xf32>
    %242 = vector.shape_cast %241 : vector<2x16xf32> to vector<2x16x1xf32>
    %243 = vector.broadcast %242 : vector<2x16x1xf32> to vector<2x16x16xf32>
    %244 = arith.divf %240, %243 : vector<2x16x16xf32>
    "tpu.trace_start"() <{level = 10 : i32, message = "bst,bte->bse"}> : () -> ()
    %cst_68 = arith.constant dense<0.000000e+00> : vector<2x16x16xf32>
    %245 = tpu.matmul %244, %227, %cst_68 {dimension_numbers = #tpu.dot_dimension_numbers<[2], [1], [1], [2], [0, 0, 0, 1, 1, 2], [0], [0]>} : vector<2x16x16xf32>, vector<2x16x16xf32>, vector<2x16x16xf32> -> vector<2x16x16xf32>
    "tpu.trace_stop"() : () -> ()
    %246 = tpu.concatenate %97, %118, %139, %160, %181, %202, %223, %244 in 2 : vector<2x16x16xf32>, vector<2x16x16xf32>, vector<2x16x16xf32>, vector<2x16x16xf32>, vector<2x16x16xf32>, vector<2x16x16xf32>, vector<2x16x16xf32>, vector<2x16x16xf32> -> vector<2x16x128xf32>
    %c0_69 = arith.constant 0 : index
    %c0_70 = arith.constant 0 : index
    %c0_71 = arith.constant 0 : index
    %247 = vector.load %arg21[%c0_69, %c0_70, %c0_71] : memref<2x16x128xf32, #tpu.memory_space<vmem>>, vector<2x16x128xf32>
    tpu.vector_store %arg21[%c0_69, %c0_70, %c0_71], %246 {strides = array<i32>} : memref<2x16x128xf32, #tpu.memory_space<vmem>>, vector<2x16x128xf32>,
    %248 = tpu.concatenate %98, %119, %140, %161, %182, %203, %224, %245 in 2 : vector<2x16x16xf32>, vector<2x16x16xf32>, vector<2x16x16xf32>, vector<2x16x16xf32>, vector<2x16x16xf32>, vector<2x16x16xf32>, vector<2x16x16xf32>, vector<2x16x16xf32> -> vector<2x16x128xf32>
    %249 = vector.shape_cast %248 : vector<2x16x128xf32> to vector<32x128xf32>
    %250 = arith.truncf %249 : vector<32x128xf32> to vector<32x128xbf16>
    %c0_72 = arith.constant 0 : index
    %c0_73 = arith.constant 0 : index
    %251 = vector.load %arg7[%c0_72, %c0_73] : memref<128x128xbf16, #tpu.memory_space<vmem>>, vector<128x128xbf16>
    %cst_74 = arith.constant dense<0.000000e+00> : vector<32x128xf32>
    %252 = tpu.matmul %250, %251, %cst_74 {dimension_numbers = #tpu.dot_dimension_numbers<[1], [0], [0], [1], [0, 0, 1, 1], [], []>} : vector<32x128xbf16>, vector<128x128xbf16>, vector<32x128xf32> -> vector<32x128xf32>
    %c0_75 = arith.constant 0 : index
    %c0_76 = arith.constant 0 : index
    %253 = vector.load %arg8[%c0_75, %c0_76] : memref<1x128xf32, #tpu.memory_space<vmem>>, vector<1x128xf32>
    %254 = vector.broadcast %253 : vector<1x128xf32> to vector<32x128xf32>
    %255 = arith.addf %252, %254 : vector<32x128xf32>
    %256 = arith.addf %5, %255 : vector<32x128xf32>
    %257 = tpu.iota {dimensions = array<i32: 1>} : vector<32x4xi32>
    %cst_77 = arith.constant dense<0.000000e+00> : vector<32xf32>
    %258 = vector.multi_reduction <add>, %256, %cst_77 [1] : vector<32x128xf32> to vector<32xf32>
    %259 = vector.shape_cast %258 : vector<32xf32> to vector<32x1xf32>
    %cst_78 = arith.constant 1.280000e+02 : f32
    %260 = vector.broadcast %cst_78 : f32 to vector<32x1xf32>
    %261 = arith.divf %259, %260 : vector<32x1xf32>
    %262 = vector.broadcast %261 : vector<32x1xf32> to vector<32x128xf32>
    %263 = arith.subf %256, %262 : vector<32x128xf32>
    %264 = arith.mulf %263, %263 : vector<32x128xf32>
    %cst_79 = arith.constant dense<0.000000e+00> : vector<32xf32>
    %265 = vector.multi_reduction <add>, %264, %cst_79 [1] : vector<32x128xf32> to vector<32xf32>
    %266 = vector.shape_cast %265 : vector<32xf32> to vector<32x1xf32>
    %cst_80 = arith.constant 1.280000e+02 : f32
    %267 = vector.broadcast %cst_80 : f32 to vector<32x1xf32>
    %268 = arith.divf %266, %267 : vector<32x1xf32>
    %269 = vector.broadcast %261 : vector<32x1xf32> to vector<32x128xf32>
    %270 = arith.subf %256, %269 : vector<32x128xf32>
    %cst_81 = arith.constant 9.99999974E-6 : f32
    %271 = vector.broadcast %cst_81 : f32 to vector<32x1xf32>
    %272 = arith.addf %268, %271 : vector<32x1xf32>
    %273 = math.rsqrt %272 : vector<32x1xf32>
    %274 = vector.broadcast %273 : vector<32x1xf32> to vector<32x128xf32>
    %275 = arith.mulf %270, %274 : vector<32x128xf32>
    %276 = vector.extract_strided_slice %6 {offsets = [1, 0], sizes = [1, 128], strides = [1, 1]} : vector<3x128xf32> to vector<1x128xf32>
    %277 = vector.broadcast %276 : vector<1x128xf32> to vector<32x128xf32>
    %278 = arith.mulf %275, %277 : vector<32x128xf32>
    %279 = vector.extract_strided_slice %7 {offsets = [1, 0], sizes = [1, 128], strides = [1, 1]} : vector<3x128xf32> to vector<1x128xf32>
    %280 = vector.broadcast %279 : vector<1x128xf32> to vector<32x128xf32>
    %281 = arith.addf %278, %280 : vector<32x128xf32>
    %c0_82 = arith.constant 0 : index
    %c0_83 = arith.constant 0 : index
    %c0_84 = arith.constant 0 : index
    %282 = vector.load %arg12[%c0_82, %c0_83, %c0_84] : memref<2x128x4xf32, #tpu.memory_space<vmem>>, vector<1x128x4xf32>
    %283 = vector.shape_cast %282 : vector<1x128x4xf32> to vector<128x4xf32>
    %cst_85 = arith.constant dense<0.000000e+00> : vector<32x4xf32>
    %284 = tpu.matmul %281, %283, %cst_85 {dimension_numbers = #tpu.dot_dimension_numbers<[1], [0], [0], [1], [0, 0, 1, 1], [], []>} : vector<32x128xf32>, vector<128x4xf32>, vector<32x4xf32> -> vector<32x4xf32>
    %c0_86 = arith.constant 0 : index
    %c0_87 = arith.constant 0 : index
    %c0_88 = arith.constant 0 : index
    %285 = vector.load %arg13[%c0_86, %c0_87, %c0_88] : memref<2x1x4xf32, #tpu.memory_space<vmem>>, vector<1x1x4xf32>
    %286 = vector.shape_cast %285 : vector<1x1x4xf32> to vector<1x4xf32>
    %287 = vector.broadcast %286 : vector<1x4xf32> to vector<32x4xf32>
    %288 = arith.addf %284, %287 : vector<32x4xf32>
    %cst_89 = arith.constant dense<0xFF800000> : vector<32xf32>
    %289 = vector.multi_reduction <maximumf>, %288, %cst_89 [1] : vector<32x4xf32> to vector<32xf32>
    %290 = vector.shape_cast %289 : vector<32xf32> to vector<32x1xf32>
    %291 = vector.broadcast %290 : vector<32x1xf32> to vector<32x4xf32>
    %292 = arith.subf %288, %291 : vector<32x4xf32>
    %293 = math.exp %292 : vector<32x4xf32>
    %cst_90 = arith.constant dense<0.000000e+00> : vector<32xf32>
    %294 = vector.multi_reduction <add>, %293, %cst_90 [1] : vector<32x4xf32> to vector<32xf32>
    %295 = vector.shape_cast %294 : vector<32xf32> to vector<32x1xf32>
    %296 = vector.broadcast %295 : vector<32x1xf32> to vector<32x4xf32>
    %297 = arith.divf %293, %296 : vector<32x4xf32>
    %cst_91 = arith.constant 0.000000e+00 : f32
    %298 = vector.broadcast %cst_91 : f32 to vector<32x4xf32>
    %299 = vector.extract_strided_slice %288 {offsets = [0, 0], sizes = [32, 1], strides = [1, 1]} : vector<32x4xf32> to vector<32x1xf32>
    %300 = vector.broadcast %299 : vector<32x1xf32> to vector<32x4xf32>
    %301 = arith.cmpf ogt, %300, %288 : vector<32x4xf32>
    %302 = vector.broadcast %299 : vector<32x1xf32> to vector<32x4xf32>
    %303 = arith.cmpf oeq, %302, %288 : vector<32x4xf32>
    %c0_i32 = arith.constant 0 : i32
    %304 = vector.broadcast %c0_i32 : i32 to vector<32x4xi32>
    %305 = arith.cmpi sgt, %257, %304 : vector<32x4xi32>
    %306 = arith.andi %303, %305 : vector<32x4xi1>
    %307 = arith.ori %301, %306 : vector<32x4xi1>
    %308 = arith.extui %307 : vector<32x4xi1> to vector<32x4xi32>
    %309 = arith.sitofp %308 : vector<32x4xi32> to vector<32x4xf32>
    %310 = arith.addf %298, %309 : vector<32x4xf32>
    %311 = vector.extract_strided_slice %288 {offsets = [0, 1], sizes = [32, 1], strides = [1, 1]} : vector<32x4xf32> to vector<32x1xf32>
    %312 = vector.broadcast %311 : vector<32x1xf32> to vector<32x4xf32>
    %313 = arith.cmpf ogt, %312, %288 : vector<32x4xf32>
    %314 = vector.broadcast %311 : vector<32x1xf32> to vector<32x4xf32>
    %315 = arith.cmpf oeq, %314, %288 : vector<32x4xf32>
    %c1_i32 = arith.constant 1 : i32
    %316 = vector.broadcast %c1_i32 : i32 to vector<32x4xi32>
    %317 = arith.cmpi sgt, %257, %316 : vector<32x4xi32>
    %318 = arith.andi %315, %317 : vector<32x4xi1>
    %319 = arith.ori %313, %318 : vector<32x4xi1>
    %320 = arith.extui %319 : vector<32x4xi1> to vector<32x4xi32>
    %321 = arith.sitofp %320 : vector<32x4xi32> to vector<32x4xf32>
    %322 = arith.addf %310, %321 : vector<32x4xf32>
    %323 = vector.extract_strided_slice %288 {offsets = [0, 2], sizes = [32, 1], strides = [1, 1]} : vector<32x4xf32> to vector<32x1xf32>
    %324 = vector.broadcast %323 : vector<32x1xf32> to vector<32x4xf32>
    %325 = arith.cmpf ogt, %324, %288 : vector<32x4xf32>
    %326 = vector.broadcast %323 : vector<32x1xf32> to vector<32x4xf32>
    %327 = arith.cmpf oeq, %326, %288 : vector<32x4xf32>
    %c2_i32 = arith.constant 2 : i32
    %328 = vector.broadcast %c2_i32 : i32 to vector<32x4xi32>
    %329 = arith.cmpi sgt, %257, %328 : vector<32x4xi32>
    %330 = arith.andi %327, %329 : vector<32x4xi1>
    %331 = arith.ori %325, %330 : vector<32x4xi1>
    %332 = arith.extui %331 : vector<32x4xi1> to vector<32x4xi32>
    %333 = arith.sitofp %332 : vector<32x4xi32> to vector<32x4xf32>
    %334 = arith.addf %322, %333 : vector<32x4xf32>
    %335 = vector.extract_strided_slice %288 {offsets = [0, 3], sizes = [32, 1], strides = [1, 1]} : vector<32x4xf32> to vector<32x1xf32>
    %336 = vector.broadcast %335 : vector<32x1xf32> to vector<32x4xf32>
    %337 = arith.cmpf ogt, %336, %288 : vector<32x4xf32>
    %338 = vector.broadcast %335 : vector<32x1xf32> to vector<32x4xf32>
    %339 = arith.cmpf oeq, %338, %288 : vector<32x4xf32>
    %c3_i32 = arith.constant 3 : i32
    %340 = vector.broadcast %c3_i32 : i32 to vector<32x4xi32>
    %341 = arith.cmpi sgt, %257, %340 : vector<32x4xi32>
    %342 = arith.andi %339, %341 : vector<32x4xi1>
    %343 = arith.ori %337, %342 : vector<32x4xi1>
    %344 = arith.extui %343 : vector<32x4xi1> to vector<32x4xi32>
    %345 = arith.sitofp %344 : vector<32x4xi32> to vector<32x4xf32>
    %346 = arith.addf %334, %345 : vector<32x4xf32>
    %cst_92 = arith.constant 2.000000e+00 : f32
    %347 = vector.broadcast %cst_92 : f32 to vector<32x4xf32>
    %348 = arith.cmpf olt, %346, %347 : vector<32x4xf32>
    %cst_93 = arith.constant -1.000000e+09 : f32
    %349 = vector.broadcast %cst_93 : f32 to vector<32x4xf32>
    %350 = arith.select %348, %288, %349 : vector<32x4xi1>, vector<32x4xf32>
    %cst_94 = arith.constant dense<0xFF800000> : vector<32xf32>
    %351 = vector.multi_reduction <maximumf>, %350, %cst_94 [1] : vector<32x4xf32> to vector<32xf32>
    %352 = vector.shape_cast %351 : vector<32xf32> to vector<32x1xf32>
    %353 = vector.broadcast %352 : vector<32x1xf32> to vector<32x4xf32>
    %354 = arith.subf %350, %353 : vector<32x4xf32>
    %355 = math.exp %354 : vector<32x4xf32>
    %cst_95 = arith.constant dense<0.000000e+00> : vector<32xf32>
    %356 = vector.multi_reduction <add>, %355, %cst_95 [1] : vector<32x4xf32> to vector<32xf32>
    %357 = vector.shape_cast %356 : vector<32xf32> to vector<32x1xf32>
    %358 = vector.broadcast %357 : vector<32x1xf32> to vector<32x4xf32>
    %359 = arith.divf %355, %358 : vector<32x4xf32>
    %cst_96 = arith.constant dense<0.000000e+00> : vector<4xf32>
    %360 = vector.multi_reduction <add>, %297, %cst_96 [0] : vector<32x4xf32> to vector<4xf32>
    %361 = vector.shape_cast %360 : vector<4xf32> to vector<1x4xf32>
    %cst_97 = arith.constant 3.200000e+01 : f32
    %362 = vector.broadcast %cst_97 : f32 to vector<1x4xf32>
    %363 = arith.divf %361, %362 : vector<1x4xf32>
    %364 = arith.extui %348 : vector<32x4xi1> to vector<32x4xi32>
    %365 = arith.sitofp %364 : vector<32x4xi32> to vector<32x4xf32>
    %cst_98 = arith.constant dense<0.000000e+00> : vector<4xf32>
    %366 = vector.multi_reduction <add>, %365, %cst_98 [0] : vector<32x4xf32> to vector<4xf32>
    %367 = vector.shape_cast %366 : vector<4xf32> to vector<1x4xf32>
    %cst_99 = arith.constant 3.200000e+01 : f32
    %368 = vector.broadcast %cst_99 : f32 to vector<1x4xf32>
    %369 = arith.divf %367, %368 : vector<1x4xf32>
    %370 = arith.mulf %363, %369 : vector<1x4xf32>
    %c0_100 = arith.constant 0 : index
    %c0_101 = arith.constant 0 : index
    %c0_102 = arith.constant 0 : index
    %371 = vector.load %arg29[%c0_100, %c0_101, %c0_102] : memref<2x1x4xf32, #tpu.memory_space<vmem>>, vector<1x1x4xf32>
    %372 = vector.shape_cast %371 : vector<1x1x4xf32> to vector<1x4xf32>
    %373 = vector.shape_cast %370 : vector<1x4xf32> to vector<1x1x4xf32>
    tpu.vector_store %arg29[%c0_100, %c0_101, %c0_102], %373 {strides = array<i32>} : memref<2x1x4xf32, #tpu.memory_space<vmem>>, vector<1x1x4xf32>,
    %374 = vector.shape_cast %359 : vector<32x4xf32> to vector<2x16x4xf32>
    %c0_103 = arith.constant 0 : index
    %c0_104 = arith.constant 0 : index
    %c0_105 = arith.constant 0 : index
    %375 = vector.load %arg24[%c0_103, %c0_104, %c0_105] : memref<2x16x4xf32, #tpu.memory_space<vmem>>, vector<2x16x4xf32>
    tpu.vector_store %arg24[%c0_103, %c0_104, %c0_105], %374 {strides = array<i32>} : memref<2x16x4xf32, #tpu.memory_space<vmem>>, vector<2x16x4xf32>,
    %376 = vector.shape_cast %297 : vector<32x4xf32> to vector<2x16x4xf32>
    %c0_106 = arith.constant 0 : index
    %c0_107 = arith.constant 0 : index
    %c0_108 = arith.constant 0 : index
    %377 = vector.load %arg25[%c0_106, %c0_107, %c0_108] : memref<2x16x4xf32, #tpu.memory_space<vmem>>, vector<2x16x4xf32>
    tpu.vector_store %arg25[%c0_106, %c0_107, %c0_108], %376 {strides = array<i32>} : memref<2x16x4xf32, #tpu.memory_space<vmem>>, vector<2x16x4xf32>,
    %378 = arith.truncf %281 : vector<32x128xf32> to vector<32x128xbf16>
    %c0_109 = arith.constant 0 : index
    %c0_110 = arith.constant 0 : index
    %c0_111 = arith.constant 0 : index
    %379 = vector.load %arg14[%c0_109, %c0_110, %c0_111] : memref<2x128x2048xbf16, #tpu.memory_space<vmem>>, vector<1x128x2048xbf16>
    %380 = vector.shape_cast %379 : vector<1x128x2048xbf16> to vector<128x2048xbf16>
    %cst_112 = arith.constant dense<0.000000e+00> : vector<32x2048xf32>
    %381 = tpu.matmul %378, %380, %cst_112 {dimension_numbers = #tpu.dot_dimension_numbers<[1], [0], [0], [1], [0, 0, 1, 1], [], []>} : vector<32x128xbf16>, vector<128x2048xbf16>, vector<32x2048xf32> -> vector<32x2048xf32>
    %c0_113 = arith.constant 0 : index
    %c0_114 = arith.constant 0 : index
    %c0_115 = arith.constant 0 : index
    %382 = vector.load %arg15[%c0_113, %c0_114, %c0_115] : memref<2x1x2048xf32, #tpu.memory_space<vmem>>, vector<1x1x2048xf32>
    %383 = vector.shape_cast %382 : vector<1x1x2048xf32> to vector<1x2048xf32>
    %384 = vector.broadcast %383 : vector<1x2048xf32> to vector<32x2048xf32>
    %385 = arith.addf %381, %384 : vector<32x2048xf32>
    %cst_116 = arith.constant 0.000000e+00 : f32
    %386 = vector.broadcast %cst_116 : f32 to vector<32x2048xf32>
    %387 = arith.maximumf %385, %386 : vector<32x2048xf32>
    %388 = arith.truncf %387 : vector<32x2048xf32> to vector<32x2048xbf16>
    %cst_117 = arith.constant 0.000000e+00 : f32
    %389 = vector.broadcast %cst_117 : f32 to vector<32x128xf32>
    %390 = vector.extract_strided_slice %388 {offsets = [0, 0], sizes = [32, 512], strides = [1, 1]} : vector<32x2048xbf16> to vector<32x512xbf16>
    %c0_118 = arith.constant 0 : index
    %c0_119 = arith.constant 0 : index
    %c0_120 = arith.constant 0 : index
    %391 = vector.load %arg16[%c0_118, %c0_119, %c0_120] : memref<8x512x128xbf16, #tpu.memory_space<vmem>>, vector<1x512x128xbf16>
    %392 = vector.shape_cast %391 : vector<1x512x128xbf16> to vector<512x128xbf16>
    %cst_121 = arith.constant dense<0.000000e+00> : vector<32x128xf32>
    %393 = tpu.matmul %390, %392, %cst_121 {dimension_numbers = #tpu.dot_dimension_numbers<[1], [0], [0], [1], [0, 0, 1, 1], [], []>} : vector<32x512xbf16>, vector<512x128xbf16>, vector<32x128xf32> -> vector<32x128xf32>
    %c0_122 = arith.constant 0 : index
    %c0_123 = arith.constant 0 : index
    %c0_124 = arith.constant 0 : index
    %394 = vector.load %arg17[%c0_122, %c0_123, %c0_124] : memref<8x1x128xf32, #tpu.memory_space<vmem>>, vector<1x1x128xf32>
    %395 = vector.shape_cast %394 : vector<1x1x128xf32> to vector<1x128xf32>
    %396 = vector.broadcast %395 : vector<1x128xf32> to vector<32x128xf32>
    %397 = arith.addf %393, %396 : vector<32x128xf32>
    %398 = vector.extract_strided_slice %359 {offsets = [0, 0], sizes = [32, 1], strides = [1, 1]} : vector<32x4xf32> to vector<32x1xf32>
    %399 = vector.broadcast %398 : vector<32x1xf32> to vector<32x128xf32>
    %400 = arith.mulf %397, %399 : vector<32x128xf32>
    %401 = vector.shape_cast %400 : vector<32x128xf32> to vector<2x16x128xf32>
    %c0_125 = arith.constant 0 : index
    %c0_126 = arith.constant 0 : index
    %c0_127 = arith.constant 0 : index
    %c0_128 = arith.constant 0 : index
    %402 = vector.load %arg22[%c0_125, %c0_126, %c0_127, %c0_128] : memref<4x2x16x128xf32, #tpu.memory_space<vmem>>, vector<1x2x16x128xf32>
    %403 = vector.shape_cast %402 : vector<1x2x16x128xf32> to vector<2x16x128xf32>
    %404 = vector.shape_cast %401 : vector<2x16x128xf32> to vector<1x2x16x128xf32>
    tpu.vector_store %arg22[%c0_125, %c0_126, %c0_127, %c0_128], %404 {strides = array<i32>} : memref<4x2x16x128xf32, #tpu.memory_space<vmem>>, vector<1x2x16x128xf32>,
    %cst_129 = arith.constant dense<0.000000e+00> : vector<32xf32>
    %405 = vector.multi_reduction <add>, %397, %cst_129 [1] : vector<32x128xf32> to vector<32xf32>
    %406 = vector.shape_cast %405 : vector<32xf32> to vector<32x1xf32>
    %cst_130 = arith.constant 1.280000e+02 : f32
    %407 = vector.broadcast %cst_130 : f32 to vector<32x1xf32>
    %408 = arith.divf %406, %407 : vector<32x1xf32>
    %c0_131 = arith.constant 0 : index
    %c0_132 = arith.constant 0 : index
    %c0_133 = arith.constant 0 : index
    %409 = vector.load %arg23[%c0_131, %c0_132, %c0_133] : memref<4x32x1xf32, #tpu.memory_space<vmem>>, vector<1x32x1xf32>
    %410 = vector.shape_cast %409 : vector<1x32x1xf32> to vector<32x1xf32>
    %411 = vector.shape_cast %408 : vector<32x1xf32> to vector<1x32x1xf32>
    tpu.vector_store %arg23[%c0_131, %c0_132, %c0_133], %411 {strides = array<i32>} : memref<4x32x1xf32, #tpu.memory_space<vmem>>, vector<1x32x1xf32>,
    %412 = arith.addf %389, %400 : vector<32x128xf32>
    %413 = vector.extract_strided_slice %388 {offsets = [0, 512], sizes = [32, 512], strides = [1, 1]} : vector<32x2048xbf16> to vector<32x512xbf16>
    %c1 = arith.constant 1 : index
    %c0_134 = arith.constant 0 : index
    %c0_135 = arith.constant 0 : index
    %414 = vector.load %arg16[%c1, %c0_134, %c0_135] : memref<8x512x128xbf16, #tpu.memory_space<vmem>>, vector<1x512x128xbf16>
    %415 = vector.shape_cast %414 : vector<1x512x128xbf16> to vector<512x128xbf16>
    %cst_136 = arith.constant dense<0.000000e+00> : vector<32x128xf32>
    %416 = tpu.matmul %413, %415, %cst_136 {dimension_numbers = #tpu.dot_dimension_numbers<[1], [0], [0], [1], [0, 0, 1, 1], [], []>} : vector<32x512xbf16>, vector<512x128xbf16>, vector<32x128xf32> -> vector<32x128xf32>
    %c1_137 = arith.constant 1 : index
    %c0_138 = arith.constant 0 : index
    %c0_139 = arith.constant 0 : index
    %417 = vector.load %arg17[%c1_137, %c0_138, %c0_139] : memref<8x1x128xf32, #tpu.memory_space<vmem>>, vector<1x1x128xf32>
    %418 = vector.shape_cast %417 : vector<1x1x128xf32> to vector<1x128xf32>
    %419 = vector.broadcast %418 : vector<1x128xf32> to vector<32x128xf32>
    %420 = arith.addf %416, %419 : vector<32x128xf32>
    %421 = vector.extract_strided_slice %359 {offsets = [0, 1], sizes = [32, 1], strides = [1, 1]} : vector<32x4xf32> to vector<32x1xf32>
    %422 = vector.broadcast %421 : vector<32x1xf32> to vector<32x128xf32>
    %423 = arith.mulf %420, %422 : vector<32x128xf32>
    %424 = vector.shape_cast %423 : vector<32x128xf32> to vector<2x16x128xf32>
    %c1_140 = arith.constant 1 : index
    %c0_141 = arith.constant 0 : index
    %c0_142 = arith.constant 0 : index
    %c0_143 = arith.constant 0 : index
    %425 = vector.load %arg22[%c1_140, %c0_141, %c0_142, %c0_143] : memref<4x2x16x128xf32, #tpu.memory_space<vmem>>, vector<1x2x16x128xf32>
    %426 = vector.shape_cast %425 : vector<1x2x16x128xf32> to vector<2x16x128xf32>
    %427 = vector.shape_cast %424 : vector<2x16x128xf32> to vector<1x2x16x128xf32>
    tpu.vector_store %arg22[%c1_140, %c0_141, %c0_142, %c0_143], %427 {strides = array<i32>} : memref<4x2x16x128xf32, #tpu.memory_space<vmem>>, vector<1x2x16x128xf32>,
    %cst_144 = arith.constant dense<0.000000e+00> : vector<32xf32>
    %428 = vector.multi_reduction <add>, %420, %cst_144 [1] : vector<32x128xf32> to vector<32xf32>
    %429 = vector.shape_cast %428 : vector<32xf32> to vector<32x1xf32>
    %cst_145 = arith.constant 1.280000e+02 : f32
    %430 = vector.broadcast %cst_145 : f32 to vector<32x1xf32>
    %431 = arith.divf %429, %430 : vector<32x1xf32>
    %c1_146 = arith.constant 1 : index
    %c0_147 = arith.constant 0 : index
    %c0_148 = arith.constant 0 : index
    %432 = vector.load %arg23[%c1_146, %c0_147, %c0_148] : memref<4x32x1xf32, #tpu.memory_space<vmem>>, vector<1x32x1xf32>
    %433 = vector.shape_cast %432 : vector<1x32x1xf32> to vector<32x1xf32>
    %434 = vector.shape_cast %431 : vector<32x1xf32> to vector<1x32x1xf32>
    tpu.vector_store %arg23[%c1_146, %c0_147, %c0_148], %434 {strides = array<i32>} : memref<4x32x1xf32, #tpu.memory_space<vmem>>, vector<1x32x1xf32>,
    %435 = arith.addf %412, %423 : vector<32x128xf32>
    %436 = vector.extract_strided_slice %388 {offsets = [0, 1024], sizes = [32, 512], strides = [1, 1]} : vector<32x2048xbf16> to vector<32x512xbf16>
    %c2 = arith.constant 2 : index
    %c0_149 = arith.constant 0 : index
    %c0_150 = arith.constant 0 : index
    %437 = vector.load %arg16[%c2, %c0_149, %c0_150] : memref<8x512x128xbf16, #tpu.memory_space<vmem>>, vector<1x512x128xbf16>
    %438 = vector.shape_cast %437 : vector<1x512x128xbf16> to vector<512x128xbf16>
    %cst_151 = arith.constant dense<0.000000e+00> : vector<32x128xf32>
    %439 = tpu.matmul %436, %438, %cst_151 {dimension_numbers = #tpu.dot_dimension_numbers<[1], [0], [0], [1], [0, 0, 1, 1], [], []>} : vector<32x512xbf16>, vector<512x128xbf16>, vector<32x128xf32> -> vector<32x128xf32>
    %c2_152 = arith.constant 2 : index
    %c0_153 = arith.constant 0 : index
    %c0_154 = arith.constant 0 : index
    %440 = vector.load %arg17[%c2_152, %c0_153, %c0_154] : memref<8x1x128xf32, #tpu.memory_space<vmem>>, vector<1x1x128xf32>
    %441 = vector.shape_cast %440 : vector<1x1x128xf32> to vector<1x128xf32>
    %442 = vector.broadcast %441 : vector<1x128xf32> to vector<32x128xf32>
    %443 = arith.addf %439, %442 : vector<32x128xf32>
    %444 = vector.extract_strided_slice %359 {offsets = [0, 2], sizes = [32, 1], strides = [1, 1]} : vector<32x4xf32> to vector<32x1xf32>
    %445 = vector.broadcast %444 : vector<32x1xf32> to vector<32x128xf32>
    %446 = arith.mulf %443, %445 : vector<32x128xf32>
    %447 = vector.shape_cast %446 : vector<32x128xf32> to vector<2x16x128xf32>
    %c2_155 = arith.constant 2 : index
    %c0_156 = arith.constant 0 : index
    %c0_157 = arith.constant 0 : index
    %c0_158 = arith.constant 0 : index
    %448 = vector.load %arg22[%c2_155, %c0_156, %c0_157, %c0_158] : memref<4x2x16x128xf32, #tpu.memory_space<vmem>>, vector<1x2x16x128xf32>
    %449 = vector.shape_cast %448 : vector<1x2x16x128xf32> to vector<2x16x128xf32>
    %450 = vector.shape_cast %447 : vector<2x16x128xf32> to vector<1x2x16x128xf32>
    tpu.vector_store %arg22[%c2_155, %c0_156, %c0_157, %c0_158], %450 {strides = array<i32>} : memref<4x2x16x128xf32, #tpu.memory_space<vmem>>, vector<1x2x16x128xf32>,
    %cst_159 = arith.constant dense<0.000000e+00> : vector<32xf32>
    %451 = vector.multi_reduction <add>, %443, %cst_159 [1] : vector<32x128xf32> to vector<32xf32>
    %452 = vector.shape_cast %451 : vector<32xf32> to vector<32x1xf32>
    %cst_160 = arith.constant 1.280000e+02 : f32
    %453 = vector.broadcast %cst_160 : f32 to vector<32x1xf32>
    %454 = arith.divf %452, %453 : vector<32x1xf32>
    %c2_161 = arith.constant 2 : index
    %c0_162 = arith.constant 0 : index
    %c0_163 = arith.constant 0 : index
    %455 = vector.load %arg23[%c2_161, %c0_162, %c0_163] : memref<4x32x1xf32, #tpu.memory_space<vmem>>, vector<1x32x1xf32>
    %456 = vector.shape_cast %455 : vector<1x32x1xf32> to vector<32x1xf32>
    %457 = vector.shape_cast %454 : vector<32x1xf32> to vector<1x32x1xf32>
    tpu.vector_store %arg23[%c2_161, %c0_162, %c0_163], %457 {strides = array<i32>} : memref<4x32x1xf32, #tpu.memory_space<vmem>>, vector<1x32x1xf32>,
    %458 = arith.addf %435, %446 : vector<32x128xf32>
    %459 = vector.extract_strided_slice %388 {offsets = [0, 1536], sizes = [32, 512], strides = [1, 1]} : vector<32x2048xbf16> to vector<32x512xbf16>
    %c3 = arith.constant 3 : index
    %c0_164 = arith.constant 0 : index
    %c0_165 = arith.constant 0 : index
    %460 = vector.load %arg16[%c3, %c0_164, %c0_165] : memref<8x512x128xbf16, #tpu.memory_space<vmem>>, vector<1x512x128xbf16>
    %461 = vector.shape_cast %460 : vector<1x512x128xbf16> to vector<512x128xbf16>
    %cst_166 = arith.constant dense<0.000000e+00> : vector<32x128xf32>
    %462 = tpu.matmul %459, %461, %cst_166 {dimension_numbers = #tpu.dot_dimension_numbers<[1], [0], [0], [1], [0, 0, 1, 1], [], []>} : vector<32x512xbf16>, vector<512x128xbf16>, vector<32x128xf32> -> vector<32x128xf32>
    %c3_167 = arith.constant 3 : index
    %c0_168 = arith.constant 0 : index
    %c0_169 = arith.constant 0 : index
    %463 = vector.load %arg17[%c3_167, %c0_168, %c0_169] : memref<8x1x128xf32, #tpu.memory_space<vmem>>, vector<1x1x128xf32>
    %464 = vector.shape_cast %463 : vector<1x1x128xf32> to vector<1x128xf32>
    %465 = vector.broadcast %464 : vector<1x128xf32> to vector<32x128xf32>
    %466 = arith.addf %462, %465 : vector<32x128xf32>
    %467 = vector.extract_strided_slice %359 {offsets = [0, 3], sizes = [32, 1], strides = [1, 1]} : vector<32x4xf32> to vector<32x1xf32>
    %468 = vector.broadcast %467 : vector<32x1xf32> to vector<32x128xf32>
    %469 = arith.mulf %466, %468 : vector<32x128xf32>
    %470 = vector.shape_cast %469 : vector<32x128xf32> to vector<2x16x128xf32>
    %c3_170 = arith.constant 3 : index
    %c0_171 = arith.constant 0 : index
    %c0_172 = arith.constant 0 : index
    %c0_173 = arith.constant 0 : index
    %471 = vector.load %arg22[%c3_170, %c0_171, %c0_172, %c0_173] : memref<4x2x16x128xf32, #tpu.memory_space<vmem>>, vector<1x2x16x128xf32>
    %472 = vector.shape_cast %471 : vector<1x2x16x128xf32> to vector<2x16x128xf32>
    %473 = vector.shape_cast %470 : vector<2x16x128xf32> to vector<1x2x16x128xf32>
    tpu.vector_store %arg22[%c3_170, %c0_171, %c0_172, %c0_173], %473 {strides = array<i32>} : memref<4x2x16x128xf32, #tpu.memory_space<vmem>>, vector<1x2x16x128xf32>,
    %cst_174 = arith.constant dense<0.000000e+00> : vector<32xf32>
    %474 = vector.multi_reduction <add>, %466, %cst_174 [1] : vector<32x128xf32> to vector<32xf32>
    %475 = vector.shape_cast %474 : vector<32xf32> to vector<32x1xf32>
    %cst_175 = arith.constant 1.280000e+02 : f32
    %476 = vector.broadcast %cst_175 : f32 to vector<32x1xf32>
    %477 = arith.divf %475, %476 : vector<32x1xf32>
    %c3_176 = arith.constant 3 : index
    %c0_177 = arith.constant 0 : index
    %c0_178 = arith.constant 0 : index
    %478 = vector.load %arg23[%c3_176, %c0_177, %c0_178] : memref<4x32x1xf32, #tpu.memory_space<vmem>>, vector<1x32x1xf32>
    %479 = vector.shape_cast %478 : vector<1x32x1xf32> to vector<32x1xf32>
    %480 = vector.shape_cast %477 : vector<32x1xf32> to vector<1x32x1xf32>
    tpu.vector_store %arg23[%c3_176, %c0_177, %c0_178], %480 {strides = array<i32>} : memref<4x32x1xf32, #tpu.memory_space<vmem>>, vector<1x32x1xf32>,
    %481 = arith.addf %458, %469 : vector<32x128xf32>
    %cst_179 = arith.constant dense<0.000000e+00> : vector<32xf32>
    %482 = vector.multi_reduction <add>, %481, %cst_179 [1] : vector<32x128xf32> to vector<32xf32>
    %483 = vector.shape_cast %482 : vector<32xf32> to vector<32x1xf32>
    %cst_180 = arith.constant 1.280000e+02 : f32
    %484 = vector.broadcast %cst_180 : f32 to vector<32x1xf32>
    %485 = arith.divf %483, %484 : vector<32x1xf32>
    %486 = vector.broadcast %485 : vector<32x1xf32> to vector<32x128xf32>
    %487 = arith.subf %481, %486 : vector<32x128xf32>
    %488 = arith.mulf %487, %487 : vector<32x128xf32>
    %cst_181 = arith.constant dense<0.000000e+00> : vector<32xf32>
    %489 = vector.multi_reduction <add>, %488, %cst_181 [1] : vector<32x128xf32> to vector<32xf32>
    %490 = vector.shape_cast %489 : vector<32xf32> to vector<32x1xf32>
    %cst_182 = arith.constant 1.280000e+02 : f32
    %491 = vector.broadcast %cst_182 : f32 to vector<32x1xf32>
    %492 = arith.divf %490, %491 : vector<32x1xf32>
    %493 = vector.broadcast %485 : vector<32x1xf32> to vector<32x128xf32>
    %494 = arith.subf %481, %493 : vector<32x128xf32>
    %cst_183 = arith.constant 9.99999974E-6 : f32
    %495 = vector.broadcast %cst_183 : f32 to vector<32x1xf32>
    %496 = arith.addf %492, %495 : vector<32x1xf32>
    %497 = math.rsqrt %496 : vector<32x1xf32>
    %498 = vector.broadcast %497 : vector<32x1xf32> to vector<32x128xf32>
    %499 = arith.mulf %494, %498 : vector<32x128xf32>
    %500 = vector.extract_strided_slice %6 {offsets = [2, 0], sizes = [1, 128], strides = [1, 1]} : vector<3x128xf32> to vector<1x128xf32>
    %501 = vector.broadcast %500 : vector<1x128xf32> to vector<32x128xf32>
    %502 = arith.mulf %499, %501 : vector<32x128xf32>
    %503 = vector.extract_strided_slice %7 {offsets = [2, 0], sizes = [1, 128], strides = [1, 1]} : vector<3x128xf32> to vector<1x128xf32>
    %504 = vector.broadcast %503 : vector<1x128xf32> to vector<32x128xf32>
    %505 = arith.addf %502, %504 : vector<32x128xf32>
    %c1_184 = arith.constant 1 : index
    %c0_185 = arith.constant 0 : index
    %c0_186 = arith.constant 0 : index
    %506 = vector.load %arg12[%c1_184, %c0_185, %c0_186] : memref<2x128x4xf32, #tpu.memory_space<vmem>>, vector<1x128x4xf32>
    %507 = vector.shape_cast %506 : vector<1x128x4xf32> to vector<128x4xf32>
    %cst_187 = arith.constant dense<0.000000e+00> : vector<32x4xf32>
    %508 = tpu.matmul %505, %507, %cst_187 {dimension_numbers = #tpu.dot_dimension_numbers<[1], [0], [0], [1], [0, 0, 1, 1], [], []>} : vector<32x128xf32>, vector<128x4xf32>, vector<32x4xf32> -> vector<32x4xf32>
    %c1_188 = arith.constant 1 : index
    %c0_189 = arith.constant 0 : index
    %c0_190 = arith.constant 0 : index
    %509 = vector.load %arg13[%c1_188, %c0_189, %c0_190] : memref<2x1x4xf32, #tpu.memory_space<vmem>>, vector<1x1x4xf32>
    %510 = vector.shape_cast %509 : vector<1x1x4xf32> to vector<1x4xf32>
    %511 = vector.broadcast %510 : vector<1x4xf32> to vector<32x4xf32>
    %512 = arith.addf %508, %511 : vector<32x4xf32>
    %cst_191 = arith.constant dense<0xFF800000> : vector<32xf32>
    %513 = vector.multi_reduction <maximumf>, %512, %cst_191 [1] : vector<32x4xf32> to vector<32xf32>
    %514 = vector.shape_cast %513 : vector<32xf32> to vector<32x1xf32>
    %515 = vector.broadcast %514 : vector<32x1xf32> to vector<32x4xf32>
    %516 = arith.subf %512, %515 : vector<32x4xf32>
    %517 = math.exp %516 : vector<32x4xf32>
    %cst_192 = arith.constant dense<0.000000e+00> : vector<32xf32>
    %518 = vector.multi_reduction <add>, %517, %cst_192 [1] : vector<32x4xf32> to vector<32xf32>
    %519 = vector.shape_cast %518 : vector<32xf32> to vector<32x1xf32>
    %520 = vector.broadcast %519 : vector<32x1xf32> to vector<32x4xf32>
    %521 = arith.divf %517, %520 : vector<32x4xf32>
    %cst_193 = arith.constant 0.000000e+00 : f32
    %522 = vector.broadcast %cst_193 : f32 to vector<32x4xf32>
    %523 = vector.extract_strided_slice %512 {offsets = [0, 0], sizes = [32, 1], strides = [1, 1]} : vector<32x4xf32> to vector<32x1xf32>
    %524 = vector.broadcast %523 : vector<32x1xf32> to vector<32x4xf32>
    %525 = arith.cmpf ogt, %524, %512 : vector<32x4xf32>
    %526 = vector.broadcast %523 : vector<32x1xf32> to vector<32x4xf32>
    %527 = arith.cmpf oeq, %526, %512 : vector<32x4xf32>
    %c0_i32_194 = arith.constant 0 : i32
    %528 = vector.broadcast %c0_i32_194 : i32 to vector<32x4xi32>
    %529 = arith.cmpi sgt, %257, %528 : vector<32x4xi32>
    %530 = arith.andi %527, %529 : vector<32x4xi1>
    %531 = arith.ori %525, %530 : vector<32x4xi1>
    %532 = arith.extui %531 : vector<32x4xi1> to vector<32x4xi32>
    %533 = arith.sitofp %532 : vector<32x4xi32> to vector<32x4xf32>
    %534 = arith.addf %522, %533 : vector<32x4xf32>
    %535 = vector.extract_strided_slice %512 {offsets = [0, 1], sizes = [32, 1], strides = [1, 1]} : vector<32x4xf32> to vector<32x1xf32>
    %536 = vector.broadcast %535 : vector<32x1xf32> to vector<32x4xf32>
    %537 = arith.cmpf ogt, %536, %512 : vector<32x4xf32>
    %538 = vector.broadcast %535 : vector<32x1xf32> to vector<32x4xf32>
    %539 = arith.cmpf oeq, %538, %512 : vector<32x4xf32>
    %c1_i32_195 = arith.constant 1 : i32
    %540 = vector.broadcast %c1_i32_195 : i32 to vector<32x4xi32>
    %541 = arith.cmpi sgt, %257, %540 : vector<32x4xi32>
    %542 = arith.andi %539, %541 : vector<32x4xi1>
    %543 = arith.ori %537, %542 : vector<32x4xi1>
    %544 = arith.extui %543 : vector<32x4xi1> to vector<32x4xi32>
    %545 = arith.sitofp %544 : vector<32x4xi32> to vector<32x4xf32>
    %546 = arith.addf %534, %545 : vector<32x4xf32>
    %547 = vector.extract_strided_slice %512 {offsets = [0, 2], sizes = [32, 1], strides = [1, 1]} : vector<32x4xf32> to vector<32x1xf32>
    %548 = vector.broadcast %547 : vector<32x1xf32> to vector<32x4xf32>
    %549 = arith.cmpf ogt, %548, %512 : vector<32x4xf32>
    %550 = vector.broadcast %547 : vector<32x1xf32> to vector<32x4xf32>
    %551 = arith.cmpf oeq, %550, %512 : vector<32x4xf32>
    %c2_i32_196 = arith.constant 2 : i32
    %552 = vector.broadcast %c2_i32_196 : i32 to vector<32x4xi32>
    %553 = arith.cmpi sgt, %257, %552 : vector<32x4xi32>
    %554 = arith.andi %551, %553 : vector<32x4xi1>
    %555 = arith.ori %549, %554 : vector<32x4xi1>
    %556 = arith.extui %555 : vector<32x4xi1> to vector<32x4xi32>
    %557 = arith.sitofp %556 : vector<32x4xi32> to vector<32x4xf32>
    %558 = arith.addf %546, %557 : vector<32x4xf32>
    %559 = vector.extract_strided_slice %512 {offsets = [0, 3], sizes = [32, 1], strides = [1, 1]} : vector<32x4xf32> to vector<32x1xf32>
    %560 = vector.broadcast %559 : vector<32x1xf32> to vector<32x4xf32>
    %561 = arith.cmpf ogt, %560, %512 : vector<32x4xf32>
    %562 = vector.broadcast %559 : vector<32x1xf32> to vector<32x4xf32>
    %563 = arith.cmpf oeq, %562, %512 : vector<32x4xf32>
    %c3_i32_197 = arith.constant 3 : i32
    %564 = vector.broadcast %c3_i32_197 : i32 to vector<32x4xi32>
    %565 = arith.cmpi sgt, %257, %564 : vector<32x4xi32>
    %566 = arith.andi %563, %565 : vector<32x4xi1>
    %567 = arith.ori %561, %566 : vector<32x4xi1>
    %568 = arith.extui %567 : vector<32x4xi1> to vector<32x4xi32>
    %569 = arith.sitofp %568 : vector<32x4xi32> to vector<32x4xf32>
    %570 = arith.addf %558, %569 : vector<32x4xf32>
    %cst_198 = arith.constant 2.000000e+00 : f32
    %571 = vector.broadcast %cst_198 : f32 to vector<32x4xf32>
    %572 = arith.cmpf olt, %570, %571 : vector<32x4xf32>
    %cst_199 = arith.constant -1.000000e+09 : f32
    %573 = vector.broadcast %cst_199 : f32 to vector<32x4xf32>
    %574 = arith.select %572, %512, %573 : vector<32x4xi1>, vector<32x4xf32>
    %cst_200 = arith.constant dense<0xFF800000> : vector<32xf32>
    %575 = vector.multi_reduction <maximumf>, %574, %cst_200 [1] : vector<32x4xf32> to vector<32xf32>
    %576 = vector.shape_cast %575 : vector<32xf32> to vector<32x1xf32>
    %577 = vector.broadcast %576 : vector<32x1xf32> to vector<32x4xf32>
    %578 = arith.subf %574, %577 : vector<32x4xf32>
    %579 = math.exp %578 : vector<32x4xf32>
    %cst_201 = arith.constant dense<0.000000e+00> : vector<32xf32>
    %580 = vector.multi_reduction <add>, %579, %cst_201 [1] : vector<32x4xf32> to vector<32xf32>
    %581 = vector.shape_cast %580 : vector<32xf32> to vector<32x1xf32>
    %582 = vector.broadcast %581 : vector<32x1xf32> to vector<32x4xf32>
    %583 = arith.divf %579, %582 : vector<32x4xf32>
    %cst_202 = arith.constant dense<0.000000e+00> : vector<4xf32>
    %584 = vector.multi_reduction <add>, %521, %cst_202 [0] : vector<32x4xf32> to vector<4xf32>
    %585 = vector.shape_cast %584 : vector<4xf32> to vector<1x4xf32>
    %cst_203 = arith.constant 3.200000e+01 : f32
    %586 = vector.broadcast %cst_203 : f32 to vector<1x4xf32>
    %587 = arith.divf %585, %586 : vector<1x4xf32>
    %588 = arith.extui %572 : vector<32x4xi1> to vector<32x4xi32>
    %589 = arith.sitofp %588 : vector<32x4xi32> to vector<32x4xf32>
    %cst_204 = arith.constant dense<0.000000e+00> : vector<4xf32>
    %590 = vector.multi_reduction <add>, %589, %cst_204 [0] : vector<32x4xf32> to vector<4xf32>
    %591 = vector.shape_cast %590 : vector<4xf32> to vector<1x4xf32>
    %cst_205 = arith.constant 3.200000e+01 : f32
    %592 = vector.broadcast %cst_205 : f32 to vector<1x4xf32>
    %593 = arith.divf %591, %592 : vector<1x4xf32>
    %594 = arith.mulf %587, %593 : vector<1x4xf32>
    %c1_206 = arith.constant 1 : index
    %c0_207 = arith.constant 0 : index
    %c0_208 = arith.constant 0 : index
    %595 = vector.load %arg29[%c1_206, %c0_207, %c0_208] : memref<2x1x4xf32, #tpu.memory_space<vmem>>, vector<1x1x4xf32>
    %596 = vector.shape_cast %595 : vector<1x1x4xf32> to vector<1x4xf32>
    %597 = vector.shape_cast %594 : vector<1x4xf32> to vector<1x1x4xf32>
    tpu.vector_store %arg29[%c1_206, %c0_207, %c0_208], %597 {strides = array<i32>} : memref<2x1x4xf32, #tpu.memory_space<vmem>>, vector<1x1x4xf32>,
    %598 = vector.shape_cast %583 : vector<32x4xf32> to vector<2x16x4xf32>
    %c0_209 = arith.constant 0 : index
    %c0_210 = arith.constant 0 : index
    %c0_211 = arith.constant 0 : index
    %599 = vector.load %arg27[%c0_209, %c0_210, %c0_211] : memref<2x16x4xf32, #tpu.memory_space<vmem>>, vector<2x16x4xf32>
    tpu.vector_store %arg27[%c0_209, %c0_210, %c0_211], %598 {strides = array<i32>} : memref<2x16x4xf32, #tpu.memory_space<vmem>>, vector<2x16x4xf32>,
    %600 = vector.shape_cast %521 : vector<32x4xf32> to vector<2x16x4xf32>
    %c0_212 = arith.constant 0 : index
    %c0_213 = arith.constant 0 : index
    %c0_214 = arith.constant 0 : index
    %601 = vector.load %arg28[%c0_212, %c0_213, %c0_214] : memref<2x16x4xf32, #tpu.memory_space<vmem>>, vector<2x16x4xf32>
    tpu.vector_store %arg28[%c0_212, %c0_213, %c0_214], %600 {strides = array<i32>} : memref<2x16x4xf32, #tpu.memory_space<vmem>>, vector<2x16x4xf32>,
    %602 = arith.truncf %505 : vector<32x128xf32> to vector<32x128xbf16>
    %c1_215 = arith.constant 1 : index
    %c0_216 = arith.constant 0 : index
    %c0_217 = arith.constant 0 : index
    %603 = vector.load %arg14[%c1_215, %c0_216, %c0_217] : memref<2x128x2048xbf16, #tpu.memory_space<vmem>>, vector<1x128x2048xbf16>
    %604 = vector.shape_cast %603 : vector<1x128x2048xbf16> to vector<128x2048xbf16>
    %cst_218 = arith.constant dense<0.000000e+00> : vector<32x2048xf32>
    %605 = tpu.matmul %602, %604, %cst_218 {dimension_numbers = #tpu.dot_dimension_numbers<[1], [0], [0], [1], [0, 0, 1, 1], [], []>} : vector<32x128xbf16>, vector<128x2048xbf16>, vector<32x2048xf32> -> vector<32x2048xf32>
    %c1_219 = arith.constant 1 : index
    %c0_220 = arith.constant 0 : index
    %c0_221 = arith.constant 0 : index
    %606 = vector.load %arg15[%c1_219, %c0_220, %c0_221] : memref<2x1x2048xf32, #tpu.memory_space<vmem>>, vector<1x1x2048xf32>
    %607 = vector.shape_cast %606 : vector<1x1x2048xf32> to vector<1x2048xf32>
    %608 = vector.broadcast %607 : vector<1x2048xf32> to vector<32x2048xf32>
    %609 = arith.addf %605, %608 : vector<32x2048xf32>
    %cst_222 = arith.constant 0.000000e+00 : f32
    %610 = vector.broadcast %cst_222 : f32 to vector<32x2048xf32>
    %611 = arith.maximumf %609, %610 : vector<32x2048xf32>
    %612 = arith.truncf %611 : vector<32x2048xf32> to vector<32x2048xbf16>
    %cst_223 = arith.constant 0.000000e+00 : f32
    %613 = vector.broadcast %cst_223 : f32 to vector<32x128xf32>
    %614 = vector.extract_strided_slice %612 {offsets = [0, 0], sizes = [32, 512], strides = [1, 1]} : vector<32x2048xbf16> to vector<32x512xbf16>
    %c4 = arith.constant 4 : index
    %c0_224 = arith.constant 0 : index
    %c0_225 = arith.constant 0 : index
    %615 = vector.load %arg16[%c4, %c0_224, %c0_225] : memref<8x512x128xbf16, #tpu.memory_space<vmem>>, vector<1x512x128xbf16>
    %616 = vector.shape_cast %615 : vector<1x512x128xbf16> to vector<512x128xbf16>
    %cst_226 = arith.constant dense<0.000000e+00> : vector<32x128xf32>
    %617 = tpu.matmul %614, %616, %cst_226 {dimension_numbers = #tpu.dot_dimension_numbers<[1], [0], [0], [1], [0, 0, 1, 1], [], []>} : vector<32x512xbf16>, vector<512x128xbf16>, vector<32x128xf32> -> vector<32x128xf32>
    %c4_227 = arith.constant 4 : index
    %c0_228 = arith.constant 0 : index
    %c0_229 = arith.constant 0 : index
    %618 = vector.load %arg17[%c4_227, %c0_228, %c0_229] : memref<8x1x128xf32, #tpu.memory_space<vmem>>, vector<1x1x128xf32>
    %619 = vector.shape_cast %618 : vector<1x1x128xf32> to vector<1x128xf32>
    %620 = vector.broadcast %619 : vector<1x128xf32> to vector<32x128xf32>
    %621 = arith.addf %617, %620 : vector<32x128xf32>
    %622 = vector.extract_strided_slice %583 {offsets = [0, 0], sizes = [32, 1], strides = [1, 1]} : vector<32x4xf32> to vector<32x1xf32>
    %623 = vector.broadcast %622 : vector<32x1xf32> to vector<32x128xf32>
    %624 = arith.mulf %621, %623 : vector<32x128xf32>
    %625 = vector.shape_cast %624 : vector<32x128xf32> to vector<2x16x128xf32>
    %c0_230 = arith.constant 0 : index
    %c0_231 = arith.constant 0 : index
    %c0_232 = arith.constant 0 : index
    %c0_233 = arith.constant 0 : index
    %626 = vector.load %arg26[%c0_230, %c0_231, %c0_232, %c0_233] : memref<4x2x16x128xf32, #tpu.memory_space<vmem>>, vector<1x2x16x128xf32>
    %627 = vector.shape_cast %626 : vector<1x2x16x128xf32> to vector<2x16x128xf32>
    %628 = vector.shape_cast %625 : vector<2x16x128xf32> to vector<1x2x16x128xf32>
    tpu.vector_store %arg26[%c0_230, %c0_231, %c0_232, %c0_233], %628 {strides = array<i32>} : memref<4x2x16x128xf32, #tpu.memory_space<vmem>>, vector<1x2x16x128xf32>,
    %629 = arith.addf %613, %624 : vector<32x128xf32>
    %630 = vector.extract_strided_slice %612 {offsets = [0, 512], sizes = [32, 512], strides = [1, 1]} : vector<32x2048xbf16> to vector<32x512xbf16>
    %c5 = arith.constant 5 : index
    %c0_234 = arith.constant 0 : index
    %c0_235 = arith.constant 0 : index
    %631 = vector.load %arg16[%c5, %c0_234, %c0_235] : memref<8x512x128xbf16, #tpu.memory_space<vmem>>, vector<1x512x128xbf16>
    %632 = vector.shape_cast %631 : vector<1x512x128xbf16> to vector<512x128xbf16>
    %cst_236 = arith.constant dense<0.000000e+00> : vector<32x128xf32>
    %633 = tpu.matmul %630, %632, %cst_236 {dimension_numbers = #tpu.dot_dimension_numbers<[1], [0], [0], [1], [0, 0, 1, 1], [], []>} : vector<32x512xbf16>, vector<512x128xbf16>, vector<32x128xf32> -> vector<32x128xf32>
    %c5_237 = arith.constant 5 : index
    %c0_238 = arith.constant 0 : index
    %c0_239 = arith.constant 0 : index
    %634 = vector.load %arg17[%c5_237, %c0_238, %c0_239] : memref<8x1x128xf32, #tpu.memory_space<vmem>>, vector<1x1x128xf32>
    %635 = vector.shape_cast %634 : vector<1x1x128xf32> to vector<1x128xf32>
    %636 = vector.broadcast %635 : vector<1x128xf32> to vector<32x128xf32>
    %637 = arith.addf %633, %636 : vector<32x128xf32>
    %638 = vector.extract_strided_slice %583 {offsets = [0, 1], sizes = [32, 1], strides = [1, 1]} : vector<32x4xf32> to vector<32x1xf32>
    %639 = vector.broadcast %638 : vector<32x1xf32> to vector<32x128xf32>
    %640 = arith.mulf %637, %639 : vector<32x128xf32>
    %641 = vector.shape_cast %640 : vector<32x128xf32> to vector<2x16x128xf32>
    %c1_240 = arith.constant 1 : index
    %c0_241 = arith.constant 0 : index
    %c0_242 = arith.constant 0 : index
    %c0_243 = arith.constant 0 : index
    %642 = vector.load %arg26[%c1_240, %c0_241, %c0_242, %c0_243] : memref<4x2x16x128xf32, #tpu.memory_space<vmem>>, vector<1x2x16x128xf32>
    %643 = vector.shape_cast %642 : vector<1x2x16x128xf32> to vector<2x16x128xf32>
    %644 = vector.shape_cast %641 : vector<2x16x128xf32> to vector<1x2x16x128xf32>
    tpu.vector_store %arg26[%c1_240, %c0_241, %c0_242, %c0_243], %644 {strides = array<i32>} : memref<4x2x16x128xf32, #tpu.memory_space<vmem>>, vector<1x2x16x128xf32>,
    %645 = arith.addf %629, %640 : vector<32x128xf32>
    %646 = vector.extract_strided_slice %612 {offsets = [0, 1024], sizes = [32, 512], strides = [1, 1]} : vector<32x2048xbf16> to vector<32x512xbf16>
    %c6 = arith.constant 6 : index
    %c0_244 = arith.constant 0 : index
    %c0_245 = arith.constant 0 : index
    %647 = vector.load %arg16[%c6, %c0_244, %c0_245] : memref<8x512x128xbf16, #tpu.memory_space<vmem>>, vector<1x512x128xbf16>
    %648 = vector.shape_cast %647 : vector<1x512x128xbf16> to vector<512x128xbf16>
    %cst_246 = arith.constant dense<0.000000e+00> : vector<32x128xf32>
    %649 = tpu.matmul %646, %648, %cst_246 {dimension_numbers = #tpu.dot_dimension_numbers<[1], [0], [0], [1], [0, 0, 1, 1], [], []>} : vector<32x512xbf16>, vector<512x128xbf16>, vector<32x128xf32> -> vector<32x128xf32>
    %c6_247 = arith.constant 6 : index
    %c0_248 = arith.constant 0 : index
    %c0_249 = arith.constant 0 : index
    %650 = vector.load %arg17[%c6_247, %c0_248, %c0_249] : memref<8x1x128xf32, #tpu.memory_space<vmem>>, vector<1x1x128xf32>
    %651 = vector.shape_cast %650 : vector<1x1x128xf32> to vector<1x128xf32>
    %652 = vector.broadcast %651 : vector<1x128xf32> to vector<32x128xf32>
    %653 = arith.addf %649, %652 : vector<32x128xf32>
    %654 = vector.extract_strided_slice %583 {offsets = [0, 2], sizes = [32, 1], strides = [1, 1]} : vector<32x4xf32> to vector<32x1xf32>
    %655 = vector.broadcast %654 : vector<32x1xf32> to vector<32x128xf32>
    %656 = arith.mulf %653, %655 : vector<32x128xf32>
    %657 = vector.shape_cast %656 : vector<32x128xf32> to vector<2x16x128xf32>
    %c2_250 = arith.constant 2 : index
    %c0_251 = arith.constant 0 : index
    %c0_252 = arith.constant 0 : index
    %c0_253 = arith.constant 0 : index
    %658 = vector.load %arg26[%c2_250, %c0_251, %c0_252, %c0_253] : memref<4x2x16x128xf32, #tpu.memory_space<vmem>>, vector<1x2x16x128xf32>
    %659 = vector.shape_cast %658 : vector<1x2x16x128xf32> to vector<2x16x128xf32>
    %660 = vector.shape_cast %657 : vector<2x16x128xf32> to vector<1x2x16x128xf32>
    tpu.vector_store %arg26[%c2_250, %c0_251, %c0_252, %c0_253], %660 {strides = array<i32>} : memref<4x2x16x128xf32, #tpu.memory_space<vmem>>, vector<1x2x16x128xf32>,
    %661 = arith.addf %645, %656 : vector<32x128xf32>
    %662 = vector.extract_strided_slice %612 {offsets = [0, 1536], sizes = [32, 512], strides = [1, 1]} : vector<32x2048xbf16> to vector<32x512xbf16>
    %c7 = arith.constant 7 : index
    %c0_254 = arith.constant 0 : index
    %c0_255 = arith.constant 0 : index
    %663 = vector.load %arg16[%c7, %c0_254, %c0_255] : memref<8x512x128xbf16, #tpu.memory_space<vmem>>, vector<1x512x128xbf16>
    %664 = vector.shape_cast %663 : vector<1x512x128xbf16> to vector<512x128xbf16>
    %cst_256 = arith.constant dense<0.000000e+00> : vector<32x128xf32>
    %665 = tpu.matmul %662, %664, %cst_256 {dimension_numbers = #tpu.dot_dimension_numbers<[1], [0], [0], [1], [0, 0, 1, 1], [], []>} : vector<32x512xbf16>, vector<512x128xbf16>, vector<32x128xf32> -> vector<32x128xf32>
    %c7_257 = arith.constant 7 : index
    %c0_258 = arith.constant 0 : index
    %c0_259 = arith.constant 0 : index
    %666 = vector.load %arg17[%c7_257, %c0_258, %c0_259] : memref<8x1x128xf32, #tpu.memory_space<vmem>>, vector<1x1x128xf32>
    %667 = vector.shape_cast %666 : vector<1x1x128xf32> to vector<1x128xf32>
    %668 = vector.broadcast %667 : vector<1x128xf32> to vector<32x128xf32>
    %669 = arith.addf %665, %668 : vector<32x128xf32>
    %670 = vector.extract_strided_slice %583 {offsets = [0, 3], sizes = [32, 1], strides = [1, 1]} : vector<32x4xf32> to vector<32x1xf32>
    %671 = vector.broadcast %670 : vector<32x1xf32> to vector<32x128xf32>
    %672 = arith.mulf %669, %671 : vector<32x128xf32>
    %673 = vector.shape_cast %672 : vector<32x128xf32> to vector<2x16x128xf32>
    %c3_260 = arith.constant 3 : index
    %c0_261 = arith.constant 0 : index
    %c0_262 = arith.constant 0 : index
    %c0_263 = arith.constant 0 : index
    %674 = vector.load %arg26[%c3_260, %c0_261, %c0_262, %c0_263] : memref<4x2x16x128xf32, #tpu.memory_space<vmem>>, vector<1x2x16x128xf32>
    %675 = vector.shape_cast %674 : vector<1x2x16x128xf32> to vector<2x16x128xf32>
    %676 = vector.shape_cast %673 : vector<2x16x128xf32> to vector<1x2x16x128xf32>
    tpu.vector_store %arg26[%c3_260, %c0_261, %c0_262, %c0_263], %676 {strides = array<i32>} : memref<4x2x16x128xf32, #tpu.memory_space<vmem>>, vector<1x2x16x128xf32>,
    %677 = arith.addf %661, %672 : vector<32x128xf32>
    %c0_264 = arith.constant 0 : index
    %c0_265 = arith.constant 0 : index
    %678 = vector.load %arg18[%c0_264, %c0_265] : memref<2x32xf32, #tpu.memory_space<vmem>>, vector<2x32xf32>
    %cst_266 = arith.constant dense<0.000000e+00> : vector<2x128xf32>
    %679 = tpu.matmul %678, %677, %cst_266 {dimension_numbers = #tpu.dot_dimension_numbers<[1], [0], [0], [1], [0, 0, 1, 1], [], []>} : vector<2x32xf32>, vector<32x128xf32>, vector<2x128xf32> -> vector<2x128xf32>
    %c0_267 = arith.constant 0 : index
    %c0_268 = arith.constant 0 : index
    %680 = vector.load %arg30[%c0_267, %c0_268] : memref<2x128xf32, #tpu.memory_space<vmem>>, vector<2x128xf32>
    tpu.vector_store %arg30[%c0_267, %c0_268], %679 {strides = array<i32>} : memref<2x128xf32, #tpu.memory_space<vmem>>, vector<2x128xf32>,
    %c0_269 = arith.constant 0 : index
    %c0_270 = arith.constant 0 : index
    %681 = vector.load %arg19[%c0_269, %c0_270] : memref<128x10xf32, #tpu.memory_space<vmem>>, vector<128x10xf32>
    %cst_271 = arith.constant dense<0.000000e+00> : vector<2x10xf32>
    %682 = tpu.matmul %679, %681, %cst_271 {dimension_numbers = #tpu.dot_dimension_numbers<[1], [0], [0], [1], [0, 0, 1, 1], [], []>} : vector<2x128xf32>, vector<128x10xf32>, vector<2x10xf32> -> vector<2x10xf32>
    %c0_272 = arith.constant 0 : index
    %c0_273 = arith.constant 0 : index
    %683 = vector.load %arg20[%c0_272, %c0_273] : memref<1x10xf32, #tpu.memory_space<vmem>>, vector<1x10xf32>
    %684 = vector.broadcast %683 : vector<1x10xf32> to vector<2x10xf32>
    %685 = arith.addf %682, %684 : vector<2x10xf32>
    %c0_274 = arith.constant 0 : index
    %c0_275 = arith.constant 0 : index
    %686 = vector.load %arg31[%c0_274, %c0_275] : memref<2x10xf32, #tpu.memory_space<vmem>>, vector<2x10xf32>
    tpu.vector_store %arg31[%c0_274, %c0_275], %685 {strides = array<i32>} : memref<2x10xf32, #tpu.memory_space<vmem>>, vector<2x10xf32>,
    return
  }
  func.func @transform_0(%arg0: i32) -> (i32, i32, i32) {
    %c0_i32 = arith.constant 0 : i32
    %c0_i32_0 = arith.constant 0 : i32
    %c0_i32_1 = arith.constant 0 : i32
    %c0_i32_2 = arith.constant 0 : i32
    return %c0_i32, %c0_i32_0, %c0_i32_1 : i32, i32, i32
  }
  func.func @transform_1(%arg0: i32) -> (i32, i32) {
    %c0_i32 = arith.constant 0 : i32
    %c0_i32_0 = arith.constant 0 : i32
    %c0_i32_1 = arith.constant 0 : i32
    return %c0_i32, %c0_i32_0 : i32, i32
  }
  func.func @transform_2(%arg0: i32) -> (i32, i32) {
    %c0_i32 = arith.constant 0 : i32
    %c0_i32_0 = arith.constant 0 : i32
    %c0_i32_1 = arith.constant 0 : i32
    return %c0_i32, %c0_i32_0 : i32, i32
  }
  func.func @transform_3(%arg0: i32) -> (i32, i32) {
    %c0_i32 = arith.constant 0 : i32
    %c0_i32_0 = arith.constant 0 : i32
    %c0_i32_1 = arith.constant 0 : i32
    return %c0_i32, %c0_i32_0 : i32, i32
  }
  func.func @transform_4(%arg0: i32) -> (i32, i32) {
    %c0_i32 = arith.constant 0 : i32
    %c0_i32_0 = arith.constant 0 : i32
    %c0_i32_1 = arith.constant 0 : i32
    return %c0_i32, %c0_i32_0 : i32, i32
  }
  func.func @transform_5(%arg0: i32) -> (i32, i32) {
    %c0_i32 = arith.constant 0 : i32
    %c0_i32_0 = arith.constant 0 : i32
    %c0_i32_1 = arith.constant 0 : i32
    return %c0_i32, %c0_i32_0 : i32, i32
  }
  func.func @transform_6(%arg0: i32) -> (i32, i32) {
    %c0_i32 = arith.constant 0 : i32
    %c0_i32_0 = arith.constant 0 : i32
    %c0_i32_1 = arith.constant 0 : i32
    return %c0_i32, %c0_i32_0 : i32, i32
  }
  func.func @transform_7(%arg0: i32) -> (i32, i32) {
    %c0_i32 = arith.constant 0 : i32
    %c0_i32_0 = arith.constant 0 : i32
    %c0_i32_1 = arith.constant 0 : i32
    return %c0_i32, %c0_i32_0 : i32, i32
  }
  func.func @transform_8(%arg0: i32) -> (i32, i32) {
    %c0_i32 = arith.constant 0 : i32
    %c0_i32_0 = arith.constant 0 : i32
    %c0_i32_1 = arith.constant 0 : i32
    return %c0_i32, %c0_i32_0 : i32, i32
  }
  func.func @transform_9(%arg0: i32) -> (i32, i32) {
    %c0_i32 = arith.constant 0 : i32
    %c0_i32_0 = arith.constant 0 : i32
    %c0_i32_1 = arith.constant 0 : i32
    return %c0_i32, %c0_i32_0 : i32, i32
  }
  func.func @transform_10(%arg0: i32) -> (i32, i32, i32) {
    %c0_i32 = arith.constant 0 : i32
    %c0_i32_0 = arith.constant 0 : i32
    %c0_i32_1 = arith.constant 0 : i32
    %c0_i32_2 = arith.constant 0 : i32
    return %c0_i32, %c0_i32_0, %c0_i32_1 : i32, i32, i32
  }
  func.func @transform_11(%arg0: i32) -> (i32, i32, i32) {
    %c0_i32 = arith.constant 0 : i32
    %c0_i32_0 = arith.constant 0 : i32
    %c0_i32_1 = arith.constant 0 : i32
    %c0_i32_2 = arith.constant 0 : i32
    return %c0_i32, %c0_i32_0, %c0_i32_1 : i32, i32, i32
  }
  func.func @transform_12(%arg0: i32) -> (i32, i32, i32) {
    %c0_i32 = arith.constant 0 : i32
    %c0_i32_0 = arith.constant 0 : i32
    %c0_i32_1 = arith.constant 0 : i32
    %c0_i32_2 = arith.constant 0 : i32
    return %c0_i32, %c0_i32_0, %c0_i32_1 : i32, i32, i32
  }
  func.func @transform_13(%arg0: i32) -> (i32, i32, i32) {
    %c0_i32 = arith.constant 0 : i32
    %c0_i32_0 = arith.constant 0 : i32
    %c0_i32_1 = arith.constant 0 : i32
    %c0_i32_2 = arith.constant 0 : i32
    return %c0_i32, %c0_i32_0, %c0_i32_1 : i32, i32, i32
  }
  func.func @transform_14(%arg0: i32) -> (i32, i32, i32) {
    %c0_i32 = arith.constant 0 : i32
    %c0_i32_0 = arith.constant 0 : i32
    %c0_i32_1 = arith.constant 0 : i32
    %c0_i32_2 = arith.constant 0 : i32
    return %c0_i32, %c0_i32_0, %c0_i32_1 : i32, i32, i32
  }
  func.func @transform_15(%arg0: i32) -> (i32, i32, i32) {
    %c0_i32 = arith.constant 0 : i32
    %c0_i32_0 = arith.constant 0 : i32
    %c0_i32_1 = arith.constant 0 : i32
    %c0_i32_2 = arith.constant 0 : i32
    return %c0_i32, %c0_i32_0, %c0_i32_1 : i32, i32, i32
  }
  func.func @transform_16(%arg0: i32) -> (i32, i32, i32) {
    %c0_i32 = arith.constant 0 : i32
    %c0_i32_0 = arith.constant 0 : i32
    %c0_i32_1 = arith.constant 0 : i32
    %c0_i32_2 = arith.constant 0 : i32
    return %c0_i32, %c0_i32_0, %c0_i32_1 : i32, i32, i32
  }
  func.func @transform_17(%arg0: i32) -> (i32, i32) {
    %c0_i32 = arith.constant 0 : i32
    %c0_i32_0 = arith.constant 0 : i32
    %c0_i32_1 = arith.constant 0 : i32
    return %c0_i32, %c0_i32_0 : i32, i32
  }
  func.func @transform_18(%arg0: i32) -> (i32, i32) {
    %c0_i32 = arith.constant 0 : i32
    %c0_i32_0 = arith.constant 0 : i32
    %c0_i32_1 = arith.constant 0 : i32
    return %c0_i32, %c0_i32_0 : i32, i32
  }
  func.func @transform_19(%arg0: i32) -> (i32, i32) {
    %c0_i32 = arith.constant 0 : i32
    %c0_i32_0 = arith.constant 0 : i32
    %c0_i32_1 = arith.constant 0 : i32
    return %c0_i32, %c0_i32_0 : i32, i32
  }
  func.func @transform_20(%arg0: i32) -> (i32, i32, i32) {
    %c0_i32 = arith.constant 0 : i32
    %c0_i32_0 = arith.constant 0 : i32
    %c0_i32_1 = arith.constant 0 : i32
    %c0_i32_2 = arith.constant 0 : i32
    return %c0_i32, %c0_i32_0, %c0_i32_1 : i32, i32, i32
  }
  func.func @transform_21(%arg0: i32) -> (i32, i32, i32, i32) {
    %c0_i32 = arith.constant 0 : i32
    %c0_i32_0 = arith.constant 0 : i32
    %c0_i32_1 = arith.constant 0 : i32
    %c0_i32_2 = arith.constant 0 : i32
    %c0_i32_3 = arith.constant 0 : i32
    return %c0_i32, %c0_i32_0, %c0_i32_1, %c0_i32_2 : i32, i32, i32, i32
  }
  func.func @transform_22(%arg0: i32) -> (i32, i32, i32) {
    %c0_i32 = arith.constant 0 : i32
    %c0_i32_0 = arith.constant 0 : i32
    %c0_i32_1 = arith.constant 0 : i32
    %c0_i32_2 = arith.constant 0 : i32
    return %c0_i32, %c0_i32_0, %c0_i32_1 : i32, i32, i32
  }
  func.func @transform_23(%arg0: i32) -> (i32, i32, i32) {
    %c0_i32 = arith.constant 0 : i32
    %c0_i32_0 = arith.constant 0 : i32
    %c0_i32_1 = arith.constant 0 : i32
    %c0_i32_2 = arith.constant 0 : i32
    return %c0_i32, %c0_i32_0, %c0_i32_1 : i32, i32, i32
  }
  func.func @transform_24(%arg0: i32) -> (i32, i32, i32) {
    %c0_i32 = arith.constant 0 : i32
    %c0_i32_0 = arith.constant 0 : i32
    %c0_i32_1 = arith.constant 0 : i32
    %c0_i32_2 = arith.constant 0 : i32
    return %c0_i32, %c0_i32_0, %c0_i32_1 : i32, i32, i32
  }
  func.func @transform_25(%arg0: i32) -> (i32, i32, i32, i32) {
    %c0_i32 = arith.constant 0 : i32
    %c0_i32_0 = arith.constant 0 : i32
    %c0_i32_1 = arith.constant 0 : i32
    %c0_i32_2 = arith.constant 0 : i32
    %c0_i32_3 = arith.constant 0 : i32
    return %c0_i32, %c0_i32_0, %c0_i32_1, %c0_i32_2 : i32, i32, i32, i32
  }
  func.func @transform_26(%arg0: i32) -> (i32, i32, i32) {
    %c0_i32 = arith.constant 0 : i32
    %c0_i32_0 = arith.constant 0 : i32
    %c0_i32_1 = arith.constant 0 : i32
    %c0_i32_2 = arith.constant 0 : i32
    return %c0_i32, %c0_i32_0, %c0_i32_1 : i32, i32, i32
  }
  func.func @transform_27(%arg0: i32) -> (i32, i32, i32) {
    %c0_i32 = arith.constant 0 : i32
    %c0_i32_0 = arith.constant 0 : i32
    %c0_i32_1 = arith.constant 0 : i32
    %c0_i32_2 = arith.constant 0 : i32
    return %c0_i32, %c0_i32_0, %c0_i32_1 : i32, i32, i32
  }
  func.func @transform_28(%arg0: i32) -> (i32, i32, i32) {
    %c0_i32 = arith.constant 0 : i32
    %c0_i32_0 = arith.constant 0 : i32
    %c0_i32_1 = arith.constant 0 : i32
    %c0_i32_2 = arith.constant 0 : i32
    return %c0_i32, %c0_i32_0, %c0_i32_1 : i32, i32, i32
  }
  func.func @transform_29(%arg0: i32) -> (i32, i32) {
    %c0_i32 = arith.constant 0 : i32
    %c0_i32_0 = arith.constant 0 : i32
    %c0_i32_1 = arith.constant 0 : i32
    return %c0_i32, %c0_i32_0 : i32, i32
  }
  func.func @transform_30(%arg0: i32) -> (i32, i32) {
    %c0_i32 = arith.constant 0 : i32
    %c0_i32_0 = arith.constant 0 : i32
    %c0_i32_1 = arith.constant 0 : i32
    return %c0_i32, %c0_i32_0 : i32, i32
  }
}

</mosaic_0001>

<bundles_post_ra>
// kernel: text_moe_forward.1
= control target key start
LH: loop header
LB: loop body
LE: loop exit
PB: predicated region body
PF: predicated region fallthrough
CT: control target
= control target key end

     0   :  { %s14063_s6 = smov 1   ;;  %s14064_s10 = smov 2   ;;  %s16614_s0 = inlined_call_operand.smem [shape: u32[31], index: -1, kind: input, shape index: {}] }
   0x1   :  { %s14125_s5 = sld [smem:[%s16614_s0]]   ;;  %s14065_s14 = smov 3  }
   0x2   :  { %s14130_s9 = sld [smem:[%s16614_s0 + %s14063_s6]]   ;;  %s14066_s18 = smov 4  }
   0x3   :  { %s14135_s13 = sld [smem:[%s16614_s0 + %s14064_s10]]   ;;  %s14067_s22 = smov 5  }
   0x4   :  { %s14140_s17 = sld [smem:[%s16614_s0 + %s14065_s14]]   ;;  %s14068_s26 = smov 6  }
   0x5   :  { %s14145_s21 = sld [smem:[%s16614_s0 + %s14066_s18]]   ;;  %s14069_s30 = smov 7  }
   0x6   :  { %s14150_s25 = sld [smem:[%s16614_s0 + %s14067_s22]]   ;;  %s14070_s4 = smov 8  }
   0x7   :  { %s14155_s29 = sld [smem:[%s16614_s0 + %s14068_s26]]   ;;  %s14071_s10 = smov 9  }
   0x8   :  { %s14160_s3 = sld [smem:[%s16614_s0 + %s14069_s30]]   ;;  %s14072_s15 = smov 10  }
   0x9   :  { %s14165_s8 = sld [smem:[%s16614_s0 + %s14070_s4]]   ;;  %s14073_s20 = smov 11  }
   0xa   :  { %s14170_s14 = sld [smem:[%s16614_s0 + %s14071_s10]]   ;;  %s14074_s26 = smov 12  }
   0xb   :  { %s14175_s19 = sld [smem:[%s16614_s0 + %s14072_s15]]   ;;  %s14075_s1 = smov 13  }
   0xc   :  { %s14180_s24 = sld [smem:[%s16614_s0 + %s14073_s20]]   ;;  %s14076_s7 = smov 14  }
   0xd   :  { %s14185_s30 = sld [smem:[%s16614_s0 + %s14074_s26]]   ;;  %s14077_s15 = smov 15  }
   0xe   :  { %s14190_s6 = sld [smem:[%s16614_s0 + %s14075_s1]]   ;;  %s14078_s22 = smov 16  }
   0xf   :  { %s14195_s12 = sld [smem:[%s16614_s0 + %s14076_s7]]   ;;  %s14079_s28 = smov 17  }
  0x10   :  { %s14200_s20 = sld [smem:[%s16614_s0 + %s14077_s15]]   ;;  %s14080_s7 = smov 18  }
  0x11   :  { %s14205_s27 = sld [smem:[%s16614_s0 + %s14078_s22]]   ;;  %s14081_s15 = smov 19  }
  0x12   :  { %s14210_s4 = sld [smem:[%s16614_s0 + %s14079_s28]]   ;;  %s14082_s22 = smov 20  }
  0x13   :  { %16710 = sst [smem:[#allocation18_spill]] %s14185_s30  ;;  %s14083_s28 = smov 21  }
  0x14   :  { %s14220_s30 = sld [smem:[%s16614_s0 + %s14081_s15]]   ;;  %s14085_s15 = smov 23  }
  0x15   :  { %16711 = sst [smem:[#allocation19_spill]] %s14195_s12 }
  0x16   :  { %s14215_s12 = sld [smem:[%s16614_s0 + %s14080_s7]]   ;;  %s14084_s7 = smov 22  }
  0x17   :  { %16712 = sst [smem:[#allocation20_spill]] %s14205_s27 }
  0x18   :  { %16713 = sst [smem:[#allocation21_spill]] %s14210_s4 }
  0x19   :  { %s14225_s27 = sld [smem:[%s16614_s0 + %s14082_s22]]   ;;  %s14086_s22 = smov 24  }
  0x1a   :  { %16715 = sst [smem:[#allocation23_spill]] %s14220_s30 }
  0x1b   :  { %s14230_s4 = sld [smem:[%s16614_s0 + %s14083_s28]]   ;;  %s14087_s28 = smov 25  }
  0x1c   :  { %16714 = sst [smem:[#allocation22_spill]] %s14215_s12 }
  0x1d   :  { %s14235_s12 = sld [smem:[%s16614_s0 + %s14084_s7]]   ;;  %s14088_s7 = smov 26  }
  0x1e   :  { %s14240_s30 = sld [smem:[%s16614_s0 + %s14085_s15]]   ;;  %s14089_s15 = smov 27  }
  0x1f   :  { %16716 = sst [smem:[#allocation24_spill]] %s14225_s27 }
  0x20   :  { %s14245_s27 = sld [smem:[%s16614_s0 + %s14086_s22]]   ;;  %s14090_s22 = smov 28  }
  0x21   :  { %16717 = sst [smem:[#allocation25_spill]] %s14230_s4 }
  0x22   :  { %s14250_s4 = sld [smem:[%s16614_s0 + %s14087_s28]]   ;;  %s14091_s28 = smov 29  }
  0x23   :  { %16718 = sst [smem:[#allocation26_spill]] %s14235_s12 }
  0x24   :  { %16719 = sst [smem:[#allocation27_spill]] %s14240_s30 }
  0x25   :  { %s14255_s12 = sld [smem:[%s16614_s0 + %s14088_s7]]   ;;  %s14092_s7 = smov 30  }
  0x26   :  { %16720 = sst [smem:[#allocation28_spill]] %s14245_s27 }
  0x27   :  { %s14260_s30 = sld [smem:[%s16614_s0 + %s14089_s15]]  }
  0x28   :  { %16721 = sst [smem:[#allocation29_spill]] %s14250_s4 }
  0x29   :  { %s14265_s27 = sld [smem:[%s16614_s0 + %s14090_s22]]  }
  0x2a   :  { %s14270_s4 = sld [smem:[%s16614_s0 + %s14091_s28]]  }
  0x2b   :  { %16722 = sst [smem:[#allocation30_spill]] %s14255_s12 }
  0x2c   :  { %s14275_s12 = sld [smem:[%s16614_s0 + %s14092_s7]]  }
  0x2d   :  { %67 = vsyncpa [#allocation3], 0 }
  0x2e   :  { %68 = vsyncpa [#allocation6], 0 }
  0x2f   :  { %69 = vsyncpa [#allocation4], 0 }
  0x30   :  { %70 = vsyncpa [#allocation9], 0 }
  0x31   :  { %71 = vsyncpa [#allocation12], 0  ;;  %s14093_s15 = smov [#allocation2]  }
  0x32   :  { %s103_s16 = sshll.u32 %s14093_s15, 4  ;;  %s104_s16 = int_to_ptr.vmem [resolvable:$true] %s103_s16 }
  0x33   :  { %s13941_s18 = scalar_lea.vmem %s104_s16, 32768  ;;  %p13946_p1 = scmp.lt.s32.totalorder %s104_s16, %s104_s16 }
  0x34   :  { %p13942_p0 = scmp.ne.s32.totalorder %s104_s16, %s13941_s18  ;;  %p13947_p2 = scmp.lt.s32.totalorder %s13941_s18, %s13941_s18 }
  0x36   :  { %p13948_p3 = por %p13947_p2, %p13946_p1 }
  0x38   :  { %p13949_p4 = pnand %p13948_p3, %p13942_p0 }
  0x3a   :  { %13952 = shalt.err (!%p13949_p4)
}
  0x3b   :  { %s14094_s22 = smov 1024   ;;  %s14095_s23 = smov 64  }
  0x3c   :  { %109 = dma.hbm_to_vmem [thread:$0]  %s14190_s6, 32768, %s104_s16, [#allocation3], %s14094_s22, %s14094_s22, %s14095_s23  }
  0x3d   :  { %s14096_s0 = smov [#allocation5]  }
  0x3e   :  { %s117_s26 = sshll.u32 %s14096_s0, 4  ;;  %s118_s26 = int_to_ptr.vmem [resolvable:$true] %s117_s26 }
  0x3f   :  { %s13961_s28 = scalar_lea.vmem %s118_s26, 32768  ;;  %p13966_p6 = scmp.lt.s32.totalorder %s118_s26, %s118_s26 }
  0x40   :  { %p13962_p5 = scmp.ne.s32.totalorder %s118_s26, %s13961_s28  ;;  %p13967_p7 = scmp.lt.s32.totalorder %s13961_s28, %s13961_s28 }
  0x42   :  { %p13968_p8 = por %p13967_p7, %p13966_p6 }
  0x44   :  { %p13969_p9 = pnand %p13968_p8, %p13962_p5 }
  0x46   :  { %13972 = shalt.err (!%p13969_p9)
}
  0x47   :  { %s14097_s1 = smov 4  }
  0x48   :  { %123 = dma.hbm_to_vmem [thread:$0]  %s14200_s20, 32768, %s118_s26, [#allocation6], %s14095_s23, %s14095_s23, %s14097_s1  }
  0x49   :  { %14053 = dma.done.wait [#allocation3], 32768  }
  0x4a   :  { %14054 = vsyncadd [#allocation3], 4294934528 }
  0x4b   :  { %14055 = dma.done.wait [#allocation6], 32768  }
  0x4c   :  { %14056 = vsyncadd [#allocation6], 4294934528  ;;  %v139_v0 = vld [vmem:[%s14125_s5] sm:$0xff]  ;;  %v141_v2 = vld [vmem:[%s14125_s5 + $0x10] sm:$0xff]  ;;  %v16624_v46 = vmov 0   ;;  %v196_v60 = vlaneseq  ;;  %vm16656_vm1 = vcmask 130048  }
  0x4d   :  { %v143_v1 = vld [vmem:[%s14130_s9] sm:$0xff]  ;;  %v140_v5 = vld [vmem:[%s14125_s5 + $0x8] sm:$0xff]  ;;  %v142_v7 = vld [vmem:[%s14125_s5 + $0x18] sm:$0xff]  ;;  %423 = vmatprep.mubr.bf16.mxu0 %v16624_v46  ;;  %13366 = vset.pattern.permute.xlu1 %v16624_v46  ;;  %s14099_s5 = smov 8   ;;  %s14105_s6 = smov 32   ;;  %vm16655_vm2 = vcmask 261120  }
  0x4e   :  { %v14285_v3 = vadd.f32 %v143_v1, %v139_v0  ;;  %v14287_v4 = vadd.f32 %v143_v1, %v141_v2  ;;  %v144_v6 = vld [vmem:[%s14130_s9 + $0x8] sm:$0xff]  ;;  %v13420_v28 = vld [vmem:[%s14145_s21 + $0x94] ss:$12 sps:$4 sm:$0xff]   ;;  %v13422_v29 = vld [vmem:[%s14145_s21 + $0xb0] ss:$12 sps:$4 sm:$0xff]   ;;  %13365 = vset.pattern.permute.xlu0 %v16624_v46  ;;  %v14348_v0 = vshrl.u32 %v196_v60, 7 }
  0x4f   :  { %v14294_v8 = vadd.f32 %v144_v6, %v140_v5  ;;  %v14296_v9 = vadd.f32 %v144_v6, %v142_v7  ;;  %v13417_v10 = vld [vmem:[%s14145_s21 + $0xac] ss:$12 sps:$4 sm:$0xff]   ;;  %v13419_v11 = vld [vmem:[%s14145_s21 + $0xa8] ss:$12 sps:$4 sm:$0xff]   ;;  %v13423_v30 = vld [vmem:[%s14145_s21 + $0x90] ss:$12 sps:$4 sm:$0xff]   ;;  %12855 = vmatprep.subr.bf16.mxu1 %v13422_v29 }
  0x50   :  { %151 = vadd.xlane.f32.xlu0 %v14285_v3  ;;  %155 = vadd.xlane.f32.xlu1 %v14287_v4  ;;  %v13424_v31 = vld [vmem:[%s14145_s21 + $0x7c] ss:$12 sps:$4 sm:$0xff]   ;;  %v13426_v32 = vld [vmem:[%s14145_s21 + $0x98] ss:$12 sps:$4 sm:$0xff]   ;;  %v13430_v35 = vld [vmem:[%s14145_s21 + $0x80] ss:$12 sps:$4 sm:$0xff]  }
  0x51   :  { %391 = vmatprep.subr.bf16.mxu0 %v13417_v10  ;;  %12856 = vmatpush3.bf16.msra.mxu1 %v13422_v29  ;;  %v13427_v33 = vld [vmem:[%s14145_s21 + $0x78] ss:$12 sps:$4 sm:$0xff]   ;;  %v13431_v36 = vld [vmem:[%s14145_s21 + $0x60] ss:$12 sps:$4 sm:$0xff]   ;;  %v13434_v38 = vld [vmem:[%s14145_s21 + $0x68] ss:$12 sps:$4 sm:$0xff]  }
  0x52   :  { %392 = vmatpush1.bf16.msra.mxu0 %v13419_v11  ;;  %12857 = vmatprep.subr.bf16.mxu1 %v13426_v32  ;;  %v13428_v34 = vld [vmem:[%s14145_s21 + $0x64] ss:$12 sps:$4 sm:$0xff]   ;;  %v13432_v37 = vld [vmem:[%s14145_s21 + $0x4c] ss:$12 sps:$4 sm:$0xff]   ;;  %v13435_v39 = vld [vmem:[%s14145_s21 + $0x48] ss:$12 sps:$4 sm:$0xff]  }
  0x53   :  { %393 = vmatprep.subr.bf16.mxu0 %v13420_v28  ;;  %v13436_v40 = vld [vmem:[%s14145_s21 + $0x34] ss:$12 sps:$4 sm:$0xff]   ;;  %v13438_v41 = vld [vmem:[%s14145_s21 + $0x50] ss:$12 sps:$4 sm:$0xff]   ;;  %v13442_v44 = vld [vmem:[%s14145_s21 + $0x38] ss:$12 sps:$4 sm:$0xff]  }
  0x54   :  { %153 = vadd.xlane.f32.xlu0 %v14294_v8  ;;  %157 = vadd.xlane.f32.xlu1 %v14296_v9  ;;  %v13439_v42 = vld [vmem:[%s14145_s21 + $0x30] ss:$12 sps:$4 sm:$0xff]   ;;  %v13443_v45 = vld [vmem:[%s14145_s21 + $0x18] ss:$12 sps:$4 sm:$0xff]   ;;  %v13446_v48 = vld [vmem:[%s14145_s21 + $0x20] ss:$12 sps:$4 sm:$0xff]  }
  0x55   :  { %12858 = vmatpush3.bf16.msra.mxu1 %v13426_v32  ;;  %v13440_v43 = vld [vmem:[%s14145_s21 + $0x1c] ss:$12 sps:$4 sm:$0xff]   ;;  %v13444_v47 = vld [vmem:[%s14145_s21 + $0x4] ss:$12 sps:$4 sm:$0xff]   ;;  %v13447_v49 = vld [vmem:[%s14145_s21] ss:$12 sps:$4 sm:$0xff]  }
  0x56   :  { %394 = vmatpush1.bf16.msra.mxu0 %v13423_v30  ;;  %12859 = vmatprep.subr.bf16.mxu1 %v13430_v35  ;;  %v13448_v50 = vld [vmem:[%s14145_s21 + $0x8] ss:$12 sps:$4 sm:$0xff]   ;;  %v14351_v1 = vsub.s32 0, %v14348_v0  ;;  %v149_v2 = vld [vmem:[%s14135_s13] sm:$0x7]  ;;  %s14100_s9 = smov 120  }
  0x57   :  { %395 = vmatprep.subr.bf16.mxu0 %v13424_v31  ;;  %v150_v10 = vld [vmem:[%s14140_s17] sm:$0x7]  ;;  %v14365_v31 = vsub.s32 1, %v14348_v0  ;;  %s14101_s21 = smov 112   ;;  %s14106_s20 = smov 16   ;;  %vm16654_vm3 = vcmask 392192  }
  0x58   :  { %v199_v7 = vrot.slane %v149_v2, %v14351_v1  ;;  %vm16653_vm4 = vcmask 523264   ;;  %vm16652_vm5 = vcmask 654336   ;;  %vm16651_vm6 = vcmask 785408   ;;  %s16801_s2 = sld [smem:[#allocation20_spill]]  ;;  %s14112_s15 = smov [#allocation8]  }
  0x59   :  { %12860 = vmatpush3.bf16.msra.mxu1 %v13430_v35  ;;  %vm16650_vm7 = vcmask 916480   ;;  %s16930_s7 = sld [smem:[#allocation24_spill]]  ;;  %s11371_s16 = sshll.u32 %s14112_s15, 4  ;;  %s11372_s16 = int_to_ptr.vmem [resolvable:$true] %s11371_s16 }
  0x5a   :  { %396 = vmatpush1.bf16.msra.mxu0 %v13427_v33  ;;  %12861 = vmatprep.subr.bf16.mxu1 %v13434_v38  ;;  %s16973_s10 = sld [smem:[#allocation28_spill]]  ;;  %p13978_p11 = scmp.lt.s32.totalorder %s11372_s16, %s11372_s16 }
  0x5b   :  { %397 = vmatprep.subr.bf16.mxu0 %v13428_v34  ;;  %s16980_s11 = sld [smem:[#allocation26_spill]] }
  0x5d   :  { %12862 = vmatpush3.bf16.msra.mxu1 %v13434_v38 }
  0x5e   :  { %398 = vmatpush1.bf16.msra.mxu0 %v13431_v36  ;;  %12863 = vmatprep.subr.bf16.mxu1 %v13438_v41 }
  0x5f   :  { %399 = vmatprep.subr.bf16.mxu0 %v13432_v37 }
  0x61   :  { %12864 = vmatpush3.bf16.msra.mxu1 %v13438_v41 }
  0x62   :  { %400 = vmatpush1.bf16.msra.mxu0 %v13435_v39  ;;  %12865 = vmatprep.subr.bf16.mxu1 %v13442_v44 }
  0x63   :  { %401 = vmatprep.subr.bf16.mxu0 %v13436_v40 }
  0x65   :  { %12866 = vmatpush3.bf16.msra.mxu1 %v13442_v44 }
  0x66   :  { %402 = vmatpush1.bf16.msra.mxu0 %v13439_v42  ;;  %12867 = vmatprep.subr.bf16.mxu1 %v13446_v48 }
  0x67   :  { %403 = vmatprep.subr.bf16.mxu0 %v13440_v43 }
  0x69   :  { %12868 = vmatpush3.bf16.msra.mxu1 %v13446_v48 }
  0x6a   :  { %404 = vmatpush1.bf16.msra.mxu0 %v13443_v45  ;;  %12869 = vmatprep.subr.bf16.mxu1 %v13448_v50 }
  0x6b   :  { %405 = vmatprep.subr.bf16.mxu0 %v13444_v47 }
  0x6d   :  { %12870 = vmatpush3.bf16.msra.mxu1 %v13448_v50 }
  0x6e   :  { %406 = vmatpush1.bf16.msra.mxu0 %v13447_v49 }
  0xd9   :  { %v152_v12 = vpop.xlane.xlu0 %151  ;;  %v156_v13 = vpop.xlane.xlu1 %155 }
  0xda   :  { %v160_v14 = vmul.f32 0.0078125, %v152_v12  ;;  %v162_v15 = vmul.f32 0.0078125, %v156_v13 }
  0xdc   :  { %v14303_v16 = vsub.f32 %v14285_v3, %v160_v14  ;;  %v14306_v17 = vsub.f32 %v14287_v4, %v162_v15  ;;  %v207_v15 = vrot.slane %v150_v10, %v14351_v1 }
  0xdd   :  { %v154_v18 = vpop.xlane.xlu0 %153  ;;  %v158_v19 = vpop.xlane.xlu1 %157 }
  0xde   :  { %v161_v20 = vmul.f32 0.0078125, %v154_v18  ;;  %v168_v21 = vmul.f32 %v14303_v16, %v14303_v16  ;;  %v163_v22 = vmul.f32 0.0078125, %v158_v19  ;;  %v170_v23 = vmul.f32 %v14306_v17, %v14306_v17 }
  0xe0   :  { %172 = vadd.xlane.f32.xlu0 %v168_v21  ;;  %v14313_v24 = vsub.f32 %v14294_v8, %v161_v20  ;;  %v14316_v25 = vsub.f32 %v14296_v9, %v163_v22 }
  0xe2   :  { %v169_v26 = vmul.f32 %v14313_v24, %v14313_v24  ;;  %v171_v27 = vmul.f32 %v14316_v25, %v14316_v25 }
  0xe4   :  { %176 = vadd.xlane.f32.xlu0 %v170_v23  ;;  %174 = vadd.xlane.f32.xlu1 %v169_v26 }
  0xe8   :  { %178 = vadd.xlane.f32.xlu1 %v171_v27 }
 0x169   :  { %v173_v51 = vpop.xlane.xlu0 %172 }
 0x16a   :  { %v180_v52 = vmul.f32 0.0078125, %v173_v51 }
 0x16c   :  { %v184_v53 = vadd.f32 1e-05, %v180_v52 }
 0x16d   :  { %v175_v54 = vpop.xlane.xlu1 %174  ;;  %v177_v55 = vpop.xlane.xlu0 %176 }
 0x16e   :  { %13713 = vrsqrt.f32 %v184_v53  ;;  %v181_v56 = vmul.f32 0.0078125, %v175_v54  ;;  %v182_v57 = vmul.f32 0.0078125, %v177_v55  ;;  %v14406_v53 = vand.u32 127, %v196_v60 }
 0x170   :  { %v185_v58 = vadd.f32 1e-05, %v181_v56  ;;  %v186_v59 = vadd.f32 1e-05, %v182_v57  ;;  %16723 = vst [vmem:[#allocation31_spill] sm:$0xff] %v14406_v53  ;;  %v499_v54 = vand.u32 15, %v14406_v53 }
 0x171   :  { %v179_v61 = vpop.xlane.xlu1 %178  ;;  %vm16657_vm9 = vcmp.gt.s32.totalorder %v14406_v53, 0  ;;  %vm16660_vm14 = vcmp.gt.s32.totalorder %v14406_v53, 1 }
 0x172   :  { %13715 = vrsqrt.f32 %v185_v58  ;;  %v183_v62 = vmul.f32 0.0078125, %v179_v61  ;;  %vm14409_vm0 = vcmp.lt.s32.totalorder %v499_v54, 8  ;;  %v493_v58 = vld [vmem:[%s14165_s8] sm:$0xff] }
 0x173   :  { %13717 = vrsqrt.f32 %v186_v59  ;;  %v495_v61 = vld [vmem:[%s14170_s14] sm:$0xff] }
 0x174   :  { %v187_v63 = vadd.f32 1e-05, %v183_v62 }
 0x176   :  { %13719 = vrsqrt.f32 %v187_v63 }
 0x17b   :  { %v13714_v5 = vpop.eup %13713 }
 0x17c   :  { %v192_v6 = vmul.f32 %v13714_v5, %v14303_v16 }
 0x17e   :  { %v200_v14 = vmul.f32 %v199_v7, %v192_v6 }
 0x17f   :  { %v13716_v11 = vpop.eup %13715 }
 0x180   :  { %v13718_v12 = vpop.eup %13717  ;;  %v193_v13 = vmul.f32 %v13716_v11, %v14313_v24  ;;  %v208_v21 = vadd.f32 %v207_v15, %v200_v14 }
 0x181   :  { %v194_v18 = vmul.f32 %v13718_v12, %v14306_v17  ;;  %v246_v17 = vld [vmem:[%s14150_s25] sm:$0x7]  ;;  %s14102_s25 = smov 96  }
 0x182   :  { %v201_v19 = vmul.f32 %v199_v7, %v193_v13  ;;  %v251_v30 = vrot.slane %v246_v17, %v14351_v1  ;;  %v255_v34 = vrot.slane %v246_v17, %v14365_v31 }
 0x183   :  { %v13720_v20 = vpop.eup %13719  ;;  %v202_v16 = vmul.f32 %v199_v7, %v194_v18 }
 0x184   :  { %v209_v22 = vadd.f32 %v207_v15, %v201_v19  ;;  %v195_v23 = vmul.f32 %v13720_v20, %v14316_v25  ;;  %v14368_v25 = vsub.s32 2, %v14348_v0  ;;  %v494_v20 = vld [vmem:[%s14165_s8 + $0x8] sm:$0xff]  ;;  %s14103_s8 = smov 80  }
 0x185   :  { %v210_v28 = vadd.f32 %v207_v15, %v202_v16 }
 0x186   :  { %v212_v26 = vpack.c.bf16 %v209_v22, %v208_v21  ;;  %v203_v27 = vmul.f32 %v199_v7, %v195_v23  ;;  %v14372_v35 = vrot.slane %v246_v17, %v14368_v25 }
 0x188   :  { %424 = vmatmul.mubr.bf16.vlgmr.msra.gmra.mxu0 %v212_v26  ;;  %12871 = vmatprep.mubr.bf16.mxu1 %v212_v26  ;;  %v211_v29 = vadd.f32 %v207_v15, %v203_v27  ;;  %v496_v15 = vld [vmem:[%s14170_s14 + $0x8] sm:$0xff]  ;;  %s14104_s14 = smov 48  }
 0x189   :  { %433 = vmatprep.mubr.bf16.mxu0 %v16624_v46 }
 0x18a   :  { %v213_v24 = vpack.c.bf16 %v211_v29, %v210_v28 }
 0x18c   :  { %12872 = vmatmul.mubr.bf16.vlgmr.msra.gmra.mxu1 %v213_v24 }
 0x190   :  { %434 = vmatmul.mubr.bf16.gmra.mxu0 %v213_v24 }
 0x248   :  { %v425_v32 = vpop.f32.mrf.mxu0 }
 0x249   :  { %v426_v33 = vadd.f32 %v425_v32, %v251_v30 }
 0x24a   :  { %v427_v36 = vpop.f32.mrf.mxu0 }
 0x24b   :  { %501 = vrot.lane.b32.xlu1 %v426_v33, %s14099_s5  ;;  %509 = vrot.lane.b32.xlu0 %v426_v33, %s14100_s9  ;;  %v428_v39 = vadd.f32 %v427_v36, %v255_v34  ;;  %v527_v63 = vmul.f32 %v493_v58, %v426_v33 }
 0x24c   :  { %v429_v37 = vpop.f32.mrf.mxu0  ;;  %v12873_v38 = vpop.f32.mrf.mxu1 }
 0x24d   :  { %v14376_v40 = vadd.f32 %v12873_v38, %v14372_v35  ;;  %v14379_v43 = vadd.f32 %v429_v37, %v251_v30  ;;  %v563_v28 = vmul.f32 %v493_v58, %v428_v39 }
 0x24e   :  { %v431_v41 = vpop.f32.mrf.mxu0  ;;  %v478_v12 = vpop.f32.mrf.mxu1 }
 0x24f   :  { %547 = vrot.lane.b32.xlu1 %v428_v39, %s14100_s9  ;;  %539 = vrot.lane.b32.xlu0 %v428_v39, %s14099_s5  ;;  %v432_v44 = vadd.f32 %v431_v41, %v255_v34  ;;  %v528_v39 = vmul.f32 %v494_v20, %v14379_v43 }
 0x250   :  { %v435_v42 = vpop.f32.mrf.mxu0  ;;  %v12874_v26 = vpop.f32.mrf.mxu1 }
 0x251   :  { %v14390_v50 = vadd.f32 %v435_v42, %v251_v30  ;;  %v564_v22 = vmul.f32 %v494_v20, %v432_v44 }
 0x252   :  { %v437_v45 = vpop.f32.mrf.mxu0  ;;  %v481_v33 = vpop.f32.mrf.mxu1 }
 0x253   :  { %511 = vrot.lane.b32.xlu1 %v14379_v43, %s14100_s9  ;;  %549 = vrot.lane.b32.xlu0 %v432_v44, %s14100_s9  ;;  %v14385_v48 = vadd.f32 %v437_v45, %v255_v34  ;;  %v14441_v41 = vadd.f32 %v481_v33, %v14372_v35 }
 0x254   :  { %v439_v47 = vpop.f32.mrf.mxu0 }
 0x255   :  { %v14400_v52 = vadd.f32 %v439_v47, %v251_v30 }
 0x256   :  { %v441_v49 = vpop.f32.mrf.mxu0 }
 0x257   :  { %541 = vrot.lane.b32.xlu1 %v432_v44, %s14099_s5  ;;  %503 = vrot.lane.b32.xlu0 %v14379_v43, %s14099_s5  ;;  %v14392_v51 = vadd.f32 %v441_v49, %v255_v34  ;;  %v529_v43 = vmul.f32 %v493_v58, %v14390_v50 }
 0x25b   :  { %543 = vrot.lane.b32.xlu1 %v14385_v48, %s14099_s5  ;;  %551 = vrot.lane.b32.xlu0 %v14385_v48, %s14100_s9 }
 0x25f   :  { %553 = vrot.lane.b32.xlu1 %v14392_v51, %s14100_s9  ;;  %513 = vrot.lane.b32.xlu0 %v14390_v50, %s14100_s9 }
 0x263   :  { %545 = vrot.lane.b32.xlu1 %v14392_v51, %s14099_s5  ;;  %505 = vrot.lane.b32.xlu0 %v14390_v50, %s14099_s5 }
 0x267   :  { %515 = vrot.lane.b32.xlu1 %v14400_v52, %s14100_s9 }
 0x26b   :  { %507 = vrot.lane.b32.xlu1 %v14400_v52, %s14099_s5 }
 0x2bd   :  { %v502_v55 = vpop.permute.xlu1 %501  ;;  %v510_v57 = vpop.permute.xlu0 %509 }
 0x2be   :  { %v517_v59 = vsub.f32 0.0, %v510_v57 }
 0x2c0   :  { %v523_v62 = vsel %vm14409_vm0, %v517_v59, %v502_v55  ;;  %v14451_v55 = vadd.f32 %v478_v12, %v14372_v35 }
 0x2c1   :  { %v548_v2 = vpop.permute.xlu1 %547  ;;  %v531_v60 = vmul.f32 %v523_v62, %v495_v61  ;;  %v540_v5 = vpop.permute.xlu0 %539  ;;  %v566_v62 = vmul.f32 %v494_v20, %v14392_v51 }
 0x2c2   :  { %v555_v7 = vsub.f32 0.0, %v548_v2 }
 0x2c3   :  { %v14417_v6 = vadd.f32 %v531_v60, %v527_v63 }
 0x2c4   :  { %v559_v13 = vsel %vm14409_vm0, %v555_v7, %v540_v5  ;;  %v565_v5 = vmul.f32 %v493_v58, %v14385_v48 }
 0x2c5   :  { %v512_v10 = vpop.permute.xlu1 %511  ;;  %12879 = vmatprep.mubr.msk.f32.mxu1 %vm16656_vm1, %v14417_v6  ;;  %v550_v11 = vpop.permute.xlu0 %549  ;;  %v567_v23 = vmul.f32 %v559_v13, %v495_v61 }
 0x2c6   :  { %v556_v14 = vsub.f32 0.0, %v550_v11  ;;  %v518_v27 = vsub.f32 0.0, %v512_v10  ;;  %v14469_v11 = vadd.f32 %v12874_v26, %v14372_v35 }
 0x2c7   :  { %v14431_v32 = vadd.f32 %v567_v23, %v563_v28 }
 0x2c9   :  { %v542_v18 = vpop.permute.xlu1 %541  ;;  %v504_v19 = vpop.permute.xlu0 %503 }
 0x2ca   :  { %v560_v21 = vsel %vm14409_vm0, %v556_v14, %v542_v18  ;;  %v524_v30 = vsel %vm14409_vm0, %v518_v27, %v504_v19  ;;  %v576_v18 = vld [vmem:[%s14175_s19 + $0x8] sm:$0xff] }
 0x2cb   :  { %v568_v16 = vmul.f32 %v560_v21, %v496_v15  ;;  %v532_v36 = vmul.f32 %v524_v30, %v496_v15 }
 0x2cd   :  { %v14427_v29 = vadd.f32 %v568_v16, %v564_v22  ;;  %v544_v24 = vpop.permute.xlu1 %543  ;;  %v552_v17 = vpop.permute.xlu0 %551  ;;  %v14447_v47 = vadd.f32 %v532_v36, %v528_v39  ;;  %v575_v22 = vld [vmem:[%s14175_s19] sm:$0xff] }
 0x2ce   :  { %v557_v34 = vsub.f32 0.0, %v552_v17 }
 0x2cf   :  { %12875 = vmatprep.subr.msk.mxu1 %vm16656_vm1, %v14427_v29 }
 0x2d0   :  { %12876 = vmatpush3.xpose.msk.msra.mxu1 %vm16656_vm1, %v14427_v29  ;;  %v561_v42 = vsel %vm14409_vm0, %v557_v34, %v544_v24 }
 0x2d1   :  { %v554_v37 = vpop.permute.xlu1 %553  ;;  %12877 = vmatprep.subr.msk.mxu1 %vm16656_vm1, %v14431_v32  ;;  %v514_v38 = vpop.permute.xlu0 %513  ;;  %v569_v63 = vmul.f32 %v561_v42, %v495_v61 }
 0x2d2   :  { %v558_v44 = vsub.f32 0.0, %v554_v37  ;;  %v519_v45 = vsub.f32 0.0, %v514_v38 }
 0x2d3   :  { %v14472_v51 = vadd.f32 %v569_v63, %v565_v5 }
 0x2d4   :  { %12878 = vmatpush3.xpose.msk.msra.mxu1 %vm16656_vm1, %v14431_v32 }
 0x2d5   :  { %v546_v49 = vpop.permute.xlu1 %545  ;;  %12889 = vmatprep.subr.mxu1 %v14441_v41  ;;  %v506_v54 = vpop.permute.xlu0 %505 }
 0x2d6   :  { %v562_v57 = vsel %vm14409_vm0, %v558_v44, %v546_v49  ;;  %v525_v59 = vsel %vm14409_vm0, %v519_v45, %v506_v54 }
 0x2d7   :  { %v570_v2 = vmul.f32 %v562_v57, %v496_v15  ;;  %v533_v60 = vmul.f32 %v525_v59, %v495_v61  ;;  %12880 = vmatmul.mubr.msk.f32.vlgmr.msra.gmra.mxu1 %vm16656_vm1, %v14447_v47  ;;  %v530_v61 = vmul.f32 %v494_v20, %v14400_v52 }
 0x2d8   :  { %12890 = vmatpush3.msra.mxu1 %v14441_v41 }
 0x2d9   :  { %v14463_v7 = vadd.f32 %v570_v2, %v566_v62  ;;  %v14465_v50 = vadd.f32 %v533_v60, %v529_v43  ;;  %v516_v10 = vpop.permute.xlu1 %515  ;;  %12891 = vmatprep.subr.mxu1 %v14451_v55 }
 0x2da   :  { %12892 = vmatpush3.msra.mxu1 %v14451_v55  ;;  %v520_v48 = vsub.f32 0.0, %v516_v10 }
 0x2db   :  { %12882 = vmatprep.subr.msk.mxu0 %vm16656_vm1, %v14463_v7  ;;  %12886 = vmatprep.mubr.msk.f32.mxu0 %vm16656_vm1, %v14465_v50 }
 0x2dc   :  { %12896 = vmatprep.subr.mxu1 %v14469_v11  ;;  %12883 = vmatpush3.xpose.msk.msra.mxu0 %vm16656_vm1, %v14463_v7 }
 0x2dd   :  { %v508_v35 = vpop.permute.xlu1 %507  ;;  %12884 = vmatprep.subr.msk.mxu0 %vm16656_vm1, %v14472_v51 }
 0x2de   :  { %v526_v58 = vsel %vm14409_vm0, %v520_v48, %v508_v35 }
 0x2df   :  { %v534_v12 = vmul.f32 %v526_v58, %v496_v15 }
 0x2e0   :  { %12885 = vmatpush3.xpose.msk.msra.mxu0 %vm16656_vm1, %v14472_v51 }
 0x2e1   :  { %v14488_v13 = vadd.f32 %v534_v12, %v530_v61 }
 0x2e3   :  { %12887 = vmatmul.mubr.msk.f32.vlgmr.msra.gmra.mxu0 %vm16656_vm1, %v14488_v13 }
 0x397   :  { %v12881_v14 = vpop.f32.mrf.mxu1 }
 0x398   :  { %v767_v19 = vmul.f32 0.25, %v12881_v14 }
 0x399   :  { %v670_v21 = vpop.f32.mrf.mxu1 }
 0x39a   :  { %v766_v23 = vmul.f32 0.25, %v670_v21  ;;  %v771_v16 = vadd.f32 %v767_v19, %v576_v18 }
 0x39c   :  { %v777_v56 = vsel %vm16656_vm1, %v771_v16, -inf  ;;  %v770_v26 = vadd.f32 %v766_v23, %v575_v22 }
 0x39d   :  { %778 = vmax.xlane.f32.xlu1 %v777_v56 }
 0x39e   :  { %v774_v52 = vsel %vm16656_vm1, %v770_v26, -inf }
 0x39f   :  { %775 = vmax.xlane.f32.xlu0 %v774_v52 }
 0x3a3   :  { %v12888_v15 = vpop.f32.mrf.mxu0 }
 0x3a4   :  { %v769_v27 = vmul.f32 0.25, %v12888_v15 }
 0x3a5   :  { %v757_v20 = vpop.f32.mrf.mxu0 }
 0x3a6   :  { %v768_v28 = vmul.f32 0.25, %v757_v20  ;;  %v773_v30 = vadd.f32 %v769_v27, %v576_v18 }
 0x3a8   :  { %v772_v24 = vadd.f32 %v768_v28, %v575_v22  ;;  %v783_v33 = vsel %vm16656_vm1, %v773_v30, -inf }
 0x3aa   :  { %v780_v17 = vsel %vm16656_vm1, %v772_v24, -inf }
 0x3ab   :  { %781 = vmax.xlane.f32.xlu0 %v780_v17 }
 0x3ae   :  { %1077 = vrot.lane.b32.xlu1 %v14463_v7, %s14101_s21 }
 0x3af   :  { %784 = vmax.xlane.f32.xlu0 %v783_v33  ;;  %v578_v33 = vld [vmem:[%s14175_s19 + $0x18] sm:$0xff] }
 0x3b2   :  { %984 = vrot.lane.b32.xlu1 %v14431_v32, %s14101_s21 }
 0x3b6   :  { %1075 = vrot.lane.b32.xlu1 %v14472_v51, %s14101_s21 }
 0x3c5   :  { %986 = vrot.lane.b32.xlu0 %v14427_v29, %s14101_s21 }
 0x426   :  { %v779_v34 = vpop.xlane.xlu1 %778 }
 0x427   :  { %v787_v36 = vsub.f32 %v771_v16, %v779_v34 }
 0x428   :  { %v776_v37 = vpop.xlane.xlu0 %775 }
 0x429   :  { %v792_v38 = vmul.f32 1.442695, %v787_v36  ;;  %v786_v39 = vsub.f32 %v770_v26, %v776_v37  ;;  %v577_v37 = vld [vmem:[%s14175_s19 + $0x10] sm:$0xff] }
 0x42a   :  { %v1078_v43 = vpop.permute.xlu1 %1077 }
 0x42b   :  { %13721 = vpow2.f32 %v792_v38  ;;  %v790_v42 = vmul.f32 1.442695, %v786_v39 }
 0x42d   :  { %13723 = vpow2.f32 %v790_v42 }
 0x42e   :  { %v985_v10 = vpop.permute.xlu1 %984 }
 0x432   :  { %v1076_v12 = vpop.permute.xlu1 %1075 }
 0x434   :  { %v782_v44 = vpop.xlane.xlu0 %781 }
 0x435   :  { %v788_v45 = vsub.f32 %v772_v24, %v782_v44 }
 0x437   :  { %v794_v49 = vmul.f32 1.442695, %v788_v45 }
 0x438   :  { %v13722_v54 = vpop.eup %13721  ;;  %v785_v57 = vpop.xlane.xlu0 %784 }
 0x439   :  { %13725 = vpow2.f32 %v794_v49  ;;  %v789_v59 = vsub.f32 %v773_v30, %v785_v57  ;;  %v801_v62 = vsel %vm16656_vm1, %v13722_v54, 0.0 }
 0x43a   :  { %v13724_v63 = vpop.eup %13723  ;;  %802 = vadd.xlane.f32.xlu1 %v801_v62 }
 0x43b   :  { %v796_v2 = vmul.f32 1.442695, %v789_v59  ;;  %v798_v60 = vsel %vm16656_vm1, %v13724_v63, 0.0 }
 0x43c   :  { %799 = vadd.xlane.f32.xlu0 %v798_v60  ;;  %v987_v5 = vpop.permute.xlu0 %986 }
 0x43d   :  { %13727 = vpow2.f32 %v796_v2  ;;  %12903 = vmatprep.subr.msk.mxu0 %vm16656_vm1, %v987_v5 }
 0x43e   :  { %12904 = vmatpush3.xpose.msk.msra.mxu0 %vm16656_vm1, %v987_v5 }
 0x43f   :  { %12905 = vmatprep.subr.msk.mxu0 %vm16656_vm1, %v985_v10 }
 0x442   :  { %12906 = vmatpush3.xpose.msk.msra.mxu0 %vm16656_vm1, %v985_v10 }
 0x446   :  { %v13726_v48 = vpop.eup %13725 }
 0x447   :  { %v804_v35 = vsel %vm16656_vm1, %v13726_v48, 0.0 }
 0x448   :  { %805 = vadd.xlane.f32.xlu0 %v804_v35 }
 0x44a   :  { %v13728_v58 = vpop.eup %13727 }
 0x44b   :  { %v807_v61 = vsel %vm16656_vm1, %v13728_v58, 0.0 }
 0x44c   :  { %808 = vadd.xlane.f32.xlu1 %v807_v61 }
 0x45d   :  { %982 = vrot.lane.b32.xlu1 %v14447_v47, %s14101_s21 }
 0x45e   :  { %980 = vrot.lane.b32.xlu0 %v14417_v6, %s14101_s21 }
 0x461   :  { %1073 = vrot.lane.b32.xlu1 %v14488_v13, %s14101_s21 }
 0x462   :  { %1071 = vrot.lane.b32.xlu0 %v14465_v50, %s14101_s21 }
 0x4c3   :  { %v803_v14 = vpop.xlane.xlu1 %802 }
 0x4c4   :  { %13729 = vrcp.f32 %v803_v14 }
 0x4c5   :  { %v800_v18 = vpop.xlane.xlu0 %799 }
 0x4c6   :  { %13731 = vrcp.f32 %v800_v18 }
 0x4d1   :  { %v806_v19 = vpop.xlane.xlu0 %805  ;;  %v13730_v21 = vpop.eup %13729 }
 0x4d2   :  { %13733 = vrcp.f32 %v806_v19  ;;  %v14524_v26 = vmul.f32 %v13730_v21, %v13722_v54 }
 0x4d3   :  { %v13732_v22 = vpop.eup %13731 }
 0x4d4   :  { %v14522_v23 = vmul.f32 %v13732_v22, %v13724_v63  ;;  %16727 = vst [vmem:[#allocation33_spill] sm:$0xff] %v14524_v26 }
 0x4d5   :  { %v809_v16 = vpop.xlane.xlu1 %808  ;;  %v981_v56 = vpop.permute.xlu0 %980 }
 0x4d6   :  { %16726 = vst [vmem:[#allocation32_spill] sm:$0xff] %v14522_v23  ;;  %13735 = vrcp.f32 %v809_v16  ;;  %12893 = vmatprep.mubr.msk.f32.mxu1 %vm16656_vm1, %v14522_v23  ;;  %12907 = vmatprep.mubr.msk.f32.mxu0 %vm16656_vm1, %v981_v56 }
 0x4d7   :  { %12894 = vmatmul.mubr.msk.f32.vlgmr.msra.gmra.mxu1 %vm16656_vm1, %v14524_v26 }
 0x4d8   :  { %12897 = vmatpush3.msra.mxu1 %v14469_v11 }
 0x4d9   :  { %12898 = vmatprep.subr.mxu1 %v14376_v40  ;;  %v983_v52 = vpop.permute.xlu1 %982  ;;  %v1072_v24 = vpop.permute.xlu0 %1071 }
 0x4da   :  { %12899 = vmatpush3.msra.mxu1 %v14376_v40  ;;  %12908 = vmatmul.mubr.msk.f32.vlgmr.msra.gmra.mxu0 %vm16656_vm1, %v983_v52 }
 0x4db   :  { %12910 = vmatprep.subr.msk.mxu1 %vm16656_vm1, %v1078_v43 }
 0x4dd   :  { %v1074_v17 = vpop.permute.xlu1 %1073 }
 0x4df   :  { %v13734_v15 = vpop.eup %13733 }
 0x4e0   :  { %v14536_v20 = vmul.f32 %v13734_v15, %v13726_v48 }
 0x4e2   :  { %16728 = vst [vmem:[#allocation34_spill] sm:$0xff] %v14536_v20  ;;  %12900 = vmatprep.mubr.msk.f32.mxu1 %vm16656_vm1, %v14536_v20 }
 0x4e3   :  { %v13736_v27 = vpop.eup %13735 }
 0x4e4   :  { %v14540_v28 = vmul.f32 %v13736_v27, %v13728_v58 }
 0x4e6   :  { %16729 = vst [vmem:[#allocation35_spill] sm:$0xff] %v14540_v28  ;;  %12901 = vmatmul.mubr.msk.f32.vlgmr.msra.gmra.mxu1 %vm16656_vm1, %v14540_v28 }
 0x4e7   :  { %12911 = vmatpush3.xpose.msk.msra.mxu1 %vm16656_vm1, %v1078_v43  ;;  %12914 = vmatprep.mubr.msk.f32.mxu1 %vm16656_vm1, %v1072_v24 }
 0x4e8   :  { %12912 = vmatprep.subr.msk.mxu1 %vm16656_vm1, %v1076_v12 }
 0x4eb   :  { %12913 = vmatpush3.xpose.msk.msra.mxu1 %vm16656_vm1, %v1076_v12 }
 0x4ee   :  { %12915 = vmatmul.mubr.msk.f32.vlgmr.msra.gmra.mxu1 %vm16656_vm1, %v1074_v17 }
 0x597   :  { %v14553_v49 = vpop.f32.mrf.mxu1 }
 0x599   :  { %v14555_v54 = vpop.f32.mrf.mxu1 }
 0x59a   :  { %v12909_v30 = vpop.f32.mrf.mxu0 }
 0x59b   :  { %v1163_v34 = vmul.f32 0.25, %v12909_v30 }
 0x59c   :  { %v1062_v36 = vpop.f32.mrf.mxu0 }
 0x59d   :  { %v1162_v38 = vmul.f32 0.25, %v1062_v36  ;;  %v1167_v39 = vadd.f32 %v1163_v34, %v578_v33 }
 0x59f   :  { %v1173_v42 = vsel %vm16656_vm1, %v1167_v39, -inf  ;;  %v1166_v44 = vadd.f32 %v1162_v38, %v577_v37 }
 0x5a0   :  { %1174 = vmax.xlane.f32.xlu1 %v1173_v42 }
 0x5a1   :  { %v1170_v45 = vsel %vm16656_vm1, %v1166_v44, -inf }
 0x5a2   :  { %1171 = vmax.xlane.f32.xlu0 %v1170_v45 }
 0x5a6   :  { %v14557_v43 = vpop.f32.mrf.mxu1 }
 0x5a8   :  { %v14559_v57 = vpop.f32.mrf.mxu1 }
 0x5ae   :  { %v12916_v59 = vpop.f32.mrf.mxu1 }
 0x5af   :  { %v1165_v63 = vmul.f32 0.25, %v12916_v59 }
 0x5b0   :  { %v1153_v62 = vpop.f32.mrf.mxu1 }
 0x5b1   :  { %v1164_v2 = vmul.f32 0.25, %v1153_v62  ;;  %v1169_v10 = vadd.f32 %v1165_v63, %v578_v33 }
 0x5b3   :  { %v1168_v60 = vadd.f32 %v1164_v2, %v577_v37  ;;  %v1179_v48 = vsel %vm16656_vm1, %v1169_v10, -inf }
 0x5b5   :  { %v1176_v5 = vsel %vm16656_vm1, %v1168_v60, -inf }
 0x5b6   :  { %1177 = vmax.xlane.f32.xlu0 %v1176_v5 }
 0x5ba   :  { %1180 = vmax.xlane.f32.xlu0 %v1179_v48 }
 0x629   :  { %v1175_v35 = vpop.xlane.xlu1 %1174 }
 0x62a   :  { %v1183_v58 = vsub.f32 %v1167_v39, %v1175_v35 }
 0x62b   :  { %v1172_v61 = vpop.xlane.xlu0 %1171 }
 0x62c   :  { %v1188_v12 = vmul.f32 1.442695, %v1183_v58  ;;  %v1182_v14 = vsub.f32 %v1166_v44, %v1172_v61 }
 0x62e   :  { %13737 = vpow2.f32 %v1188_v12  ;;  %v1186_v18 = vmul.f32 1.442695, %v1182_v14 }
 0x630   :  { %13739 = vpow2.f32 %v1186_v18 }
 0x63b   :  { %v13738_v19 = vpop.eup %13737 }
 0x63c   :  { %v1197_v21 = vsel %vm16656_vm1, %v13738_v19, 0.0 }
 0x63d   :  { %v13740_v22 = vpop.eup %13739  ;;  %1198 = vadd.xlane.f32.xlu1 %v1197_v21 }
 0x63e   :  { %v1194_v16 = vsel %vm16656_vm1, %v13740_v22, 0.0 }
 0x63f   :  { %1195 = vadd.xlane.f32.xlu0 %v1194_v16  ;;  %v1178_v56 = vpop.xlane.xlu0 %1177 }
 0x640   :  { %v1184_v52 = vsub.f32 %v1168_v60, %v1178_v56 }
 0x642   :  { %v1190_v27 = vmul.f32 1.442695, %v1184_v52 }
 0x643   :  { %v1181_v15 = vpop.xlane.xlu0 %1180 }
 0x644   :  { %v1185_v24 = vsub.f32 %v1169_v10, %v1181_v15  ;;  %13741 = vpow2.f32 %v1190_v27  ;;  %v580_v27 = vld [vmem:[%s14175_s19 + $0x28] sm:$0xff] }
 0x646   :  { %v1192_v17 = vmul.f32 1.442695, %v1185_v24 }
 0x648   :  { %13743 = vpow2.f32 %v1192_v17 }
 0x64e   :  { %1307 = vrot.lane.b32.xlu1 %v14469_v11, %s14101_s21 }
 0x651   :  { %v13742_v30 = vpop.eup %13741 }
 0x652   :  { %1216 = vrot.lane.b32.xlu1 %v14451_v55, %s14101_s21  ;;  %v1200_v33 = vsel %vm16656_vm1, %v13742_v30, 0.0 }
 0x655   :  { %1218 = vrot.lane.b32.xlu0 %v14441_v41, %s14101_s21  ;;  %v13744_v34 = vpop.eup %13743 }
 0x656   :  { %1305 = vrot.lane.b32.xlu1 %v14376_v40, %s14101_s21  ;;  %v1203_v36 = vsel %vm16656_vm1, %v13744_v34, 0.0 }
 0x659   :  { %1398 = vrot.lane.b32.xlu0 %v14427_v29, %s14102_s25 }
 0x65a   :  { %1489 = vrot.lane.b32.xlu1 %v14463_v7, %s14102_s25 }
 0x65d   :  { %1396 = vrot.lane.b32.xlu0 %v14431_v32, %s14102_s25 }
 0x65e   :  { %1487 = vrot.lane.b32.xlu1 %v14472_v51, %s14102_s25 }
 0x67c   :  { %1201 = vadd.xlane.f32.xlu0 %v1200_v33 }
 0x682   :  { %1204 = vadd.xlane.f32.xlu1 %v1203_v36 }
 0x692   :  { %1392 = vrot.lane.b32.xlu0 %v14417_v6, %s14102_s25 }
 0x693   :  { %1394 = vrot.lane.b32.xlu1 %v14447_v47, %s14102_s25 }
 0x696   :  { %1483 = vrot.lane.b32.xlu0 %v14465_v50, %s14102_s25 }
 0x697   :  { %1485 = vrot.lane.b32.xlu1 %v14488_v13, %s14102_s25 }
 0x6c6   :  { %v1199_v37 = vpop.xlane.xlu1 %1198 }
 0x6c7   :  { %13745 = vrcp.f32 %v1199_v37 }
 0x6c8   :  { %v1196_v38 = vpop.xlane.xlu0 %1195 }
 0x6c9   :  { %13747 = vrcp.f32 %v1196_v38 }
 0x6ca   :  { %v1308_v39 = vpop.permute.xlu1 %1307 }
 0x6cb   :  { %12924 = vmatprep.subr.mxu1 %v1308_v39 }
 0x6cc   :  { %12925 = vmatpush3.msra.mxu1 %v1308_v39  ;;  %v1219_v42 = vpop.permute.xlu0 %1218 }
 0x6cd   :  { %12917 = vmatprep.subr.mxu0 %v1219_v42 }
 0x6ce   :  { %v1217_v44 = vpop.permute.xlu1 %1216  ;;  %12918 = vmatpush3.msra.mxu0 %v1219_v42 }
 0x6cf   :  { %12919 = vmatprep.subr.mxu0 %v1217_v44 }
 0x6d0   :  { %12920 = vmatpush3.msra.mxu0 %v1217_v44  ;;  %v1399_v45 = vpop.permute.xlu0 %1398 }
 0x6d1   :  { %12931 = vmatprep.subr.msk.mxu0 %vm16656_vm1, %v1399_v45 }
 0x6d2   :  { %v1306_v59 = vpop.permute.xlu1 %1305 }
 0x6d3   :  { %12926 = vmatprep.subr.mxu1 %v1306_v59 }
 0x6d4   :  { %12927 = vmatpush3.msra.mxu1 %v1306_v59  ;;  %v13746_v62 = vpop.eup %13745  ;;  %v1397_v10 = vpop.permute.xlu0 %1396 }
 0x6d5   :  { %v14595_v5 = vmul.f32 %v13746_v62, %v13738_v19 }
 0x6d6   :  { %v13748_v63 = vpop.eup %13747  ;;  %v1490_v2 = vpop.permute.xlu1 %1489 }
 0x6d7   :  { %12938 = vmatprep.subr.msk.mxu1 %vm16656_vm1, %v1490_v2  ;;  %v14593_v60 = vmul.f32 %v13748_v63, %v13740_v22  ;;  %16731 = vst [vmem:[#allocation37_spill] sm:$0xff] %v14595_v5 }
 0x6d9   :  { %16730 = vst [vmem:[#allocation36_spill] sm:$0xff] %v14593_v60  ;;  %12921 = vmatprep.mubr.msk.f32.mxu0 %vm16656_vm1, %v14593_v60 }
 0x6da   :  { %12922 = vmatmul.mubr.msk.f32.vlgmr.msra.gmra.mxu0 %vm16656_vm1, %v14595_v5  ;;  %v1488_v35 = vpop.permute.xlu1 %1487 }
 0x6db   :  { %12932 = vmatpush3.xpose.msk.msra.mxu0 %vm16656_vm1, %v1399_v45 }
 0x6dc   :  { %12933 = vmatprep.subr.msk.mxu0 %vm16656_vm1, %v1397_v10 }
 0x6df   :  { %12934 = vmatpush3.xpose.msk.msra.mxu0 %vm16656_vm1, %v1397_v10 }
 0x705   :  { %v1202_v48 = vpop.xlane.xlu0 %1201 }
 0x706   :  { %13749 = vrcp.f32 %v1202_v48 }
 0x709   :  { %v1393_v58 = vpop.permute.xlu0 %1392 }
 0x70a   :  { %12935 = vmatprep.mubr.msk.f32.mxu0 %vm16656_vm1, %v1393_v58 }
 0x70b   :  { %v1205_v61 = vpop.xlane.xlu1 %1204 }
 0x70c   :  { %13751 = vrcp.f32 %v1205_v61 }
 0x70d   :  { %v1484_v22 = vpop.permute.xlu0 %1483 }
 0x70f   :  { %v1395_v12 = vpop.permute.xlu1 %1394 }
 0x710   :  { %12936 = vmatmul.mubr.msk.f32.vlgmr.msra.gmra.mxu0 %vm16656_vm1, %v1395_v12 }
 0x713   :  { %v13750_v14 = vpop.eup %13749  ;;  %v1486_v16 = vpop.permute.xlu1 %1485 }
 0x714   :  { %v14606_v18 = vmul.f32 %v13750_v14, %v13742_v30  ;;  %v579_v30 = vld [vmem:[%s14175_s19 + $0x20] sm:$0xff] }
 0x716   :  { %16732 = vst [vmem:[#allocation38_spill] sm:$0xff] %v14606_v18  ;;  %12928 = vmatprep.mubr.msk.f32.mxu1 %vm16656_vm1, %v14606_v18 }
 0x719   :  { %v13752_v19 = vpop.eup %13751 }
 0x71a   :  { %v14610_v21 = vmul.f32 %v13752_v19, %v13744_v34 }
 0x71c   :  { %16733 = vst [vmem:[#allocation39_spill] sm:$0xff] %v14610_v21  ;;  %12929 = vmatmul.mubr.msk.f32.vlgmr.msra.gmra.mxu1 %vm16656_vm1, %v14610_v21 }
 0x71d   :  { %12939 = vmatpush3.xpose.msk.msra.mxu1 %vm16656_vm1, %v1490_v2  ;;  %12942 = vmatprep.mubr.msk.f32.mxu1 %vm16656_vm1, %v1484_v22 }
 0x71e   :  { %12940 = vmatprep.subr.msk.mxu1 %vm16656_vm1, %v1488_v35 }
 0x721   :  { %12941 = vmatpush3.xpose.msk.msra.mxu1 %vm16656_vm1, %v1488_v35 }
 0x724   :  { %12943 = vmatmul.mubr.msk.f32.vlgmr.msra.gmra.mxu1 %vm16656_vm1, %v1486_v16 }
 0x79a   :  { %v14619_v56 = vpop.f32.mrf.mxu0 }
 0x79c   :  { %v14621_v52 = vpop.f32.mrf.mxu0 }
 0x7d0   :  { %v12937_v15 = vpop.f32.mrf.mxu0 }
 0x7d1   :  { %v1575_v24 = vmul.f32 0.25, %v12937_v15 }
 0x7d2   :  { %v1474_v17 = vpop.f32.mrf.mxu0 }
 0x7d3   :  { %v1574_v33 = vmul.f32 0.25, %v1474_v17  ;;  %v1579_v34 = vadd.f32 %v1575_v24, %v580_v27 }
 0x7d5   :  { %v1585_v36 = vsel %vm16656_vm1, %v1579_v34, -inf  ;;  %v1578_v37 = vadd.f32 %v1574_v33, %v579_v30 }
 0x7d6   :  { %1586 = vmax.xlane.f32.xlu1 %v1585_v36 }
 0x7d7   :  { %v1582_v38 = vsel %vm16656_vm1, %v1578_v37, -inf }
 0x7d8   :  { %1583 = vmax.xlane.f32.xlu0 %v1582_v38 }
 0x7dc   :  { %v14627_v39 = vpop.f32.mrf.mxu1 }
 0x7de   :  { %v14629_v42 = vpop.f32.mrf.mxu1 }
 0x7e4   :  { %v12944_v44 = vpop.f32.mrf.mxu1 }
 0x7e5   :  { %v1577_v59 = vmul.f32 0.25, %v12944_v44 }
 0x7e6   :  { %v1565_v45 = vpop.f32.mrf.mxu1 }
 0x7e7   :  { %v1576_v62 = vmul.f32 0.25, %v1565_v45  ;;  %v1581_v10 = vadd.f32 %v1577_v59, %v580_v27 }
 0x7e9   :  { %v1580_v63 = vadd.f32 %v1576_v62, %v579_v30  ;;  %v1591_v48 = vsel %vm16656_vm1, %v1581_v10, -inf }
 0x7eb   :  { %v1588_v2 = vsel %vm16656_vm1, %v1580_v63, -inf }
 0x7ec   :  { %1589 = vmax.xlane.f32.xlu0 %v1588_v2 }
 0x7f0   :  { %1592 = vmax.xlane.f32.xlu0 %v1591_v48 }
 0x85f   :  { %v1587_v35 = vpop.xlane.xlu1 %1586 }
 0x860   :  { %v1595_v58 = vsub.f32 %v1579_v34, %v1587_v35 }
 0x861   :  { %v1584_v61 = vpop.xlane.xlu0 %1583 }
 0x862   :  { %v1600_v12 = vmul.f32 1.442695, %v1595_v58  ;;  %v1594_v14 = vsub.f32 %v1578_v37, %v1584_v61 }
 0x864   :  { %13753 = vpow2.f32 %v1600_v12  ;;  %v1598_v19 = vmul.f32 1.442695, %v1594_v14 }
 0x866   :  { %13755 = vpow2.f32 %v1598_v19 }
 0x871   :  { %v13754_v22 = vpop.eup %13753 }
 0x872   :  { %v1609_v16 = vsel %vm16656_vm1, %v13754_v22, 0.0 }
 0x873   :  { %v13756_v15 = vpop.eup %13755  ;;  %1610 = vadd.xlane.f32.xlu1 %v1609_v16 }
 0x874   :  { %v1606_v24 = vsel %vm16656_vm1, %v13756_v15, 0.0 }
 0x875   :  { %1607 = vadd.xlane.f32.xlu0 %v1606_v24  ;;  %v1590_v27 = vpop.xlane.xlu0 %1589 }
 0x876   :  { %v1596_v17 = vsub.f32 %v1580_v63, %v1590_v27 }
 0x878   :  { %v1602_v33 = vmul.f32 1.442695, %v1596_v17 }
 0x879   :  { %v1593_v30 = vpop.xlane.xlu0 %1592 }
 0x87a   :  { %v1597_v34 = vsub.f32 %v1581_v10, %v1593_v30  ;;  %13757 = vpow2.f32 %v1602_v33 }
 0x87c   :  { %v1604_v36 = vmul.f32 1.442695, %v1597_v34 }
 0x87e   :  { %13759 = vpow2.f32 %v1604_v36 }
 0x884   :  { %1715 = vrot.lane.b32.xlu1 %v14469_v11, %s14102_s25 }
 0x887   :  { %v13758_v37 = vpop.eup %13757 }
 0x888   :  { %1626 = vrot.lane.b32.xlu1 %v14451_v55, %s14102_s25  ;;  %v1612_v38 = vsel %vm16656_vm1, %v13758_v37, 0.0 }
 0x88b   :  { %1628 = vrot.lane.b32.xlu0 %v14441_v41, %s14102_s25  ;;  %v13760_v44 = vpop.eup %13759 }
 0x88c   :  { %1713 = vrot.lane.b32.xlu1 %v14376_v40, %s14102_s25  ;;  %v1615_v45 = vsel %vm16656_vm1, %v13760_v44, 0.0 }
 0x88f   :  { %1806 = vrot.lane.b32.xlu0 %v14427_v29, %s14103_s8 }
 0x890   :  { %1897 = vrot.lane.b32.xlu1 %v14463_v7, %s14103_s8 }
 0x893   :  { %1804 = vrot.lane.b32.xlu0 %v14431_v32, %s14103_s8 }
 0x894   :  { %1895 = vrot.lane.b32.xlu1 %v14472_v51, %s14103_s8 }
 0x8b2   :  { %1613 = vadd.xlane.f32.xlu0 %v1612_v38 }
 0x8b8   :  { %1616 = vadd.xlane.f32.xlu1 %v1615_v45 }
 0x8c8   :  { %1800 = vrot.lane.b32.xlu0 %v14417_v6, %s14103_s8 }
 0x8c9   :  { %1802 = vrot.lane.b32.xlu1 %v14447_v47, %s14103_s8 }
 0x8cc   :  { %1891 = vrot.lane.b32.xlu0 %v14465_v50, %s14103_s8 }
 0x8cd   :  { %1893 = vrot.lane.b32.xlu1 %v14488_v13, %s14103_s8 }
 0x8fc   :  { %v1611_v59 = vpop.xlane.xlu1 %1610 }
 0x8fd   :  { %13761 = vrcp.f32 %v1611_v59 }
 0x8fe   :  { %v1608_v62 = vpop.xlane.xlu0 %1607 }
 0x8ff   :  { %13763 = vrcp.f32 %v1608_v62  ;;  %v582_v62 = vld [vmem:[%s14175_s19 + $0x38] sm:$0xff] }
 0x900   :  { %v1716_v63 = vpop.permute.xlu1 %1715 }
 0x901   :  { %12952 = vmatprep.subr.mxu1 %v1716_v63 }
 0x902   :  { %12953 = vmatpush3.msra.mxu1 %v1716_v63  ;;  %v1629_v2 = vpop.permute.xlu0 %1628 }
 0x903   :  { %12945 = vmatprep.subr.mxu0 %v1629_v2 }
 0x904   :  { %v1627_v10 = vpop.permute.xlu1 %1626  ;;  %12946 = vmatpush3.msra.mxu0 %v1629_v2 }
 0x905   :  { %12947 = vmatprep.subr.mxu0 %v1627_v10 }
 0x906   :  { %12948 = vmatpush3.msra.mxu0 %v1627_v10  ;;  %v1807_v48 = vpop.permute.xlu0 %1806  ;;  %v581_v10 = vld [vmem:[%s14175_s19 + $0x30] sm:$0xff] }
 0x907   :  { %12959 = vmatprep.subr.msk.mxu0 %vm16656_vm1, %v1807_v48 }
 0x908   :  { %v1714_v35 = vpop.permute.xlu1 %1713 }
 0x909   :  { %12954 = vmatprep.subr.mxu1 %v1714_v35 }
 0x90a   :  { %12955 = vmatpush3.msra.mxu1 %v1714_v35  ;;  %v13762_v58 = vpop.eup %13761  ;;  %v1805_v16 = vpop.permute.xlu0 %1804 }
 0x90b   :  { %v14665_v19 = vmul.f32 %v13762_v58, %v13754_v22 }
 0x90c   :  { %v13764_v61 = vpop.eup %13763  ;;  %v1898_v12 = vpop.permute.xlu1 %1897 }
 0x90d   :  { %12966 = vmatprep.subr.msk.mxu1 %vm16656_vm1, %v1898_v12  ;;  %v14663_v14 = vmul.f32 %v13764_v61, %v13756_v15  ;;  %16735 = vst [vmem:[#allocation41_spill] sm:$0xff] %v14665_v19 }
 0x90f   :  { %16734 = vst [vmem:[#allocation40_spill] sm:$0xff] %v14663_v14  ;;  %12949 = vmatprep.mubr.msk.f32.mxu0 %vm16656_vm1, %v14663_v14 }
 0x910   :  { %12950 = vmatmul.mubr.msk.f32.vlgmr.msra.gmra.mxu0 %vm16656_vm1, %v14665_v19  ;;  %v1896_v27 = vpop.permute.xlu1 %1895 }
 0x911   :  { %12960 = vmatpush3.xpose.msk.msra.mxu0 %vm16656_vm1, %v1807_v48 }
 0x912   :  { %12961 = vmatprep.subr.msk.mxu0 %vm16656_vm1, %v1805_v16 }
 0x915   :  { %12962 = vmatpush3.xpose.msk.msra.mxu0 %vm16656_vm1, %v1805_v16 }
 0x93b   :  { %v1614_v24 = vpop.xlane.xlu0 %1613 }
 0x93c   :  { %13765 = vrcp.f32 %v1614_v24 }
 0x93f   :  { %v1801_v15 = vpop.permute.xlu0 %1800 }
 0x940   :  { %12963 = vmatprep.mubr.msk.f32.mxu0 %vm16656_vm1, %v1801_v15 }
 0x941   :  { %v1617_v22 = vpop.xlane.xlu1 %1616 }
 0x942   :  { %13767 = vrcp.f32 %v1617_v22 }
 0x943   :  { %v1892_v38 = vpop.permute.xlu0 %1891 }
 0x945   :  { %v1803_v17 = vpop.permute.xlu1 %1802 }
 0x946   :  { %12964 = vmatmul.mubr.msk.f32.vlgmr.msra.gmra.mxu0 %vm16656_vm1, %v1803_v17 }
 0x949   :  { %v13766_v30 = vpop.eup %13765 }
 0x94a   :  { %v14676_v33 = vmul.f32 %v13766_v30, %v13758_v37  ;;  %v1894_v37 = vpop.permute.xlu1 %1893 }
 0x94c   :  { %16736 = vst [vmem:[#allocation42_spill] sm:$0xff] %v14676_v33  ;;  %12956 = vmatprep.mubr.msk.f32.mxu1 %vm16656_vm1, %v14676_v33 }
 0x94f   :  { %v13768_v34 = vpop.eup %13767 }
 0x950   :  { %v14680_v36 = vmul.f32 %v13768_v34, %v13760_v44 }
 0x952   :  { %16737 = vst [vmem:[#allocation43_spill] sm:$0xff] %v14680_v36  ;;  %12957 = vmatmul.mubr.msk.f32.vlgmr.msra.gmra.mxu1 %vm16656_vm1, %v14680_v36 }
 0x953   :  { %12967 = vmatpush3.xpose.msk.msra.mxu1 %vm16656_vm1, %v1898_v12  ;;  %12970 = vmatprep.mubr.msk.f32.mxu1 %vm16656_vm1, %v1892_v38 }
 0x954   :  { %12968 = vmatprep.subr.msk.mxu1 %vm16656_vm1, %v1896_v27 }
 0x957   :  { %12969 = vmatpush3.xpose.msk.msra.mxu1 %vm16656_vm1, %v1896_v27 }
 0x95a   :  { %12971 = vmatmul.mubr.msk.f32.vlgmr.msra.gmra.mxu1 %vm16656_vm1, %v1894_v37 }
 0x9d0   :  { %v14689_v45 = vpop.f32.mrf.mxu0 }
 0x9d2   :  { %v14691_v59 = vpop.f32.mrf.mxu0 }
 0xa06   :  { %v12965_v44 = vpop.f32.mrf.mxu0 }
 0xa07   :  { %v1983_v63 = vmul.f32 0.25, %v12965_v44 }
 0xa08   :  { %v1882_v2 = vpop.f32.mrf.mxu0 }
 0xa09   :  { %v1982_v48 = vmul.f32 0.25, %v1882_v2  ;;  %v1987_v35 = vadd.f32 %v1983_v63, %v582_v62 }
 0xa0b   :  { %v1993_v58 = vsel %vm16656_vm1, %v1987_v35, -inf  ;;  %v1986_v61 = vadd.f32 %v1982_v48, %v581_v10 }
 0xa0c   :  { %1994 = vmax.xlane.f32.xlu1 %v1993_v58 }
 0xa0d   :  { %v1990_v12 = vsel %vm16656_vm1, %v1986_v61, -inf }
 0xa0e   :  { %1991 = vmax.xlane.f32.xlu0 %v1990_v12 }
 0xa12   :  { %v14697_v16 = vpop.f32.mrf.mxu1 }
 0xa14   :  { %v14699_v24 = vpop.f32.mrf.mxu1 }
 0xa1a   :  { %v12972_v27 = vpop.f32.mrf.mxu1 }
 0xa1b   :  { %v1985_v22 = vmul.f32 0.25, %v12972_v27 }
 0xa1c   :  { %v1973_v15 = vpop.f32.mrf.mxu1 }
 0xa1d   :  { %v1984_v17 = vmul.f32 0.25, %v1973_v15  ;;  %v1989_v38 = vadd.f32 %v1985_v22, %v582_v62 }
 0xa1f   :  { %v1988_v30 = vadd.f32 %v1984_v17, %v581_v10  ;;  %v1999_v37 = vsel %vm16656_vm1, %v1989_v38, -inf }
 0xa21   :  { %v1996_v34 = vsel %vm16656_vm1, %v1988_v30, -inf }
 0xa22   :  { %1997 = vmax.xlane.f32.xlu0 %v1996_v34 }
 0xa26   :  { %2000 = vmax.xlane.f32.xlu0 %v1999_v37 }
 0xa95   :  { %v1995_v44 = vpop.xlane.xlu1 %1994 }
 0xa96   :  { %v2003_v63 = vsub.f32 %v1987_v35, %v1995_v44 }
 0xa97   :  { %v1992_v2 = vpop.xlane.xlu0 %1991 }
 0xa98   :  { %v2008_v48 = vmul.f32 1.442695, %v2003_v63  ;;  %v2002_v58 = vsub.f32 %v1986_v61, %v1992_v2 }
 0xa9a   :  { %13769 = vpow2.f32 %v2008_v48  ;;  %v2006_v12 = vmul.f32 1.442695, %v2002_v58 }
 0xa9c   :  { %13771 = vpow2.f32 %v2006_v12 }
 0xaa7   :  { %v13770_v46 = vpop.eup %13769 }
 0xaa8   :  { %v2017_v27 = vsel %vm16656_vm1, %v13770_v46, 0.0 }
 0xaa9   :  { %v13772_v15 = vpop.eup %13771  ;;  %2018 = vadd.xlane.f32.xlu1 %v2017_v27 }
 0xaaa   :  { %v2014_v10 = vsel %vm16656_vm1, %v13772_v15, 0.0 }
 0xaab   :  { %2015 = vadd.xlane.f32.xlu0 %v2014_v10  ;;  %v1998_v62 = vpop.xlane.xlu0 %1997 }
 0xaac   :  { %v2004_v35 = vsub.f32 %v1988_v30, %v1998_v62 }
 0xaae   :  { %v2010_v22 = vmul.f32 1.442695, %v2004_v35 }
 0xaaf   :  { %v2001_v61 = vpop.xlane.xlu0 %2000 }
 0xab0   :  { %v2005_v17 = vsub.f32 %v1989_v38, %v2001_v61  ;;  %13773 = vpow2.f32 %v2010_v22 }
 0xab2   :  { %v2012_v34 = vmul.f32 1.442695, %v2005_v17 }
 0xab4   :  { %13775 = vpow2.f32 %v2012_v34 }
 0xaba   :  { %2123 = vrot.lane.b32.xlu1 %v14469_v11, %s14103_s8 }
 0xabd   :  { %v13774_v37 = vpop.eup %13773 }
 0xabe   :  { %2034 = vrot.lane.b32.xlu1 %v14451_v55, %s14103_s8  ;;  %v2020_v44 = vsel %vm16656_vm1, %v13774_v37, 0.0 }
 0xac1   :  { %2036 = vrot.lane.b32.xlu0 %v14441_v41, %s14103_s8  ;;  %v13776_v63 = vpop.eup %13775 }
 0xac2   :  { %2121 = vrot.lane.b32.xlu1 %v14376_v40, %s14103_s8  ;;  %v2023_v2 = vsel %vm16656_vm1, %v13776_v63, 0.0 }
 0xac5   :  { %2214 = vrot.lane.b32.xlu0 %v14427_v29, %s14095_s23 }
 0xac6   :  { %2305 = vrot.lane.b32.xlu1 %v14463_v7, %s14095_s23 }
 0xac9   :  { %2212 = vrot.lane.b32.xlu0 %v14431_v32, %s14095_s23 }
 0xaca   :  { %2303 = vrot.lane.b32.xlu1 %v14472_v51, %s14095_s23 }
 0xae8   :  { %2021 = vadd.xlane.f32.xlu0 %v2020_v44 }
 0xaee   :  { %2024 = vadd.xlane.f32.xlu1 %v2023_v2 }
 0xafe   :  { %2208 = vrot.lane.b32.xlu0 %v14417_v6, %s14095_s23 }
 0xaff   :  { %2210 = vrot.lane.b32.xlu1 %v14447_v47, %s14095_s23 }
 0xb02   :  { %2299 = vrot.lane.b32.xlu0 %v14465_v50, %s14095_s23 }
 0xb03   :  { %2301 = vrot.lane.b32.xlu1 %v14488_v13, %s14095_s23 }
 0xb32   :  { %v2019_v30 = vpop.xlane.xlu1 %2018 }
 0xb33   :  { %13777 = vrcp.f32 %v2019_v30 }
 0xb34   :  { %v2016_v38 = vpop.xlane.xlu0 %2015 }
 0xb35   :  { %13779 = vrcp.f32 %v2016_v38 }
 0xb36   :  { %v2124_v48 = vpop.permute.xlu1 %2123 }
 0xb37   :  { %12980 = vmatprep.subr.mxu1 %v2124_v48 }
 0xb38   :  { %12981 = vmatpush3.msra.mxu1 %v2124_v48  ;;  %v2037_v58 = vpop.permute.xlu0 %2036 }
 0xb39   :  { %12973 = vmatprep.subr.mxu0 %v2037_v58 }
 0xb3a   :  { %v2035_v12 = vpop.permute.xlu1 %2034  ;;  %12974 = vmatpush3.msra.mxu0 %v2037_v58 }
 0xb3b   :  { %12975 = vmatprep.subr.mxu0 %v2035_v12 }
 0xb3c   :  { %12976 = vmatpush3.msra.mxu0 %v2035_v12  ;;  %v2215_v27 = vpop.permute.xlu0 %2214 }
 0xb3d   :  { %12987 = vmatprep.subr.msk.mxu0 %vm16656_vm1, %v2215_v27 }
 0xb3e   :  { %v2122_v10 = vpop.permute.xlu1 %2121 }
 0xb3f   :  { %12982 = vmatprep.subr.mxu1 %v2122_v10 }
 0xb40   :  { %12983 = vmatpush3.msra.mxu1 %v2122_v10  ;;  %v13778_v62 = vpop.eup %13777  ;;  %v2213_v34 = vpop.permute.xlu0 %2212 }
 0xb41   :  { %v14735_v17 = vmul.f32 %v13778_v62, %v13770_v46 }
 0xb42   :  { %v13780_v35 = vpop.eup %13779  ;;  %v2306_v61 = vpop.permute.xlu1 %2305 }
 0xb43   :  { %12994 = vmatprep.subr.msk.mxu1 %vm16656_vm1, %v2306_v61  ;;  %v14733_v22 = vmul.f32 %v13780_v35, %v13772_v15  ;;  %16739 = vst [vmem:[#allocation45_spill] sm:$0xff] %v14735_v17 }
 0xb45   :  { %16738 = vst [vmem:[#allocation44_spill] sm:$0xff] %v14733_v22  ;;  %12977 = vmatprep.mubr.msk.f32.mxu0 %vm16656_vm1, %v14733_v22 }
 0xb46   :  { %12978 = vmatmul.mubr.msk.f32.vlgmr.msra.gmra.mxu0 %vm16656_vm1, %v14735_v17  ;;  %v2304_v2 = vpop.permute.xlu1 %2303 }
 0xb47   :  { %12988 = vmatpush3.xpose.msk.msra.mxu0 %vm16656_vm1, %v2215_v27 }
 0xb48   :  { %12989 = vmatprep.subr.msk.mxu0 %vm16656_vm1, %v2213_v34 }
 0xb4b   :  { %12990 = vmatpush3.xpose.msk.msra.mxu0 %vm16656_vm1, %v2213_v34 }
 0xb71   :  { %v2022_v44 = vpop.xlane.xlu0 %2021 }
 0xb72   :  { %13781 = vrcp.f32 %v2022_v44  ;;  %v583_v44 = vld [vmem:[%s14175_s19 + $0x40] sm:$0xff] }
 0xb75   :  { %v2209_v15 = vpop.permute.xlu0 %2208 }
 0xb76   :  { %12991 = vmatprep.mubr.msk.f32.mxu0 %vm16656_vm1, %v2209_v15 }
 0xb77   :  { %v2025_v46 = vpop.xlane.xlu1 %2024 }
 0xb78   :  { %13783 = vrcp.f32 %v2025_v46 }
 0xb79   :  { %v2300_v27 = vpop.permute.xlu0 %2299 }
 0xb7b   :  { %v2211_v30 = vpop.permute.xlu1 %2210 }
 0xb7c   :  { %12992 = vmatmul.mubr.msk.f32.vlgmr.msra.gmra.mxu0 %vm16656_vm1, %v2211_v30 }
 0xb7f   :  { %v13782_v38 = vpop.eup %13781 }
 0xb80   :  { %v14746_v48 = vmul.f32 %v13782_v38, %v13774_v37  ;;  %v2302_v37 = vpop.permute.xlu1 %2301 }
 0xb82   :  { %16740 = vst [vmem:[#allocation46_spill] sm:$0xff] %v14746_v48  ;;  %12984 = vmatprep.mubr.msk.f32.mxu1 %vm16656_vm1, %v14746_v48 }
 0xb85   :  { %v13784_v58 = vpop.eup %13783 }
 0xb86   :  { %v14750_v12 = vmul.f32 %v13784_v58, %v13776_v63  ;;  %v584_v63 = vld [vmem:[%s14175_s19 + $0x48] sm:$0xff] }
 0xb88   :  { %16741 = vst [vmem:[#allocation47_spill] sm:$0xff] %v14750_v12  ;;  %12985 = vmatmul.mubr.msk.f32.vlgmr.msra.gmra.mxu1 %vm16656_vm1, %v14750_v12 }
 0xb89   :  { %12995 = vmatpush3.xpose.msk.msra.mxu1 %vm16656_vm1, %v2306_v61  ;;  %12998 = vmatprep.mubr.msk.f32.mxu1 %vm16656_vm1, %v2300_v27 }
 0xb8a   :  { %12996 = vmatprep.subr.msk.mxu1 %vm16656_vm1, %v2304_v2 }
 0xb8d   :  { %12997 = vmatpush3.xpose.msk.msra.mxu1 %vm16656_vm1, %v2304_v2 }
 0xb90   :  { %12999 = vmatmul.mubr.msk.f32.vlgmr.msra.gmra.mxu1 %vm16656_vm1, %v2302_v37 }
 0xc06   :  { %v14759_v10 = vpop.f32.mrf.mxu0 }
 0xc08   :  { %v14761_v62 = vpop.f32.mrf.mxu0 }
 0xc3c   :  { %v12993_v35 = vpop.f32.mrf.mxu0 }
 0xc3d   :  { %v2391_v34 = vmul.f32 0.25, %v12993_v35 }
 0xc3e   :  { %v2290_v15 = vpop.f32.mrf.mxu0 }
 0xc3f   :  { %v2395_v46 = vadd.f32 %v2391_v34, %v584_v63  ;;  %v2390_v61 = vmul.f32 0.25, %v2290_v15 }
 0xc41   :  { %v2394_v30 = vadd.f32 %v2390_v61, %v583_v44  ;;  %v2401_v38 = vsel %vm16656_vm1, %v2395_v46, -inf }
 0xc42   :  { %2402 = vmax.xlane.f32.xlu1 %v2401_v38 }
 0xc43   :  { %v2398_v2 = vsel %vm16656_vm1, %v2394_v30, -inf }
 0xc44   :  { %2399 = vmax.xlane.f32.xlu0 %v2398_v2 }
 0xc48   :  { %v14767_v58 = vpop.f32.mrf.mxu1 }
 0xc4a   :  { %v14769_v27 = vpop.f32.mrf.mxu1 }
 0xc50   :  { %v13000_v37 = vpop.f32.mrf.mxu1 }
 0xc51   :  { %v2393_v23 = vmul.f32 0.25, %v13000_v37 }
 0xc52   :  { %v2381_v20 = vpop.f32.mrf.mxu1 }
 0xc53   :  { %v2392_v26 = vmul.f32 0.25, %v2381_v20  ;;  %v2397_v28 = vadd.f32 %v2393_v23, %v584_v63 }
 0xc55   :  { %v2396_v35 = vadd.f32 %v2392_v26, %v583_v44  ;;  %v2407_v15 = vsel %vm16656_vm1, %v2397_v28, -inf }
 0xc57   :  { %v2404_v34 = vsel %vm16656_vm1, %v2396_v35, -inf }
 0xc58   :  { %2405 = vmax.xlane.f32.xlu0 %v2404_v34 }
 0xc5c   :  { %2408 = vmax.xlane.f32.xlu0 %v2407_v15 }
 0xccb   :  { %v2403_v61 = vpop.xlane.xlu1 %2402 }
 0xccc   :  { %v2411_v38 = vsub.f32 %v2395_v46, %v2403_v61 }
 0xccd   :  { %v2400_v12 = vpop.xlane.xlu0 %2399 }
 0xcce   :  { %v2416_v2 = vmul.f32 1.442695, %v2411_v38  ;;  %v2410_v48 = vsub.f32 %v2394_v30, %v2400_v12 }
 0xcd0   :  { %13785 = vpow2.f32 %v2416_v2  ;;  %v2414_v17 = vmul.f32 1.442695, %v2410_v48 }
 0xcd2   :  { %13787 = vpow2.f32 %v2414_v17 }
 0xcdd   :  { %v13786_v22 = vpop.eup %13785 }
 0xcde   :  { %v2425_v37 = vsel %vm16656_vm1, %v13786_v22, 0.0 }
 0xcdf   :  { %v13788_v20 = vpop.eup %13787  ;;  %2426 = vadd.xlane.f32.xlu1 %v2425_v37 }
 0xce0   :  { %v2422_v23 = vsel %vm16656_vm1, %v13788_v20, 0.0 }
 0xce1   :  { %2423 = vadd.xlane.f32.xlu0 %v2422_v23  ;;  %v2406_v26 = vpop.xlane.xlu0 %2405 }
 0xce2   :  { %v2412_v17 = vsub.f32 %v2396_v35, %v2406_v26 }
 0xce4   :  { %v2418_v12 = vmul.f32 1.442695, %v2412_v17 }
 0xce5   :  { %v2409_v48 = vpop.xlane.xlu0 %2408 }
 0xce6   :  { %v2413_v63 = vsub.f32 %v2397_v28, %v2409_v48  ;;  %13789 = vpow2.f32 %v2418_v12 }
 0xce8   :  { %v2420_v44 = vmul.f32 1.442695, %v2413_v63 }
 0xcea   :  { %13791 = vpow2.f32 %v2420_v44 }
 0xcf0   :  { %2531 = vrot.lane.b32.xlu1 %v14469_v11, %s14095_s23 }
 0xcf3   :  { %v13790_v46 = vpop.eup %13789 }
 0xcf4   :  { %2442 = vrot.lane.b32.xlu1 %v14451_v55, %s14095_s23  ;;  %v2428_v30 = vsel %vm16656_vm1, %v13790_v46, 0.0 }
 0xcf7   :  { %2444 = vrot.lane.b32.xlu0 %v14441_v41, %s14095_s23  ;;  %v13792_v34 = vpop.eup %13791 }
 0xcf8   :  { %2529 = vrot.lane.b32.xlu1 %v14376_v40, %s14095_s23  ;;  %v2431_v15 = vsel %vm16656_vm1, %v13792_v34, 0.0 }
 0xcfb   :  { %2622 = vrot.lane.b32.xlu0 %v14427_v29, %s14104_s14 }
 0xcfc   :  { %2713 = vrot.lane.b32.xlu1 %v14463_v7, %s14104_s14 }
 0xcff   :  { %2620 = vrot.lane.b32.xlu0 %v14431_v32, %s14104_s14 }
 0xd00   :  { %2711 = vrot.lane.b32.xlu1 %v14472_v51, %s14104_s14 }
 0xd1e   :  { %2429 = vadd.xlane.f32.xlu0 %v2428_v30 }
 0xd24   :  { %2432 = vadd.xlane.f32.xlu1 %v2431_v15 }
 0xd34   :  { %2616 = vrot.lane.b32.xlu0 %v14417_v6, %s14104_s14 }
 0xd35   :  { %2618 = vrot.lane.b32.xlu1 %v14447_v47, %s14104_s14 }
 0xd38   :  { %2707 = vrot.lane.b32.xlu0 %v14465_v50, %s14104_s14 }
 0xd39   :  { %2709 = vrot.lane.b32.xlu1 %v14488_v13, %s14104_s14 }
 0xd68   :  { %v2427_v28 = vpop.xlane.xlu1 %2426 }
 0xd69   :  { %13793 = vrcp.f32 %v2427_v28 }
 0xd6a   :  { %v2424_v35 = vpop.xlane.xlu0 %2423 }
 0xd6b   :  { %13795 = vrcp.f32 %v2424_v35 }
 0xd6c   :  { %v2532_v61 = vpop.permute.xlu1 %2531 }
 0xd6d   :  { %13008 = vmatprep.subr.mxu1 %v2532_v61 }
 0xd6e   :  { %13009 = vmatpush3.msra.mxu1 %v2532_v61  ;;  %v2445_v38 = vpop.permute.xlu0 %2444 }
 0xd6f   :  { %13001 = vmatprep.subr.mxu0 %v2445_v38 }
 0xd70   :  { %v2443_v2 = vpop.permute.xlu1 %2442  ;;  %13002 = vmatpush3.msra.mxu0 %v2445_v38 }
 0xd71   :  { %13003 = vmatprep.subr.mxu0 %v2443_v2 }
 0xd72   :  { %13004 = vmatpush3.msra.mxu0 %v2443_v2  ;;  %v2623_v37 = vpop.permute.xlu0 %2622 }
 0xd73   :  { %13015 = vmatprep.subr.msk.mxu0 %vm16656_vm1, %v2623_v37 }
 0xd74   :  { %v2530_v23 = vpop.permute.xlu1 %2529 }
 0xd75   :  { %13010 = vmatprep.subr.mxu1 %v2530_v23 }
 0xd76   :  { %13011 = vmatpush3.msra.mxu1 %v2530_v23  ;;  %v13794_v26 = vpop.eup %13793  ;;  %v2621_v44 = vpop.permute.xlu0 %2620 }
 0xd77   :  { %v14805_v63 = vmul.f32 %v13794_v26, %v13786_v22 }
 0xd78   :  { %v13796_v17 = vpop.eup %13795  ;;  %v2714_v48 = vpop.permute.xlu1 %2713 }
 0xd79   :  { %13022 = vmatprep.subr.msk.mxu1 %vm16656_vm1, %v2714_v48  ;;  %v14803_v12 = vmul.f32 %v13796_v17, %v13788_v20  ;;  %16743 = vst [vmem:[#allocation49_spill] sm:$0xff] %v14805_v63 }
 0xd7b   :  { %16742 = vst [vmem:[#allocation48_spill] sm:$0xff] %v14803_v12  ;;  %13005 = vmatprep.mubr.msk.f32.mxu0 %vm16656_vm1, %v14803_v12 }
 0xd7c   :  { %13006 = vmatmul.mubr.msk.f32.vlgmr.msra.gmra.mxu0 %vm16656_vm1, %v14805_v63  ;;  %v2712_v15 = vpop.permute.xlu1 %2711 }
 0xd7d   :  { %13016 = vmatpush3.xpose.msk.msra.mxu0 %vm16656_vm1, %v2623_v37 }
 0xd7e   :  { %13017 = vmatprep.subr.msk.mxu0 %vm16656_vm1, %v2621_v44 }
 0xd81   :  { %13018 = vmatpush3.xpose.msk.msra.mxu0 %vm16656_vm1, %v2621_v44 }
 0xda7   :  { %v2430_v30 = vpop.xlane.xlu0 %2429 }
 0xda8   :  { %13797 = vrcp.f32 %v2430_v30  ;;  %v585_v30 = vld [vmem:[%s14175_s19 + $0x50] sm:$0xff] }
 0xdab   :  { %v2617_v20 = vpop.permute.xlu0 %2616 }
 0xdac   :  { %13019 = vmatprep.mubr.msk.f32.mxu0 %vm16656_vm1, %v2617_v20 }
 0xdad   :  { %v2433_v22 = vpop.xlane.xlu1 %2432 }
 0xdae   :  { %13799 = vrcp.f32 %v2433_v22 }
 0xdaf   :  { %v2708_v37 = vpop.permute.xlu0 %2707 }
 0xdb1   :  { %v2619_v28 = vpop.permute.xlu1 %2618 }
 0xdb2   :  { %13020 = vmatmul.mubr.msk.f32.vlgmr.msra.gmra.mxu0 %vm16656_vm1, %v2619_v28 }
 0xdb5   :  { %v13798_v35 = vpop.eup %13797 }
 0xdb6   :  { %v14816_v61 = vmul.f32 %v13798_v35, %v13790_v46  ;;  %v2710_v46 = vpop.permute.xlu1 %2709 }
 0xdb8   :  { %16744 = vst [vmem:[#allocation50_spill] sm:$0xff] %v14816_v61  ;;  %13012 = vmatprep.mubr.msk.f32.mxu1 %vm16656_vm1, %v14816_v61 }
 0xdbb   :  { %v13800_v38 = vpop.eup %13799 }
 0xdbc   :  { %v14820_v2 = vmul.f32 %v13800_v38, %v13792_v34  ;;  %v586_v34 = vld [vmem:[%s14175_s19 + $0x58] sm:$0xff] }
 0xdbe   :  { %16745 = vst [vmem:[#allocation51_spill] sm:$0xff] %v14820_v2  ;;  %13013 = vmatmul.mubr.msk.f32.vlgmr.msra.gmra.mxu1 %vm16656_vm1, %v14820_v2 }
 0xdbf   :  { %13023 = vmatpush3.xpose.msk.msra.mxu1 %vm16656_vm1, %v2714_v48  ;;  %13026 = vmatprep.mubr.msk.f32.mxu1 %vm16656_vm1, %v2708_v37 }
 0xdc0   :  { %13024 = vmatprep.subr.msk.mxu1 %vm16656_vm1, %v2712_v15 }
 0xdc3   :  { %13025 = vmatpush3.xpose.msk.msra.mxu1 %vm16656_vm1, %v2712_v15 }
 0xdc6   :  { %13027 = vmatmul.mubr.msk.f32.vlgmr.msra.gmra.mxu1 %vm16656_vm1, %v2710_v46 }
 0xe3c   :  { %v14829_v23 = vpop.f32.mrf.mxu0 }
 0xe3e   :  { %v14831_v26 = vpop.f32.mrf.mxu0 }
 0xe72   :  { %v13021_v17 = vpop.f32.mrf.mxu0 }
 0xe73   :  { %v2799_v44 = vmul.f32 0.25, %v13021_v17 }
 0xe74   :  { %v2698_v20 = vpop.f32.mrf.mxu0 }
 0xe75   :  { %v2803_v22 = vadd.f32 %v2799_v44, %v586_v34  ;;  %v2798_v48 = vmul.f32 0.25, %v2698_v20 }
 0xe77   :  { %v2802_v28 = vadd.f32 %v2798_v48, %v585_v30  ;;  %v2809_v35 = vsel %vm16656_vm1, %v2803_v22, -inf }
 0xe78   :  { %2810 = vmax.xlane.f32.xlu1 %v2809_v35 }
 0xe79   :  { %v2806_v15 = vsel %vm16656_vm1, %v2802_v28, -inf }
 0xe7a   :  { %2807 = vmax.xlane.f32.xlu0 %v2806_v15 }
 0xe7e   :  { %v14837_v38 = vpop.f32.mrf.mxu1 }
 0xe80   :  { %v14839_v37 = vpop.f32.mrf.mxu1 }
 0xe86   :  { %v13028_v46 = vpop.f32.mrf.mxu1 }
 0xe87   :  { %v2801_v12 = vmul.f32 0.25, %v13028_v46 }
 0xe88   :  { %v2789_v61 = vpop.f32.mrf.mxu1 }
 0xe89   :  { %v2800_v2 = vmul.f32 0.25, %v2789_v61  ;;  %v2805_v63 = vadd.f32 %v2801_v12, %v586_v34 }
 0xe8b   :  { %v2804_v17 = vadd.f32 %v2800_v2, %v585_v30  ;;  %v2815_v20 = vsel %vm16656_vm1, %v2805_v63, -inf }
 0xe8d   :  { %v2812_v44 = vsel %vm16656_vm1, %v2804_v17, -inf }
 0xe8e   :  { %2813 = vmax.xlane.f32.xlu0 %v2812_v44 }
 0xe92   :  { %2816 = vmax.xlane.f32.xlu0 %v2815_v20 }
 0xf01   :  { %v2811_v48 = vpop.xlane.xlu1 %2810 }
 0xf02   :  { %v2819_v35 = vsub.f32 %v2803_v22, %v2811_v48 }
 0xf03   :  { %v2808_v33 = vpop.xlane.xlu0 %2807 }
 0xf04   :  { %v2824_v15 = vmul.f32 1.442695, %v2819_v35  ;;  %v2818_v14 = vsub.f32 %v2802_v28, %v2808_v33 }
 0xf06   :  { %13801 = vpow2.f32 %v2824_v15  ;;  %v2822_v18 = vmul.f32 1.442695, %v2818_v14 }
 0xf08   :  { %13803 = vpow2.f32 %v2822_v18 }
 0xf13   :  { %v13802_v60 = vpop.eup %13801 }
 0xf14   :  { %v2833_v46 = vsel %vm16656_vm1, %v13802_v60, 0.0 }
 0xf15   :  { %v13804_v61 = vpop.eup %13803  ;;  %2834 = vadd.xlane.f32.xlu1 %v2833_v46 }
 0xf16   :  { %v2830_v12 = vsel %vm16656_vm1, %v13804_v61, 0.0 }
 0xf17   :  { %2831 = vadd.xlane.f32.xlu0 %v2830_v12  ;;  %v2814_v18 = vpop.xlane.xlu0 %2813 }
 0xf18   :  { %v2820_v14 = vsub.f32 %v2804_v17, %v2814_v18 }
 0xf1a   :  { %v2826_v2 = vmul.f32 1.442695, %v2820_v14 }
 0xf1b   :  { %v2817_v33 = vpop.xlane.xlu0 %2816 }
 0xf1c   :  { %v2821_v34 = vsub.f32 %v2805_v63, %v2817_v33  ;;  %13805 = vpow2.f32 %v2826_v2 }
 0xf1e   :  { %v2828_v30 = vmul.f32 1.442695, %v2821_v34 }
 0xf20   :  { %13807 = vpow2.f32 %v2828_v30 }
 0xf26   :  { %2939 = vrot.lane.b32.xlu1 %v14469_v11, %s14104_s14 }
 0xf29   :  { %v13806_v22 = vpop.eup %13805 }
 0xf2a   :  { %2850 = vrot.lane.b32.xlu1 %v14451_v55, %s14104_s14  ;;  %v2836_v28 = vsel %vm16656_vm1, %v13806_v22, 0.0 }
 0xf2d   :  { %2852 = vrot.lane.b32.xlu0 %v14441_v41, %s14104_s14  ;;  %v13808_v44 = vpop.eup %13807 }
 0xf2e   :  { %2937 = vrot.lane.b32.xlu1 %v14376_v40, %s14104_s14  ;;  %v2839_v20 = vsel %vm16656_vm1, %v13808_v44, 0.0 }
 0xf31   :  { %3030 = vrot.lane.b32.xlu0 %v14427_v29, %s14105_s6 }
 0xf32   :  { %3121 = vrot.lane.b32.xlu1 %v14463_v7, %s14105_s6 }
 0xf35   :  { %3028 = vrot.lane.b32.xlu0 %v14431_v32, %s14105_s6 }
 0xf36   :  { %3119 = vrot.lane.b32.xlu1 %v14472_v51, %s14105_s6 }
 0xf54   :  { %2837 = vadd.xlane.f32.xlu0 %v2836_v28 }
 0xf5a   :  { %2840 = vadd.xlane.f32.xlu1 %v2839_v20 }
 0xf6a   :  { %3024 = vrot.lane.b32.xlu0 %v14417_v6, %s14105_s6 }
 0xf6b   :  { %3026 = vrot.lane.b32.xlu1 %v14447_v47, %s14105_s6 }
 0xf6e   :  { %3115 = vrot.lane.b32.xlu0 %v14465_v50, %s14105_s6 }
 0xf6f   :  { %3117 = vrot.lane.b32.xlu1 %v14488_v13, %s14105_s6 }
 0xf9e   :  { %v2835_v63 = vpop.xlane.xlu1 %2834 }
 0xf9f   :  { %13809 = vrcp.f32 %v2835_v63 }
 0xfa0   :  { %v2832_v17 = vpop.xlane.xlu0 %2831 }
 0xfa1   :  { %13811 = vrcp.f32 %v2832_v17 }
 0xfa2   :  { %v2940_v48 = vpop.permute.xlu1 %2939 }
 0xfa3   :  { %13036 = vmatprep.subr.mxu1 %v2940_v48 }
 0xfa4   :  { %13037 = vmatpush3.msra.mxu1 %v2940_v48  ;;  %v2853_v35 = vpop.permute.xlu0 %2852 }
 0xfa5   :  { %13029 = vmatprep.subr.mxu0 %v2853_v35 }
 0xfa6   :  { %v2851_v15 = vpop.permute.xlu1 %2850  ;;  %13030 = vmatpush3.msra.mxu0 %v2853_v35 }
 0xfa7   :  { %13031 = vmatprep.subr.mxu0 %v2851_v15 }
 0xfa8   :  { %13032 = vmatpush3.msra.mxu0 %v2851_v15  ;;  %v3031_v46 = vpop.permute.xlu0 %3030 }
 0xfa9   :  { %13043 = vmatprep.subr.msk.mxu0 %vm16656_vm1, %v3031_v46 }
 0xfaa   :  { %v2938_v12 = vpop.permute.xlu1 %2937 }
 0xfab   :  { %13038 = vmatprep.subr.mxu1 %v2938_v12 }
 0xfac   :  { %13039 = vmatpush3.msra.mxu1 %v2938_v12  ;;  %v13810_v18 = vpop.eup %13809  ;;  %v3029_v30 = vpop.permute.xlu0 %3028 }
 0xfad   :  { %v14875_v34 = vmul.f32 %v13810_v18, %v13802_v60 }
 0xfae   :  { %v13812_v14 = vpop.eup %13811  ;;  %v3122_v33 = vpop.permute.xlu1 %3121 }
 0xfaf   :  { %13050 = vmatprep.subr.msk.mxu1 %vm16656_vm1, %v3122_v33  ;;  %v14873_v2 = vmul.f32 %v13812_v14, %v13804_v61  ;;  %16747 = vst [vmem:[#allocation53_spill] sm:$0xff] %v14875_v34 }
 0xfb1   :  { %16746 = vst [vmem:[#allocation52_spill] sm:$0xff] %v14873_v2  ;;  %13033 = vmatprep.mubr.msk.f32.mxu0 %vm16656_vm1, %v14873_v2 }
 0xfb2   :  { %13034 = vmatmul.mubr.msk.f32.vlgmr.msra.gmra.mxu0 %vm16656_vm1, %v14875_v34  ;;  %v3120_v20 = vpop.permute.xlu1 %3119 }
 0xfb3   :  { %13044 = vmatpush3.xpose.msk.msra.mxu0 %vm16656_vm1, %v3031_v46 }
 0xfb4   :  { %13045 = vmatprep.subr.msk.mxu0 %vm16656_vm1, %v3029_v30 }
 0xfb7   :  { %13046 = vmatpush3.xpose.msk.msra.mxu0 %vm16656_vm1, %v3029_v30 }
 0xfdd   :  { %v2838_v28 = vpop.xlane.xlu0 %2837 }
 0xfde   :  { %13813 = vrcp.f32 %v2838_v28  ;;  %v587_v28 = vld [vmem:[%s14175_s19 + $0x60] sm:$0xff] }
 0xfe1   :  { %v3025_v61 = vpop.permute.xlu0 %3024 }
 0xfe2   :  { %13047 = vmatprep.mubr.msk.f32.mxu0 %vm16656_vm1, %v3025_v61 }
 0xfe3   :  { %v2841_v60 = vpop.xlane.xlu1 %2840 }
 0xfe4   :  { %13815 = vrcp.f32 %v2841_v60 }
 0xfe5   :  { %v3116_v46 = vpop.permute.xlu0 %3115 }
 0xfe7   :  { %v3027_v63 = vpop.permute.xlu1 %3026 }
 0xfe8   :  { %13048 = vmatmul.mubr.msk.f32.vlgmr.msra.gmra.mxu0 %vm16656_vm1, %v3027_v63 }
 0xfeb   :  { %v13814_v17 = vpop.eup %13813 }
 0xfec   :  { %v14886_v48 = vmul.f32 %v13814_v17, %v13806_v22  ;;  %v3118_v22 = vpop.permute.xlu1 %3117 }
 0xfee   :  { %16748 = vst [vmem:[#allocation54_spill] sm:$0xff] %v14886_v48  ;;  %13040 = vmatprep.mubr.msk.f32.mxu1 %vm16656_vm1, %v14886_v48 }
 0xff1   :  { %v13816_v35 = vpop.eup %13815 }
 0xff2   :  { %v14890_v15 = vmul.f32 %v13816_v35, %v13808_v44  ;;  %v588_v44 = vld [vmem:[%s14175_s19 + $0x68] sm:$0xff] }
 0xff4   :  { %16749 = vst [vmem:[#allocation55_spill] sm:$0xff] %v14890_v15  ;;  %13041 = vmatmul.mubr.msk.f32.vlgmr.msra.gmra.mxu1 %vm16656_vm1, %v14890_v15 }
 0xff5   :  { %13051 = vmatpush3.xpose.msk.msra.mxu1 %vm16656_vm1, %v3122_v33  ;;  %13054 = vmatprep.mubr.msk.f32.mxu1 %vm16656_vm1, %v3116_v46 }
 0xff6   :  { %13052 = vmatprep.subr.msk.mxu1 %vm16656_vm1, %v3120_v20 }
 0xff9   :  { %13053 = vmatpush3.xpose.msk.msra.mxu1 %vm16656_vm1, %v3120_v20 }
 0xffc   :  { %13055 = vmatmul.mubr.msk.f32.vlgmr.msra.gmra.mxu1 %vm16656_vm1, %v3118_v22 }
0x1072   :  { %v14899_v12 = vpop.f32.mrf.mxu0 }
0x1074   :  { %v14901_v18 = vpop.f32.mrf.mxu0 }
0x10a8   :  { %v13049_v14 = vpop.f32.mrf.mxu0 }
0x10a9   :  { %v3207_v30 = vmul.f32 0.25, %v13049_v14 }
0x10aa   :  { %v3106_v61 = vpop.f32.mrf.mxu0 }
0x10ab   :  { %v3211_v60 = vadd.f32 %v3207_v30, %v588_v44  ;;  %v3206_v33 = vmul.f32 0.25, %v3106_v61 }
0x10ad   :  { %v3210_v63 = vadd.f32 %v3206_v33, %v587_v28  ;;  %v3217_v17 = vsel %vm16656_vm1, %v3211_v60, -inf }
0x10ae   :  { %3218 = vmax.xlane.f32.xlu1 %v3217_v17 }
0x10af   :  { %v3214_v20 = vsel %vm16656_vm1, %v3210_v63, -inf }
0x10b0   :  { %3215 = vmax.xlane.f32.xlu0 %v3214_v20 }
0x10b4   :  { %v14907_v35 = vpop.f32.mrf.mxu1 }
0x10b6   :  { %v14909_v46 = vpop.f32.mrf.mxu1 }
0x10bc   :  { %v13056_v22 = vpop.f32.mrf.mxu1 }
0x10bd   :  { %v3209_v2 = vmul.f32 0.25, %v13056_v22 }
0x10be   :  { %v3197_v48 = vpop.f32.mrf.mxu1 }
0x10bf   :  { %v3208_v15 = vmul.f32 0.25, %v3197_v48  ;;  %v3213_v34 = vadd.f32 %v3209_v2, %v588_v44 }
0x10c1   :  { %v3212_v14 = vadd.f32 %v3208_v15, %v587_v28  ;;  %v3223_v61 = vsel %vm16656_vm1, %v3213_v34, -inf }
0x10c3   :  { %v3220_v30 = vsel %vm16656_vm1, %v3212_v14, -inf }
0x10c4   :  { %3221 = vmax.xlane.f32.xlu0 %v3220_v30 }
0x10c8   :  { %3224 = vmax.xlane.f32.xlu0 %v3223_v61 }
0x1137   :  { %v3219_v33 = vpop.xlane.xlu1 %3218 }
0x1138   :  { %v3227_v17 = vsub.f32 %v3211_v60, %v3219_v33 }
0x1139   :  { %v3216_v36 = vpop.xlane.xlu0 %3215 }
0x113a   :  { %v3232_v20 = vmul.f32 1.442695, %v3227_v17  ;;  %v3226_v19 = vsub.f32 %v3210_v63, %v3216_v36 }
0x113c   :  { %13817 = vpow2.f32 %v3232_v20  ;;  %v3230_v21 = vmul.f32 1.442695, %v3226_v19 }
0x113e   :  { %13819 = vpow2.f32 %v3230_v21 }
0x1149   :  { %v13818_v5 = vpop.eup %13817 }
0x114a   :  { %v3241_v22 = vsel %vm16656_vm1, %v13818_v5, 0.0 }
0x114b   :  { %v13820_v48 = vpop.eup %13819  ;;  %3242 = vadd.xlane.f32.xlu1 %v3241_v22 }
0x114c   :  { %v3238_v2 = vsel %vm16656_vm1, %v13820_v48, 0.0 }
0x114d   :  { %3239 = vadd.xlane.f32.xlu0 %v3238_v2  ;;  %v3222_v21 = vpop.xlane.xlu0 %3221 }
0x114e   :  { %v3228_v19 = vsub.f32 %v3212_v14, %v3222_v21 }
0x1150   :  { %v3234_v15 = vmul.f32 1.442695, %v3228_v19 }
0x1151   :  { %v3225_v36 = vpop.xlane.xlu0 %3224 }
0x1152   :  { %v3229_v44 = vsub.f32 %v3213_v34, %v3225_v36  ;;  %13821 = vpow2.f32 %v3234_v15 }
0x1154   :  { %v3236_v28 = vmul.f32 1.442695, %v3229_v44 }
0x1156   :  { %13823 = vpow2.f32 %v3236_v28 }
0x115c   :  { %3347 = vrot.lane.b32.xlu1 %v14469_v11, %s14105_s6 }
0x115f   :  { %v13822_v60 = vpop.eup %13821 }
0x1160   :  { %3258 = vrot.lane.b32.xlu1 %v14451_v55, %s14105_s6 }
0x1163   :  { %3260 = vrot.lane.b32.xlu0 %v14441_v41, %s14105_s6  ;;  %v13824_v63 = vpop.eup %13823 }
0x1164   :  { %3345 = vrot.lane.b32.xlu1 %v14376_v40, %s14105_s6 }
0x1167   :  { %3438 = vrot.lane.b32.xlu0 %v14427_v29, %s14106_s20  ;;  %v3244_v29 = vsel %vm16656_vm1, %v13822_v60, 0.0 }
0x1168   :  { %3529 = vrot.lane.b32.xlu1 %v14463_v7, %s14106_s20  ;;  %v3247_v7 = vsel %vm16656_vm1, %v13824_v63, 0.0 }
0x116b   :  { %3436 = vrot.lane.b32.xlu0 %v14431_v32, %s14106_s20 }
0x116c   :  { %3527 = vrot.lane.b32.xlu1 %v14472_v51, %s14106_s20 }
0x118a   :  { %3245 = vadd.xlane.f32.xlu0 %v3244_v29 }
0x1190   :  { %3248 = vadd.xlane.f32.xlu1 %v3247_v7 }
0x11a0   :  { %3432 = vrot.lane.b32.xlu0 %v14417_v6, %s14106_s20 }
0x11a1   :  { %3434 = vrot.lane.b32.xlu1 %v14447_v47, %s14106_s20 }
0x11a4   :  { %3523 = vrot.lane.b32.xlu0 %v14465_v50, %s14106_s20 }
0x11a5   :  { %3525 = vrot.lane.b32.xlu1 %v14488_v13, %s14106_s20 }
0x11d4   :  { %v3243_v32 = vpop.xlane.xlu1 %3242 }
0x11d5   :  { %13825 = vrcp.f32 %v3243_v32 }
0x11d6   :  { %v3240_v51 = vpop.xlane.xlu0 %3239 }
0x11d7   :  { %13827 = vrcp.f32 %v3240_v51 }
0x11d8   :  { %v3348_v34 = vpop.permute.xlu1 %3347 }
0x11d9   :  { %13064 = vmatprep.subr.mxu1 %v3348_v34 }
0x11da   :  { %13065 = vmatpush3.msra.mxu1 %v3348_v34  ;;  %v3261_v14 = vpop.permute.xlu0 %3260  ;;  %v589_v34 = vld [vmem:[%s14175_s19 + $0x70] sm:$0xff] }
0x11db   :  { %13057 = vmatprep.subr.mxu0 %v3261_v14 }
0x11dc   :  { %v3259_v30 = vpop.permute.xlu1 %3258  ;;  %13058 = vmatpush3.msra.mxu0 %v3261_v14 }
0x11dd   :  { %13059 = vmatprep.subr.mxu0 %v3259_v30 }
0x11de   :  { %13060 = vmatpush3.msra.mxu0 %v3259_v30  ;;  %v3439_v6 = vpop.permute.xlu0 %3438 }
0x11df   :  { %13071 = vmatprep.subr.msk.mxu0 %vm16656_vm1, %v3439_v6 }
0x11e0   :  { %v3346_v47 = vpop.permute.xlu1 %3345 }
0x11e1   :  { %13066 = vmatprep.subr.mxu1 %v3346_v47 }
0x11e2   :  { %13067 = vmatpush3.msra.mxu1 %v3346_v47  ;;  %v13826_v50 = vpop.eup %13825  ;;  %v3437_v20 = vpop.permute.xlu0 %3436 }
0x11e3   :  { %v14945_v17 = vmul.f32 %v13826_v50, %v13818_v5 }
0x11e4   :  { %v13828_v13 = vpop.eup %13827  ;;  %v3530_v61 = vpop.permute.xlu1 %3529 }
0x11e5   :  { %13078 = vmatprep.subr.msk.mxu1 %vm16656_vm1, %v3530_v61  ;;  %v14943_v33 = vmul.f32 %v13828_v13, %v13820_v48  ;;  %16751 = vst [vmem:[#allocation57_spill] sm:$0xff] %v14945_v17 }
0x11e7   :  { %16750 = vst [vmem:[#allocation56_spill] sm:$0xff] %v14943_v33  ;;  %13061 = vmatprep.mubr.msk.f32.mxu0 %vm16656_vm1, %v14943_v33  ;;  %v15548_v33 = vld [vmem:[%s16801_s2 + $0x1] ss:$0 sm:$0xff] }
0x11e8   :  { %13062 = vmatmul.mubr.msk.f32.vlgmr.msra.gmra.mxu0 %vm16656_vm1, %v14945_v17  ;;  %v3528_v2 = vpop.permute.xlu1 %3527 }
0x11e9   :  { %13072 = vmatpush3.xpose.msk.msra.mxu0 %vm16656_vm1, %v3439_v6 }
0x11ea   :  { %13073 = vmatprep.subr.msk.mxu0 %vm16656_vm1, %v3437_v20 }
0x11ed   :  { %13074 = vmatpush3.xpose.msk.msra.mxu0 %vm16656_vm1, %v3437_v20 }
0x1213   :  { %v3246_v22 = vpop.xlane.xlu0 %3245 }
0x1214   :  { %13829 = vrcp.f32 %v3246_v22 }
0x1217   :  { %v3433_v48 = vpop.permute.xlu0 %3432 }
0x1218   :  { %13075 = vmatprep.mubr.msk.f32.mxu0 %vm16656_vm1, %v3433_v48 }
0x1219   :  { %v3249_v5 = vpop.xlane.xlu1 %3248 }
0x121a   :  { %13831 = vrcp.f32 %v3249_v5 }
0x121b   :  { %v3524_v28 = vpop.permute.xlu0 %3523 }
0x121d   :  { %v3435_v21 = vpop.permute.xlu1 %3434 }
0x121e   :  { %13076 = vmatmul.mubr.msk.f32.vlgmr.msra.gmra.mxu0 %vm16656_vm1, %v3435_v21 }
0x1221   :  { %v13830_v19 = vpop.eup %13829 }
0x1222   :  { %v14956_v36 = vmul.f32 %v13830_v19, %v13822_v60  ;;  %v3526_v60 = vpop.permute.xlu1 %3525 }
0x1224   :  { %16752 = vst [vmem:[#allocation58_spill] sm:$0xff] %v14956_v36  ;;  %13068 = vmatprep.mubr.msk.f32.mxu1 %vm16656_vm1, %v14956_v36  ;;  %v15545_v36 = vld [vmem:[%s16801_s2] ss:$0 sm:$0xff] }
0x1227   :  { %v13832_v15 = vpop.eup %13831 }
0x1228   :  { %v14960_v44 = vmul.f32 %v13832_v15, %v13824_v63  ;;  %v590_v63 = vld [vmem:[%s14175_s19 + $0x78] sm:$0xff]  ;;  %s16794_s19 = sld [smem:[#allocation27_spill]] }
0x122a   :  { %16753 = vst [vmem:[#allocation59_spill] sm:$0xff] %v14960_v44  ;;  %13069 = vmatmul.mubr.msk.f32.vlgmr.msra.gmra.mxu1 %vm16656_vm1, %v14960_v44 }
0x122b   :  { %13079 = vmatpush3.xpose.msk.msra.mxu1 %vm16656_vm1, %v3530_v61  ;;  %13082 = vmatprep.mubr.msk.f32.mxu1 %vm16656_vm1, %v3524_v28 }
0x122c   :  { %13080 = vmatprep.subr.msk.mxu1 %vm16656_vm1, %v3528_v2 }
0x122f   :  { %13081 = vmatpush3.xpose.msk.msra.mxu1 %vm16656_vm1, %v3528_v2 }
0x1232   :  { %13083 = vmatmul.mubr.msk.f32.vlgmr.msra.gmra.mxu1 %vm16656_vm1, %v3526_v60 }
0x12a8   :  { %v14969_v29 = vpop.f32.mrf.mxu0 }
0x12aa   :  { %v14971_v7 = vpop.f32.mrf.mxu0 }
0x12de   :  { %v13077_v32 = vpop.f32.mrf.mxu0 }
0x12df   :  { %v3615_v51 = vmul.f32 0.25, %v13077_v32 }
0x12e0   :  { %v3514_v14 = vpop.f32.mrf.mxu0 }
0x12e1   :  { %v3619_v30 = vadd.f32 %v3615_v51, %v590_v63  ;;  %v3614_v6 = vmul.f32 0.25, %v3514_v14 }
0x12e3   :  { %v3618_v47 = vadd.f32 %v3614_v6, %v589_v34  ;;  %v3625_v50 = vsel %vm16656_vm1, %v3619_v30, -inf }
0x12e4   :  { %3626 = vmax.xlane.f32.xlu1 %v3625_v50 }
0x12e5   :  { %v3622_v13 = vsel %vm16656_vm1, %v3618_v47, -inf }
0x12e6   :  { %3623 = vmax.xlane.f32.xlu0 %v3622_v13 }
0x12ea   :  { %v14977_v61 = vpop.f32.mrf.mxu1 }
0x12ec   :  { %v14979_v20 = vpop.f32.mrf.mxu1 }
0x12f2   :  { %v13084_v22 = vpop.f32.mrf.mxu1 }
0x12f3   :  { %v3617_v48 = vmul.f32 0.25, %v13084_v22 }
0x12f4   :  { %v3605_v2 = vpop.f32.mrf.mxu1 }
0x12f5   :  { %v3616_v5 = vmul.f32 0.25, %v3605_v2  ;;  %v3621_v19 = vadd.f32 %v3617_v48, %v590_v63 }
0x12f7   :  { %v3620_v21 = vadd.f32 %v3616_v5, %v589_v34  ;;  %v3631_v28 = vsel %vm16656_vm1, %v3621_v19, -inf }
0x12f9   :  { %v3628_v15 = vsel %vm16656_vm1, %v3620_v21, -inf }
0x12fa   :  { %3629 = vmax.xlane.f32.xlu0 %v3628_v15 }
0x12fe   :  { %3632 = vmax.xlane.f32.xlu0 %v3631_v28 }
0x136d   :  { %v3627_v60 = vpop.xlane.xlu1 %3626 }
0x136e   :  { %v3635_v32 = vsub.f32 %v3619_v30, %v3627_v60 }
0x136f   :  { %v3624_v51 = vpop.xlane.xlu0 %3623 }
0x1370   :  { %v3640_v14 = vmul.f32 1.442695, %v3635_v32  ;;  %v3634_v6 = vsub.f32 %v3618_v47, %v3624_v51 }
0x1372   :  { %13833 = vpow2.f32 %v3640_v14  ;;  %v3638_v50 = vmul.f32 1.442695, %v3634_v6  ;;  %v13451_v14 = vld [vmem:[%s14155_s29 + $0x28] sm:$0xff]   ;;  %v13452_v6 = vld [vmem:[%s14155_s29 + $0x20] sm:$0xff]  }
0x1374   :  { %13835 = vpow2.f32 %v3638_v50  ;;  %v13453_v50 = vld [vmem:[%s14155_s29 + $0x18] sm:$0xff]  }
0x137f   :  { %v14983_v13 = vpop.eup %13833 }
0x1380   :  { %v3649_v34 = vsel %vm16656_vm1, %v14983_v13, 0.0 }
0x1381   :  { %v13836_v63 = vpop.eup %13835  ;;  %3650 = vadd.xlane.f32.xlu1 %v3649_v34  ;;  %v13455_v34 = vld [vmem:[%s14155_s29 + $0x8] sm:$0xff]  }
0x1382   :  { %v3646_v22 = vsel %vm16656_vm1, %v13836_v63, 0.0 }
0x1383   :  { %v3630_v2 = vpop.xlane.xlu0 %3629  ;;  %3647 = vadd.xlane.f32.xlu0 %v3646_v22 }
0x1384   :  { %v3636_v48 = vsub.f32 %v3620_v21, %v3630_v2  ;;  %v13295_v21 = vpack.i.bf16 %v14619_v56, %v14621_v52  ;;  %v13325_v56 = vpack.i.bf16 %v14829_v23, %v14831_v26  ;;  %v13335_v52 = vpack.i.bf16 %v14899_v12, %v14901_v18 }
0x1386   :  { %v3642_v5 = vmul.f32 1.442695, %v3636_v48 }
0x1387   :  { %v3633_v30 = vpop.xlane.xlu0 %3632 }
0x1388   :  { %13837 = vpow2.f32 %v3642_v5  ;;  %v3637_v15 = vsub.f32 %v3621_v19, %v3633_v30  ;;  %v13305_v19 = vpack.i.bf16 %v14689_v45, %v14691_v59  ;;  %v13340_v45 = vpack.i.bf16 %v14907_v35, %v14909_v46 }
0x1389   :  { %v13350_v59 = vpack.i.bf16 %v14977_v61, %v14979_v20  ;;  %v13449_v61 = vld [vmem:[%s14155_s29 + $0x38] sm:$0xff]   ;;  %v13450_v20 = vld [vmem:[%s14155_s29 + $0x30] sm:$0xff]  }
0x138a   :  { %v3644_v47 = vmul.f32 1.442695, %v3637_v15 }
0x138c   :  { %13839 = vpow2.f32 %v3644_v47 }
0x1395   :  { %v13838_v28 = vpop.eup %13837 }
0x1396   :  { %v3652_v60 = vsel %vm16656_vm1, %v13838_v28, 0.0 }
0x1397   :  { %3653 = vadd.xlane.f32.xlu0 %v3652_v60 }
0x1399   :  { %v13840_v32 = vpop.eup %13839 }
0x139a   :  { %v3655_v51 = vsel %vm16656_vm1, %v13840_v32, 0.0 }
0x139b   :  { %3656 = vadd.xlane.f32.xlu1 %v3655_v51 }
0x13ac   :  { %3755 = vrot.lane.b32.xlu1 %v14469_v11, %s14106_s20  ;;  %v13300_v11 = vpack.i.bf16 %v14627_v39, %v14629_v42  ;;  %v13330_v39 = vpack.i.bf16 %v14837_v38, %v14839_v37  ;;  %v13345_v42 = vpack.i.bf16 %v14969_v29, %v14971_v7 }
0x13ad   :  { %3668 = vrot.lane.b32.xlu0 %v14441_v41, %s14106_s20  ;;  %v13315_v41 = vpack.i.bf16 %v14759_v10, %v14761_v62 }
0x13b0   :  { %3666 = vrot.lane.b32.xlu1 %v14451_v55, %s14106_s20  ;;  %v13310_v55 = vpack.i.bf16 %v14697_v16, %v14699_v24 }
0x13b1   :  { %13296 = vrot.lane.b32.xlu0 %v13295_v21, %s14106_s20 }
0x13b4   :  { %3753 = vrot.lane.b32.xlu1 %v14376_v40, %s14106_s20  ;;  %v13320_v40 = vpack.i.bf16 %v14767_v58, %v14769_v27 }
0x13b5   :  { %13306 = vrot.lane.b32.xlu0 %v13305_v19, %s14105_s6 }
0x13b8   :  { %13301 = vrot.lane.b32.xlu1 %v13300_v11, %s14106_s20 }
0x13b9   :  { %13316 = vrot.lane.b32.xlu0 %v13315_v41, %s14104_s14 }
0x13bc   :  { %13311 = vrot.lane.b32.xlu1 %v13310_v55, %s14105_s6 }
0x13bd   :  { %13326 = vrot.lane.b32.xlu0 %v13325_v56, %s14095_s23 }
0x13c0   :  { %13321 = vrot.lane.b32.xlu1 %v13320_v40, %s14104_s14 }
0x13c1   :  { %13336 = vrot.lane.b32.xlu0 %v13335_v52, %s14103_s8 }
0x13c4   :  { %13331 = vrot.lane.b32.xlu1 %v13330_v39, %s14095_s23 }
0x13c5   :  { %13346 = vrot.lane.b32.xlu0 %v13345_v42, %s14102_s25 }
0x13c8   :  { %13341 = vrot.lane.b32.xlu1 %v13340_v45, %s14103_s8 }
0x13cc   :  { %13351 = vrot.lane.b32.xlu1 %v13350_v59, %s14102_s25 }
0x140a   :  { %v3651_v10 = vpop.xlane.xlu1 %3650 }
0x140c   :  { %v3648_v16 = vpop.xlane.xlu0 %3647 }
0x140d   :  { %13841 = vrcp.f32 %v3648_v16 }
0x140e   :  { %13843 = vrcp.f32 %v3651_v10 }
0x141a   :  { %v13842_v24 = vpop.eup %13841 }
0x141b   :  { %v15034_v62 = vmul.f32 %v13842_v24, %v13836_v63  ;;  %v13844_v38 = vpop.eup %13843  ;;  %v13456_v63 = vld [vmem:[%s14155_s29] sm:$0xff]  }
0x141c   :  { %v15039_v12 = vmul.f32 %v13844_v38, %v14983_v13  ;;  %v13454_v13 = vld [vmem:[%s14155_s29 + $0x10] sm:$0xff]   ;;  %s16759_s29 = sld [smem:[#allocation18_spill]] }
0x141d   :  { %16754 = vst [vmem:[#allocation60_spill] sm:$0xff] %v15034_v62  ;;  %13089 = vmatprep.mubr.msk.f32.mxu0 %vm16656_vm1, %v15034_v62 }
0x141e   :  { %16755 = vst [vmem:[#allocation61_spill] sm:$0xff] %v15039_v12 }
0x1420   :  { %v3654_v58 = vpop.xlane.xlu0 %3653 }
0x1421   :  { %13845 = vrcp.f32 %v3654_v58 }
0x1424   :  { %v3657_v27 = vpop.xlane.xlu1 %3656  ;;  %v3669_v23 = vpop.permute.xlu0 %3668 }
0x1425   :  { %13847 = vrcp.f32 %v3657_v27  ;;  %13085 = vmatprep.subr.mxu0 %v3669_v23 }
0x1426   :  { %13086 = vmatpush3.msra.mxu0 %v3669_v23 }
0x1428   :  { %v3756_v26 = vpop.permute.xlu1 %3755  ;;  %v13297_v47 = vpop.permute.xlu0 %13296 }
0x1429   :  { %13092 = vmatprep.subr.mxu1 %v3756_v26  ;;  %v13299_v55 = vunpack.i.h.bf16 %v13297_v47  ;;  %v13298_v56 = vunpack.i.l.bf16 %v13297_v47 }
0x142a   :  { %13093 = vmatpush3.msra.mxu1 %v3756_v26 }
0x142b   :  { %v4075_v42 = vsel %vm16656_vm1, %v14553_v49, %v13299_v55  ;;  %v4074_v16 = vsel %vm16656_vm1, %v14555_v54, %v13298_v56 }
0x142c   :  { %v3667_v37 = vpop.permute.xlu1 %3666 }
0x142d   :  { %13087 = vmatprep.subr.mxu0 %v3667_v37 }
0x142e   :  { %v13846_v18 = vpop.eup %13845  ;;  %13088 = vmatpush3.msra.mxu0 %v3667_v37 }
0x142f   :  { %13090 = vmatmul.mubr.msk.f32.vlgmr.msra.gmra.mxu0 %vm16656_vm1, %v15039_v12  ;;  %v15043_v35 = vmul.f32 %v13846_v18, %v13838_v28  ;;  %13099 = vmatprep.subr.bf16.mxu0 %v13449_v61  ;;  %v13307_v28 = vpop.permute.xlu0 %13306 }
0x1430   :  { %v3754_v46 = vpop.permute.xlu1 %3753  ;;  %13100 = vmatpush3.bf16.msra.mxu0 %v13449_v61  ;;  %v13308_v40 = vunpack.i.l.bf16 %v13307_v28  ;;  %v13309_v52 = vunpack.i.h.bf16 %v13307_v28 }
0x1431   :  { %16756 = vst [vmem:[#allocation62_spill] sm:$0xff] %v15043_v35  ;;  %13094 = vmatprep.subr.mxu1 %v3754_v46  ;;  %13096 = vmatprep.mubr.msk.f32.mxu1 %vm16656_vm1, %v15043_v35 }
0x1432   :  { %v13848_v29 = vpop.eup %13847  ;;  %13095 = vmatpush3.msra.mxu1 %v3754_v46  ;;  %13101 = vmatprep.subr.bf16.mxu0 %v13450_v20  ;;  %v4078_v26 = vsel %vm16655_vm2, %v4074_v16, %v13308_v40  ;;  %v4079_v46 = vsel %vm16655_vm2, %v4075_v42, %v13309_v52 }
0x1433   :  { %v15047_v7 = vmul.f32 %v13848_v29, %v13840_v32  ;;  %v13317_v32 = vpop.permute.xlu0 %13316 }
0x1434   :  { %13102 = vmatpush3.bf16.msra.mxu0 %v13450_v20  ;;  %v13302_v60 = vpop.permute.xlu1 %13301  ;;  %v13318_v39 = vunpack.i.l.bf16 %v13317_v32  ;;  %v13319_v45 = vunpack.i.h.bf16 %v13317_v32 }
0x1435   :  { %16757 = vst [vmem:[#allocation63_spill] sm:$0xff] %v15047_v7  ;;  %13097 = vmatmul.mubr.msk.f32.vlgmr.msra.gmra.mxu1 %vm16656_vm1, %v15047_v7  ;;  %13103 = vmatprep.subr.bf16.mxu0 %v13451_v14  ;;  %v13304_v59 = vunpack.i.h.bf16 %v13302_v60  ;;  %v13303_v24 = vunpack.i.l.bf16 %v13302_v60 }
0x1436   :  { %v4082_v49 = vsel %vm16654_vm3, %v4078_v26, %v13318_v39  ;;  %v4083_v29 = vsel %vm16654_vm3, %v4079_v46, %v13319_v45  ;;  %v11585_v46 = vld [vmem:[%s14160_s3] ss:$0 sm:$0xff]  ;;  %s16760_s3 = sld [smem:[#allocation19_spill]] }
0x1437   :  { %v13327_v21 = vpop.permute.xlu0 %13326  ;;  %v4077_v54 = vsel %vm16656_vm1, %v14557_v43, %v13304_v59 }
0x1438   :  { %13104 = vmatpush3.bf16.msra.mxu0 %v13451_v14  ;;  %v13312_v51 = vpop.permute.xlu1 %13311  ;;  %v13329_v10 = vunpack.i.h.bf16 %v13327_v21  ;;  %v13328_v58 = vunpack.i.l.bf16 %v13327_v21  ;;  %v4076_v14 = vsel %vm16656_vm1, %v14559_v57, %v13303_v24 }
0x1439   :  { %13105 = vmatprep.subr.bf16.mxu0 %v13452_v6  ;;  %v13313_v38 = vunpack.i.l.bf16 %v13312_v51 }
0x143b   :  { %v13337_v11 = vpop.permute.xlu0 %13336 }
0x143c   :  { %13106 = vmatpush3.bf16.msra.mxu0 %v13452_v6  ;;  %v13322_v19 = vpop.permute.xlu1 %13321  ;;  %v13339_v37 = vunpack.i.h.bf16 %v13337_v11  ;;  %v13338_v18 = vunpack.i.l.bf16 %v13337_v11  ;;  %v4086_v6 = vsel %vm16653_vm4, %v4082_v49, %v13328_v58 }
0x143d   :  { %13107 = vmatprep.subr.bf16.mxu0 %v13453_v50  ;;  %v13323_v43 = vunpack.i.l.bf16 %v13322_v19 }
0x143f   :  { %v13347_v27 = vpop.permute.xlu0 %13346 }
0x1440   :  { %13108 = vmatpush3.bf16.msra.mxu0 %v13453_v50  ;;  %v13332_v41 = vpop.permute.xlu1 %13331  ;;  %v13349_v61 = vunpack.i.h.bf16 %v13347_v27  ;;  %v13348_v20 = vunpack.i.l.bf16 %v13347_v27  ;;  %v4087_v50 = vsel %vm16653_vm4, %v4083_v29, %v13329_v10 }
0x1441   :  { %13109 = vmatprep.subr.bf16.mxu0 %v13454_v13  ;;  %v13334_v47 = vunpack.i.h.bf16 %v13332_v41  ;;  %v13333_v57 = vunpack.i.l.bf16 %v13332_v41 }
0x1444   :  { %13110 = vmatpush3.bf16.msra.mxu0 %v13454_v13  ;;  %v13342_v23 = vpop.permute.xlu1 %13341  ;;  %v13314_v13 = vunpack.i.h.bf16 %v13312_v51 }
0x1445   :  { %13111 = vmatprep.subr.bf16.mxu0 %v13455_v34  ;;  %v13344_v32 = vunpack.i.h.bf16 %v13342_v23  ;;  %v13343_v51 = vunpack.i.l.bf16 %v13342_v23 }
0x1446   :  { %v4081_v55 = vsel %vm16655_vm2, %v4077_v54, %v13314_v13 }
0x1448   :  { %13112 = vmatpush3.bf16.msra.mxu0 %v13455_v34  ;;  %v4080_v34 = vsel %vm16655_vm2, %v4076_v14, %v13313_v38 }
0x1449   :  { %13113 = vmatprep.subr.bf16.mxu0 %v13456_v63  ;;  %v4084_v52 = vsel %vm16654_vm3, %v4080_v34, %v13323_v43  ;;  %v4847_v43 = vld [vmem:[#allocation2 + $0x3c0] sm:$0xff] }
0x144a   :  { %v4088_v41 = vsel %vm16653_vm4, %v4084_v52, %v13333_v57  ;;  %v4823_v52 = vld [vmem:[#allocation2 + $0x300] sm:$0xff] }
0x144b   :  { %v4092_v59 = vsel %vm16652_vm5, %v4088_v41, %v13343_v51 }
0x144c   :  { %13114 = vmatpush3.bf16.msra.mxu0 %v13456_v63  ;;  %v4090_v63 = vsel %vm16652_vm5, %v4086_v6, %v13338_v18 }
0x144d   :  { %v4094_v28 = vsel %vm16651_vm6, %v4090_v63, %v13348_v20 }
0x14ef   :  { %v13091_v22 = vpop.f32.mrf.mxu0 }
0x14f1   :  { %v3744_v2 = vpop.f32.mrf.mxu0 }
0x14f2   :  { %v13355_v48 = vpack.i.bf16 %v13091_v22, %v3744_v2  ;;  %v4091_v22 = vsel %vm16652_vm5, %v4087_v50, %v13339_v37  ;;  %v16758_v37 = vmov 0  }
0x14f3   :  { %v4095_v60 = vsel %vm16651_vm6, %v4091_v22, %v13349_v61  ;;  %v4303_v22 = vld [vmem:[%s14180_s24 + $0x78] sm:$0xff] }
0x14f4   :  { %13356 = vrot.lane.b32.xlu0 %v13355_v48, %s14101_s21  ;;  %v13324_v48 = vunpack.i.h.bf16 %v13322_v19  ;;  %13119 = vmatprep.subr.mxu1 %v4303_v22 }
0x14f5   :  { %v13098_v5 = vpop.f32.mrf.mxu1  ;;  %13120 = vmatpush3.msra.mxu1 %v4303_v22  ;;  %v4743_v22 = vld [vmem:[#allocation2 + $0x80] sm:$0xff] }
0x14f6   :  { %v4085_v39 = vsel %vm16654_vm3, %v4081_v55, %v13324_v48  ;;  %v4839_v48 = vld [vmem:[#allocation2 + $0x380] sm:$0xff] }
0x14f7   :  { %v3831_v30 = vpop.f32.mrf.mxu1  ;;  %v4089_v42 = vsel %vm16653_vm4, %v4085_v39, %v13334_v47  ;;  %v4831_v39 = vld [vmem:[#allocation2 + $0x340] sm:$0xff] }
0x14f8   :  { %v13360_v15 = vpack.i.bf16 %v13098_v5, %v3831_v30  ;;  %v13352_v5 = vpop.permute.xlu1 %13351  ;;  %v4093_v16 = vsel %vm16652_vm5, %v4089_v42, %v13344_v32  ;;  %v11712_v41 = vcombine.high %v4823_v52, %v4831_v39  ;;  %v4300_v42 = vld [vmem:[%s14180_s24 + $0x60] sm:$0xff] }
0x14f9   :  { %v13354_v56 = vunpack.i.h.bf16 %v13352_v5  ;;  %v13353_v40 = vunpack.i.l.bf16 %v13352_v5  ;;  %v11728_v5 = vcombine.high %v4839_v48, %v4847_v43 }
0x14fa   :  { %13361 = vrot.lane.b32.xlu1 %v13360_v15, %s14101_s21 }
0x14fb   :  { %v4096_v58 = vsel %vm16651_vm6, %v4092_v59, %v13353_v40  ;;  %v4097_v27 = vsel %vm16651_vm6, %v4093_v16, %v13354_v56  ;;  %5579 = vmatprep.subr.bf16.mxu0 %v11728_v5  ;;  %v4299_v59 = vld [vmem:[%s14180_s24 + $0x58] sm:$0xff]  ;;  %v4807_v16 = vld [vmem:[#allocation2 + $0x280] sm:$0xff]  ;;  %vm16659_vm6 = vcmp.gt.s32.totalorder %v14406_v53, 2 }
0x14fc   :  { %v4291_v5 = vld [vmem:[%s14180_s24 + $0x18] sm:$0xff] }
0x1566   :  { %v13357_v2 = vpop.permute.xlu0 %13356 }
0x1567   :  { %v13359_v30 = vunpack.i.h.bf16 %v13357_v2  ;;  %v13358_v15 = vunpack.i.l.bf16 %v13357_v2  ;;  %v4302_v2 = vld [vmem:[%s14180_s24 + $0x70] sm:$0xff] }
0x1568   :  { %13121 = vmatprep.subr.mxu1 %v4302_v2 }
0x1569   :  { %v4098_v21 = vsel %vm16650_vm7, %v4094_v28, %v13358_v15  ;;  %v4099_v11 = vsel %vm16650_vm7, %v4095_v60, %v13359_v30  ;;  %v4301_v30 = vld [vmem:[%s14180_s24 + $0x68] sm:$0xff]  ;;  %13122 = vmatpush3.msra.mxu1 %v4302_v2  ;;  %v4751_v2 = vld [vmem:[#allocation2 + $0xc0] sm:$0xff] }
0x156a   :  { %v4102_v19 = vpack.c.bf16 %v4099_v11, %v4098_v21  ;;  %13123 = vmatprep.subr.mxu1 %v4301_v30 }
0x156b   :  { %13124 = vmatpush3.msra.mxu1 %v4301_v30  ;;  %v4290_v30 = vld [vmem:[%s14180_s24 + $0x10] sm:$0xff] }
0x156c   :  { %v13362_v45 = vpop.permute.xlu1 %13361  ;;  %13115 = vmatprep.mubr.bf16.mxu0 %v4102_v19  ;;  %13125 = vmatprep.subr.mxu1 %v4300_v42 }
0x156d   :  { %v13364_v24 = vunpack.i.h.bf16 %v13362_v45  ;;  %v13363_v10 = vunpack.i.l.bf16 %v13362_v45  ;;  %v11711_v45 = vcombine.low %v4823_v52, %v4831_v39  ;;  %13126 = vmatpush3.msra.mxu1 %v4300_v42  ;;  %v4849_v52 = vld [vmem:[#allocation2 + $0x3d0] sm:$0xff] }
0x156e   :  { %13127 = vmatprep.subr.mxu1 %v4299_v59 }
0x156f   :  { %v4101_v23 = vsel %vm16650_vm7, %v4097_v27, %v13364_v24  ;;  %v4100_v26 = vsel %vm16650_vm7, %v4096_v58, %v13363_v10  ;;  %v4815_v24 = vld [vmem:[#allocation2 + $0x2c0] sm:$0xff]  ;;  %13128 = vmatpush3.msra.mxu1 %v4299_v59  ;;  %v4298_v58 = vld [vmem:[%s14180_s24 + $0x50] sm:$0xff] }
0x1570   :  { %v4103_v38 = vpack.c.bf16 %v4101_v23, %v4100_v26  ;;  %v11696_v10 = vcombine.high %v4807_v16, %v4815_v24  ;;  %v11695_v27 = vcombine.low %v4807_v16, %v4815_v24  ;;  %13129 = vmatprep.subr.mxu1 %v4298_v58  ;;  %v4297_v23 = vld [vmem:[%s14180_s24 + $0x48] sm:$0xff]  ;;  %v4791_v26 = vld [vmem:[#allocation2 + $0x200] sm:$0xff] }
0x1571   :  { %13130 = vmatpush3.msra.mxu1 %v4298_v58 }
0x1572   :  { %13116 = vmatmul.mubr.bf16.vlgmr.msra.gmra.mxu0 %v4103_v38  ;;  %v4799_v38 = vld [vmem:[#allocation2 + $0x240] sm:$0xff]  ;;  %13131 = vmatprep.subr.mxu1 %v4297_v23 }
0x1573   :  { %5611 = vmatprep.mubr.bf16.mxu0 %v16758_v37  ;;  %13132 = vmatpush3.msra.mxu1 %v4297_v23 }
0x1632   :  { %v13117_v18 = vpop.f32.mrf.mxu0 }
0x1633   :  { %v4218_v61 = vadd.f32 %v13117_v18, %v11585_v46  ;;  %v11680_v18 = vcombine.high %v4791_v26, %v4799_v38 }
0x1634   :  { %v4209_v49 = vpop.f32.mrf.mxu0 }
0x1635   :  { %v4210_v29 = vadd.f32 %v11585_v46, %v4209_v49  ;;  %v4226_v50 = vadd.f32 %v4218_v61, %v14287_v4  ;;  %v11679_v49 = vcombine.low %v4791_v26, %v4799_v38  ;;  %v4783_v61 = vld [vmem:[#allocation2 + $0x1c0] sm:$0xff] }
0x1636   :  { %v13118_v54 = vpop.f32.mrf.mxu0 }
0x1637   :  { %v4224_v20 = vadd.f32 %v4210_v29, %v14285_v3  ;;  %v4221_v13 = vadd.f32 %v13118_v54, %v11585_v46  ;;  %v11727_v3 = vcombine.low %v4839_v48, %v4847_v43  ;;  %v4295_v29 = vld [vmem:[%s14180_s24 + $0x38] sm:$0xff]  ;;  %v4775_v54 = vld [vmem:[#allocation2 + $0x180] sm:$0xff] }
0x1638   :  { %v4212_v14 = vpop.f32.mrf.mxu0  ;;  %v4292_v48 = vld [vmem:[%s14180_s24 + $0x20] sm:$0xff] }
0x1639   :  { %v4213_v6 = vadd.f32 %v11585_v46, %v4212_v14  ;;  %4228 = vadd.xlane.f32.xlu0 %v4224_v20  ;;  %v4227_v63 = vadd.f32 %v4221_v13, %v14296_v9  ;;  %5580 = vmatpush1.bf16.msra.mxu0 %v11727_v3  ;;  %v4296_v46 = vld [vmem:[%s14180_s24 + $0x40] sm:$0xff]  ;;  %v11663_v14 = vcombine.low %v4775_v54, %v4783_v61 }
0x163a   :  { %5581 = vmatprep.subr.bf16.mxu0 %v11712_v41  ;;  %13133 = vmatprep.subr.mxu1 %v4296_v46  ;;  %v4759_v13 = vld [vmem:[#allocation2 + $0x100] sm:$0xff]  ;;  %v11632_v3 = vcombine.high %v4743_v22, %v4751_v2 }
0x163b   :  { %v4225_v34 = vadd.f32 %v4213_v6, %v14294_v8  ;;  %13134 = vmatpush3.msra.mxu1 %v4296_v46  ;;  %v11664_v6 = vcombine.high %v4775_v54, %v4783_v61  ;;  %v13929_v46 = vld [vmem:[%s14135_s13] sm:$0x7] }
0x163c   :  { %13135 = vmatprep.subr.mxu1 %v4295_v29  ;;  %v13930_v61 = vld [vmem:[%s14140_s17] sm:$0x7] }
0x163d   :  { %4230 = vadd.xlane.f32.xlu1 %v4225_v34  ;;  %4232 = vadd.xlane.f32.xlu0 %v4226_v50 }
0x163e   :  { %5582 = vmatpush1.bf16.msra.mxu0 %v11711_v45  ;;  %13136 = vmatpush3.msra.mxu1 %v4295_v29 }
0x163f   :  { %5583 = vmatprep.subr.bf16.mxu0 %v11696_v10 }
0x1641   :  { %4234 = vadd.xlane.f32.xlu0 %v4227_v63 }
0x1642   :  { %5584 = vmatpush1.bf16.msra.mxu0 %v11695_v27 }
0x1643   :  { %5585 = vmatprep.subr.bf16.mxu0 %v11680_v18 }
0x1646   :  { %5586 = vmatpush1.bf16.msra.mxu0 %v11679_v49  ;;  %v4275_v49 = vrot.slane %v13929_v46, %v14365_v31 }
0x1647   :  { %5587 = vmatprep.subr.bf16.mxu0 %v11664_v6 }
0x164a   :  { %5588 = vmatpush1.bf16.msra.mxu0 %v11663_v14 }
0x16c2   :  { %v4229_v4 = vpop.xlane.xlu0 %4228 }
0x16c3   :  { %v4236_v8 = vmul.f32 0.0078125, %v4229_v4  ;;  %v11631_v4 = vcombine.low %v4743_v22, %v4751_v2  ;;  %v4824_v22 = vld [vmem:[#allocation2 + $0x308] sm:$0xff] }
0x16c4   :  { %v4832_v2 = vld [vmem:[#allocation2 + $0x348] sm:$0xff] }
0x16c5   :  { %v15102_v15 = vsub.f32 %v4224_v20, %v4236_v8  ;;  %v4294_v20 = vld [vmem:[%s14180_s24 + $0x30] sm:$0xff]  ;;  %v4289_v8 = vld [vmem:[%s14180_s24 + $0x8] sm:$0xff] }
0x16c6   :  { %v4231_v9 = vpop.xlane.xlu1 %4230  ;;  %v4233_v47 = vpop.xlane.xlu0 %4232  ;;  %13137 = vmatprep.subr.mxu1 %v4294_v20 }
0x16c7   :  { %v4237_v57 = vmul.f32 0.0078125, %v4231_v9  ;;  %v4238_v28 = vmul.f32 0.0078125, %v4233_v47  ;;  %v4244_v60 = vmul.f32 %v15102_v15, %v15102_v15  ;;  %13138 = vmatpush3.msra.mxu1 %v4294_v20  ;;  %v4727_v9 = vld [vmem:[#allocation2] sm:$0xff]  ;;  %v4283_v20 = vrot.slane %v13930_v61, %v14365_v31 }
0x16c8   :  { %v4735_v47 = vld [vmem:[#allocation2 + $0x40] sm:$0xff] }
0x16c9   :  { %v15106_v32 = vsub.f32 %v4225_v34, %v4237_v57  ;;  %v15108_v51 = vsub.f32 %v4226_v50, %v4238_v28  ;;  %4248 = vadd.xlane.f32.xlu0 %v4244_v60  ;;  %v4293_v50 = vld [vmem:[%s14180_s24 + $0x28] sm:$0xff]  ;;  %v4767_v34 = vld [vmem:[#allocation2 + $0x140] sm:$0xff]  ;;  %v11616_v57 = vcombine.high %v4727_v9, %v4735_v47  ;;  %v11615_v60 = vcombine.low %v4727_v9, %v4735_v47 }
0x16ca   :  { %v4235_v21 = vpop.xlane.xlu0 %4234  ;;  %v11647_v43 = vcombine.low %v4759_v13, %v4767_v34  ;;  %13139 = vmatprep.subr.mxu1 %v4293_v50  ;;  %v4288_v28 = vld [vmem:[%s14180_s24] sm:$0xff]  ;;  %v4808_v47 = vld [vmem:[#allocation2 + $0x288] sm:$0xff] }
0x16cb   :  { %v4239_v11 = vmul.f32 0.0078125, %v4235_v21  ;;  %v4245_v55 = vmul.f32 %v15106_v32, %v15106_v32  ;;  %v4246_v56 = vmul.f32 %v15108_v51, %v15108_v51  ;;  %13140 = vmatpush3.msra.mxu1 %v4293_v50  ;;  %v4840_v21 = vld [vmem:[#allocation2 + $0x388] sm:$0xff] }
0x16cc   :  { %13141 = vmatprep.subr.mxu1 %v4292_v48 }
0x16cd   :  { %v15114_v40 = vsub.f32 %v4227_v63, %v4239_v11  ;;  %4250 = vadd.xlane.f32.xlu1 %v4245_v55  ;;  %4252 = vadd.xlane.f32.xlu0 %v4246_v56  ;;  %v11648_v63 = vcombine.high %v4759_v13, %v4767_v34  ;;  %v4848_v11 = vld [vmem:[#allocation2 + $0x3c8] sm:$0xff] }
0x16ce   :  { %13142 = vmatpush3.msra.mxu1 %v4292_v48  ;;  %v11730_v55 = vcombine.high %v4840_v21, %v4848_v11  ;;  %v11729_v56 = vcombine.low %v4840_v21, %v4848_v11  ;;  %v4809_v21 = vld [vmem:[#allocation2 + $0x290] sm:$0xff] }
0x16cf   :  { %v4247_v19 = vmul.f32 %v15114_v40, %v15114_v40  ;;  %5589 = vmatprep.subr.bf16.mxu0 %v11648_v63  ;;  %13143 = vmatprep.subr.mxu1 %v4291_v5  ;;  %v4817_v11 = vld [vmem:[#allocation2 + $0x2d0] sm:$0xff] }
0x16d0   :  { %5590 = vmatpush1.bf16.msra.mxu0 %v11647_v43  ;;  %13144 = vmatpush3.msra.mxu1 %v4291_v5  ;;  %v4825_v5 = vld [vmem:[#allocation2 + $0x310] sm:$0xff] }
0x16d1   :  { %4254 = vadd.xlane.f32.xlu1 %v4247_v19  ;;  %5591 = vmatprep.subr.bf16.mxu0 %v11632_v3  ;;  %v4841_v19 = vld [vmem:[#allocation2 + $0x390] sm:$0xff] }
0x16d2   :  { %13145 = vmatprep.subr.mxu1 %v4290_v30  ;;  %v11732_v39 = vcombine.high %v4841_v19, %v4849_v52  ;;  %v11731_v41 = vcombine.low %v4841_v19, %v4849_v52  ;;  %v4792_v52 = vld [vmem:[#allocation2 + $0x208] sm:$0xff] }
0x16d3   :  { %13146 = vmatpush3.msra.mxu1 %v4290_v30  ;;  %v4833_v30 = vld [vmem:[#allocation2 + $0x350] sm:$0xff] }
0x16d4   :  { %5592 = vmatpush1.bf16.msra.mxu0 %v11631_v4  ;;  %13147 = vmatprep.subr.mxu1 %v4289_v8  ;;  %v11714_v4 = vcombine.high %v4824_v22, %v4832_v2 }
0x16d5   :  { %13148 = vmatpush3.msra.mxu1 %v4289_v8  ;;  %5593 = vmatprep.subr.bf16.mxu0 %v11616_v57  ;;  %v4816_v57 = vld [vmem:[#allocation2 + $0x2c8] sm:$0xff] }
0x16d6   :  { %13149 = vmatprep.subr.mxu1 %v4288_v28  ;;  %v11698_v19 = vcombine.high %v4808_v47, %v4816_v57 }
0x16d7   :  { %13150 = vmatpush3.msra.mxu1 %v4288_v28 }
0x16d8   :  { %5594 = vmatpush1.bf16.msra.mxu0 %v11615_v60  ;;  %5632 = vmatprep.subr.bf16.mxu1 %v11730_v55  ;;  %v11713_v60 = vcombine.low %v4824_v22, %v4832_v2  ;;  %v4745_v2 = vld [vmem:[#allocation2 + $0x90] sm:$0xff] }
0x16d9   :  { %5685 = vmatprep.subr.bf16.mxu0 %v11732_v39  ;;  %v4800_v39 = vld [vmem:[#allocation2 + $0x248] sm:$0xff] }
0x1752   :  { %v4249_v42 = vpop.xlane.xlu0 %4248 }
0x1753   :  { %v4256_v45 = vmul.f32 0.0078125, %v4249_v42  ;;  %v11700_v42 = vcombine.high %v4809_v21, %v4817_v11 }
0x1755   :  { %v4260_v59 = vadd.f32 1e-05, %v4256_v45  ;;  %v4793_v45 = vld [vmem:[#allocation2 + $0x210] sm:$0xff] }
0x1756   :  { %v4251_v16 = vpop.xlane.xlu1 %4250  ;;  %v4253_v24 = vpop.xlane.xlu0 %4252 }
0x1757   :  { %13849 = vrsqrt.f32 %v4260_v59  ;;  %v4257_v10 = vmul.f32 0.0078125, %v4251_v16  ;;  %v4258_v58 = vmul.f32 0.0078125, %v4253_v24  ;;  %v4801_v59 = vld [vmem:[#allocation2 + $0x250] sm:$0xff]  ;;  %v11682_v16 = vcombine.high %v4792_v52, %v4800_v39 }
0x1758   :  { %v11699_v24 = vcombine.low %v4809_v21, %v4817_v11  ;;  %v11683_v46 = vcombine.low %v4793_v45, %v4801_v59  ;;  %v4843_v11 = vld [vmem:[#allocation2 + $0x3a0] sm:$0xff] }
0x1759   :  { %v4261_v27 = vadd.f32 1e-05, %v4257_v10  ;;  %v4262_v23 = vadd.f32 1e-05, %v4258_v58  ;;  %v4776_v10 = vld [vmem:[#allocation2 + $0x188] sm:$0xff] }
0x175a   :  { %v4255_v26 = vpop.xlane.xlu1 %4254 }
0x175b   :  { %13851 = vrsqrt.f32 %v4261_v27  ;;  %v4259_v38 = vmul.f32 0.0078125, %v4255_v26  ;;  %v11684_v27 = vcombine.high %v4793_v45, %v4801_v59  ;;  %v4777_v26 = vld [vmem:[#allocation2 + $0x190] sm:$0xff]  ;;  %v4827_v45 = vld [vmem:[#allocation2 + $0x320] sm:$0xff] }
0x175c   :  { %13853 = vrsqrt.f32 %v4262_v23  ;;  %v11681_v23 = vcombine.low %v4792_v52, %v4800_v39  ;;  %v4826_v52 = vld [vmem:[#allocation2 + $0x318] sm:$0xff]  ;;  %v4835_v59 = vld [vmem:[#allocation2 + $0x360] sm:$0xff] }
0x175d   :  { %v4263_v18 = vadd.f32 1e-05, %v4259_v38  ;;  %v4785_v38 = vld [vmem:[#allocation2 + $0x1d0] sm:$0xff]  ;;  %v4834_v39 = vld [vmem:[#allocation2 + $0x358] sm:$0xff] }
0x175f   :  { %13855 = vrsqrt.f32 %v4263_v18 }
0x1764   :  { %v13850_v29 = vpop.eup %13849 }
0x1765   :  { %v4268_v54 = vmul.f32 %v13850_v29, %v15102_v15  ;;  %v4768_v29 = vld [vmem:[#allocation2 + $0x148] sm:$0xff] }
0x1767   :  { %v4276_v14 = vmul.f32 %v4275_v49, %v4268_v54  ;;  %v11668_v54 = vcombine.high %v4777_v26, %v4785_v38 }
0x1768   :  { %v13852_v6 = vpop.eup %13851 }
0x1769   :  { %v13854_v50 = vpop.eup %13853  ;;  %v4269_v13 = vmul.f32 %v13852_v6, %v15106_v32  ;;  %v4284_v34 = vadd.f32 %v4283_v20, %v4276_v14  ;;  %v4769_v14 = vld [vmem:[#allocation2 + $0x150] sm:$0xff] }
0x176a   :  { %v4270_v63 = vmul.f32 %v13854_v50, %v15108_v51  ;;  %v11716_v51 = vcombine.high %v4825_v5, %v4833_v30  ;;  %v11667_v50 = vcombine.low %v4777_v26, %v4785_v38  ;;  %v4811_v26 = vld [vmem:[#allocation2 + $0x2a0] sm:$0xff] }
0x176b   :  { %v4277_v48 = vmul.f32 %v4275_v49, %v4269_v13  ;;  %13151 = vmatprep.mubr.f32.mxu1 %v4284_v34  ;;  %v4744_v13 = vld [vmem:[#allocation2 + $0x88] sm:$0xff]  ;;  %v4819_v38 = vld [vmem:[#allocation2 + $0x2e0] sm:$0xff] }
0x176c   :  { %v13856_v43 = vpop.eup %13855  ;;  %v4278_v3 = vmul.f32 %v4275_v49, %v4270_v63 }
0x176d   :  { %v4285_v15 = vadd.f32 %v4283_v20, %v4277_v48  ;;  %v4271_v8 = vmul.f32 %v13856_v43, %v15114_v40  ;;  %v11715_v40 = vcombine.low %v4825_v5, %v4833_v30  ;;  %v4753_v48 = vld [vmem:[#allocation2 + $0xd0] sm:$0xff]  ;;  %v4728_v5 = vld [vmem:[#allocation2 + $0x8] sm:$0xff] }
0x176e   :  { %v4286_v9 = vadd.f32 %v4283_v20, %v4278_v3  ;;  %v4736_v30 = vld [vmem:[#allocation2 + $0x48] sm:$0xff] }
0x176f   :  { %v15139_v28 = vpack.c.bf16 %v4285_v15, %v4284_v34  ;;  %13152 = vmatmul.mubr.f32.vlgmr.msra.gmra.mxu1 %v4285_v15  ;;  %v4279_v32 = vmul.f32 %v4275_v49, %v4271_v8  ;;  %v4760_v49 = vld [vmem:[#allocation2 + $0x108] sm:$0xff]  ;;  %v11636_v15 = vcombine.high %v4745_v2, %v4753_v48  ;;  %v4729_v8 = vld [vmem:[#allocation2 + $0x10] sm:$0xff]  ;;  %v11617_v21 = vcombine.low %v4728_v5, %v4736_v30 }
0x1770   :  { %5633 = vmatpush1.bf16.msra.mxu1 %v11729_v56  ;;  %13154 = vmatprep.mubr.f32.mxu1 %v4286_v9  ;;  %v11697_v56 = vcombine.low %v4808_v47, %v4816_v57  ;;  %v11650_v6 = vcombine.high %v4760_v49, %v4768_v29  ;;  %v4752_v34 = vld [vmem:[#allocation2 + $0xc8] sm:$0xff]  ;;  %v11649_v22 = vcombine.low %v4760_v49, %v4768_v29  ;;  %v4794_v49 = vld [vmem:[#allocation2 + $0x218] sm:$0xff] }
0x1771   :  { %5612 = vmatmul.mubr.bf16.vlgmr.msra.gmra.mxu0 %v15139_v28  ;;  %5634 = vmatprep.subr.bf16.mxu1 %v11714_v4  ;;  %v4287_v55 = vadd.f32 %v4283_v20, %v4279_v32  ;;  %v4761_v20 = vld [vmem:[#allocation2 + $0x110] sm:$0xff]  ;;  %v11634_v43 = vcombine.high %v4744_v13, %v4752_v34  ;;  %v11633_v4 = vcombine.low %v4744_v13, %v4752_v34  ;;  %v4842_v32 = vld [vmem:[#allocation2 + $0x398] sm:$0xff] }
0x1772   :  { %5686 = vmatpush1.bf16.msra.mxu0 %v11731_v41  ;;  %5621 = vmatprep.mubr.bf16.mxu0 %v16758_v37  ;;  %v4784_v41 = vld [vmem:[#allocation2 + $0x1c8] sm:$0xff]  ;;  %v11652_v63 = vcombine.high %v4761_v20, %v4769_v14  ;;  %v11651_v3 = vcombine.low %v4761_v20, %v4769_v14  ;;  %v11618_v47 = vcombine.high %v4728_v5, %v4736_v30  ;;  %v4802_v29 = vld [vmem:[#allocation2 + $0x258] sm:$0xff]  ;;  %v4795_v20 = vld [vmem:[#allocation2 + $0x220] sm:$0xff] }
0x1773   :  { %13155 = vmatmul.mubr.f32.gmra.mxu1 %v4287_v55  ;;  %5687 = vmatprep.subr.bf16.mxu0 %v11716_v51  ;;  %v15144_v58 = vpack.c.bf16 %v4287_v55, %v4286_v9  ;;  %v11666_v18 = vcombine.high %v4776_v10, %v4784_v41  ;;  %v11665_v61 = vcombine.low %v4776_v10, %v4784_v41  ;;  %v4737_v9 = vld [vmem:[#allocation2 + $0x50] sm:$0xff]  ;;  %v4850_v51 = vld [vmem:[#allocation2 + $0x3d8] sm:$0xff]  ;;  %v4851_v55 = vld [vmem:[#allocation2 + $0x3e0] sm:$0xff] }
0x1774   :  { %5635 = vmatpush1.bf16.msra.mxu1 %v11713_v60  ;;  %5664 = vmatprep.mubr.bf16.mxu1 %v16758_v37  ;;  %v11635_v57 = vcombine.low %v4745_v2, %v4753_v48  ;;  %v11620_v60 = vcombine.high %v4729_v8, %v4737_v9  ;;  %v4810_v10 = vld [vmem:[#allocation2 + $0x298] sm:$0xff]  ;;  %v4803_v14 = vld [vmem:[#allocation2 + $0x260] sm:$0xff] }
0x1775   :  { %5636 = vmatprep.subr.bf16.mxu1 %v11698_v19  ;;  %v11734_v19 = vcombine.high %v4842_v32, %v4850_v51  ;;  %v4818_v41 = vld [vmem:[#allocation2 + $0x2d8] sm:$0xff]  ;;  %v4779_v2 = vld [vmem:[#allocation2 + $0x1a0] sm:$0xff] }
0x1776   :  { %5688 = vmatpush1.bf16.msra.mxu0 %v11715_v40  ;;  %v11619_v40 = vcombine.low %v4729_v8, %v4737_v9  ;;  %v4778_v13 = vld [vmem:[#allocation2 + $0x198] sm:$0xff]  ;;  %v4787_v48 = vld [vmem:[#allocation2 + $0x1e0] sm:$0xff] }
0x1777   :  { %5689 = vmatprep.subr.bf16.mxu0 %v11700_v42  ;;  %v11736_v42 = vcombine.high %v4843_v11, %v4851_v55  ;;  %v4786_v34 = vld [vmem:[#allocation2 + $0x1d8] sm:$0xff]  ;;  %v4763_v8 = vld [vmem:[#allocation2 + $0x120] sm:$0xff] }
0x1778   :  { %5637 = vmatpush1.bf16.msra.mxu1 %v11697_v56  ;;  %v11733_v56 = vcombine.low %v4842_v32, %v4850_v51  ;;  %v4762_v5 = vld [vmem:[#allocation2 + $0x118] sm:$0xff]  ;;  %v4771_v9 = vld [vmem:[#allocation2 + $0x160] sm:$0xff] }
0x1779   :  { %5622 = vmatmul.mubr.bf16.gmra.mxu0 %v15144_v58  ;;  %5638 = vmatprep.subr.bf16.mxu1 %v11682_v16  ;;  %v11718_v16 = vcombine.high %v4826_v52, %v4834_v39  ;;  %v4770_v30 = vld [vmem:[#allocation2 + $0x158] sm:$0xff] }
0x177a   :  { %5690 = vmatpush1.bf16.msra.mxu0 %v11699_v24  ;;  %5717 = vmatprep.mubr.bf16.mxu0 %v16758_v37  ;;  %v11735_v24 = vcombine.low %v4843_v11, %v4851_v55  ;;  %v4746_v32 = vld [vmem:[#allocation2 + $0x98] sm:$0xff]  ;;  %v4747_v11 = vld [vmem:[#allocation2 + $0xa0] sm:$0xff] }
0x177b   :  { %5691 = vmatprep.subr.bf16.mxu0 %v11684_v27  ;;  %v11720_v27 = vcombine.high %v4827_v45, %v4835_v59  ;;  %v4754_v51 = vld [vmem:[#allocation2 + $0xd8] sm:$0xff]  ;;  %v4755_v55 = vld [vmem:[#allocation2 + $0xe0] sm:$0xff] }
0x177c   :  { %5639 = vmatpush1.bf16.msra.mxu1 %v11681_v23  ;;  %v11717_v23 = vcombine.low %v4826_v52, %v4834_v39  ;;  %v4730_v52 = vld [vmem:[#allocation2 + $0x18] sm:$0xff] }
0x177d   :  { %5640 = vmatprep.subr.bf16.mxu1 %v11666_v18  ;;  %v11702_v18 = vcombine.high %v4810_v10, %v4818_v41  ;;  %v4738_v39 = vld [vmem:[#allocation2 + $0x58] sm:$0xff] }
0x177e   :  { %5692 = vmatpush1.bf16.msra.mxu0 %v11683_v46  ;;  %v11719_v46 = vcombine.low %v4827_v45, %v4835_v59  ;;  %v4731_v45 = vld [vmem:[#allocation2 + $0x20] sm:$0xff] }
0x177f   :  { %5693 = vmatprep.subr.bf16.mxu0 %v11668_v54  ;;  %v11704_v54 = vcombine.high %v4811_v26, %v4819_v38  ;;  %v4739_v59 = vld [vmem:[#allocation2 + $0x60] sm:$0xff] }
0x1780   :  { %5641 = vmatpush1.bf16.msra.mxu1 %v11665_v61  ;;  %v11701_v61 = vcombine.low %v4810_v10, %v4818_v41  ;;  %v4844_v10 = vld [vmem:[#allocation2 + $0x3a8] sm:$0xff] }
0x1781   :  { %5642 = vmatprep.subr.bf16.mxu1 %v11650_v6  ;;  %v11686_v6 = vcombine.high %v4794_v49, %v4802_v29  ;;  %v4852_v41 = vld [vmem:[#allocation2 + $0x3e8] sm:$0xff] }
0x1782   :  { %5694 = vmatpush1.bf16.msra.mxu0 %v11667_v50  ;;  %v11703_v50 = vcombine.low %v4811_v26, %v4819_v38  ;;  %v4845_v26 = vld [vmem:[#allocation2 + $0x3b0] sm:$0xff] }
0x1783   :  { %5695 = vmatprep.subr.bf16.mxu0 %v11652_v63  ;;  %v11688_v63 = vcombine.high %v4795_v20, %v4803_v14  ;;  %v4853_v38 = vld [vmem:[#allocation2 + $0x3f0] sm:$0xff] }
0x1784   :  { %5643 = vmatpush1.bf16.msra.mxu1 %v11649_v22  ;;  %v11685_v22 = vcombine.low %v4794_v49, %v4802_v29  ;;  %v4828_v49 = vld [vmem:[#allocation2 + $0x328] sm:$0xff] }
0x1785   :  { %5644 = vmatprep.subr.bf16.mxu1 %v11634_v43  ;;  %v11670_v43 = vcombine.high %v4778_v13, %v4786_v34  ;;  %v4836_v29 = vld [vmem:[#allocation2 + $0x368] sm:$0xff] }
0x1786   :  { %5696 = vmatpush1.bf16.msra.mxu0 %v11651_v3  ;;  %v11687_v3 = vcombine.low %v4795_v20, %v4803_v14  ;;  %v4829_v20 = vld [vmem:[#allocation2 + $0x330] sm:$0xff] }
0x1787   :  { %5697 = vmatprep.subr.bf16.mxu0 %v11636_v15  ;;  %v11672_v15 = vcombine.high %v4779_v2, %v4787_v48  ;;  %v4837_v14 = vld [vmem:[#allocation2 + $0x370] sm:$0xff] }
0x1788   :  { %5645 = vmatpush1.bf16.msra.mxu1 %v11633_v4  ;;  %v11669_v4 = vcombine.low %v4778_v13, %v4786_v34  ;;  %v4812_v13 = vld [vmem:[#allocation2 + $0x2a8] sm:$0xff] }
0x1789   :  { %5646 = vmatprep.subr.bf16.mxu1 %v11618_v47  ;;  %v11654_v47 = vcombine.high %v4762_v5, %v4770_v30  ;;  %v4820_v34 = vld [vmem:[#allocation2 + $0x2e8] sm:$0xff] }
0x178a   :  { %5698 = vmatpush1.bf16.msra.mxu0 %v11635_v57  ;;  %v11671_v57 = vcombine.low %v4779_v2, %v4787_v48  ;;  %v4813_v2 = vld [vmem:[#allocation2 + $0x2b0] sm:$0xff] }
0x178b   :  { %5699 = vmatprep.subr.bf16.mxu0 %v11620_v60  ;;  %v11656_v60 = vcombine.high %v4763_v8, %v4771_v9  ;;  %v4821_v48 = vld [vmem:[#allocation2 + $0x2f0] sm:$0xff] }
0x178c   :  { %5647 = vmatpush1.bf16.msra.mxu1 %v11617_v21  ;;  %v11653_v21 = vcombine.low %v4762_v5, %v4770_v30  ;;  %v4796_v5 = vld [vmem:[#allocation2 + $0x228] sm:$0xff] }
0x178d   :  { %5738 = vmatprep.subr.bf16.mxu1 %v11734_v19  ;;  %v11638_v19 = vcombine.high %v4746_v32, %v4754_v51  ;;  %v4804_v30 = vld [vmem:[#allocation2 + $0x268] sm:$0xff] }
0x178e   :  { %5700 = vmatpush1.bf16.msra.mxu0 %v11619_v40  ;;  %v11655_v40 = vcombine.low %v4763_v8, %v4771_v9  ;;  %v4797_v8 = vld [vmem:[#allocation2 + $0x230] sm:$0xff] }
0x178f   :  { %5665 = vmatmul.mubr.bf16.vlgmr.msra.gmra.mxu1 %v15139_v28  ;;  %5791 = vmatprep.subr.bf16.mxu0 %v11736_v42  ;;  %v11640_v42 = vcombine.high %v4747_v11, %v4755_v55  ;;  %v4805_v9 = vld [vmem:[#allocation2 + $0x270] sm:$0xff] }
0x1790   :  { %5739 = vmatpush1.bf16.msra.mxu1 %v11733_v56  ;;  %5674 = vmatprep.mubr.bf16.mxu1 %v16758_v37  ;;  %v11637_v56 = vcombine.low %v4746_v32, %v4754_v51  ;;  %v4780_v32 = vld [vmem:[#allocation2 + $0x1a8] sm:$0xff] }
0x1791   :  { %5718 = vmatmul.mubr.bf16.vlgmr.msra.gmra.mxu0 %v15139_v28  ;;  %5740 = vmatprep.subr.bf16.mxu1 %v11718_v16  ;;  %v11622_v16 = vcombine.high %v4730_v52, %v4738_v39  ;;  %v4788_v51 = vld [vmem:[#allocation2 + $0x1e8] sm:$0xff] }
0x1792   :  { %5792 = vmatpush1.bf16.msra.mxu0 %v11735_v24  ;;  %5727 = vmatprep.mubr.bf16.mxu0 %v16758_v37  ;;  %v11639_v24 = vcombine.low %v4747_v11, %v4755_v55  ;;  %v4781_v11 = vld [vmem:[#allocation2 + $0x1b0] sm:$0xff] }
0x1793   :  { %5793 = vmatprep.subr.bf16.mxu0 %v11720_v27  ;;  %v11624_v27 = vcombine.high %v4731_v45, %v4739_v59  ;;  %v4789_v55 = vld [vmem:[#allocation2 + $0x1f0] sm:$0xff] }
0x1794   :  { %5741 = vmatpush1.bf16.msra.mxu1 %v11717_v23  ;;  %v11621_v23 = vcombine.low %v4730_v52, %v4738_v39  ;;  %v4764_v52 = vld [vmem:[#allocation2 + $0x128] sm:$0xff] }
0x1795   :  { %5742 = vmatprep.subr.bf16.mxu1 %v11702_v18  ;;  %v11738_v18 = vcombine.high %v4844_v10, %v4852_v41  ;;  %v4772_v39 = vld [vmem:[#allocation2 + $0x168] sm:$0xff] }
0x1796   :  { %5794 = vmatpush1.bf16.msra.mxu0 %v11719_v46  ;;  %v11623_v46 = vcombine.low %v4731_v45, %v4739_v59  ;;  %v4765_v45 = vld [vmem:[#allocation2 + $0x130] sm:$0xff] }
0x1797   :  { %5675 = vmatmul.mubr.bf16.gmra.mxu1 %v15144_v58  ;;  %5795 = vmatprep.subr.bf16.mxu0 %v11704_v54  ;;  %v11740_v54 = vcombine.high %v4845_v26, %v4853_v38  ;;  %v4773_v59 = vld [vmem:[#allocation2 + $0x170] sm:$0xff] }
0x1798   :  { %5743 = vmatpush1.bf16.msra.mxu1 %v11701_v61  ;;  %5770 = vmatprep.mubr.bf16.mxu1 %v16758_v37  ;;  %v11737_v61 = vcombine.low %v4844_v10, %v4852_v41  ;;  %v4748_v10 = vld [vmem:[#allocation2 + $0xa8] sm:$0xff] }
0x1799   :  { %5728 = vmatmul.mubr.bf16.gmra.mxu0 %v15144_v58  ;;  %5744 = vmatprep.subr.bf16.mxu1 %v11686_v6  ;;  %v11722_v6 = vcombine.high %v4828_v49, %v4836_v29  ;;  %v4756_v41 = vld [vmem:[#allocation2 + $0xe8] sm:$0xff] }
0x179a   :  { %5796 = vmatpush1.bf16.msra.mxu0 %v11703_v50  ;;  %5823 = vmatprep.mubr.bf16.mxu0 %v16758_v37  ;;  %v11739_v50 = vcombine.low %v4845_v26, %v4853_v38  ;;  %v4749_v26 = vld [vmem:[#allocation2 + $0xb0] sm:$0xff] }
0x179b   :  { %5797 = vmatprep.subr.bf16.mxu0 %v11688_v63  ;;  %v11724_v63 = vcombine.high %v4829_v20, %v4837_v14  ;;  %v4757_v38 = vld [vmem:[#allocation2 + $0xf0] sm:$0xff] }
0x179c   :  { %5745 = vmatpush1.bf16.msra.mxu1 %v11685_v22  ;;  %v11721_v22 = vcombine.low %v4828_v49, %v4836_v29  ;;  %v4732_v49 = vld [vmem:[#allocation2 + $0x28] sm:$0xff] }
0x179d   :  { %5746 = vmatprep.subr.bf16.mxu1 %v11670_v43  ;;  %v11706_v43 = vcombine.high %v4812_v13, %v4820_v34  ;;  %v4740_v29 = vld [vmem:[#allocation2 + $0x68] sm:$0xff] }
0x179e   :  { %5798 = vmatpush1.bf16.msra.mxu0 %v11687_v3  ;;  %v11723_v3 = vcombine.low %v4829_v20, %v4837_v14  ;;  %v4733_v20 = vld [vmem:[#allocation2 + $0x30] sm:$0xff] }
0x179f   :  { %5799 = vmatprep.subr.bf16.mxu0 %v11672_v15  ;;  %v11708_v15 = vcombine.high %v4813_v2, %v4821_v48  ;;  %v4741_v14 = vld [vmem:[#allocation2 + $0x70] sm:$0xff] }
0x17a0   :  { %5747 = vmatpush1.bf16.msra.mxu1 %v11669_v4  ;;  %v11705_v4 = vcombine.low %v4812_v13, %v4820_v34  ;;  %v4846_v13 = vld [vmem:[#allocation2 + $0x3b8] sm:$0xff] }
0x17a1   :  { %5748 = vmatprep.subr.bf16.mxu1 %v11654_v47  ;;  %v11690_v47 = vcombine.high %v4796_v5, %v4804_v30  ;;  %v4854_v34 = vld [vmem:[#allocation2 + $0x3f8] sm:$0xff] }
0x17a2   :  { %5800 = vmatpush1.bf16.msra.mxu0 %v11671_v57  ;;  %v11707_v57 = vcombine.low %v4813_v2, %v4821_v48  ;;  %v11742_v2 = vcombine.high %v4846_v13, %v4854_v34  ;;  %v11627_v48 = vcombine.low %v4733_v20, %v4741_v14 }
0x17a3   :  { %5801 = vmatprep.subr.bf16.mxu0 %v11656_v60  ;;  %v11692_v60 = vcombine.high %v4797_v8, %v4805_v9 }
0x17a4   :  { %5749 = vmatpush1.bf16.msra.mxu1 %v11653_v21  ;;  %v11689_v21 = vcombine.low %v4796_v5, %v4804_v30  ;;  %v13457_v5 = vld [vmem:[#allocation5 + $0x78] sm:$0xff]   ;;  %v11741_v30 = vcombine.low %v4846_v13, %v4854_v34  ;;  %v13471_v13 = vld [vmem:[#allocation5 + $0x40] sm:$0xff]  }
0x17a5   :  { %5750 = vmatprep.subr.bf16.mxu1 %v11638_v19  ;;  %v11674_v19 = vcombine.high %v4780_v32, %v4788_v51 }
0x17a6   :  { %5802 = vmatpush1.bf16.msra.mxu0 %v11655_v40  ;;  %v11691_v40 = vcombine.low %v4797_v8, %v4805_v9  ;;  %v4822_v8 = vld [vmem:[#allocation2 + $0x2f8] sm:$0xff] }
0x17a7   :  { %5803 = vmatprep.subr.bf16.mxu0 %v11640_v42  ;;  %v11676_v42 = vcombine.high %v4781_v11, %v4789_v55  ;;  %v13458_v9 = vld [vmem:[#allocation5 + $0x38] sm:$0xff]  }
0x17a8   :  { %5751 = vmatpush1.bf16.msra.mxu1 %v11637_v56  ;;  %v11673_v56 = vcombine.low %v4780_v32, %v4788_v51  ;;  %v4798_v51 = vld [vmem:[#allocation2 + $0x238] sm:$0xff] }
0x17a9   :  { %5752 = vmatprep.subr.bf16.mxu1 %v11622_v16  ;;  %v11658_v16 = vcombine.high %v4764_v52, %v4772_v39 }
0x17aa   :  { %5804 = vmatpush1.bf16.msra.mxu0 %v11639_v24  ;;  %v11675_v24 = vcombine.low %v4781_v11, %v4789_v55  ;;  %v13461_v11 = vld [vmem:[#allocation5 + $0x68] sm:$0xff]  }
0x17ab   :  { %5805 = vmatprep.subr.bf16.mxu0 %v11624_v27  ;;  %v11660_v27 = vcombine.high %v4765_v45, %v4773_v59 }
0x17ac   :  { %5753 = vmatpush1.bf16.msra.mxu1 %v11621_v23  ;;  %v11657_v23 = vcombine.low %v4764_v52, %v4772_v39  ;;  %v4790_v52 = vld [vmem:[#allocation2 + $0x1f8] sm:$0xff]  ;;  %v13462_v39 = vld [vmem:[#allocation5 + $0x28] sm:$0xff]  }
0x17ad   :  { %5844 = vmatprep.subr.bf16.mxu1 %v11738_v18  ;;  %v11642_v18 = vcombine.high %v4748_v10, %v4756_v41 }
0x17ae   :  { %5806 = vmatpush1.bf16.msra.mxu0 %v11623_v46  ;;  %v11659_v46 = vcombine.low %v4765_v45, %v4773_v59  ;;  %v4766_v59 = vld [vmem:[#allocation2 + $0x138] sm:$0xff] }
0x17af   :  { %5771 = vmatmul.mubr.bf16.vlgmr.msra.gmra.mxu1 %v15139_v28  ;;  %5897 = vmatprep.subr.bf16.mxu0 %v11740_v54  ;;  %v11644_v54 = vcombine.high %v4749_v26, %v4757_v38 }
0x17b0   :  { %5845 = vmatpush1.bf16.msra.mxu1 %v11737_v61  ;;  %5780 = vmatprep.mubr.bf16.mxu1 %v16758_v37  ;;  %v11641_v61 = vcombine.low %v4748_v10, %v4756_v41  ;;  %v13465_v10 = vld [vmem:[#allocation5 + $0x58] sm:$0xff]  }
0x17b1   :  { %5824 = vmatmul.mubr.bf16.vlgmr.msra.gmra.mxu0 %v15139_v28  ;;  %5846 = vmatprep.subr.bf16.mxu1 %v11722_v6  ;;  %v11626_v6 = vcombine.high %v4732_v49, %v4740_v29 }
0x17b2   :  { %5898 = vmatpush1.bf16.msra.mxu0 %v11739_v50  ;;  %5833 = vmatprep.mubr.bf16.mxu0 %v16758_v37  ;;  %v11643_v50 = vcombine.low %v4749_v26, %v4757_v38  ;;  %v4758_v26 = vld [vmem:[#allocation2 + $0xf8] sm:$0xff] }
0x17b3   :  { %5899 = vmatprep.subr.bf16.mxu0 %v11724_v63  ;;  %v11628_v63 = vcombine.high %v4733_v20, %v4741_v14  ;;  %v13466_v38 = vld [vmem:[#allocation5 + $0x18] sm:$0xff]   ;;  %v13469_v20 = vld [vmem:[#allocation5 + $0x48] sm:$0xff]  }
0x17b4   :  { %5847 = vmatpush1.bf16.msra.mxu1 %v11721_v22  ;;  %v11625_v22 = vcombine.low %v4732_v49, %v4740_v29  ;;  %v4734_v29 = vld [vmem:[#allocation2 + $0x38] sm:$0xff] }
0x17b5   :  { %5848 = vmatprep.subr.bf16.mxu1 %v11706_v43  ;;  %v4830_v43 = vld [vmem:[#allocation2 + $0x338] sm:$0xff] }
0x17b6   :  { %5900 = vmatpush1.bf16.msra.mxu0 %v11723_v3  ;;  %v4838_v3 = vld [vmem:[#allocation2 + $0x378] sm:$0xff] }
0x17b7   :  { %5781 = vmatmul.mubr.bf16.gmra.mxu1 %v15144_v58  ;;  %5901 = vmatprep.subr.bf16.mxu0 %v11708_v15  ;;  %v11726_v15 = vcombine.high %v4830_v43, %v4838_v3 }
0x17b8   :  { %5849 = vmatpush1.bf16.msra.mxu1 %v11705_v4  ;;  %5876 = vmatprep.mubr.bf16.mxu1 %v16758_v37  ;;  %v4814_v4 = vld [vmem:[#allocation2 + $0x2b8] sm:$0xff] }
0x17b9   :  { %5834 = vmatmul.mubr.bf16.gmra.mxu0 %v15144_v58  ;;  %5850 = vmatprep.subr.bf16.mxu1 %v11690_v47  ;;  %v13459_v47 = vld [vmem:[#allocation5 + $0x70] sm:$0xff]   ;;  %v11710_v32 = vcombine.high %v4814_v4, %v4822_v8  ;;  %v11709_v55 = vcombine.low %v4814_v4, %v4822_v8  ;;  %v13486_v4 = vld [vmem:[#allocation5 + $0xa0] sm:$0xff]   ;;  %v13489_v8 = vld [vmem:[#allocation5 + $0xd8] sm:$0xff]  }
0x17ba   :  { %5902 = vmatpush1.bf16.msra.mxu0 %v11707_v57  ;;  %5929 = vmatprep.mubr.bf16.mxu0 %v16758_v37  ;;  %v11725_v57 = vcombine.low %v4830_v43, %v4838_v3  ;;  %v13477_v43 = vld [vmem:[#allocation5 + $0xf0] sm:$0xff]  }
0x17bb   :  { %5903 = vmatprep.subr.bf16.mxu0 %v11692_v60  ;;  %v4806_v60 = vld [vmem:[#allocation2 + $0x278] sm:$0xff]  ;;  %v13478_v3 = vld [vmem:[#allocation5 + $0xb0] sm:$0xff]  }
0x17bc   :  { %5851 = vmatpush1.bf16.msra.mxu1 %v11689_v21  ;;  %v13460_v21 = vld [vmem:[#allocation5 + $0x30] sm:$0xff]  }
0x17bd   :  { %5852 = vmatprep.subr.bf16.mxu1 %v11674_v19  ;;  %v11694_v19 = vcombine.high %v4798_v51, %v4806_v60 }
0x17be   :  { %5904 = vmatpush1.bf16.msra.mxu0 %v11691_v40  ;;  %v4782_v40 = vld [vmem:[#allocation2 + $0x1b8] sm:$0xff] }
0x17bf   :  { %5905 = vmatprep.subr.bf16.mxu0 %v11676_v42  ;;  %v13463_v42 = vld [vmem:[#allocation5 + $0x60] sm:$0xff]   ;;  %v11678_v45 = vcombine.high %v4782_v40, %v4790_v52  ;;  %v11677_v41 = vcombine.low %v4782_v40, %v4790_v52 }
0x17c0   :  { %5853 = vmatpush1.bf16.msra.mxu1 %v11673_v56  ;;  %v11693_v56 = vcombine.low %v4798_v51, %v4806_v60  ;;  %v13501_v51 = vld [vmem:[#allocation5 + $0xc0] sm:$0xff]   ;;  %v13505_v60 = vld [vmem:[#allocation5 + $0x1f8] sm:$0xff]  }
0x17c1   :  { %5854 = vmatprep.subr.bf16.mxu1 %v11658_v16  ;;  %v4774_v16 = vld [vmem:[#allocation2 + $0x178] sm:$0xff] }
0x17c2   :  { %5906 = vmatpush1.bf16.msra.mxu0 %v11675_v24  ;;  %v13464_v24 = vld [vmem:[#allocation5 + $0x20] sm:$0xff]  }
0x17c3   :  { %5907 = vmatprep.subr.bf16.mxu0 %v11660_v27  ;;  %v11662_v27 = vcombine.high %v4766_v59, %v4774_v16 }
0x17c4   :  { %5855 = vmatpush1.bf16.msra.mxu1 %v11657_v23  ;;  %v4750_v23 = vld [vmem:[#allocation2 + $0xb8] sm:$0xff] }
0x17c5   :  { %5856 = vmatprep.subr.bf16.mxu1 %v11642_v18  ;;  %v13467_v18 = vld [vmem:[#allocation5 + $0x50] sm:$0xff]   ;;  %v11646_v49 = vcombine.high %v4750_v23, %v4758_v26  ;;  %v11645_v14 = vcombine.low %v4750_v23, %v4758_v26  ;;  %v16667_v23 = vmov 1  }
0x17c6   :  { %5908 = vmatpush1.bf16.msra.mxu0 %v11659_v46  ;;  %v11661_v46 = vcombine.low %v4766_v59, %v4774_v16 }
0x17c7   :  { %5909 = vmatprep.subr.bf16.mxu0 %v11644_v54  ;;  %v4742_v54 = vld [vmem:[#allocation2 + $0x78] sm:$0xff] }
0x17c8   :  { %5857 = vmatpush1.bf16.msra.mxu1 %v11641_v61  ;;  %v13468_v61 = vld [vmem:[#allocation5 + $0x10] sm:$0xff]   ;;  %v11629_v34 = vcombine.low %v4734_v29, %v4742_v54 }
0x17c9   :  { %5858 = vmatprep.subr.bf16.mxu1 %v11626_v6  ;;  %v11630_v6 = vcombine.high %v4734_v29, %v4742_v54 }
0x17ca   :  { %5910 = vmatpush1.bf16.msra.mxu0 %v11643_v50  ;;  %v13470_v50 = vld [vmem:[#allocation5 + $0x8] sm:$0xff]  }
0x17cb   :  { %5911 = vmatprep.subr.bf16.mxu0 %v11628_v63  ;;  %v13473_v63 = vld [vmem:[#allocation5 + $0xf8] sm:$0xff]  }
0x17cc   :  { %5859 = vmatpush1.bf16.msra.mxu1 %v11625_v22  ;;  %v13472_v22 = vld [vmem:[#allocation5] sm:$0xff]  }
0x17cd   :  { %5950 = vmatprep.subr.bf16.mxu1 %v11742_v2  ;;  %v13475_v2 = vld [vmem:[#allocation5 + $0x178] sm:$0xff]  }
0x17ce   :  { %5912 = vmatpush1.bf16.msra.mxu0 %v11627_v48  ;;  %v13474_v48 = vld [vmem:[#allocation5 + $0xb8] sm:$0xff]  }
0x17cf   :  { %5877 = vmatmul.mubr.bf16.vlgmr.msra.gmra.mxu1 %v15139_v28  ;;  %12365 = vmatprep.subr.bf16.mxu0 %v13457_v5  ;;  %v13481_v5 = vld [vmem:[#allocation5 + $0xe8] sm:$0xff]  }
0x17d0   :  { %5951 = vmatpush1.bf16.msra.mxu1 %v11741_v30  ;;  %5886 = vmatprep.mubr.bf16.mxu1 %v16758_v37  ;;  %v13482_v30 = vld [vmem:[#allocation5 + $0xa8] sm:$0xff]  }
0x17d1   :  { %5930 = vmatmul.mubr.bf16.vlgmr.msra.gmra.mxu0 %v15139_v28  ;;  %5952 = vmatprep.subr.bf16.mxu1 %v11726_v15  ;;  %v13485_v15 = vld [vmem:[#allocation5 + $0xe0] sm:$0xff]  }
0x17d2   :  { %5939 = vmatprep.mubr.bf16.mxu0 %v16758_v37  ;;  %12366 = vmatpush3.bf16.msra.mxu0 %v13458_v9  ;;  %v13490_v9 = vld [vmem:[#allocation5 + $0x98] sm:$0xff]  }
0x17d3   :  { %12367 = vmatprep.subr.bf16.mxu0 %v13459_v47  ;;  %v13494_v47 = vld [vmem:[#allocation5 + $0x90] sm:$0xff]  }
0x17d4   :  { %5953 = vmatpush1.bf16.msra.mxu1 %v11725_v57  ;;  %v13497_v57 = vld [vmem:[#allocation5 + $0xc8] sm:$0xff]  }
0x17d5   :  { %5954 = vmatprep.subr.bf16.mxu1 %v11710_v32  ;;  %v13498_v32 = vld [vmem:[#allocation5 + $0x88] sm:$0xff]  }
0x17d6   :  { %12368 = vmatpush3.bf16.msra.mxu0 %v13460_v21  ;;  %v11594_v21 = vld [vmem:[%s16759_s29] ss:$0 sm:$0xff] }
0x17d7   :  { %5887 = vmatmul.mubr.bf16.gmra.mxu1 %v15144_v58  ;;  %12369 = vmatprep.subr.bf16.mxu0 %v13461_v11 }
0x17d8   :  { %5955 = vmatpush1.bf16.msra.mxu1 %v11709_v55  ;;  %5982 = vmatprep.mubr.bf16.mxu1 %v16758_v37 }
0x17d9   :  { %5940 = vmatmul.mubr.bf16.gmra.mxu0 %v15144_v58  ;;  %5956 = vmatprep.subr.bf16.mxu1 %v11694_v19  ;;  %v15178_v19 = vld [vmem:[%s16760_s3] sm:$0xff] }
0x17da   :  { %12370 = vmatpush3.bf16.msra.mxu0 %v13462_v39 }
0x17db   :  { %12371 = vmatprep.subr.bf16.mxu0 %v13463_v42  ;;  %v4866_v42 = vrot.slane %v15178_v19, %v14365_v31 }
0x17dc   :  { %5957 = vmatpush1.bf16.msra.mxu1 %v11693_v56  ;;  %v4862_v56 = vrot.slane %v15178_v19, %v14351_v1 }
0x17dd   :  { %5958 = vmatprep.subr.bf16.mxu1 %v11678_v45 }
0x17de   :  { %12372 = vmatpush3.bf16.msra.mxu0 %v13464_v24 }
0x17df   :  { %12373 = vmatprep.subr.bf16.mxu0 %v13465_v10 }
0x17e0   :  { %5959 = vmatpush1.bf16.msra.mxu1 %v11677_v41 }
0x17e1   :  { %5960 = vmatprep.subr.bf16.mxu1 %v11662_v27 }
0x17e2   :  { %12374 = vmatpush3.bf16.msra.mxu0 %v13466_v38 }
0x17e3   :  { %12375 = vmatprep.subr.bf16.mxu0 %v13467_v18 }
0x17e4   :  { %5961 = vmatpush1.bf16.msra.mxu1 %v11661_v46 }
0x17e5   :  { %5962 = vmatprep.subr.bf16.mxu1 %v11646_v49 }
0x17e6   :  { %12376 = vmatpush3.bf16.msra.mxu0 %v13468_v61 }
0x17e7   :  { %12377 = vmatprep.subr.bf16.mxu0 %v13469_v20  ;;  %v16665_v20 = vmov 2  }
0x17e8   :  { %5963 = vmatpush1.bf16.msra.mxu1 %v11645_v14 }
0x17e9   :  { %5964 = vmatprep.subr.bf16.mxu1 %v11630_v6 }
0x17ea   :  { %12378 = vmatpush3.bf16.msra.mxu0 %v13470_v50  ;;  %v13476_v50 = vld [vmem:[#allocation5 + $0x138] sm:$0xff]  }
0x17eb   :  { %12379 = vmatprep.subr.bf16.mxu0 %v13471_v13 }
0x17ec   :  { %5965 = vmatpush1.bf16.msra.mxu1 %v11629_v34 }
0x17ed   :  { %12393 = vmatprep.subr.bf16.mxu1 %v13473_v63  ;;  %v13479_v63 = vld [vmem:[#allocation5 + $0x170] sm:$0xff]  }
0x17ee   :  { %12380 = vmatpush3.bf16.msra.mxu0 %v13472_v22 }
0x17ef   :  { %5983 = vmatmul.mubr.bf16.vlgmr.msra.gmra.mxu1 %v15139_v28  ;;  %12421 = vmatprep.subr.bf16.mxu0 %v13475_v2  ;;  %v13493_v28 = vld [vmem:[#allocation5 + $0xd0] sm:$0xff]  }
0x17f0   :  { %5992 = vmatprep.mubr.bf16.mxu1 %v16758_v37  ;;  %12394 = vmatpush3.bf16.msra.mxu1 %v13474_v48 }
0x17f1   :  { %12395 = vmatprep.subr.bf16.mxu1 %v13477_v43 }
0x17f4   :  { %12396 = vmatpush3.bf16.msra.mxu1 %v13478_v3 }
0x17f5   :  { %12397 = vmatprep.subr.bf16.mxu1 %v13481_v5  ;;  %v13480_v5 = vld [vmem:[#allocation5 + $0x130] sm:$0xff]  }
0x17f7   :  { %5993 = vmatmul.mubr.bf16.gmra.mxu1 %v15144_v58  ;;  %v13502_v58 = vld [vmem:[#allocation5 + $0x80] sm:$0xff]  }
0x17f8   :  { %12398 = vmatpush3.bf16.msra.mxu1 %v13482_v30 }
0x17f9   :  { %12399 = vmatprep.subr.bf16.mxu1 %v13485_v15 }
0x17fc   :  { %12400 = vmatpush3.bf16.msra.mxu1 %v13486_v4  ;;  %v13483_v4 = vld [vmem:[#allocation5 + $0x168] sm:$0xff]  }
0x17fd   :  { %12401 = vmatprep.subr.bf16.mxu1 %v13489_v8 }
0x1800   :  { %12402 = vmatpush3.bf16.msra.mxu1 %v13490_v9 }
0x1801   :  { %12403 = vmatprep.subr.bf16.mxu1 %v13493_v28  ;;  %v16663_v28 = vmov 3  }
0x1804   :  { %12404 = vmatpush3.bf16.msra.mxu1 %v13494_v47 }
0x1805   :  { %12405 = vmatprep.subr.bf16.mxu1 %v13497_v57 }
0x1808   :  { %12406 = vmatpush3.bf16.msra.mxu1 %v13498_v32  ;;  %v13484_v32 = vld [vmem:[#allocation5 + $0x128] sm:$0xff]  }
0x1809   :  { %12407 = vmatprep.subr.bf16.mxu1 %v13501_v51 }
0x180c   :  { %12408 = vmatpush3.bf16.msra.mxu1 %v13502_v58  ;;  %v13487_v58 = vld [vmem:[#allocation5 + $0x160] sm:$0xff]  }
0x180d   :  { %12449 = vmatprep.subr.bf16.mxu1 %v13505_v60  ;;  %v13488_v60 = vld [vmem:[#allocation5 + $0x120] sm:$0xff]  }
0x182f   :  { %v13153_v11 = vpop.f32.mrf.mxu1 }
0x1830   :  { %v15175_v55 = vadd.f32 %v13153_v11, %v11594_v21  ;;  %v13492_v11 = vld [vmem:[#allocation5 + $0x118] sm:$0xff]  }
0x1831   :  { %v4377_v40 = vpop.f32.mrf.mxu1  ;;  %v5613_v52 = vpop.f32.mrf.mxu0 }
0x1832   :  { %16761 = vst [vmem:[#allocation64_spill] sm:$0xff] %v15175_v55  ;;  %v15180_v39 = vadd.f32 %v11594_v21, %v4377_v40  ;;  %4448 = vperm.xlu1 %13366, %v15175_v55   ;;  %v5614_v26 = vadd.f32 %v5613_v52, %v4862_v56  ;;  %v15210_v40 = vsub.s32 3, %v14348_v0  ;;  %v13495_v52 = vld [vmem:[#allocation5 + $0x150] sm:$0xff]  }
0x1833   :  { %v13156_v45 = vpop.f32.mrf.mxu1  ;;  %v5615_v59 = vpop.f32.mrf.mxu0 }
0x1834   :  { %16762 = vst [vmem:[#allocation65_spill] sm:$0xff] %v15180_v39  ;;  %4443 = vperm.xlu0 %13365, %v15180_v39   ;;  %v5616_v10 = vadd.f32 %v5615_v59, %v4866_v42  ;;  %v6003_v61 = vmax.f32 %v5614_v26, 0.0  ;;  %v15199_v30 = vadd.f32 %v13156_v45, %v11594_v21  ;;  %v15217_v45 = vsub.s32 5, %v14348_v0  ;;  %v13496_v59 = vld [vmem:[#allocation5 + $0x110] sm:$0xff]  }
0x1835   :  { %v4387_v16 = vpop.f32.mrf.mxu1  ;;  %v5617_v24 = vpop.f32.mrf.mxu0  ;;  %v4870_v26 = vrot.slane %v15178_v19, %v14368_v25 }
0x1836   :  { %v15188_v41 = vadd.f32 %v11594_v21, %v4387_v16  ;;  %v5618_v27 = vadd.f32 %v5617_v24, %v4862_v56  ;;  %13367 = vset.pattern.permute.xlu1 %v16667_v23  ;;  %v6004_v29 = vmax.f32 %v5616_v10, 0.0  ;;  %16764 = vst [vmem:[#allocation67_spill] sm:$0xff] %v15199_v30  ;;  %v13491_v21 = vld [vmem:[#allocation5 + $0x158] sm:$0xff]   ;;  %v4874_v16 = vrot.slane %v15178_v19, %v15210_v40 }
0x1837   :  { %v5619_v38 = vpop.f32.mrf.mxu0  ;;  %4495 = vperm.xlu1 %13367, %v15175_v55  }
0x1838   :  { %16763 = vst [vmem:[#allocation66_spill] sm:$0xff] %v15188_v41  ;;  %v5620_v18 = vadd.f32 %v5619_v38, %v4866_v42  ;;  %13376 = vset.pattern.permute.xlu0 %v16667_v23  ;;  %v6019_v46 = vmax.f32 %v5618_v27, 0.0  ;;  %v13499_v27 = vld [vmem:[#allocation5 + $0x148] sm:$0xff]  }
0x1839   :  { %v5623_v49 = vpop.f32.mrf.mxu0  ;;  %4499 = vperm.xlu0 %13376, %v15188_v41  }
0x183a   :  { %v6020_v54 = vmax.f32 %v5620_v18, 0.0  ;;  %v6067_v13 = vpack.c.bf16 %v6019_v46, %v6003_v61  ;;  %v5624_v48 = vadd.f32 %v5623_v49, %v4862_v56  ;;  %v15227_v46 = vrot.slane %v15178_v19, %v15217_v45 }
0x183b   :  { %13368 = vset.pattern.permute.xlu1 %v16665_v20  ;;  %v5625_v14 = vpop.f32.mrf.mxu0 }
0x183c   :  { %4540 = vperm.xlu1 %13368, %v15175_v55   ;;  %v6068_v6 = vpack.c.bf16 %v6020_v54, %v6004_v29  ;;  %v5626_v22 = vadd.f32 %v5625_v14, %v4866_v42  ;;  %v6035_v47 = vmax.f32 %v5624_v48, 0.0  ;;  %v13500_v54 = vld [vmem:[#allocation5 + $0x108] sm:$0xff]  }
0x183d   :  { %v5627_v34 = vpop.f32.mrf.mxu0  ;;  %13377 = vset.pattern.permute.xlu0 %v16665_v20 }
0x183e   :  { %v5628_v2 = vadd.f32 %v5627_v34, %v4862_v56  ;;  %6394 = vmatprep.mubr.bf16.mxu0 %v6068_v6  ;;  %4544 = vperm.xlu0 %13377, %v15188_v41   ;;  %v6036_v8 = vmax.f32 %v5626_v22, 0.0  ;;  %v15214_v56 = vsub.s32 4, %v14348_v0 }
0x183f   :  { %v5629_v43 = vpop.f32.mrf.mxu0  ;;  %6395 = vmatmul.mubr.bf16.vlgmr.msra.gmra.mxu0 %v6067_v13 }
0x1840   :  { %v5630_v3 = vadd.f32 %v5629_v43, %v4866_v42  ;;  %12422 = vmatpush3.bf16.msra.mxu0 %v13476_v50  ;;  %13369 = vset.pattern.permute.xlu1 %v16667_v23  ;;  %v6051_v15 = vmax.f32 %v5628_v2, 0.0  ;;  %v4878_v38 = vrot.slane %v15178_v19, %v15214_v56  ;;  %v13503_v50 = vld [vmem:[#allocation5 + $0x140] sm:$0xff]  }
0x1841   :  { %4491 = vperm.xlu1 %13369, %v15180_v39   ;;  %12423 = vmatprep.subr.bf16.mxu0 %v13479_v63 }
0x1842   :  { %v6052_v9 = vmax.f32 %v5630_v3, 0.0  ;;  %13379 = vset.pattern.permute.xlu0 %v16663_v28  ;;  %v6083_v51 = vpack.c.bf16 %v6051_v15, %v6035_v47  ;;  %v13504_v15 = vld [vmem:[#allocation5 + $0x100] sm:$0xff]  }
0x1843   :  { %4593 = vperm.xlu0 %13379, %v15199_v30  }
0x1844   :  { %12424 = vmatpush3.bf16.msra.mxu0 %v13480_v5  ;;  %v6084_v57 = vpack.c.bf16 %v6052_v9, %v6036_v8 }
0x1845   :  { %13370 = vset.pattern.permute.xlu1 %v16665_v20  ;;  %12425 = vmatprep.subr.bf16.mxu0 %v13483_v4 }
0x1846   :  { %4536 = vperm.xlu1 %13370, %v15180_v39   ;;  %6402 = vmatprep.mubr.bf16.mxu0 %v6084_v57 }
0x1847   :  { %6403 = vmatmul.mubr.bf16.gmra.mxu0 %v6083_v51  ;;  %13381 = vset.pattern.permute.xlu0 %v16667_v23  ;;  %v13507_v51 = vld [vmem:[#allocation5 + $0x278] sm:$0xff]  }
0x1848   :  { %12426 = vmatpush3.bf16.msra.mxu0 %v13484_v32 }
0x1849   :  { %12427 = vmatprep.subr.bf16.mxu0 %v13487_v58 }
0x184a   :  { %13371 = vset.pattern.permute.xlu1 %v16663_v28 }
0x184b   :  { %4581 = vperm.xlu1 %13371, %v15180_v39  }
0x184c   :  { %12428 = vmatpush3.bf16.msra.mxu0 %v13488_v60 }
0x184d   :  { %12429 = vmatprep.subr.bf16.mxu0 %v13491_v21 }
0x184f   :  { %v5666_v42 = vpop.f32.mrf.mxu1  ;;  %4585 = vperm.xlu1 %13371, %v15175_v55  }
0x1850   :  { %12430 = vmatpush3.bf16.msra.mxu0 %v13492_v11  ;;  %v5667_v13 = vadd.f32 %v5666_v42, %v4870_v26 }
0x1851   :  { %v5668_v24 = vpop.f32.mrf.mxu1  ;;  %v5719_v10 = vpop.f32.mrf.mxu0  ;;  %12431 = vmatprep.subr.bf16.mxu0 %v13495_v52 }
0x1852   :  { %v5669_v61 = vadd.f32 %v5668_v24, %v4874_v16  ;;  %v5720_v22 = vadd.f32 %v5719_v10, %v4878_v38  ;;  %v6005_v32 = vmax.f32 %v5667_v13, 0.0 }
0x1853   :  { %v5670_v18 = vpop.f32.mrf.mxu1  ;;  %v5721_v49 = vpop.f32.mrf.mxu0  ;;  %13372 = vset.pattern.permute.xlu1 %v16758_v37 }
0x1854   :  { %v5671_v29 = vadd.f32 %v5670_v18, %v4870_v26  ;;  %12432 = vmatpush3.bf16.msra.mxu0 %v13496_v59  ;;  %4458 = vperm.xlu1 %13372, %v15199_v30   ;;  %v5722_v2 = vadd.f32 %v5721_v49, %v15227_v46  ;;  %v6006_v4 = vmax.f32 %v5669_v61, 0.0  ;;  %v6007_v58 = vmax.f32 %v5720_v22, 0.0  ;;  %v13506_v59 = vld [vmem:[#allocation5 + $0x1b8] sm:$0xff]  }
0x1855   :  { %v5723_v14 = vpop.f32.mrf.mxu0  ;;  %v5672_v6 = vpop.f32.mrf.mxu1  ;;  %12433 = vmatprep.subr.bf16.mxu0 %v13499_v27 }
0x1856   :  { %v5724_v34 = vadd.f32 %v5723_v14, %v4878_v38  ;;  %v5673_v63 = vadd.f32 %v5672_v6, %v4874_v16  ;;  %v6021_v3 = vmax.f32 %v5671_v29, 0.0  ;;  %v6008_v60 = vmax.f32 %v5722_v2, 0.0  ;;  %v13508_v14 = vld [vmem:[#allocation5 + $0x238] sm:$0xff]   ;;  %v13509_v6 = vld [vmem:[#allocation5 + $0x1f0] sm:$0xff]  }
0x1857   :  { %v5676_v48 = vpop.f32.mrf.mxu1  ;;  %v5725_v43 = vpop.f32.mrf.mxu0 }
0x1858   :  { %v6022_v5 = vmax.f32 %v5673_v63, 0.0  ;;  %12434 = vmatpush3.bf16.msra.mxu0 %v13500_v54  ;;  %13373 = vset.pattern.permute.xlu1 %v16667_v23  ;;  %v6023_v8 = vmax.f32 %v5724_v34, 0.0  ;;  %v5726_v9 = vadd.f32 %v5725_v43, %v15227_v46  ;;  %v6069_v24 = vpack.c.bf16 %v6021_v3, %v6005_v32  ;;  %v13511_v63 = vld [vmem:[#allocation5 + $0x270] sm:$0xff]  }
0x1859   :  { %v5729_v47 = vpop.f32.mrf.mxu0  ;;  %v5678_v57 = vpop.f32.mrf.mxu1  ;;  %4503 = vperm.xlu1 %13373, %v15199_v30   ;;  %12435 = vmatprep.subr.bf16.mxu0 %v13503_v50  ;;  %v5677_v49 = vadd.f32 %v5676_v48, %v4870_v26 }
0x185a   :  { %v6024_v21 = vmax.f32 %v5726_v9, 0.0  ;;  %v6070_v42 = vpack.c.bf16 %v6022_v5, %v6006_v4  ;;  %v5679_v10 = vadd.f32 %v5678_v57, %v4874_v16  ;;  %v6071_v18 = vpack.c.bf16 %v6023_v8, %v6007_v58  ;;  %v13514_v57 = vld [vmem:[#allocation5 + $0x1a8] sm:$0xff]  }
0x185b   :  { %v5680_v11 = vpop.f32.mrf.mxu1  ;;  %v5731_v52 = vpop.f32.mrf.mxu0  ;;  %v5730_v22 = vadd.f32 %v5729_v47, %v4878_v38  ;;  %v13513_v47 = vld [vmem:[#allocation5 + $0x1e8] sm:$0xff]  }
0x185c   :  { %v5681_v27 = vadd.f32 %v5680_v11, %v4870_v26  ;;  %12436 = vmatpush3.bf16.msra.mxu0 %v13504_v15  ;;  %6443 = vmatprep.mubr.bf16.mxu1 %v6070_v42  ;;  %v6072_v61 = vpack.c.bf16 %v6024_v21, %v6008_v60  ;;  %v5732_v50 = vadd.f32 %v5731_v52, %v15227_v46  ;;  %v13510_v26 = vld [vmem:[#allocation5 + $0x1b0] sm:$0xff]   ;;  %v6038_v48 = vmax.f32 %v5679_v10, 0.0  ;;  %v13515_v58 = vld [vmem:[#allocation5 + $0x268] sm:$0xff]   ;;  %v13517_v11 = vld [vmem:[#allocation5 + $0x1e0] sm:$0xff]  }
0x185d   :  { %v5682_v29 = vpop.f32.mrf.mxu1  ;;  %v5733_v54 = vpop.f32.mrf.mxu0  ;;  %13374 = vset.pattern.permute.xlu1 %v16665_v20  ;;  %6444 = vmatmul.mubr.bf16.vlgmr.msra.gmra.mxu1 %v6069_v24  ;;  %v6037_v15 = vmax.f32 %v5677_v49, 0.0  ;;  %v6039_v32 = vmax.f32 %v5730_v22, 0.0  ;;  %v13516_v60 = vld [vmem:[#allocation5 + $0x228] sm:$0xff]   ;;  %v13518_v52 = vld [vmem:[#allocation5 + $0x1a0] sm:$0xff]   ;;  %v13523_v10 = vld [vmem:[#allocation5 + $0x258] sm:$0xff]  }
0x185e   :  { %v5683_v13 = vadd.f32 %v5682_v29, %v4874_v16  ;;  %v5734_v34 = vadd.f32 %v5733_v54, %v4878_v38  ;;  %12477 = vmatprep.subr.bf16.mxu0 %v13507_v51  ;;  %6806 = vmatprep.mubr.bf16.mxu0 %v6072_v61  ;;  %v6053_v43 = vmax.f32 %v5681_v27, 0.0  ;;  %v13512_v16 = vld [vmem:[#allocation5 + $0x230] sm:$0xff]   ;;  %v6040_v4 = vmax.f32 %v5732_v50, 0.0  ;;  %v13519_v42 = vld [vmem:[#allocation5 + $0x260] sm:$0xff]   ;;  %v13522_v27 = vld [vmem:[#allocation5 + $0x198] sm:$0xff]  }
0x185f   :  { %12450 = vmatpush3.bf16.msra.mxu1 %v13506_v59  ;;  %v5735_v2 = vpop.f32.mrf.mxu0  ;;  %6807 = vmatmul.mubr.bf16.vlgmr.msra.gmra.mxu0 %v6071_v18  ;;  %v13521_v59 = vld [vmem:[#allocation5 + $0x1d8] sm:$0xff]   ;;  %v13520_v24 = vld [vmem:[#allocation5 + $0x220] sm:$0xff]   ;;  %v13525_v18 = vld [vmem:[#allocation5 + $0x1d0] sm:$0xff]   ;;  %v15244_v29 = vsub.s32 7, %v14348_v0  ;;  %v15247_v54 = vsub.s32 6, %v14348_v0 }
0x1860   :  { %v6054_v3 = vmax.f32 %v5683_v13, 0.0  ;;  %v5736_v5 = vadd.f32 %v5735_v2, %v15227_v46  ;;  %4548 = vperm.xlu1 %13374, %v15199_v30   ;;  %12478 = vmatpush3.bf16.msra.mxu0 %v13508_v14  ;;  %v6055_v8 = vmax.f32 %v5734_v34, 0.0  ;;  %v6085_v51 = vpack.c.bf16 %v6053_v43, %v6037_v15  ;;  %v13524_v49 = vld [vmem:[#allocation5 + $0x218] sm:$0xff]   ;;  %v13527_v61 = vld [vmem:[#allocation5 + $0x250] sm:$0xff]   ;;  %v15251_v50 = vld [vmem:[%s16760_s3 + $0x8] sm:$0xff] }
0x1861   :  { %12451 = vmatprep.subr.bf16.mxu1 %v13509_v6  ;;  %12479 = vmatprep.subr.bf16.mxu0 %v13511_v63  ;;  %v13526_v6 = vld [vmem:[#allocation5 + $0x190] sm:$0xff]   ;;  %v13529_v13 = vld [vmem:[#allocation5 + $0x1c8] sm:$0xff]   ;;  %v15255_v34 = vrot.slane %v15178_v19, %v15244_v29  ;;  %v4886_v2 = vrot.slane %v15178_v19, %v15247_v54 }
0x1862   :  { %v6056_v9 = vmax.f32 %v5736_v5, 0.0  ;;  %v6086_v38 = vpack.c.bf16 %v6054_v3, %v6038_v48  ;;  %v6087_v21 = vpack.c.bf16 %v6055_v8, %v6039_v32  ;;  %v13528_v0 = vld [vmem:[#allocation5 + $0x210] sm:$0xff]   ;;  %v15261_v48 = vrot.slane %v15251_v50, %v14351_v1  ;;  %v13530_v15 = vld [vmem:[#allocation5 + $0x188] sm:$0xff]  }
0x1863   :  { %12452 = vmatpush3.bf16.msra.mxu1 %v13510_v26  ;;  %v13531_v26 = vld [vmem:[#allocation5 + $0x248] sm:$0xff]   ;;  %v15265_v3 = vrot.slane %v15251_v50, %v14365_v31 }
0x1864   :  { %13375 = vset.pattern.permute.xlu1 %v16758_v37  ;;  %6451 = vmatprep.mubr.bf16.mxu1 %v6086_v38  ;;  %v6088_v46 = vpack.c.bf16 %v6056_v9, %v6040_v4  ;;  %v13533_v4 = vld [vmem:[#allocation5 + $0x1c0] sm:$0xff]   ;;  %v13532_v38 = vld [vmem:[#allocation5 + $0x208] sm:$0xff]  }
0x1865   :  { %12480 = vmatpush3.bf16.msra.mxu0 %v13512_v16  ;;  %4453 = vperm.xlu1 %13375, %v15188_v41  }
0x1866   :  { %6452 = vmatmul.mubr.bf16.gmra.mxu1 %v6085_v51  ;;  %12453 = vmatprep.subr.bf16.mxu1 %v13513_v47  ;;  %v13535_v51 = vld [vmem:[#allocation5 + $0x240] sm:$0xff]  }
0x1867   :  { %6814 = vmatprep.mubr.bf16.mxu0 %v6088_v46  ;;  %12454 = vmatpush3.bf16.msra.mxu1 %v13514_v57 }
0x1868   :  { %6815 = vmatmul.mubr.bf16.gmra.mxu0 %v6087_v21  ;;  %12481 = vmatprep.subr.bf16.mxu0 %v13515_v58 }
0x1869   :  { %12482 = vmatpush3.bf16.msra.mxu0 %v13516_v60  ;;  %13378 = vset.pattern.permute.xlu1 %v16663_v28 }
0x186a   :  { %12455 = vmatprep.subr.bf16.mxu1 %v13517_v11  ;;  %4589 = vperm.xlu1 %13378, %v15188_v41   ;;  %v13534_v11 = vld [vmem:[#allocation5 + $0x180] sm:$0xff]  }
0x186b   :  { %12456 = vmatpush3.bf16.msra.mxu1 %v13518_v52  ;;  %12483 = vmatprep.subr.bf16.mxu0 %v13519_v42 }
0x186c   :  { %12457 = vmatprep.subr.bf16.mxu1 %v13521_v59  ;;  %v13537_v59 = vld [vmem:[#allocation5 + $0x2f8] sm:$0xff]  }
0x186d   :  { %12484 = vmatpush3.bf16.msra.mxu0 %v13520_v24 }
0x186e   :  { %12485 = vmatprep.subr.bf16.mxu0 %v13523_v10  ;;  %13380 = vset.pattern.permute.xlu1 %v16758_v37 }
0x186f   :  { %12458 = vmatpush3.bf16.msra.mxu1 %v13522_v27  ;;  %v5772_v14 = vpop.f32.mrf.mxu1 }
0x1870   :  { %12459 = vmatprep.subr.bf16.mxu1 %v13525_v18  ;;  %v5773_v47 = vadd.f32 %v5772_v14, %v4886_v2 }
0x1871   :  { %12486 = vmatpush3.bf16.msra.mxu0 %v13524_v49  ;;  %v5774_v63 = vpop.f32.mrf.mxu1  ;;  %v5825_v22 = vpop.f32.mrf.mxu0 }
0x1872   :  { %12487 = vmatprep.subr.bf16.mxu0 %v13527_v61  ;;  %v5775_v8 = vadd.f32 %v5774_v63, %v15255_v34  ;;  %v5826_v46 = vadd.f32 %v5825_v22, %v15261_v48  ;;  %v13536_v61 = vld [vmem:[#allocation5 + $0x200] sm:$0xff]   ;;  %v6009_v14 = vmax.f32 %v5773_v47, 0.0 }
0x1873   :  { %12460 = vmatpush3.bf16.msra.mxu1 %v13526_v6  ;;  %v5776_v43 = vpop.f32.mrf.mxu1  ;;  %v5827_v5 = vpop.f32.mrf.mxu0  ;;  %v13539_v6 = vld [vmem:[#allocation5 + $0x378] sm:$0xff]  }
0x1874   :  { %v5777_v16 = vadd.f32 %v5776_v43, %v4886_v2  ;;  %12461 = vmatprep.subr.bf16.mxu1 %v13529_v13  ;;  %v5828_v58 = vadd.f32 %v5827_v5, %v15265_v3  ;;  %v6010_v24 = vmax.f32 %v5775_v8, 0.0  ;;  %v6011_v13 = vmax.f32 %v5826_v46, 0.0  ;;  %v13538_v5 = vld [vmem:[#allocation5 + $0x2b8] sm:$0xff]   ;;  %v13541_v8 = vld [vmem:[#allocation5 + $0x2f0] sm:$0xff]  }
0x1875   :  { %12488 = vmatpush3.bf16.msra.mxu0 %v13528_v0  ;;  %v5778_v19 = vpop.f32.mrf.mxu1  ;;  %v5829_v9 = vpop.f32.mrf.mxu0 }
0x1876   :  { %v5779_v57 = vadd.f32 %v5778_v19, %v15255_v34  ;;  %v5830_v32 = vadd.f32 %v5829_v9, %v15261_v48  ;;  %12489 = vmatprep.subr.bf16.mxu0 %v13531_v26  ;;  %v6025_v52 = vmax.f32 %v5777_v16, 0.0  ;;  %v6012_v63 = vmax.f32 %v5828_v58, 0.0 }
0x1877   :  { %12462 = vmatpush3.bf16.msra.mxu1 %v13530_v15  ;;  %v5782_v60 = vpop.f32.mrf.mxu1  ;;  %v5831_v21 = vpop.f32.mrf.mxu0 }
0x1878   :  { %v6026_v42 = vmax.f32 %v5779_v57, 0.0  ;;  %12463 = vmatprep.subr.bf16.mxu1 %v13533_v4  ;;  %v6027_v10 = vmax.f32 %v5830_v32, 0.0  ;;  %v5832_v27 = vadd.f32 %v5831_v21, %v15265_v3  ;;  %v6073_v15 = vpack.c.bf16 %v6025_v52, %v6009_v14  ;;  %v13540_v32 = vld [vmem:[#allocation5 + $0x338] sm:$0xff]   ;;  %v13543_v21 = vld [vmem:[#allocation5 + $0x370] sm:$0xff]  }
0x1879   :  { %12490 = vmatpush3.bf16.msra.mxu0 %v13532_v38  ;;  %v5784_v18 = vpop.f32.mrf.mxu1  ;;  %v5835_v49 = vpop.f32.mrf.mxu0  ;;  %v5783_v9 = vadd.f32 %v5782_v60, %v4886_v2  ;;  %v13542_v60 = vld [vmem:[#allocation5 + $0x2b0] sm:$0xff]  }
0x187a   :  { %12491 = vmatprep.subr.bf16.mxu0 %v13535_v51  ;;  %v6028_v22 = vmax.f32 %v5832_v27, 0.0  ;;  %v6074_v43 = vpack.c.bf16 %v6026_v42, %v6010_v24  ;;  %v5785_v16 = vadd.f32 %v5784_v18, %v15255_v34  ;;  %v6075_v19 = vpack.c.bf16 %v6027_v10, %v6011_v13  ;;  %v13545_v10 = vld [vmem:[#allocation5 + $0x2e8] sm:$0xff]   ;;  %v13544_v27 = vld [vmem:[#allocation5 + $0x330] sm:$0xff]  }
0x187b   :  { %12464 = vmatpush3.bf16.msra.mxu1 %v13534_v11  ;;  %v5786_v0 = vpop.f32.mrf.mxu1  ;;  %v5837_v26 = vpop.f32.mrf.mxu0  ;;  %v5836_v11 = vadd.f32 %v5835_v49, %v15261_v48  ;;  %v13546_v49 = vld [vmem:[#allocation5 + $0x2a8] sm:$0xff]  }
0x187c   :  { %v5787_v4 = vadd.f32 %v5786_v0, %v4886_v2  ;;  %12505 = vmatprep.subr.bf16.mxu1 %v13537_v59  ;;  %6855 = vmatprep.mubr.bf16.mxu1 %v6074_v43  ;;  %v6076_v57 = vpack.c.bf16 %v6028_v22, %v6012_v63  ;;  %v5838_v51 = vadd.f32 %v5837_v26, %v15265_v3  ;;  %v6042_v52 = vmax.f32 %v5785_v16, 0.0  ;;  %v13548_v0 = vld [vmem:[#allocation5 + $0x328] sm:$0xff]   ;;  %v13551_v43 = vld [vmem:[#allocation5 + $0x360] sm:$0xff]  }
0x187d   :  { %12492 = vmatpush3.bf16.msra.mxu0 %v13536_v61  ;;  %v5788_v38 = vpop.f32.mrf.mxu1  ;;  %v5839_v47 = vpop.f32.mrf.mxu0  ;;  %v6043_v13 = vmax.f32 %v5836_v11, 0.0  ;;  %v13552_v16 = vld [vmem:[#allocation5 + $0x320] sm:$0xff]   ;;  %v4902_v11 = vrot.slane %v15251_v50, %v14368_v25 }
0x187e   :  { %v5789_v46 = vadd.f32 %v5788_v38, %v15255_v34  ;;  %v5840_v58 = vadd.f32 %v5839_v47, %v15261_v48  ;;  %6856 = vmatmul.mubr.bf16.vlgmr.msra.gmra.mxu1 %v6073_v15  ;;  %12533 = vmatprep.subr.bf16.mxu0 %v13539_v6  ;;  %v6057_v42 = vmax.f32 %v5787_v4, 0.0  ;;  %v6041_v34 = vmax.f32 %v5783_v9, 0.0  ;;  %v13547_v6 = vld [vmem:[#allocation5 + $0x368] sm:$0xff]   ;;  %v13553_v15 = vld [vmem:[#allocation5 + $0x2d8] sm:$0xff]   ;;  %v13559_v38 = vld [vmem:[#allocation5 + $0x350] sm:$0xff]  }
0x187f   :  { %7215 = vmatprep.mubr.bf16.mxu0 %v6076_v57  ;;  %12506 = vmatpush3.bf16.msra.mxu1 %v13538_v5  ;;  %v5841_v2 = vpop.f32.mrf.mxu0  ;;  %v6044_v18 = vmax.f32 %v5838_v51, 0.0  ;;  %v13550_v5 = vld [vmem:[#allocation5 + $0x2a0] sm:$0xff]   ;;  %v13555_v4 = vld [vmem:[#allocation5 + $0x358] sm:$0xff]   ;;  %v13558_v57 = vld [vmem:[#allocation5 + $0x290] sm:$0xff]   ;;  %v15281_v51 = vrot.slane %v15251_v50, %v15210_v40 }
0x1880   :  { %v6058_v59 = vmax.f32 %v5789_v46, 0.0  ;;  %v5842_v24 = vadd.f32 %v5841_v2, %v15265_v3  ;;  %7216 = vmatmul.mubr.bf16.vlgmr.msra.gmra.mxu0 %v6075_v19  ;;  %12507 = vmatprep.subr.bf16.mxu1 %v13541_v8  ;;  %v6059_v61 = vmax.f32 %v5840_v58, 0.0  ;;  %v6089_v63 = vpack.c.bf16 %v6057_v42, %v6041_v34  ;;  %v13549_v3 = vld [vmem:[#allocation5 + $0x2e0] sm:$0xff]   ;;  %v13554_v8 = vld [vmem:[#allocation5 + $0x298] sm:$0xff]   ;;  %v13557_v19 = vld [vmem:[#allocation5 + $0x2d0] sm:$0xff]  }
0x1881   :  { %12534 = vmatpush3.bf16.msra.mxu0 %v13540_v32  ;;  %v13556_v9 = vld [vmem:[#allocation5 + $0x318] sm:$0xff]   ;;  %v13561_v32 = vld [vmem:[#allocation5 + $0x2c8] sm:$0xff]   ;;  %v13565_v34 = vld [vmem:[#allocation5 + $0x2c0] sm:$0xff]  }
0x1882   :  { %v6060_v14 = vmax.f32 %v5842_v24, 0.0  ;;  %12535 = vmatprep.subr.bf16.mxu0 %v13543_v21  ;;  %v6090_v48 = vpack.c.bf16 %v6058_v59, %v6042_v52  ;;  %v6091_v26 = vpack.c.bf16 %v6059_v61, %v6043_v13  ;;  %v13560_v21 = vld [vmem:[#allocation5 + $0x310] sm:$0xff]   ;;  %v13563_v2 = vld [vmem:[#allocation5 + $0x348] sm:$0xff]   ;;  %v15287_v52 = vrot.slane %v15251_v50, %v15217_v45  ;;  %v13567_v13 = vld [vmem:[#allocation5 + $0x340] sm:$0xff]  }
0x1883   :  { %12508 = vmatpush3.bf16.msra.mxu1 %v13542_v60  ;;  %v13562_v59 = vld [vmem:[#allocation5 + $0x288] sm:$0xff]   ;;  %v4910_v24 = vrot.slane %v15251_v50, %v15214_v56 }
0x1884   :  { %v6092_v22 = vpack.c.bf16 %v6060_v14, %v6044_v18  ;;  %6863 = vmatprep.mubr.bf16.mxu1 %v6090_v48  ;;  %12509 = vmatprep.subr.bf16.mxu1 %v13545_v10  ;;  %v13564_v14 = vld [vmem:[#allocation5 + $0x308] sm:$0xff]  }
0x1885   :  { %12536 = vmatpush3.bf16.msra.mxu0 %v13544_v27 }
0x1886   :  { %6864 = vmatmul.mubr.bf16.gmra.mxu1 %v6089_v63  ;;  %7223 = vmatprep.mubr.bf16.mxu0 %v6092_v22 }
0x1887   :  { %12510 = vmatpush3.bf16.msra.mxu1 %v13546_v49  ;;  %12537 = vmatprep.subr.bf16.mxu0 %v13547_v6 }
0x1888   :  { %7224 = vmatmul.mubr.bf16.gmra.mxu0 %v6091_v26  ;;  %12511 = vmatprep.subr.bf16.mxu1 %v13549_v3 }
0x1889   :  { %12538 = vmatpush3.bf16.msra.mxu0 %v13548_v0  ;;  %v13566_v0 = vld [vmem:[#allocation5 + $0x280] sm:$0xff]  }
0x188a   :  { %12539 = vmatprep.subr.bf16.mxu0 %v13551_v43 }
0x188b   :  { %12512 = vmatpush3.bf16.msra.mxu1 %v13550_v5 }
0x188c   :  { %12513 = vmatprep.subr.bf16.mxu1 %v13553_v15  ;;  %v13569_v15 = vld [vmem:[#allocation5 + $0x3f8] sm:$0xff]  }
0x188d   :  { %12540 = vmatpush3.bf16.msra.mxu0 %v13552_v16 }
0x188e   :  { %12541 = vmatprep.subr.bf16.mxu0 %v13555_v4 }
0x188f   :  { %12514 = vmatpush3.bf16.msra.mxu1 %v13554_v8  ;;  %v5878_v47 = vpop.f32.mrf.mxu1 }
0x1890   :  { %12515 = vmatprep.subr.bf16.mxu1 %v13557_v19  ;;  %v5879_v48 = vadd.f32 %v5878_v47, %v4902_v11 }
0x1891   :  { %12542 = vmatpush3.bf16.msra.mxu0 %v13556_v9  ;;  %v5880_v46 = vpop.f32.mrf.mxu1  ;;  %v5931_v58 = vpop.f32.mrf.mxu0  ;;  %v13568_v9 = vld [vmem:[#allocation5 + $0x300] sm:$0xff]  }
0x1892   :  { %12543 = vmatprep.subr.bf16.mxu0 %v13559_v38  ;;  %v5881_v27 = vadd.f32 %v5880_v46, %v15281_v51  ;;  %v5932_v26 = vadd.f32 %v5931_v58, %v4910_v24  ;;  %v6013_v38 = vmax.f32 %v5879_v48, 0.0 }
0x1893   :  { %12516 = vmatpush3.bf16.msra.mxu1 %v13558_v57  ;;  %v5882_v60 = vpop.f32.mrf.mxu1  ;;  %v5933_v42 = vpop.f32.mrf.mxu0 }
0x1894   :  { %v5883_v10 = vadd.f32 %v5882_v60, %v4902_v11  ;;  %12517 = vmatprep.subr.bf16.mxu1 %v13561_v32  ;;  %v5934_v63 = vadd.f32 %v5933_v42, %v15287_v52  ;;  %v6014_v16 = vmax.f32 %v5881_v27, 0.0  ;;  %v6015_v60 = vmax.f32 %v5932_v26, 0.0 }
0x1895   :  { %12544 = vmatpush3.bf16.msra.mxu0 %v13560_v21  ;;  %v5884_v18 = vpop.f32.mrf.mxu1  ;;  %v5935_v61 = vpop.f32.mrf.mxu0 }
0x1896   :  { %v5885_v49 = vadd.f32 %v5884_v18, %v15281_v51  ;;  %v5936_v6 = vadd.f32 %v5935_v61, %v4910_v24  ;;  %12545 = vmatprep.subr.bf16.mxu0 %v13563_v2  ;;  %v6029_v43 = vmax.f32 %v5883_v10, 0.0  ;;  %v6016_v57 = vmax.f32 %v5934_v63, 0.0  ;;  %v13570_v2 = vld [vmem:[#allocation5 + $0x3b8] sm:$0xff]  }
0x1897   :  { %12518 = vmatpush3.bf16.msra.mxu1 %v13562_v59  ;;  %v5888_v22 = vpop.f32.mrf.mxu1  ;;  %v5937_v3 = vpop.f32.mrf.mxu0 }
0x1898   :  { %v6030_v5 = vmax.f32 %v5885_v49, 0.0  ;;  %12519 = vmatprep.subr.bf16.mxu1 %v13565_v34  ;;  %v5938_v4 = vadd.f32 %v5937_v3, %v15287_v52  ;;  %v6031_v47 = vmax.f32 %v5936_v6, 0.0  ;;  %v6077_v42 = vpack.c.bf16 %v6029_v43, %v6013_v38  ;;  %v13571_v34 = vld [vmem:[#allocation5 + $0x3f0] sm:$0xff]  }
0x1899   :  { %12546 = vmatpush3.bf16.msra.mxu0 %v13564_v14  ;;  %v5890_v8 = vpop.f32.mrf.mxu1  ;;  %v5941_v19 = vpop.f32.mrf.mxu0  ;;  %v5889_v27 = vadd.f32 %v5888_v22, %v4902_v11 }
0x189a   :  { %12547 = vmatprep.subr.bf16.mxu0 %v13567_v13  ;;  %v6032_v32 = vmax.f32 %v5938_v4, 0.0  ;;  %v6078_v58 = vpack.c.bf16 %v6030_v5, %v6014_v16  ;;  %v5891_v59 = vadd.f32 %v5890_v8, %v15281_v51  ;;  %v6079_v48 = vpack.c.bf16 %v6031_v47, %v6015_v60  ;;  %v13573_v5 = vld [vmem:[#allocation5 + $0x3e8] sm:$0xff]   ;;  %v13575_v47 = vld [vmem:[#allocation5 + $0x3e0] sm:$0xff]   ;;  %v13580_v60 = vld [vmem:[#allocation5 + $0x390] sm:$0xff]  }
0x189b   :  { %12520 = vmatpush3.bf16.msra.mxu1 %v13566_v0  ;;  %v5892_v46 = vpop.f32.mrf.mxu1  ;;  %v5943_v21 = vpop.f32.mrf.mxu0  ;;  %v5942_v63 = vadd.f32 %v5941_v19, %v4910_v24  ;;  %v13572_v0 = vld [vmem:[#allocation5 + $0x3b0] sm:$0xff]  }
0x189c   :  { %v5893_v10 = vadd.f32 %v5892_v46, %v4902_v11  ;;  %12561 = vmatprep.subr.bf16.mxu1 %v13569_v15  ;;  %v6080_v18 = vpack.c.bf16 %v6032_v32, %v6016_v57  ;;  %7264 = vmatprep.mubr.bf16.mxu1 %v6078_v58  ;;  %v5944_v49 = vadd.f32 %v5943_v21, %v15287_v52  ;;  %v6046_v26 = vmax.f32 %v5891_v59, 0.0  ;;  %v13577_v32 = vld [vmem:[#allocation5 + $0x3d8] sm:$0xff]   ;;  %v13579_v21 = vld [vmem:[#allocation5 + $0x3d0] sm:$0xff]   ;;  %v13581_v59 = vld [vmem:[#allocation5 + $0x3c8] sm:$0xff]  }
0x189d   :  { %12548 = vmatpush3.bf16.msra.mxu0 %v13568_v9  ;;  %v5894_v61 = vpop.f32.mrf.mxu1  ;;  %v5945_v14 = vpop.f32.mrf.mxu0  ;;  %v6045_v15 = vmax.f32 %v5889_v27, 0.0  ;;  %v13574_v9 = vld [vmem:[#allocation5 + $0x3a8] sm:$0xff]   ;;  %v13578_v46 = vld [vmem:[#allocation5 + $0x398] sm:$0xff]  }
0x189e   :  { %v5895_v6 = vadd.f32 %v5894_v61, %v15281_v51  ;;  %v5946_v13 = vadd.f32 %v5945_v14, %v4910_v24  ;;  %7265 = vmatmul.mubr.bf16.vlgmr.msra.gmra.mxu1 %v6077_v42  ;;  %7624 = vmatprep.mubr.bf16.mxu0 %v6080_v18  ;;  %v6061_v43 = vmax.f32 %v5893_v10, 0.0  ;;  %v6048_v16 = vmax.f32 %v5944_v49, 0.0  ;;  %v13582_v61 = vld [vmem:[#allocation5 + $0x388] sm:$0xff]   ;;  %v13583_v49 = vld [vmem:[#allocation5 + $0x3c0] sm:$0xff]  }
0x189f   :  { %12562 = vmatpush3.bf16.msra.mxu1 %v13570_v2  ;;  %v5947_v3 = vpop.f32.mrf.mxu0  ;;  %v6047_v24 = vmax.f32 %v5942_v63, 0.0  ;;  %v4922_v42 = vrot.slane %v15251_v50, %v15244_v29 }
0x18a0   :  { %v6062_v11 = vmax.f32 %v5895_v6, 0.0  ;;  %v5948_v22 = vadd.f32 %v5947_v3, %v15287_v52  ;;  %7625 = vmatmul.mubr.bf16.vlgmr.msra.gmra.mxu0 %v6079_v48  ;;  %12563 = vmatprep.subr.bf16.mxu1 %v13571_v34  ;;  %v6063_v8 = vmax.f32 %v5946_v13, 0.0  ;;  %v6093_v19 = vpack.c.bf16 %v6061_v43, %v6045_v15  ;;  %v13576_v52 = vld [vmem:[#allocation5 + $0x3a0] sm:$0xff]  }
0x18a1   :  { %v4918_v34 = vrot.slane %v15251_v50, %v15247_v54  ;;  %v13584_v43 = vld [vmem:[#allocation5 + $0x380] sm:$0xff]  }
0x18a2   :  { %v6094_v4 = vpack.c.bf16 %v6062_v11, %v6046_v26  ;;  %v6064_v51 = vmax.f32 %v5948_v22, 0.0  ;;  %v6095_v57 = vpack.c.bf16 %v6063_v8, %v6047_v24 }
0x18a3   :  { %12564 = vmatpush3.bf16.msra.mxu1 %v13572_v0 }
0x18a4   :  { %v6096_v38 = vpack.c.bf16 %v6064_v51, %v6048_v16  ;;  %7272 = vmatprep.mubr.bf16.mxu1 %v6094_v4  ;;  %12565 = vmatprep.subr.bf16.mxu1 %v13573_v5 }
0x18a6   :  { %7273 = vmatmul.mubr.bf16.gmra.mxu1 %v6093_v19  ;;  %7632 = vmatprep.mubr.bf16.mxu0 %v6096_v38 }
0x18a7   :  { %12566 = vmatpush3.bf16.msra.mxu1 %v13574_v9 }
0x18a8   :  { %7633 = vmatmul.mubr.bf16.gmra.mxu0 %v6095_v57  ;;  %12567 = vmatprep.subr.bf16.mxu1 %v13575_v47 }
0x18ab   :  { %12568 = vmatpush3.bf16.msra.mxu1 %v13576_v52 }
0x18ac   :  { %12569 = vmatprep.subr.bf16.mxu1 %v13577_v32 }
0x18ad   :  { %v15299_v58 = vpop.permute.xlu1 %4448 }
0x18ae   :  { %vm4466_vm10 = vcmp.eq.f32.partialorder %v15299_v58, %v15175_v55  ;;  %vm4462_vm2 = vcmp.gt.f32.partialorder %v15299_v58, %v15175_v55 }
0x18af   :  { %12570 = vmatpush3.bf16.msra.mxu1 %v13578_v46  ;;  %v5984_v2 = vpop.f32.mrf.mxu1  ;;  %v4444_v63 = vpop.permute.xlu0 %4443  ;;  %vm15320_vm13 = vmand %vm4466_vm10, %vm16657_vm9 }
0x18b0   :  { %12571 = vmatprep.subr.bf16.mxu1 %v13579_v21  ;;  %v5985_v13 = vadd.f32 %v5984_v2, %v4918_v34  ;;  %vm4465_vm8 = vcmp.eq.f32.partialorder %v4444_v63, %v15180_v39  ;;  %vm4461_vm11 = vcmp.gt.f32.partialorder %v4444_v63, %v15180_v39 }
0x18b1   :  { %v5986_v10 = vpop.f32.mrf.mxu1  ;;  %vm15314_vm12 = vmand %vm4465_vm8, %vm16657_vm9 }
0x18b2   :  { %v15305_v27 = vpop.permute.xlu1 %4495  ;;  %v5987_v14 = vadd.f32 %v5986_v10, %v4922_v42  ;;  %v6017_v15 = vmax.f32 %v5985_v13, 0.0  ;;  %vm15335_vm10 = vmor %vm4461_vm11, %vm15314_vm12 }
0x18b3   :  { %12572 = vmatpush3.bf16.msra.mxu1 %v13580_v60  ;;  %v5988_v18 = vpop.f32.mrf.mxu1  ;;  %vm4511_vm15 = vcmp.eq.f32.partialorder %v15305_v27, %v15175_v55  ;;  %vm15370_vm9 = vmor %vm4462_vm2, %vm15320_vm13 }
0x18b4   :  { %v5989_v48 = vadd.f32 %v5988_v18, %v4918_v34  ;;  %12573 = vmatprep.subr.bf16.mxu1 %v13581_v59  ;;  %v6018_v11 = vmax.f32 %v5987_v14, 0.0  ;;  %vm15343_vm4 = vmand %vm4511_vm15, %vm16660_vm14  ;;  %v15378_v13 = vpop.permute.xlu0 %4499 }
0x18b5   :  { %v5990_v6 = vpop.f32.mrf.mxu1 }
0x18b6   :  { %v5991_v3 = vadd.f32 %v5990_v6, %v4922_v42  ;;  %v6033_v22 = vmax.f32 %v5989_v48, 0.0 }
0x18b7   :  { %12574 = vmatpush3.bf16.msra.mxu1 %v13582_v61  ;;  %v5994_v0 = vpop.f32.mrf.mxu1  ;;  %v4541_v26 = vpop.permute.xlu1 %4540  ;;  %v16661_v61 = vmov 0.0  }
0x18b8   :  { %v6034_v50 = vmax.f32 %v5991_v3, 0.0  ;;  %12575 = vmatprep.subr.bf16.mxu1 %v13583_v49  ;;  %v6081_v51 = vpack.c.bf16 %v6033_v22, %v6017_v15  ;;  %v5995_v57 = vadd.f32 %v5994_v0, %v4918_v34  ;;  %vm4556_vm5 = vcmp.eq.f32.partialorder %v4541_v26, %v15175_v55 }
0x18b9   :  { %v5996_v5 = vpop.f32.mrf.mxu1  ;;  %vm15351_vm12 = vmand %vm4556_vm5, %vm16659_vm6  ;;  %v11595_v48 = vsel %vm15335_vm10, 1.0, %v16661_v61  ;;  %v11596_v0 = vsel %vm15370_vm9, 1.0, %v16661_v61 }
0x18ba   :  { %v6082_v16 = vpack.c.bf16 %v6034_v50, %v6018_v11  ;;  %v5997_v9 = vadd.f32 %v5996_v5, %v4922_v42  ;;  %v6049_v59 = vmax.f32 %v5995_v57, 0.0  ;;  %v4545_v5 = vpop.permute.xlu0 %4544 }
0x18bb   :  { %12576 = vmatpush3.bf16.msra.mxu1 %v13584_v43  ;;  %v5998_v4 = vpop.f32.mrf.mxu1 }
0x18bc   :  { %v5999_v24 = vadd.f32 %v5998_v4, %v4918_v34  ;;  %7673 = vmatprep.mubr.bf16.mxu1 %v6082_v16  ;;  %v4492_v19 = vpop.permute.xlu1 %4491  ;;  %v6050_v21 = vmax.f32 %v5997_v9, 0.0 }
0x18bd   :  { %vm4510_vm0 = vcmp.eq.f32.partialorder %v4492_v19, %v15180_v39  ;;  %v6000_v47 = vpop.f32.mrf.mxu1  ;;  %vm4506_vm8 = vcmp.gt.f32.partialorder %v4492_v19, %v15180_v39 }
0x18be   :  { %vm4515_vm7 = vmand %vm4510_vm0, %vm16660_vm14  ;;  %v6001_v52 = vadd.f32 %v6000_v47, %v4922_v42  ;;  %7674 = vmatmul.mubr.bf16.vlgmr.msra.gmra.mxu1 %v6081_v51  ;;  %v6065_v2 = vmax.f32 %v5999_v24, 0.0  ;;  %vm4507_vm0 = vcmp.gt.f32.partialorder %v15305_v27, %v15175_v55  ;;  %v4594_v47 = vpop.permute.xlu0 %4593 }
0x18bf   :  { %vm4519_vm11 = vmor %vm4506_vm8, %vm4515_vm7  ;;  %vm4552_vm7 = vcmp.gt.f32.partialorder %v4541_v26, %v15175_v55 }
0x18c0   :  { %v6066_v60 = vmax.f32 %v6001_v52, 0.0  ;;  %v6097_v18 = vpack.c.bf16 %v6065_v2, %v6049_v59  ;;  %v11599_v14 = vsel %vm4519_vm11, 1.0, %v16661_v61  ;;  %vm4520_vm8 = vmor %vm4507_vm0, %vm15343_vm4  ;;  %v16777_v2 = vmov 0 }
0x18c1   :  { %v4537_v42 = vpop.permute.xlu1 %4536  ;;  %v4531_v27 = vadd.f32 %v11599_v14, %v11595_v48  ;;  %v11600_v63 = vsel %vm4520_vm8, 1.0, %v16661_v61  ;;  %vm4512_vm8 = vcmp.eq.f32.partialorder %v15378_v13, %v15188_v41 }
0x18c2   :  { %v6098_v34 = vpack.c.bf16 %v6066_v60, %v6050_v21  ;;  %vm4551_vm15 = vcmp.gt.f32.partialorder %v4537_v42, %v15180_v39  ;;  %vm4555_vm3 = vcmp.eq.f32.partialorder %v4537_v42, %v15180_v39  ;;  %v4532_v22 = vadd.f32 %v11600_v63, %v11596_v0 }
0x18c3   :  { %vm4560_vm1 = vmand %vm4555_vm3, %vm16659_vm6  ;;  %vm16692_vm3 = vcmp.gt.s32.totalorder %v14406_v53, 3 }
0x18c4   :  { %vm4564_vm5 = vmor %vm4551_vm15, %vm4560_vm1  ;;  %7681 = vmatprep.mubr.bf16.mxu1 %v6098_v34 }
0x18c5   :  { %v11603_v49 = vsel %vm4564_vm5, 1.0, %v16661_v61  ;;  %vm4565_vm1 = vmor %vm4552_vm7, %vm15351_vm12  ;;  %vm16658_vm5 = vcmask 31744  }
0x18c6   :  { %7682 = vmatmul.mubr.bf16.gmra.mxu1 %v6097_v18  ;;  %v4582_v6 = vpop.permute.xlu1 %4581  ;;  %v4576_v3 = vadd.f32 %v11603_v49, %v4531_v27  ;;  %v11604_v26 = vsel %vm4565_vm1, 1.0, %v16661_v61 }
0x18c7   :  { %vm4596_vm2 = vcmp.gt.f32.partialorder %v4582_v6, %v15180_v39  ;;  %vm4600_vm4 = vcmp.eq.f32.partialorder %v4582_v6, %v15180_v39  ;;  %9117 = vmatprep.mubr.bf16.mxu1 %v16758_v37  ;;  %v4577_v15 = vadd.f32 %v11604_v26, %v4532_v22 }
0x18c8   :  { %vm4605_vm13 = vmand %vm4600_vm4, %vm16692_vm3 }
0x18c9   :  { %vm4609_vm10 = vmor %vm4596_vm2, %vm4605_vm13 }
0x18ca   :  { %v4586_v43 = vpop.permute.xlu1 %4585  ;;  %v11607_v11 = vsel %vm4609_vm10, 1.0, %v16661_v61  ;;  %vm15418_vm2 = vmand %vm4512_vm8, %vm16660_vm14  ;;  %vm4603_vm10 = vcmp.eq.f32.partialorder %v4594_v47, %v15199_v30  ;;  %vm4599_vm8 = vcmp.gt.f32.partialorder %v4594_v47, %v15199_v30 }
0x18cb   :  { %vm4597_vm0 = vcmp.gt.f32.partialorder %v4586_v43, %v15175_v55  ;;  %vm4601_vm11 = vcmp.eq.f32.partialorder %v4586_v43, %v15175_v55  ;;  %v4621_v50 = vadd.f32 %v11607_v11, %v4576_v3  ;;  %v16778_v2 = vsel %vm15418_vm2, 4294967295, %v16777_v2 }
0x18cc   :  { %vm4606_vm12 = vmand %vm4601_vm11, %vm16692_vm3  ;;  %vm16780_vm2 = vcmp.gt.s32.totalorder %v14406_v53, 2 }
0x18cd   :  { %vm4610_vm15 = vmor %vm4597_vm0, %vm4606_vm12  ;;  %vm4625_vm7 = vcmp.lt.f32.partialorder %v4621_v50, 2.0  ;;  %vm16779_vm12 = vcmp.gt.s32.totalorder %v14406_v53, 0 }
0x18ce   :  { %v15399_v16 = vsel %vm4625_vm7, %v15180_v39, -1e+09  ;;  %v11608_v4 = vsel %vm4610_vm15, 1.0, %v16661_v61  ;;  %v11611_v24 = vsel %vm4625_vm7, 1.0, %v16661_v61  ;;  %vm4557_vm7 = vcmp.eq.f32.partialorder %v4545_v5, %v15188_v41 }
0x18cf   :  { %v4459_v8 = vpop.permute.xlu1 %4458  ;;  %v4633_v51 = vsel %vm16658_vm5, %v15399_v16, -inf  ;;  %v4622_v9 = vadd.f32 %v11608_v4, %v4577_v15  ;;  %v4700_v57 = vsel %vm16658_vm5, %v11611_v24, 0.0 }
0x18d0   :  { %4634 = vmax.xlane.f32.xlu1 %v4633_v51  ;;  %vm4468_vm1 = vcmp.eq.f32.partialorder %v4459_v8, %v15199_v30  ;;  %vm4464_vm11 = vcmp.gt.f32.partialorder %v4459_v8, %v15199_v30 }
0x18d1   :  { %vm4626_vm9 = vcmp.lt.f32.partialorder %v4622_v9, 2.0  ;;  %vm4473_vm15 = vmand %vm4468_vm1, %vm16779_vm12 }
0x18d2   :  { %v15408_v19 = vsel %vm4626_vm9, %v15175_v55, -1e+09  ;;  %v11612_v38 = vsel %vm4626_vm9, 1.0, %v16661_v61  ;;  %vm4477_vm6 = vmor %vm4464_vm11, %vm4473_vm15  ;;  %vm4553_vm11 = vcmp.gt.f32.partialorder %v4545_v5, %v15188_v41 }
0x18d3   :  { %v4636_v52 = vsel %vm16658_vm5, %v15408_v19, -inf  ;;  %v4701_v32 = vsel %vm16658_vm5, %v11612_v38, 0.0  ;;  %vm4608_vm5 = vmand %vm4603_vm10, %vm16692_vm3  ;;  %vm4508_vm10 = vcmp.gt.f32.partialorder %v15378_v13, %v15188_v41  ;;  %v11598_v34 = vsel %vm4477_vm6, 1.0, %v16661_v61 }
0x18d4   :  { %v4504_v46 = vpop.permute.xlu1 %4503  ;;  %4637 = vmax.xlane.f32.xlu0 %v4636_v52  ;;  %v4702_v21 = vadd.f32 %v4701_v32, %v4700_v57 }
0x18d5   :  { %vm4509_vm4 = vcmp.gt.f32.partialorder %v4504_v46, %v15199_v30  ;;  %vm4513_vm13 = vcmp.eq.f32.partialorder %v4504_v46, %v15199_v30 }
0x18d6   :  { %vm4518_vm0 = vmand %vm4513_vm13, %vm16660_vm14 }
0x18d7   :  { %vm4522_vm9 = vmor %vm4509_vm4, %vm4518_vm0 }
0x18d8   :  { %vm15436_vm13 = vmand %vm4557_vm7, %vm16780_vm2  ;;  %v11602_v42 = vsel %vm4522_vm9, 1.0, %v16661_v61 }
0x18d9   :  { %vm15441_vm14 = vmor %vm4599_vm8, %vm4608_vm5  ;;  %v4534_v18 = vadd.f32 %v11602_v42, %v11598_v34  ;;  %vm16785_vm5 = vnez %v16778_v2  ;;  %vm16786_vm8 = vcmp.gt.s32.totalorder %v14406_v53, 0 }
0x18da   :  { %vm4521_vm15 = vmor %vm4508_vm10, %vm16785_vm5  ;;  %v11610_v49 = vsel %vm15441_vm14, 1.0, %v16661_v61 }
0x18db   :  { %v4549_v59 = vpop.permute.xlu1 %4548  ;;  %vm4566_vm7 = vmor %vm4553_vm11, %vm15436_vm13  ;;  %v11601_v13 = vsel %vm4521_vm15, 1.0, %v16661_v61 }
0x18dc   :  { %vm4554_vm1 = vcmp.gt.f32.partialorder %v4549_v59, %v15199_v30  ;;  %vm4558_vm4 = vcmp.eq.f32.partialorder %v4549_v59, %v15199_v30  ;;  %v11605_v26 = vsel %vm4566_vm7, 1.0, %v16661_v61 }
0x18dd   :  { %vm4563_vm0 = vmand %vm4558_vm4, %vm16780_vm2  ;;  %vm16787_vm2 = vcmask 31744  }
0x18de   :  { %vm4567_vm12 = vmor %vm4554_vm1, %vm4563_vm0 }
0x18df   :  { %v11606_v14 = vsel %vm4567_vm12, 1.0, %v16661_v61  ;;  %vm16788_vm5 = vmmov %vm16787_vm2 }
0x18e0   :  { %v4454_v58 = vpop.permute.xlu1 %4453  ;;  %v4579_v48 = vadd.f32 %v11606_v14, %v4534_v18  ;;  %vm16789_vm15 = vmmov %vm16787_vm2 }
0x18e1   :  { %vm4463_vm9 = vcmp.gt.f32.partialorder %v4454_v58, %v15188_v41  ;;  %vm4467_vm6 = vcmp.eq.f32.partialorder %v4454_v58, %v15188_v41  ;;  %vm16790_vm7 = vmmov %vm16787_vm2 }
0x18e2   :  { %vm4472_vm1 = vmand %vm4467_vm6, %vm16786_vm8  ;;  %v4624_v6 = vadd.f32 %v11610_v49, %v4579_v48 }
0x18e3   :  { %vm4476_vm4 = vmor %vm4463_vm9, %vm4472_vm1 }
0x18e4   :  { %v11597_v27 = vsel %vm4476_vm4, 1.0, %v16661_v61  ;;  %vm4628_vm10 = vcmp.lt.f32.partialorder %v4624_v6, 2.0  ;;  %vm16792_vm9 = vmmov %vm16787_vm2 }
0x18e5   :  { %v4533_v63 = vadd.f32 %v11601_v13, %v11597_v27  ;;  %v4590_v3 = vpop.permute.xlu1 %4589  ;;  %v4632_v0 = vsel %vm4628_vm10, %v15199_v30, -1e+09  ;;  %v11614_v5 = vsel %vm4628_vm10, 1.0, %v16661_v61  ;;  %vm16793_vm6 = vmmov %vm16787_vm2 }
0x18e6   :  { %vm4598_vm13 = vcmp.gt.f32.partialorder %v4590_v3, %v15188_v41  ;;  %vm4602_vm14 = vcmp.eq.f32.partialorder %v4590_v3, %v15188_v41  ;;  %v4642_v43 = vsel %vm16787_vm2, %v4632_v0, -inf  ;;  %v4705_v24 = vsel %vm16790_vm7, %v11614_v5, 0.0  ;;  %vm16795_vm8 = vmmov %vm16787_vm2 }
0x18e7   :  { %vm4607_vm0 = vmand %vm4602_vm14, %vm16692_vm3  ;;  %4643 = vmax.xlane.f32.xlu0 %v4642_v43  ;;  %v4578_v11 = vadd.f32 %v11605_v26, %v4533_v63 }
0x18e8   :  { %vm4611_vm11 = vmor %vm4598_vm13, %vm4607_vm0 }
0x18e9   :  { %v11609_v22 = vsel %vm4611_vm11, 1.0, %v16661_v61  ;;  %vm16796_vm1 = vmmov %vm16787_vm2 }
0x18ea   :  { %v4623_v50 = vadd.f32 %v11609_v22, %v4578_v11  ;;  %vm16797_vm4 = vmmov %vm16796_vm1 }
0x18eb   :  { %vm16798_vm10 = vmmov %vm16796_vm1 }
0x18ec   :  { %vm4627_vm12 = vcmp.lt.f32.partialorder %v4623_v50, 2.0  ;;  %vm16799_vm13 = vmmov %vm16796_vm1 }
0x18ed   :  { %v4631_v15 = vsel %vm4627_vm12, %v15188_v41, -1e+09  ;;  %v11613_v4 = vsel %vm4627_vm12, 1.0, %v16661_v61  ;;  %vm16800_vm14 = vmmov %vm16796_vm1 }
0x18ee   :  { %v4639_v8 = vsel %vm16788_vm5, %v4631_v15, -inf  ;;  %v4703_v51 = vsel %vm16789_vm15, %v11613_v4, 0.0 }
0x18ef   :  { %v4704_v9 = vadd.f32 %v4703_v51, %v4702_v21  ;;  %4640 = vmax.xlane.f32.xlu1 %v4639_v8 }
0x18f1   :  { %v15481_v38 = vadd.f32 %v4705_v24, %v4704_v9 }
0x18f3   :  { %16791 = vst [vmem:[#allocation68_spill] sm:$0xff] %v15481_v38 }
0x18ff   :  { %v12381_v4 = vpop.f32.mrf.mxu0 }
0x1901   :  { %v12382_v51 = vpop.f32.mrf.mxu0 }
0x1902   :  { %v12383_v38 = vadd.f32 %v12382_v51, %v12381_v4 }
0x1903   :  { %v12384_v24 = vpop.f32.mrf.mxu0 }
0x1904   :  { %v6397_v17 = vadd.f32 %v12383_v38, %v15545_v36 }
0x191d   :  { %v12409_v8 = vpop.f32.mrf.mxu1 }
0x191f   :  { %v12410_v9 = vpop.f32.mrf.mxu1 }
0x1920   :  { %v12411_v7 = vadd.f32 %v12410_v9, %v12409_v8 }
0x1922   :  { %v15556_v39 = vadd.f32 %v12411_v7, %v6397_v17 }
0x1959   :  { %v4635_v47 = vpop.xlane.xlu1 %4634 }
0x195a   :  { %v4645_v57 = vsub.f32 %v15399_v16, %v4635_v47  ;;  %v12412_v47 = vpop.f32.mrf.mxu1 }
0x195c   :  { %v4649_v52 = vmul.f32 1.442695, %v4645_v57  ;;  %v12385_v57 = vpop.f32.mrf.mxu0 }
0x195d   :  { %v4638_v32 = vpop.xlane.xlu0 %4637  ;;  %v12386_v55 = vadd.f32 %v12385_v57, %v12384_v24 }
0x195e   :  { %13857 = vpow2.f32 %v4649_v52  ;;  %v4646_v46 = vsub.f32 %v15408_v19, %v4638_v32  ;;  %v12413_v52 = vpop.f32.mrf.mxu1  ;;  %v15507_v32 = vpop.f32.mrf.mxu0 }
0x195f   :  { %v12414_v4 = vadd.f32 %v12413_v52, %v12412_v47  ;;  %v6400_v8 = vadd.f32 %v12386_v55, %v15545_v36 }
0x1960   :  { %v4651_v2 = vmul.f32 1.442695, %v4646_v46  ;;  %v15509_v46 = vpop.f32.mrf.mxu1 }
0x1961   :  { %v15563_v57 = vadd.f32 %v12414_v4, %v6400_v8  ;;  %v15570_v4 = vld [vmem:[%s16801_s2 + $0x2] ss:$0 sm:$0xff] }
0x1962   :  { %13859 = vpow2.f32 %v4651_v2  ;;  %v15511_v2 = vpop.f32.mrf.mxu0 }
0x1963   :  { %16803 = vst [vmem:[#allocation70_spill] sm:$0xff] %v15563_v57 }
0x196b   :  { %v13858_v60 = vpop.eup %13857 }
0x196c   :  { %v4657_v42 = vsel %vm16792_vm9, %v13858_v60, 0.0 }
0x196d   :  { %4658 = vadd.xlane.f32.xlu1 %v4657_v42  ;;  %v15516_v42 = vpop.f32.mrf.mxu0 }
0x196f   :  { %v13860_v21 = vpop.eup %13859 }
0x1970   :  { %v4644_v59 = vpop.xlane.xlu0 %4643  ;;  %v4660_v10 = vsel %vm16793_vm6, %v13860_v21, 0.0 }
0x1971   :  { %v4648_v34 = vsub.f32 %v4632_v0, %v4644_v59  ;;  %4661 = vadd.xlane.f32.xlu0 %v4660_v10  ;;  %v15520_v59 = vpop.f32.mrf.mxu0 }
0x1973   :  { %v4655_v18 = vmul.f32 1.442695, %v4648_v34  ;;  %v12437_v10 = vpop.f32.mrf.mxu0 }
0x1975   :  { %13861 = vpow2.f32 %v4655_v18 }
0x1978   :  { %v4641_v16 = vpop.xlane.xlu1 %4640 }
0x1979   :  { %v4647_v14 = vsub.f32 %v4631_v15, %v4641_v16  ;;  %v12438_v16 = vpop.f32.mrf.mxu0 }
0x197a   :  { %v12439_v35 = vadd.f32 %v12438_v16, %v12437_v10 }
0x197b   :  { %v4653_v58 = vmul.f32 1.442695, %v4647_v14 }
0x197c   :  { %v6809_v30 = vadd.f32 %v12439_v35, %v15548_v33 }
0x197d   :  { %13863 = vpow2.f32 %v4653_v58  ;;  %v12440_v58 = vpop.f32.mrf.mxu0 }
0x1982   :  { %v13862_v19 = vpop.eup %13861 }
0x1983   :  { %v4666_v48 = vsel %vm16795_vm8, %v13862_v19, 0.0 }
0x1984   :  { %4667 = vadd.xlane.f32.xlu0 %v4666_v48  ;;  %v12441_v48 = vpop.f32.mrf.mxu0 }
0x1985   :  { %v12442_v24 = vadd.f32 %v12441_v48, %v12440_v58 }
0x1987   :  { %v6812_v55 = vadd.f32 %v12442_v24, %v15548_v33 }
0x198a   :  { %v13864_v49 = vpop.eup %13863 }
0x198b   :  { %v4663_v6 = vsel %vm16796_vm1, %v13864_v49, 0.0 }
0x198c   :  { %4664 = vadd.xlane.f32.xlu1 %v4663_v6  ;;  %v15524_v6 = vpop.f32.mrf.mxu0 }
0x19f6   :  { %v4659_v13 = vpop.xlane.xlu1 %4658 }
0x19f7   :  { %13865 = vrcp.f32 %v4659_v13 }
0x19fa   :  { %v4662_v27 = vpop.xlane.xlu0 %4661 }
0x19fb   :  { %13867 = vrcp.f32 %v4662_v27  ;;  %v15528_v27 = vpop.f32.mrf.mxu0 }
0x1a04   :  { %v13866_v63 = vpop.eup %13865 }
0x1a05   :  { %v4670_v3 = vmul.f32 %v13866_v63, %v13858_v60  ;;  %v15513_v60 = vpop.f32.mrf.mxu1 }
0x1a07   :  { %6462 = vperm.xlu1 %13380, %v4670_v3   ;;  %4717 = vst.msk [vmem:[%s16794_s19] sm:$0xff] %vm16797_vm4, %v4670_v3  ;;  %6873 = vperm.xlu0 %13381, %v4670_v3  }
0x1a08   :  { %v13868_v0 = vpop.eup %13867 }
0x1a09   :  { %v4672_v26 = vmul.f32 %v13868_v0, %v13860_v21  ;;  %v15518_v21 = vpop.f32.mrf.mxu1 }
0x1a0b   :  { %6467 = vperm.xlu1 %13380, %v4672_v26   ;;  %4718 = vst.msk [vmem:[%s16794_s19 + $0x8] sm:$0xff] %vm16798_vm10, %v4672_v26  ;;  %13385 = vset.pattern.permute.xlu0 %v16758_v37  ;;  %v15522_v34 = vpop.f32.mrf.mxu1 }
0x1a0d   :  { %v4668_v43 = vpop.xlane.xlu0 %4667  ;;  %v12465_v18 = vpop.f32.mrf.mxu1 }
0x1a0e   :  { %13869 = vrcp.f32 %v4668_v43 }
0x1a0f   :  { %13382 = vset.pattern.permute.xlu1 %v16667_v23  ;;  %v12466_v14 = vpop.f32.mrf.mxu1 }
0x1a10   :  { %6877 = vperm.xlu1 %13382, %v4672_v26   ;;  %v12467_v12 = vadd.f32 %v12466_v14, %v12465_v18 }
0x1a12   :  { %v15558_v51 = vadd.f32 %v12467_v12, %v6809_v30 }
0x1a14   :  { %13383 = vset.pattern.permute.xlu1 %v16665_v20  ;;  %16802 = vst [vmem:[#allocation69_spill] sm:$0xff] %v15558_v51 }
0x1a15   :  { %v4665_v11 = vpop.xlane.xlu1 %4664  ;;  %7286 = vperm.xlu1 %13383, %v4672_v26  }
0x1a16   :  { %13871 = vrcp.f32 %v4665_v11 }
0x1a19   :  { %7282 = vperm.xlu1 %13383, %v4670_v3  }
0x1a1b   :  { %v13870_v22 = vpop.eup %13869 }
0x1a1c   :  { %v4676_v50 = vmul.f32 %v13870_v22, %v13862_v19  ;;  %v12468_v19 = vpop.f32.mrf.mxu1 }
0x1a1d   :  { %13384 = vset.pattern.permute.xlu1 %v16663_v28 }
0x1a1e   :  { %6477 = vperm.xlu0 %13385, %v4676_v50   ;;  %4720 = vst.msk [vmem:[%s16794_s19 + $0x18] sm:$0xff] %vm16799_vm13, %v4676_v50  ;;  %7691 = vperm.xlu1 %13384, %v4670_v3   ;;  %v15532_v3 = vpop.f32.mrf.mxu0 }
0x1a22   :  { %13387 = vset.pattern.permute.xlu0 %v16665_v20  ;;  %7695 = vperm.xlu1 %13384, %v4672_v26   ;;  %v15536_v26 = vpop.f32.mrf.mxu0 }
0x1a23   :  { %v13872_v5 = vpop.eup %13871  ;;  %7294 = vperm.xlu0 %13387, %v4676_v50  }
0x1a24   :  { %v4674_v15 = vmul.f32 %v13872_v5, %v13864_v49  ;;  %v12469_v49 = vpop.f32.mrf.mxu1  ;;  %v12493_v43 = vpop.f32.mrf.mxu0 }
0x1a25   :  { %v12470_v17 = vadd.f32 %v12469_v49, %v12468_v19 }
0x1a26   :  { %13386 = vset.pattern.permute.xlu1 %v16667_v23  ;;  %4719 = vst.msk [vmem:[%s16794_s19 + $0x10] sm:$0xff] %vm16800_vm14, %v4674_v15  ;;  %v15526_v13 = vpop.f32.mrf.mxu1 }
0x1a27   :  { %6885 = vperm.xlu1 %13386, %v4676_v50  }
0x1a28   :  { %v15530_v63 = vpop.f32.mrf.mxu1 }
0x1a2a   :  { %v15534_v0 = vpop.f32.mrf.mxu1 }
0x1a2b   :  { %13388 = vset.pattern.permute.xlu1 %v16758_v37 }
0x1a2c   :  { %6472 = vperm.xlu1 %13388, %v4674_v15   ;;  %v15538_v11 = vpop.f32.mrf.mxu1 }
0x1a2e   :  { %v12521_v22 = vpop.f32.mrf.mxu1 }
0x1a30   :  { %13389 = vset.pattern.permute.xlu1 %v16667_v23  ;;  %v12522_v5 = vpop.f32.mrf.mxu1 }
0x1a31   :  { %6881 = vperm.xlu1 %13389, %v4674_v15  }
0x1a32   :  { %v12524_v61 = vpop.f32.mrf.mxu1 }
0x1a35   :  { %13390 = vset.pattern.permute.xlu1 %v16665_v20  ;;  %v12525_v20 = vpop.f32.mrf.mxu1 }
0x1a36   :  { %7290 = vperm.xlu1 %13390, %v4674_v15   ;;  %v12526_v58 = vadd.f32 %v12525_v20, %v12524_v61  ;;  %v12392_v61 = vadd.f32 %v15520_v59, %v15516_v42 }
0x1a37   :  { %v15542_v62 = vpop.f32.mrf.mxu1 }
0x1a39   :  { %v15554_v41 = vpop.f32.mrf.mxu1 }
0x1a3a   :  { %13391 = vset.pattern.permute.xlu1 %v16663_v28 }
0x1a3b   :  { %7699 = vperm.xlu1 %13391, %v4674_v15   ;;  %v12530_v9 = vpop.f32.mrf.mxu1 }
0x1a3d   :  { %v12531_v30 = vpop.f32.mrf.mxu1 }
0x1a3f   :  { %7703 = vperm.xlu1 %13391, %v4676_v50   ;;  %v12494_v50 = vpop.f32.mrf.mxu0  ;;  %v12577_v14 = vpop.f32.mrf.mxu1 }
0x1a40   :  { %v12495_v49 = vadd.f32 %v12494_v50, %v12493_v43  ;;  %v15583_v43 = vld [vmem:[%s16801_s2 + $0x3] ss:$0 sm:$0xff] }
0x1a41   :  { %v12496_v15 = vpop.f32.mrf.mxu0 }
0x1a43   :  { %13392 = vset.pattern.permute.xlu1 %v16758_v37  ;;  %v12497_v28 = vpop.f32.mrf.mxu0 }
0x1a44   :  { %v12498_v52 = vadd.f32 %v12497_v28, %v12496_v15 }
0x1a45   :  { %v15540_v23 = vpop.f32.mrf.mxu0 }
0x1a46   :  { %v7221_v8 = vadd.f32 %v12498_v52, %v15570_v4 }
0x1a47   :  { %v15550_v44 = vpop.f32.mrf.mxu0 }
0x1a48   :  { %v15574_v24 = vadd.f32 %v12526_v58, %v7221_v8  ;;  %v6408_v8 = vadd.f32 %v12392_v61, %v15545_v36 }
0x1a49   :  { %v12502_v10 = vpop.f32.mrf.mxu0 }
0x1a4a   :  { %16805 = vst [vmem:[#allocation72_spill] sm:$0xff] %v15574_v24 }
0x1a4b   :  { %v12503_v35 = vpop.f32.mrf.mxu0 }
0x1a4c   :  { %v12504_v59 = vadd.f32 %v12503_v35, %v12502_v10  ;;  %v12448_v10 = vadd.f32 %v15536_v26, %v15532_v3 }
0x1a4d   :  { %v12549_v7 = vpop.f32.mrf.mxu0 }
0x1a4e   :  { %v7229_v35 = vadd.f32 %v12504_v59, %v15570_v4  ;;  %v6820_v26 = vadd.f32 %v12448_v10, %v15548_v33 }
0x1a82   :  { %v6463_v16 = vpop.permute.xlu1 %6462  ;;  %v6874_v53 = vpop.permute.xlu0 %6873 }
0x1a83   :  { %v6480_v18 = vmul.f32 %v6463_v16, %v15556_v39  ;;  %v6888_v38 = vmul.f32 %v6874_v53, %v15558_v51  ;;  %v15567_v16 = vadd.f32 %v12470_v17, %v6812_v55  ;;  %v12550_v53 = vpop.f32.mrf.mxu0  ;;  %v12578_v51 = vpop.f32.mrf.mxu1  ;;  %v7218_v17 = vadd.f32 %v12495_v49, %v15570_v4 }
0x1a85   :  { %6484 = vst [vmem:[#allocation7] sm:$0xff] %v6480_v18  ;;  %6893 = vst [vmem:[#allocation7 + $0x20] sm:$0xff] %v6888_v38  ;;  %v12552_v28 = vpop.f32.mrf.mxu0  ;;  %v12580_v55 = vpop.f32.mrf.mxu1 }
0x1a86   :  { %v6468_v12 = vpop.permute.xlu1 %6467  ;;  %16804 = vst [vmem:[#allocation71_spill] sm:$0xff] %v15567_v16 }
0x1a87   :  { %v6481_v47 = vmul.f32 %v6468_v12, %v15563_v57  ;;  %v12523_v12 = vadd.f32 %v12522_v5, %v12521_v22  ;;  %v12551_v57 = vadd.f32 %v12550_v53, %v12549_v7  ;;  %v12553_v50 = vpop.f32.mrf.mxu0  ;;  %v12420_v22 = vadd.f32 %v15522_v34, %v15518_v21  ;;  %v12581_v58 = vpop.f32.mrf.mxu1 }
0x1a88   :  { %v12579_v5 = vadd.f32 %v12578_v51, %v12577_v14  ;;  %v12554_v42 = vadd.f32 %v12553_v50, %v12552_v28 }
0x1a89   :  { %6485 = vst [vmem:[#allocation7 + $0x8] sm:$0xff] %v6481_v47  ;;  %v15590_v7 = vadd.f32 %v12420_v22, %v6408_v8  ;;  %v12473_v8 = vadd.f32 %v15530_v63, %v15526_v13 }
0x1a8a   :  { %v7630_v51 = vadd.f32 %v12554_v42, %v15583_v43 }
0x1a8b   :  { %v6878_v48 = vpop.permute.xlu1 %6877  ;;  %16807 = vst [vmem:[#allocation74_spill] sm:$0xff] %v15590_v7 }
0x1a8c   :  { %v6889_v19 = vmul.f32 %v6878_v48, %v15567_v16  ;;  %v15580_v48 = vadd.f32 %v12523_v12, %v7218_v17  ;;  %v12582_v12 = vadd.f32 %v12581_v58, %v12580_v55  ;;  %v6914_v17 = vadd.f32 %v6888_v38, %v6480_v18  ;;  %v12555_v58 = vpop.f32.mrf.mxu0  ;;  %v16895_v16 = vld [vmem:[#allocation64_spill] sm:$0xff] }
0x1a8d   :  { %v12476_v18 = vadd.f32 %v15538_v11, %v15534_v0  ;;  %v12417_v11 = vadd.f32 %v15513_v60, %v15509_v46 }
0x1a8e   :  { %6894 = vst [vmem:[#allocation7 + $0x28] sm:$0xff] %v6889_v19  ;;  %16806 = vst [vmem:[#allocation73_spill] sm:$0xff] %v15580_v48  ;;  %v15602_v28 = vadd.f32 %v12582_v12, %v7630_v51  ;;  %v6915_v55 = vadd.f32 %v6889_v19, %v6481_v47  ;;  %v12389_v19 = vadd.f32 %v15511_v2, %v15507_v32  ;;  %v12556_v46 = vpop.f32.mrf.mxu0 }
0x1a8f   :  { %v15619_v0 = vadd.f32 %v12476_v18, %v6820_v26  ;;  %v12445_v32 = vadd.f32 %v15528_v27, %v15524_v6  ;;  %v12529_v6 = vadd.f32 %v15554_v41, %v15542_v62 }
0x1a90   :  { %v7287_v15 = vpop.permute.xlu1 %7286  ;;  %16809 = vst [vmem:[#allocation76_spill] sm:$0xff] %v15602_v28  ;;  %v12558_v27 = vpop.f32.mrf.mxu0 }
0x1a91   :  { %v7298_v20 = vmul.f32 %v7287_v15, %v15574_v24  ;;  %v7627_v15 = vadd.f32 %v12551_v57, %v15583_v43  ;;  %v12532_v24 = vadd.f32 %v12531_v30, %v12530_v9  ;;  %16811 = vst [vmem:[#allocation78_spill] sm:$0xff] %v15619_v0  ;;  %v6817_v42 = vadd.f32 %v12445_v32, %v15548_v33 }
0x1a92   :  { %v12559_v51 = vpop.f32.mrf.mxu0 }
0x1a93   :  { %7303 = vst [vmem:[#allocation7 + $0x48] sm:$0xff] %v7298_v20  ;;  %v15592_v53 = vadd.f32 %v12579_v5, %v7627_v15  ;;  %v15609_v38 = vadd.f32 %v12532_v24, %v7229_v35  ;;  %v7324_v61 = vadd.f32 %v7298_v20, %v6915_v55  ;;  %v6405_v5 = vadd.f32 %v12389_v19, %v15545_v36 }
0x1a94   :  { %v7283_v52 = vpop.permute.xlu1 %7282  ;;  %v12501_v36 = vadd.f32 %v15550_v44, %v15540_v23  ;;  %v15636_v12 = vadd.f32 %v12473_v8, %v6817_v42  ;;  %v12560_v62 = vadd.f32 %v12559_v51, %v12558_v27  ;;  %v8328_v27 = vld [vmem:[#allocation2 + $0x700] sm:$0xff] }
0x1a95   :  { %v7297_v49 = vmul.f32 %v7283_v52, %v15580_v48  ;;  %16808 = vst [vmem:[#allocation75_spill] sm:$0xff] %v15592_v53  ;;  %16810 = vst [vmem:[#allocation77_spill] sm:$0xff] %v15609_v38  ;;  %v15628_v2 = vadd.f32 %v12417_v11, %v6405_v5  ;;  %v16899_v48 = vld [vmem:[#allocation55_spill] sm:$0xff] }
0x1a96   :  { %16813 = vst [vmem:[#allocation80_spill] sm:$0xff] %v15636_v12  ;;  %v7226_v63 = vadd.f32 %v12501_v36, %v15570_v4  ;;  %v7638_v18 = vadd.f32 %v12560_v62, %v15583_v43  ;;  %v8304_v62 = vld [vmem:[#allocation2 + $0x640] sm:$0xff] }
0x1a97   :  { %7302 = vst [vmem:[#allocation7 + $0x40] sm:$0xff] %v7297_v49  ;;  %v7323_v14 = vadd.f32 %v7297_v49, %v6914_v17  ;;  %16812 = vst [vmem:[#allocation79_spill] sm:$0xff] %v15628_v2  ;;  %v12583_v49 = vpop.f32.mrf.mxu1 }
0x1a98   :  { %v15642_v33 = vadd.f32 %v12529_v6, %v7226_v63  ;;  %v11903_v6 = vld [vmem:[%s14180_s24 + $0xe8] sm:$0xff] }
0x1a99   :  { %v6478_v21 = vpop.permute.xlu0 %6477  ;;  %v7692_v34 = vpop.permute.xlu1 %7691 }
0x1a9a   :  { %v15596_v52 = vmul.f32 %v6478_v21, %v15590_v7  ;;  %v7706_v57 = vmul.f32 %v7692_v34, %v15592_v53  ;;  %v12584_v59 = vpop.f32.mrf.mxu1  ;;  %v12557_v34 = vadd.f32 %v12556_v46, %v12555_v58  ;;  %16814 = vst [vmem:[#allocation81_spill] sm:$0xff] %v15642_v33  ;;  %v8352_v58 = vld [vmem:[#allocation2 + $0x7c0] sm:$0xff]  ;;  %v16897_v7 = vld [vmem:[#allocation53_spill] sm:$0xff] }
0x1a9b   :  { %v12585_v44 = vadd.f32 %v12584_v59, %v12583_v49 }
0x1a9c   :  { %6487 = vst [vmem:[#allocation7 + $0x18] sm:$0xff] %v15596_v52  ;;  %7711 = vst [vmem:[#allocation7 + $0x60] sm:$0xff] %v7706_v57  ;;  %v15605_v9 = vadd.f32 %v7706_v57, %v7323_v14  ;;  %v12586_v21 = vpop.f32.mrf.mxu1  ;;  %v7635_v10 = vadd.f32 %v12557_v34, %v15583_v43  ;;  %v11905_v43 = vld [vmem:[%s14180_s24 + $0xf8] sm:$0xff]  ;;  %v8320_v34 = vld [vmem:[#allocation2 + $0x6c0] sm:$0xff] }
0x1a9d   :  { %v7696_v30 = vpop.permute.xlu1 %7695  ;;  %13157 = vmatprep.subr.mxu0 %v11905_v43 }
0x1a9e   :  { %v7295_v50 = vpop.permute.xlu0 %7294  ;;  %v7707_v3 = vmul.f32 %v7696_v30, %v15602_v28  ;;  %7736 = vadd.xlane.f32.xlu0 %v15605_v9  ;;  %v12587_v14 = vpop.f32.mrf.mxu1  ;;  %v15646_v41 = vadd.f32 %v12585_v44, %v7635_v10  ;;  %13158 = vmatpush3.msra.mxu0 %v11905_v43  ;;  %v11900_v44 = vld [vmem:[%s14180_s24 + $0xd0] sm:$0xff]  ;;  %v11898_v10 = vld [vmem:[%s14180_s24 + $0xc0] sm:$0xff] }
0x1a9f   :  { %v7300_v47 = vmul.f32 %v7295_v50, %v15609_v38  ;;  %v12588_v35 = vadd.f32 %v12587_v14, %v12586_v21  ;;  %v8312_v21 = vld [vmem:[#allocation2 + $0x680] sm:$0xff]  ;;  %v11899_v14 = vld [vmem:[%s14180_s24 + $0xc8] sm:$0xff]  ;;  %v11896_v43 = vld [vmem:[%s14180_s24 + $0xb0] sm:$0xff] }
0x1aa0   :  { %7712 = vst [vmem:[#allocation7 + $0x68] sm:$0xff] %v7707_v3  ;;  %v15617_v22 = vadd.f32 %v7707_v3, %v7324_v61  ;;  %16815 = vst [vmem:[#allocation82_spill] sm:$0xff] %v15646_v41  ;;  %v12012_v51 = vcombine.high %v8312_v21, %v8320_v34  ;;  %v16894_v28 = vld [vmem:[#allocation51_spill] sm:$0xff] }
0x1aa1   :  { %7305 = vst [vmem:[#allocation7 + $0x58] sm:$0xff] %v7300_v47  ;;  %v15651_v3 = vadd.f32 %v12588_v35, %v7638_v18  ;;  %v8288_v18 = vld [vmem:[#allocation2 + $0x5c0] sm:$0xff] }
0x1aa2   :  { %7738 = vadd.xlane.f32.xlu1 %v15617_v22  ;;  %v6886_v24 = vpop.permute.xlu1 %6885 }
0x1aa3   :  { %v6891_v20 = vmul.f32 %v6886_v24, %v15619_v0  ;;  %16816 = vst [vmem:[#allocation83_spill] sm:$0xff] %v15651_v3 }
0x1aa5   :  { %6896 = vst [vmem:[#allocation7 + $0x38] sm:$0xff] %v6891_v20  ;;  %v6917_v30 = vadd.f32 %v6891_v20, %v15596_v52  ;;  %v11904_v52 = vld [vmem:[%s14180_s24 + $0xf0] sm:$0xff]  ;;  %v8344_v20 = vld [vmem:[#allocation2 + $0x780] sm:$0xff] }
0x1aa6   :  { %v12043_v32 = vcombine.low %v8344_v20, %v8352_v58  ;;  %v12044_v49 = vcombine.high %v8344_v20, %v8352_v58  ;;  %13159 = vmatprep.subr.mxu0 %v11904_v52 }
0x1aa7   :  { %v6473_v15 = vpop.permute.xlu1 %6472  ;;  %v7326_v11 = vadd.f32 %v7300_v47, %v6917_v30  ;;  %13160 = vmatpush3.msra.mxu0 %v11904_v52  ;;  %v11897_v30 = vld [vmem:[%s14180_s24 + $0xb8] sm:$0xff] }
0x1aa8   :  { %v6482_v60 = vmul.f32 %v6473_v15, %v15628_v2  ;;  %9085 = vmatprep.subr.bf16.mxu1 %v12044_v49  ;;  %13161 = vmatprep.subr.mxu0 %v11903_v6  ;;  %v8248_v49 = vld [vmem:[#allocation2 + $0x480] sm:$0xff] }
0x1aa9   :  { %9086 = vmatpush1.bf16.msra.mxu1 %v12043_v32  ;;  %13162 = vmatpush3.msra.mxu0 %v11903_v6  ;;  %v11895_v32 = vld [vmem:[%s14180_s24 + $0xa8] sm:$0xff]  ;;  %v16253_v2 = vld [vmem:[%s16801_s2 + $0x5] ss:$0 sm:$0xff] }
0x1aaa   :  { %6486 = vst [vmem:[#allocation7 + $0x10] sm:$0xff] %v6482_v60 }
0x1aac   :  { %v6882_v17 = vpop.permute.xlu1 %6881 }
0x1aad   :  { %v6890_v13 = vmul.f32 %v6882_v17, %v15636_v12  ;;  %v8336_v17 = vld [vmem:[#allocation2 + $0x740] sm:$0xff] }
0x1aae   :  { %v12027_v63 = vcombine.low %v8328_v27, %v8336_v17 }
0x1aaf   :  { %6895 = vst [vmem:[#allocation7 + $0x30] sm:$0xff] %v6890_v13  ;;  %v6916_v55 = vadd.f32 %v6890_v13, %v6482_v60  ;;  %v11902_v13 = vld [vmem:[%s14180_s24 + $0xe0] sm:$0xff] }
0x1ab0   :  { %13163 = vmatprep.subr.mxu0 %v11902_v13 }
0x1ab1   :  { %v7291_v23 = vpop.permute.xlu1 %7290  ;;  %13164 = vmatpush3.msra.mxu0 %v11902_v13 }
0x1ab2   :  { %v7299_v57 = vmul.f32 %v7291_v23, %v15642_v33  ;;  %v12011_v23 = vcombine.low %v8312_v21, %v8320_v34  ;;  %v11890_v34 = vld [vmem:[%s14180_s24 + $0x80] sm:$0xff] }
0x1ab4   :  { %7304 = vst [vmem:[#allocation7 + $0x50] sm:$0xff] %v7299_v57  ;;  %v7325_v61 = vadd.f32 %v7299_v57, %v6916_v55  ;;  %v8296_v57 = vld [vmem:[#allocation2 + $0x600] sm:$0xff] }
0x1ab5   :  { %v11995_v35 = vcombine.low %v8296_v57, %v8304_v62  ;;  %v11996_v55 = vcombine.high %v8296_v57, %v8304_v62  ;;  %v8354_v62 = vld [vmem:[#allocation2 + $0x7d0] sm:$0xff] }
0x1ab6   :  { %v7700_v4 = vpop.permute.xlu1 %7699 }
0x1ab7   :  { %v7708_v50 = vmul.f32 %v7700_v4, %v15646_v41  ;;  %v8280_v4 = vld [vmem:[#allocation2 + $0x580] sm:$0xff] }
0x1ab8   :  { %v11979_v52 = vcombine.low %v8280_v4, %v8288_v18 }
0x1ab9   :  { %7713 = vst [vmem:[#allocation7 + $0x70] sm:$0xff] %v7708_v50  ;;  %v15653_v26 = vadd.f32 %v7708_v50, %v7325_v61  ;;  %v11980_v61 = vcombine.high %v8280_v4, %v8288_v18  ;;  %v8264_v50 = vld [vmem:[#allocation2 + $0x500] sm:$0xff] }
0x1aba   :  { %v7704_v19 = vpop.permute.xlu1 %7703 }
0x1abb   :  { %v7709_v24 = vmul.f32 %v7704_v19, %v15651_v3  ;;  %7740 = vadd.xlane.f32.xlu0 %v15653_v26  ;;  %v8272_v19 = vld [vmem:[#allocation2 + $0x540] sm:$0xff] }
0x1abc   :  { %v11964_v20 = vcombine.high %v8264_v50, %v8272_v19 }
0x1abd   :  { %7714 = vst [vmem:[#allocation7 + $0x78] sm:$0xff] %v7709_v24  ;;  %v15657_v5 = vadd.f32 %v7709_v24, %v7326_v11 }
0x1abf   :  { %7742 = vadd.xlane.f32.xlu0 %v15657_v5 }
0x1b27   :  { %v7737_v47 = vpop.xlane.xlu0 %7736 }
0x1b28   :  { %v7744_v8 = vmul.f32 0.0078125, %v7737_v47  ;;  %v8256_v47 = vld [vmem:[#allocation2 + $0x4c0] sm:$0xff] }
0x1b29   :  { %v11947_v13 = vcombine.low %v8248_v49, %v8256_v47 }
0x1b2a   :  { %v15663_v15 = vsub.f32 %v15605_v9, %v7744_v8  ;;  %v12028_v9 = vcombine.high %v8328_v27, %v8336_v17  ;;  %v11893_v27 = vld [vmem:[%s14180_s24 + $0x98] sm:$0xff] }
0x1b2b   :  { %v7739_v46 = vpop.xlane.xlu1 %7738 }
0x1b2c   :  { %v7745_v60 = vmul.f32 0.0078125, %v7739_v46  ;;  %v7752_v42 = vmul.f32 %v15663_v15, %v15663_v15  ;;  %9087 = vmatprep.subr.bf16.mxu1 %v12028_v9  ;;  %v11892_v9 = vld [vmem:[%s14180_s24 + $0x90] sm:$0xff] }
0x1b2d   :  { %9088 = vmatpush1.bf16.msra.mxu1 %v12027_v63  ;;  %v11891_v63 = vld [vmem:[%s14180_s24 + $0x88] sm:$0xff] }
0x1b2e   :  { %v15668_v36 = vsub.f32 %v15617_v22, %v7745_v60  ;;  %7756 = vadd.xlane.f32.xlu0 %v7752_v42  ;;  %v11901_v22 = vld [vmem:[%s14180_s24 + $0xd8] sm:$0xff]  ;;  %9089 = vmatprep.subr.bf16.mxu1 %v12012_v51  ;;  %v11894_v42 = vld [vmem:[%s14180_s24 + $0xa0] sm:$0xff]  ;;  %s16919_s24 = sld [smem:[#allocation22_spill]] }
0x1b2f   :  { %13165 = vmatprep.subr.mxu0 %v11901_v22 }
0x1b30   :  { %v7753_v59 = vmul.f32 %v15668_v36, %v15668_v36  ;;  %13166 = vmatpush3.msra.mxu0 %v11901_v22  ;;  %v8240_v22 = vld [vmem:[#allocation2 + $0x440] sm:$0xff] }
0x1b31   :  { %13167 = vmatprep.subr.mxu0 %v11900_v44  ;;  %9090 = vmatpush1.bf16.msra.mxu1 %v12011_v23  ;;  %v8353_v23 = vld [vmem:[#allocation2 + $0x7c8] sm:$0xff] }
0x1b32   :  { %7758 = vadd.xlane.f32.xlu1 %v7753_v59  ;;  %13168 = vmatpush3.msra.mxu0 %v11900_v44  ;;  %v11963_v59 = vcombine.low %v8264_v50, %v8272_v19  ;;  %v8345_v44 = vld [vmem:[#allocation2 + $0x788] sm:$0xff] }
0x1b33   :  { %13169 = vmatprep.subr.mxu0 %v11899_v14  ;;  %9091 = vmatprep.subr.bf16.mxu1 %v11996_v55  ;;  %v12046_v57 = vcombine.high %v8345_v44, %v8353_v23 }
0x1b34   :  { %13170 = vmatpush3.msra.mxu0 %v11899_v14  ;;  %v12045_v14 = vcombine.low %v8345_v44, %v8353_v23 }
0x1b35   :  { %13171 = vmatprep.subr.mxu0 %v11898_v10  ;;  %9092 = vmatpush1.bf16.msra.mxu1 %v11995_v35 }
0x1b36   :  { %13172 = vmatpush3.msra.mxu0 %v11898_v10  ;;  %9093 = vmatprep.subr.bf16.mxu1 %v11980_v61  ;;  %v8346_v10 = vld [vmem:[#allocation2 + $0x790] sm:$0xff] }
0x1b37   :  { %13173 = vmatprep.subr.mxu0 %v11897_v30  ;;  %v12048_v35 = vcombine.high %v8346_v10, %v8354_v62  ;;  %v12047_v55 = vcombine.low %v8346_v10, %v8354_v62  ;;  %v8297_v10 = vld [vmem:[#allocation2 + $0x608] sm:$0xff] }
0x1b38   :  { %13174 = vmatpush3.msra.mxu0 %v11897_v30  ;;  %v8305_v62 = vld [vmem:[#allocation2 + $0x648] sm:$0xff] }
0x1b39   :  { %13175 = vmatprep.subr.mxu0 %v11896_v43  ;;  %9094 = vmatpush1.bf16.msra.mxu1 %v11979_v52 }
0x1b3a   :  { %13176 = vmatpush3.msra.mxu0 %v11896_v43  ;;  %9095 = vmatprep.subr.bf16.mxu1 %v11964_v20  ;;  %v13932_v20 = vld [vmem:[%s14140_s17] sm:$0x7]  ;;  %s16918_s17 = sld [smem:[#allocation21_spill]] }
0x1b3b   :  { %13177 = vmatprep.subr.mxu0 %v11895_v32 }
0x1b3c   :  { %13178 = vmatpush3.msra.mxu0 %v11895_v32  ;;  %v15703_v32 = vrot.slane %v13932_v20, %v14368_v25  ;;  %v11997_v20 = vcombine.low %v8297_v10, %v8305_v62 }
0x1b3d   :  { %13179 = vmatprep.subr.mxu0 %v11894_v42  ;;  %9096 = vmatpush1.bf16.msra.mxu1 %v11963_v59 }
0x1b3e   :  { %13180 = vmatpush3.msra.mxu0 %v11894_v42  ;;  %v8337_v42 = vld [vmem:[#allocation2 + $0x748] sm:$0xff] }
0x1b3f   :  { %13181 = vmatprep.subr.mxu0 %v11893_v27 }
0x1b40   :  { %13182 = vmatpush3.msra.mxu0 %v11893_v27  ;;  %v8338_v27 = vld [vmem:[#allocation2 + $0x750] sm:$0xff] }
0x1b41   :  { %13183 = vmatprep.subr.mxu0 %v11892_v9 }
0x1b42   :  { %13184 = vmatpush3.msra.mxu0 %v11892_v9  ;;  %v8313_v9 = vld [vmem:[#allocation2 + $0x688] sm:$0xff] }
0x1b43   :  { %13185 = vmatprep.subr.mxu0 %v11891_v63 }
0x1b44   :  { %v7741_v11 = vpop.xlane.xlu0 %7740  ;;  %13186 = vmatpush3.msra.mxu0 %v11891_v63 }
0x1b45   :  { %v7746_v24 = vmul.f32 0.0078125, %v7741_v11  ;;  %13187 = vmatprep.subr.mxu0 %v11890_v34  ;;  %v13931_v11 = vld [vmem:[%s14135_s13] sm:$0x7]  ;;  %s16867_s13 = sld [smem:[#allocation30_spill]] }
0x1b46   :  { %13188 = vmatpush3.msra.mxu0 %v11890_v34  ;;  %v8314_v34 = vld [vmem:[#allocation2 + $0x690] sm:$0xff] }
0x1b47   :  { %v15681_v58 = vsub.f32 %v15653_v26, %v7746_v24  ;;  %v11948_v26 = vcombine.high %v8248_v49, %v8256_v47  ;;  %9138 = vmatprep.subr.bf16.mxu0 %v12046_v57  ;;  %v15698_v24 = vrot.slane %v13931_v11, %v14368_v25 }
0x1b48   :  { %v7743_v8 = vpop.xlane.xlu0 %7742 }
0x1b49   :  { %v7747_v46 = vmul.f32 0.0078125, %v7743_v8  ;;  %v7754_v60 = vmul.f32 %v15681_v58, %v15681_v58  ;;  %9097 = vmatprep.subr.bf16.mxu1 %v11948_v26  ;;  %v8330_v26 = vld [vmem:[#allocation2 + $0x710] sm:$0xff] }
0x1b4a   :  { %9098 = vmatpush1.bf16.msra.mxu1 %v11947_v13  ;;  %v8321_v13 = vld [vmem:[#allocation2 + $0x6c8] sm:$0xff]  ;;  %v12031_v57 = vcombine.low %v8330_v26, %v8338_v27 }
0x1b4b   :  { %v15688_v6 = vsub.f32 %v15657_v5, %v7747_v46  ;;  %7760 = vadd.xlane.f32.xlu0 %v7754_v60  ;;  %v8232_v5 = vld [vmem:[#allocation2 + $0x400] sm:$0xff]  ;;  %v8329_v60 = vld [vmem:[#allocation2 + $0x708] sm:$0xff]  ;;  %v12014_v44 = vcombine.high %v8313_v9, %v8321_v13 }
0x1b4c   :  { %v11932_v21 = vcombine.high %v8232_v5, %v8240_v22  ;;  %v11931_v51 = vcombine.low %v8232_v5, %v8240_v22  ;;  %v12032_v22 = vcombine.high %v8330_v26, %v8338_v27  ;;  %v8266_v27 = vld [vmem:[#allocation2 + $0x510] sm:$0xff] }
0x1b4d   :  { %v7755_v17 = vmul.f32 %v15688_v6, %v15688_v6 }
0x1b4e   :  { %9099 = vmatprep.subr.bf16.mxu1 %v11932_v21  ;;  %v12029_v21 = vcombine.low %v8329_v60, %v8337_v42 }
0x1b4f   :  { %7762 = vadd.xlane.f32.xlu1 %v7755_v17  ;;  %9100 = vmatpush1.bf16.msra.mxu1 %v11931_v51  ;;  %v12030_v17 = vcombine.high %v8329_v60, %v8337_v42  ;;  %v8322_v51 = vld [vmem:[#allocation2 + $0x6d0] sm:$0xff]  ;;  %v8265_v60 = vld [vmem:[#allocation2 + $0x508] sm:$0xff] }
0x1b50   :  { %9191 = vmatprep.subr.bf16.mxu1 %v12048_v35  ;;  %v12015_v11 = vcombine.low %v8314_v34, %v8322_v51  ;;  %v8273_v42 = vld [vmem:[#allocation2 + $0x548] sm:$0xff] }
0x1bb7   :  { %v7757_v4 = vpop.xlane.xlu0 %7756 }
0x1bb8   :  { %v7764_v18 = vmul.f32 0.0078125, %v7757_v4  ;;  %v12016_v4 = vcombine.high %v8314_v34, %v8322_v51  ;;  %v8258_v34 = vld [vmem:[#allocation2 + $0x4d0] sm:$0xff] }
0x1bba   :  { %v7768_v30 = vadd.f32 1e-05, %v7764_v18 }
0x1bbb   :  { %v7759_v61 = vpop.xlane.xlu1 %7758 }
0x1bbc   :  { %13873 = vrsqrt.f32 %v7768_v30  ;;  %v7765_v50 = vmul.f32 0.0078125, %v7759_v61  ;;  %v8298_v30 = vld [vmem:[#allocation2 + $0x610] sm:$0xff] }
0x1bbd   :  { %v8306_v61 = vld [vmem:[#allocation2 + $0x650] sm:$0xff] }
0x1bbe   :  { %v7769_v19 = vadd.f32 1e-05, %v7765_v50  ;;  %v11998_v50 = vcombine.high %v8297_v10, %v8305_v62  ;;  %v8233_v10 = vld [vmem:[#allocation2 + $0x408] sm:$0xff] }
0x1bbf   :  { %v8241_v62 = vld [vmem:[#allocation2 + $0x448] sm:$0xff] }
0x1bc0   :  { %13875 = vrsqrt.f32 %v7769_v19 }
0x1bc9   :  { %v13874_v43 = vpop.eup %13873 }
0x1bca   :  { %v7776_v52 = vmul.f32 %v13874_v43, %v15663_v15  ;;  %v8289_v43 = vld [vmem:[#allocation2 + $0x5c8] sm:$0xff] }
0x1bcc   :  { %v7784_v49 = vmul.f32 %v15698_v24, %v7776_v52  ;;  %v12000_v52 = vcombine.high %v8298_v30, %v8306_v61 }
0x1bcd   :  { %v13876_v47 = vpop.eup %13875 }
0x1bce   :  { %v7777_v8 = vmul.f32 %v13876_v47, %v15668_v36  ;;  %v7792_v46 = vadd.f32 %v15703_v32, %v7784_v49  ;;  %v8282_v49 = vld [vmem:[#allocation2 + $0x590] sm:$0xff] }
0x1bcf   :  { %v8290_v47 = vld [vmem:[#allocation2 + $0x5d0] sm:$0xff] }
0x1bd0   :  { %v7785_v59 = vmul.f32 %v15698_v24, %v7777_v8  ;;  %13189 = vmatprep.mubr.f32.mxu0 %v7792_v46 }
0x1bd2   :  { %v7793_v15 = vadd.f32 %v15703_v32, %v7785_v59  ;;  %v11984_v59 = vcombine.high %v8282_v49, %v8290_v47 }
0x1bd4   :  { %v15710_v63 = vpack.c.bf16 %v7793_v15, %v7792_v46  ;;  %13190 = vmatmul.mubr.f32.vlgmr.msra.gmra.mxu0 %v7793_v15  ;;  %v7761_v5 = vpop.xlane.xlu0 %7760  ;;  %v11999_v46 = vcombine.low %v8298_v30, %v8306_v61  ;;  %v8274_v15 = vld [vmem:[#allocation2 + $0x550] sm:$0xff] }
0x1bd5   :  { %v7766_v36 = vmul.f32 0.0078125, %v7761_v5  ;;  %9139 = vmatpush1.bf16.msra.mxu0 %v12045_v14  ;;  %v12013_v14 = vcombine.low %v8313_v9, %v8321_v13  ;;  %v11983_v9 = vcombine.low %v8282_v49, %v8290_v47  ;;  %v8249_v13 = vld [vmem:[#allocation2 + $0x488] sm:$0xff]  ;;  %v8242_v30 = vld [vmem:[#allocation2 + $0x450] sm:$0xff]  ;;  %v11933_v49 = vcombine.low %v8233_v10, %v8241_v62  ;;  %v8348_v47 = vld [vmem:[#allocation2 + $0x7a0] sm:$0xff] }
0x1bd6   :  { %9118 = vmatmul.mubr.bf16.vlgmr.msra.gmra.mxu1 %v15710_v63  ;;  %9140 = vmatprep.subr.bf16.mxu0 %v12030_v17  ;;  %v11966_v17 = vcombine.high %v8265_v60, %v8273_v42  ;;  %v8257_v5 = vld [vmem:[#allocation2 + $0x4c8] sm:$0xff] }
0x1bd7   :  { %v7770_v23 = vadd.f32 1e-05, %v7766_v36  ;;  %9192 = vmatpush1.bf16.msra.mxu1 %v12047_v55  ;;  %9127 = vmatprep.mubr.bf16.mxu1 %v16758_v37  ;;  %v8281_v55 = vld [vmem:[#allocation2 + $0x588] sm:$0xff]  ;;  %v11965_v36 = vcombine.low %v8265_v60, %v8273_v42 }
0x1bd8   :  { %v7763_v35 = vpop.xlane.xlu1 %7762  ;;  %9193 = vmatprep.subr.bf16.mxu1 %v12032_v22  ;;  %v11982_v8 = vcombine.high %v8281_v55, %v8289_v43  ;;  %v11981_v26 = vcombine.low %v8281_v55, %v8289_v43  ;;  %v11968_v22 = vcombine.high %v8266_v27, %v8274_v15  ;;  %v8347_v55 = vld [vmem:[#allocation2 + $0x798] sm:$0xff] }
0x1bd9   :  { %13877 = vrsqrt.f32 %v7770_v23  ;;  %v7767_v18 = vmul.f32 0.0078125, %v7763_v35  ;;  %9141 = vmatpush1.bf16.msra.mxu0 %v12029_v21  ;;  %v8250_v21 = vld [vmem:[#allocation2 + $0x490] sm:$0xff]  ;;  %v8355_v43 = vld [vmem:[#allocation2 + $0x7d8] sm:$0xff] }
0x1bda   :  { %9142 = vmatprep.subr.bf16.mxu0 %v12014_v44  ;;  %v11950_v44 = vcombine.high %v8249_v13, %v8257_v5  ;;  %v11952_v35 = vcombine.high %v8250_v21, %v8258_v34  ;;  %v12050_v60 = vcombine.high %v8347_v55, %v8355_v43 }
0x1bdb   :  { %v7771_v19 = vadd.f32 1e-05, %v7767_v18  ;;  %9194 = vmatpush1.bf16.msra.mxu1 %v12031_v57  ;;  %v11967_v57 = vcombine.low %v8266_v27, %v8274_v15 }
0x1bdc   :  { %9195 = vmatprep.subr.bf16.mxu1 %v12016_v4  ;;  %v11949_v4 = vcombine.low %v8249_v13, %v8257_v5  ;;  %v8332_v13 = vld [vmem:[#allocation2 + $0x720] sm:$0xff] }
0x1bdd   :  { %13879 = vrsqrt.f32 %v7771_v19  ;;  %9143 = vmatpush1.bf16.msra.mxu0 %v12013_v14  ;;  %v8234_v14 = vld [vmem:[#allocation2 + $0x410] sm:$0xff]  ;;  %v8340_v5 = vld [vmem:[#allocation2 + $0x760] sm:$0xff] }
0x1bde   :  { %9144 = vmatprep.subr.bf16.mxu0 %v11998_v50  ;;  %v11934_v50 = vcombine.high %v8233_v10, %v8241_v62  ;;  %v11935_v42 = vcombine.low %v8234_v14, %v8242_v30  ;;  %v12035_v62 = vcombine.low %v8332_v13, %v8340_v5 }
0x1bdf   :  { %9196 = vmatpush1.bf16.msra.mxu1 %v12015_v11 }
0x1be0   :  { %9197 = vmatprep.subr.bf16.mxu1 %v12000_v52  ;;  %v11936_v52 = vcombine.high %v8234_v14, %v8242_v30  ;;  %v8300_v30 = vld [vmem:[#allocation2 + $0x620] sm:$0xff] }
0x1be1   :  { %9145 = vmatpush1.bf16.msra.mxu0 %v11997_v20 }
0x1be2   :  { %9146 = vmatprep.subr.bf16.mxu0 %v11982_v8  ;;  %v8356_v8 = vld [vmem:[#allocation2 + $0x7e0] sm:$0xff] }
0x1be3   :  { %9198 = vmatpush1.bf16.msra.mxu1 %v11999_v46  ;;  %v12052_v27 = vcombine.high %v8348_v47, %v8356_v8 }
0x1be4   :  { %9199 = vmatprep.subr.bf16.mxu1 %v11984_v59  ;;  %v8339_v59 = vld [vmem:[#allocation2 + $0x758] sm:$0xff] }
0x1be5   :  { %9147 = vmatpush1.bf16.msra.mxu0 %v11981_v26 }
0x1be6   :  { %v13878_v51 = vpop.eup %13877  ;;  %9148 = vmatprep.subr.bf16.mxu0 %v11966_v17  ;;  %v8323_v17 = vld [vmem:[#allocation2 + $0x6d8] sm:$0xff] }
0x1be7   :  { %9200 = vmatpush1.bf16.msra.mxu1 %v11983_v9  ;;  %v7778_v23 = vmul.f32 %v13878_v51, %v15681_v58  ;;  %v11951_v58 = vcombine.low %v8250_v21, %v8258_v34  ;;  %v8299_v21 = vld [vmem:[#allocation2 + $0x618] sm:$0xff]  ;;  %v12036_v51 = vcombine.high %v8332_v13, %v8340_v5  ;;  %v8252_v13 = vld [vmem:[#allocation2 + $0x4a0] sm:$0xff] }
0x1be8   :  { %9201 = vmatprep.subr.bf16.mxu1 %v11968_v22  ;;  %v8307_v34 = vld [vmem:[#allocation2 + $0x658] sm:$0xff]  ;;  %v8260_v5 = vld [vmem:[#allocation2 + $0x4e0] sm:$0xff] }
0x1be9   :  { %9149 = vmatpush1.bf16.msra.mxu0 %v11965_v36  ;;  %v7786_v18 = vmul.f32 %v15698_v24, %v7778_v23  ;;  %v12051_v36 = vcombine.low %v8348_v47, %v8356_v8  ;;  %v8316_v23 = vld [vmem:[#allocation2 + $0x6a0] sm:$0xff]  ;;  %v12002_v10 = vcombine.high %v8299_v21, %v8307_v34  ;;  %v12001_v14 = vcombine.low %v8299_v21, %v8307_v34  ;;  %v8251_v8 = vld [vmem:[#allocation2 + $0x498] sm:$0xff]  ;;  %v8349_v21 = vld [vmem:[#allocation2 + $0x7a8] sm:$0xff] }
0x1bea   :  { %v13880_v61 = vpop.eup %13879  ;;  %9150 = vmatprep.subr.bf16.mxu0 %v11950_v44  ;;  %v8357_v34 = vld [vmem:[#allocation2 + $0x7e8] sm:$0xff] }
0x1beb   :  { %v7794_v19 = vadd.f32 %v15703_v32, %v7786_v18  ;;  %9202 = vmatpush1.bf16.msra.mxu1 %v11967_v57  ;;  %v7779_v11 = vmul.f32 %v13880_v61, %v15688_v6  ;;  %v8331_v6 = vld [vmem:[#allocation2 + $0x718] sm:$0xff]  ;;  %v8324_v57 = vld [vmem:[#allocation2 + $0x6e0] sm:$0xff] }
0x1bec   :  { %9203 = vmatprep.subr.bf16.mxu1 %v11952_v35  ;;  %v12034_v15 = vcombine.high %v8331_v6, %v8339_v59  ;;  %v12033_v9 = vcombine.low %v8331_v6, %v8339_v59  ;;  %v8283_v35 = vld [vmem:[#allocation2 + $0x598] sm:$0xff]  ;;  %v12020_v18 = vcombine.high %v8316_v23, %v8324_v57  ;;  %v8308_v61 = vld [vmem:[#allocation2 + $0x660] sm:$0xff] }
0x1bed   :  { %13192 = vmatprep.mubr.f32.mxu0 %v7794_v19  ;;  %9151 = vmatpush1.bf16.msra.mxu0 %v11949_v4  ;;  %v7787_v20 = vmul.f32 %v15698_v24, %v7779_v11  ;;  %v12049_v24 = vcombine.low %v8347_v55, %v8355_v43  ;;  %v8291_v4 = vld [vmem:[#allocation2 + $0x5d8] sm:$0xff]  ;;  %v12004_v55 = vcombine.high %v8300_v30, %v8308_v61  ;;  %v8268_v6 = vld [vmem:[#allocation2 + $0x520] sm:$0xff] }
0x1bee   :  { %9152 = vmatprep.subr.bf16.mxu0 %v11934_v50  ;;  %v11986_v50 = vcombine.high %v8283_v35, %v8291_v4  ;;  %v8267_v11 = vld [vmem:[#allocation2 + $0x518] sm:$0xff]  ;;  %v11985_v43 = vcombine.low %v8283_v35, %v8291_v4  ;;  %v12003_v47 = vcombine.low %v8300_v30, %v8308_v61  ;;  %v8276_v59 = vld [vmem:[#allocation2 + $0x560] sm:$0xff]  ;;  %v8333_v35 = vld [vmem:[#allocation2 + $0x728] sm:$0xff] }
0x1bef   :  { %v7795_v46 = vadd.f32 %v15703_v32, %v7787_v20  ;;  %9204 = vmatpush1.bf16.msra.mxu1 %v11951_v58  ;;  %v8315_v32 = vld [vmem:[#allocation2 + $0x698] sm:$0xff]  ;;  %v8292_v20 = vld [vmem:[#allocation2 + $0x5e0] sm:$0xff]  ;;  %v8341_v4 = vld [vmem:[#allocation2 + $0x768] sm:$0xff] }
0x1bf0   :  { %9205 = vmatprep.subr.bf16.mxu1 %v11936_v52  ;;  %v12018_v22 = vcombine.high %v8315_v32, %v8323_v17  ;;  %v12017_v44 = vcombine.low %v8315_v32, %v8323_v17  ;;  %v8275_v58 = vld [vmem:[#allocation2 + $0x558] sm:$0xff]  ;;  %v8284_v52 = vld [vmem:[#allocation2 + $0x5a0] sm:$0xff]  ;;  %v11972_v17 = vcombine.high %v8268_v6, %v8276_v59  ;;  %v8350_v30 = vld [vmem:[#allocation2 + $0x7b0] sm:$0xff] }
0x1bf1   :  { %13193 = vmatmul.mubr.f32.gmra.mxu0 %v7795_v46  ;;  %v15720_v26 = vpack.c.bf16 %v7795_v46, %v7794_v19  ;;  %v12019_v19 = vcombine.low %v8316_v23, %v8324_v57  ;;  %v8259_v46 = vld [vmem:[#allocation2 + $0x4d8] sm:$0xff]  ;;  %v8236_v23 = vld [vmem:[#allocation2 + $0x420] sm:$0xff]  ;;  %v8358_v61 = vld [vmem:[#allocation2 + $0x7f0] sm:$0xff] }
0x1bf2   :  { %9153 = vmatpush1.bf16.msra.mxu0 %v11933_v49  ;;  %9170 = vmatprep.mubr.bf16.mxu0 %v16758_v37  ;;  %v11970_v49 = vcombine.high %v8267_v11, %v8275_v58  ;;  %v8243_v32 = vld [vmem:[#allocation2 + $0x458] sm:$0xff]  ;;  %v8244_v57 = vld [vmem:[#allocation2 + $0x460] sm:$0xff] }
0x1bf3   :  { %9128 = vmatmul.mubr.bf16.gmra.mxu1 %v15720_v26  ;;  %9244 = vmatprep.subr.bf16.mxu0 %v12050_v60  ;;  %v11988_v60 = vcombine.high %v8284_v52, %v8292_v20 }
0x1bf4   :  { %9206 = vmatpush1.bf16.msra.mxu1 %v11935_v42  ;;  %9223 = vmatprep.mubr.bf16.mxu1 %v16758_v37  ;;  %v11969_v42 = vcombine.low %v8267_v11, %v8275_v58  ;;  %v8317_v11 = vld [vmem:[#allocation2 + $0x6a8] sm:$0xff] }
0x1bf5   :  { %9171 = vmatmul.mubr.bf16.vlgmr.msra.gmra.mxu0 %v15710_v63  ;;  %9297 = vmatprep.subr.bf16.mxu1 %v12052_v27  ;;  %v11954_v27 = vcombine.high %v8251_v8, %v8259_v46  ;;  %v8325_v58 = vld [vmem:[#allocation2 + $0x6e8] sm:$0xff] }
0x1bf6   :  { %9245 = vmatpush1.bf16.msra.mxu0 %v12049_v24  ;;  %9180 = vmatprep.mubr.bf16.mxu0 %v16758_v37  ;;  %v11987_v24 = vcombine.low %v8284_v52, %v8292_v20  ;;  %v8334_v52 = vld [vmem:[#allocation2 + $0x730] sm:$0xff] }
0x1bf7   :  { %9246 = vmatprep.subr.bf16.mxu0 %v12034_v15  ;;  %v8235_v15 = vld [vmem:[#allocation2 + $0x418] sm:$0xff]  ;;  %v8342_v20 = vld [vmem:[#allocation2 + $0x770] sm:$0xff] }
0x1bfa   :  { %9247 = vmatpush1.bf16.msra.mxu0 %v12033_v9  ;;  %v11953_v9 = vcombine.low %v8251_v8, %v8259_v46  ;;  %v8301_v8 = vld [vmem:[#allocation2 + $0x628] sm:$0xff] }
0x1bfb   :  { %9224 = vmatmul.mubr.bf16.vlgmr.msra.gmra.mxu1 %v15710_v63  ;;  %9248 = vmatprep.subr.bf16.mxu0 %v12018_v22  ;;  %v11938_v22 = vcombine.high %v8235_v15, %v8243_v32  ;;  %v8309_v46 = vld [vmem:[#allocation2 + $0x668] sm:$0xff] }
0x1bfc   :  { %9298 = vmatpush1.bf16.msra.mxu1 %v12051_v36  ;;  %9233 = vmatprep.mubr.bf16.mxu1 %v16758_v37  ;;  %v11971_v36 = vcombine.low %v8268_v6, %v8276_v59  ;;  %v8318_v6 = vld [vmem:[#allocation2 + $0x6b0] sm:$0xff] }
0x1bfd   :  { %9181 = vmatmul.mubr.bf16.gmra.mxu0 %v15720_v26  ;;  %9299 = vmatprep.subr.bf16.mxu1 %v12036_v51  ;;  %v11956_v51 = vcombine.high %v8252_v13, %v8260_v5  ;;  %v8326_v59 = vld [vmem:[#allocation2 + $0x6f0] sm:$0xff] }
0x1bfe   :  { %9249 = vmatpush1.bf16.msra.mxu0 %v12017_v44  ;;  %9276 = vmatprep.mubr.bf16.mxu0 %v16758_v37  ;;  %v11937_v44 = vcombine.low %v8235_v15, %v8243_v32  ;;  %v8285_v15 = vld [vmem:[#allocation2 + $0x5a8] sm:$0xff] }
0x1bff   :  { %9250 = vmatprep.subr.bf16.mxu0 %v12002_v10  ;;  %v12054_v10 = vcombine.high %v8349_v21, %v8357_v34  ;;  %v8293_v32 = vld [vmem:[#allocation2 + $0x5e8] sm:$0xff] }
0x1c00   :  { %9300 = vmatpush1.bf16.msra.mxu1 %v12035_v62  ;;  %v11955_v62 = vcombine.low %v8252_v13, %v8260_v5  ;;  %v8302_v13 = vld [vmem:[#allocation2 + $0x630] sm:$0xff] }
0x1c01   :  { %9301 = vmatprep.subr.bf16.mxu1 %v12020_v18  ;;  %v11940_v18 = vcombine.high %v8236_v23, %v8244_v57  ;;  %v8310_v5 = vld [vmem:[#allocation2 + $0x670] sm:$0xff] }
0x1c02   :  { %9251 = vmatpush1.bf16.msra.mxu0 %v12001_v14  ;;  %v12053_v14 = vcombine.low %v8349_v21, %v8357_v34  ;;  %v8269_v21 = vld [vmem:[#allocation2 + $0x528] sm:$0xff] }
0x1c03   :  { %9234 = vmatmul.mubr.bf16.gmra.mxu1 %v15720_v26  ;;  %9252 = vmatprep.subr.bf16.mxu0 %v11986_v50  ;;  %v12038_v50 = vcombine.high %v8333_v35, %v8341_v4  ;;  %v8277_v34 = vld [vmem:[#allocation2 + $0x568] sm:$0xff] }
0x1c04   :  { %9302 = vmatpush1.bf16.msra.mxu1 %v12019_v19  ;;  %9329 = vmatprep.mubr.bf16.mxu1 %v16758_v37  ;;  %v11939_v19 = vcombine.low %v8236_v23, %v8244_v57  ;;  %v8286_v23 = vld [vmem:[#allocation2 + $0x5b0] sm:$0xff] }
0x1c05   :  { %9303 = vmatprep.subr.bf16.mxu1 %v12004_v55  ;;  %v12056_v55 = vcombine.high %v8350_v30, %v8358_v61  ;;  %v8294_v57 = vld [vmem:[#allocation2 + $0x5f0] sm:$0xff] }
0x1c06   :  { %9253 = vmatpush1.bf16.msra.mxu0 %v11985_v43  ;;  %v12037_v43 = vcombine.low %v8333_v35, %v8341_v4  ;;  %v8253_v35 = vld [vmem:[#allocation2 + $0x4a8] sm:$0xff] }
0x1c07   :  { %9254 = vmatprep.subr.bf16.mxu0 %v11970_v49  ;;  %v12022_v49 = vcombine.high %v8317_v11, %v8325_v58  ;;  %v8261_v4 = vld [vmem:[#allocation2 + $0x4e8] sm:$0xff] }
0x1c08   :  { %9304 = vmatpush1.bf16.msra.mxu1 %v12003_v47  ;;  %v12055_v47 = vcombine.low %v8350_v30, %v8358_v61  ;;  %v8270_v30 = vld [vmem:[#allocation2 + $0x530] sm:$0xff] }
0x1c09   :  { %9305 = vmatprep.subr.bf16.mxu1 %v11988_v60  ;;  %v12040_v60 = vcombine.high %v8334_v52, %v8342_v20  ;;  %v8278_v61 = vld [vmem:[#allocation2 + $0x570] sm:$0xff] }
0x1c0a   :  { %9255 = vmatpush1.bf16.msra.mxu0 %v11969_v42  ;;  %v12021_v42 = vcombine.low %v8317_v11, %v8325_v58  ;;  %v8237_v11 = vld [vmem:[#allocation2 + $0x428] sm:$0xff] }
0x1c0b   :  { %9256 = vmatprep.subr.bf16.mxu0 %v11954_v27  ;;  %v12006_v27 = vcombine.high %v8301_v8, %v8309_v46  ;;  %v8245_v58 = vld [vmem:[#allocation2 + $0x468] sm:$0xff] }
0x1c0c   :  { %9306 = vmatpush1.bf16.msra.mxu1 %v11987_v24  ;;  %v12039_v24 = vcombine.low %v8334_v52, %v8342_v20  ;;  %v8254_v52 = vld [vmem:[#allocation2 + $0x4b0] sm:$0xff] }
0x1c0d   :  { %9307 = vmatprep.subr.bf16.mxu1 %v11972_v17  ;;  %v12024_v17 = vcombine.high %v8318_v6, %v8326_v59  ;;  %v8262_v20 = vld [vmem:[#allocation2 + $0x4f0] sm:$0xff] }
0x1c0e   :  { %9257 = vmatpush1.bf16.msra.mxu0 %v11953_v9  ;;  %v12005_v9 = vcombine.low %v8301_v8, %v8309_v46  ;;  %v8351_v8 = vld [vmem:[#allocation2 + $0x7b8] sm:$0xff] }
0x1c0f   :  { %9258 = vmatprep.subr.bf16.mxu0 %v11938_v22  ;;  %v11990_v22 = vcombine.high %v8285_v15, %v8293_v32  ;;  %v8359_v46 = vld [vmem:[#allocation2 + $0x7f8] sm:$0xff] }
0x1c10   :  { %9308 = vmatpush1.bf16.msra.mxu1 %v11971_v36  ;;  %v12023_v36 = vcombine.low %v8318_v6, %v8326_v59  ;;  %v8238_v6 = vld [vmem:[#allocation2 + $0x430] sm:$0xff] }
0x1c11   :  { %9309 = vmatprep.subr.bf16.mxu1 %v11956_v51  ;;  %v12008_v51 = vcombine.high %v8302_v13, %v8310_v5  ;;  %v8246_v59 = vld [vmem:[#allocation2 + $0x470] sm:$0xff] }
0x1c12   :  { %9259 = vmatpush1.bf16.msra.mxu0 %v11937_v44  ;;  %v11989_v44 = vcombine.low %v8285_v15, %v8293_v32  ;;  %v8335_v15 = vld [vmem:[#allocation2 + $0x738] sm:$0xff] }
0x1c13   :  { %9350 = vmatprep.subr.bf16.mxu0 %v12054_v10  ;;  %v11974_v10 = vcombine.high %v8269_v21, %v8277_v34  ;;  %v8343_v32 = vld [vmem:[#allocation2 + $0x778] sm:$0xff] }
0x1c14   :  { %9310 = vmatpush1.bf16.msra.mxu1 %v11955_v62  ;;  %v12007_v62 = vcombine.low %v8302_v13, %v8310_v5  ;;  %v12042_v13 = vcombine.high %v8335_v15, %v8343_v32  ;;  %v11943_v5 = vcombine.low %v8238_v6, %v8246_v59 }
0x1c15   :  { %9277 = vmatmul.mubr.bf16.vlgmr.msra.gmra.mxu0 %v15710_v63  ;;  %9311 = vmatprep.subr.bf16.mxu1 %v11940_v18  ;;  %v11992_v18 = vcombine.high %v8286_v23, %v8294_v57 }
0x1c16   :  { %9351 = vmatpush1.bf16.msra.mxu0 %v12053_v14  ;;  %9286 = vmatprep.mubr.bf16.mxu0 %v16758_v37  ;;  %v11973_v14 = vcombine.low %v8269_v21, %v8277_v34  ;;  %v13585_v21 = vld [vmem:[#allocation5 + $0x478] sm:$0xff]   ;;  %v12041_v34 = vcombine.low %v8335_v15, %v8343_v32  ;;  %v13596_v32 = vld [vmem:[#allocation5 + $0x410] sm:$0xff]  }
0x1c17   :  { %9352 = vmatprep.subr.bf16.mxu0 %v12038_v50  ;;  %v11958_v50 = vcombine.high %v8253_v35, %v8261_v4 }
0x1c18   :  { %9312 = vmatpush1.bf16.msra.mxu1 %v11939_v19  ;;  %v11991_v19 = vcombine.low %v8286_v23, %v8294_v57  ;;  %v8311_v23 = vld [vmem:[#allocation2 + $0x678] sm:$0xff] }
0x1c19   :  { %9403 = vmatprep.subr.bf16.mxu1 %v12056_v55  ;;  %v11976_v55 = vcombine.high %v8270_v30, %v8278_v61  ;;  %v13586_v57 = vld [vmem:[#allocation5 + $0x438] sm:$0xff]  }
0x1c1a   :  { %9353 = vmatpush1.bf16.msra.mxu0 %v12037_v43  ;;  %v11957_v43 = vcombine.low %v8253_v35, %v8261_v4  ;;  %v8287_v4 = vld [vmem:[#allocation2 + $0x5b8] sm:$0xff] }
0x1c1b   :  { %9330 = vmatmul.mubr.bf16.vlgmr.msra.gmra.mxu1 %v15710_v63  ;;  %9354 = vmatprep.subr.bf16.mxu0 %v12022_v49  ;;  %v11942_v49 = vcombine.high %v8237_v11, %v8245_v58 }
0x1c1c   :  { %9404 = vmatpush1.bf16.msra.mxu1 %v12055_v47  ;;  %9339 = vmatprep.mubr.bf16.mxu1 %v16758_v37  ;;  %v11975_v47 = vcombine.low %v8270_v30, %v8278_v61  ;;  %v13589_v30 = vld [vmem:[#allocation5 + $0x468] sm:$0xff]  }
0x1c1d   :  { %9287 = vmatmul.mubr.bf16.gmra.mxu0 %v15720_v26  ;;  %9405 = vmatprep.subr.bf16.mxu1 %v12040_v60  ;;  %v11960_v60 = vcombine.high %v8254_v52, %v8262_v20 }
0x1c1e   :  { %9355 = vmatpush1.bf16.msra.mxu0 %v12021_v42  ;;  %9382 = vmatprep.mubr.bf16.mxu0 %v16758_v37  ;;  %v11941_v42 = vcombine.low %v8237_v11, %v8245_v58  ;;  %v8279_v11 = vld [vmem:[#allocation2 + $0x578] sm:$0xff]  ;;  %v13590_v58 = vld [vmem:[#allocation5 + $0x428] sm:$0xff]  }
0x1c1f   :  { %9356 = vmatprep.subr.bf16.mxu0 %v12006_v27  ;;  %v12058_v27 = vcombine.high %v8351_v8, %v8359_v46 }
0x1c20   :  { %9406 = vmatpush1.bf16.msra.mxu1 %v12039_v24  ;;  %v11959_v24 = vcombine.low %v8254_v52, %v8262_v20  ;;  %v8255_v20 = vld [vmem:[#allocation2 + $0x4b8] sm:$0xff] }
0x1c21   :  { %9407 = vmatprep.subr.bf16.mxu1 %v12024_v17  ;;  %v11944_v17 = vcombine.high %v8238_v6, %v8246_v59  ;;  %v8247_v6 = vld [vmem:[#allocation2 + $0x478] sm:$0xff] }
0x1c22   :  { %9357 = vmatpush1.bf16.msra.mxu0 %v12005_v9  ;;  %v12057_v9 = vcombine.low %v8351_v8, %v8359_v46  ;;  %v13593_v8 = vld [vmem:[#allocation5 + $0x458] sm:$0xff]  }
0x1c23   :  { %9340 = vmatmul.mubr.bf16.gmra.mxu1 %v15720_v26  ;;  %9358 = vmatprep.subr.bf16.mxu0 %v11990_v22  ;;  %v8319_v22 = vld [vmem:[#allocation2 + $0x6b8] sm:$0xff] }
0x1c24   :  { %9408 = vmatpush1.bf16.msra.mxu1 %v12023_v36  ;;  %9435 = vmatprep.mubr.bf16.mxu1 %v16758_v37  ;;  %v8327_v36 = vld [vmem:[#allocation2 + $0x6f8] sm:$0xff] }
0x1c25   :  { %9409 = vmatprep.subr.bf16.mxu1 %v12008_v51  ;;  %v12026_v51 = vcombine.high %v8319_v22, %v8327_v36  ;;  %v13594_v59 = vld [vmem:[#allocation5 + $0x418] sm:$0xff]  }
0x1c26   :  { %9359 = vmatpush1.bf16.msra.mxu0 %v11989_v44  ;;  %v8303_v44 = vld [vmem:[#allocation2 + $0x638] sm:$0xff] }
0x1c27   :  { %9360 = vmatprep.subr.bf16.mxu0 %v11974_v10  ;;  %v13587_v10 = vld [vmem:[#allocation5 + $0x470] sm:$0xff]   ;;  %v12010_v35 = vcombine.high %v8303_v44, %v8311_v23  ;;  %v12009_v61 = vcombine.low %v8303_v44, %v8311_v23  ;;  %v13607_v23 = vld [vmem:[#allocation5 + $0x4e8] sm:$0xff]  }
0x1c28   :  { %9410 = vmatpush1.bf16.msra.mxu1 %v12007_v62  ;;  %v12025_v62 = vcombine.low %v8319_v22, %v8327_v36  ;;  %v13599_v22 = vld [vmem:[#allocation5 + $0x440] sm:$0xff]   ;;  %v13602_v36 = vld [vmem:[#allocation5 + $0x4b8] sm:$0xff]   ;;  %v13604_v44 = vld [vmem:[#allocation5 + $0x4b0] sm:$0xff]  }
0x1c29   :  { %9411 = vmatprep.subr.bf16.mxu1 %v11992_v18  ;;  %v8295_v18 = vld [vmem:[#allocation2 + $0x5f8] sm:$0xff] }
0x1c2a   :  { %9361 = vmatpush1.bf16.msra.mxu0 %v11973_v14  ;;  %v13588_v14 = vld [vmem:[#allocation5 + $0x430] sm:$0xff]  }
0x1c2b   :  { %9362 = vmatprep.subr.bf16.mxu0 %v11958_v50  ;;  %v11994_v50 = vcombine.high %v8287_v4, %v8295_v18 }
0x1c2c   :  { %9412 = vmatpush1.bf16.msra.mxu1 %v11991_v19  ;;  %v8271_v19 = vld [vmem:[#allocation2 + $0x538] sm:$0xff] }
0x1c2d   :  { %9413 = vmatprep.subr.bf16.mxu1 %v11976_v55  ;;  %v13591_v55 = vld [vmem:[#allocation5 + $0x460] sm:$0xff]   ;;  %v11978_v52 = vcombine.high %v8271_v19, %v8279_v11  ;;  %v11977_v46 = vcombine.low %v8271_v19, %v8279_v11 }
0x1c2e   :  { %9363 = vmatpush1.bf16.msra.mxu0 %v11957_v43  ;;  %v11993_v43 = vcombine.low %v8287_v4, %v8295_v18  ;;  %v13619_v4 = vld [vmem:[#allocation5 + $0x4d0] sm:$0xff]   ;;  %v15752_v19 = vld [vmem:[%s16759_s29 + $0x1] ss:$0 sm:$0xff] }
0x1c2f   :  { %9364 = vmatprep.subr.bf16.mxu0 %v11942_v49  ;;  %v8263_v49 = vld [vmem:[#allocation2 + $0x4f8] sm:$0xff]  ;;  %v13620_v18 = vld [vmem:[#allocation5 + $0x490] sm:$0xff]  }
0x1c30   :  { %9414 = vmatpush1.bf16.msra.mxu1 %v11975_v47  ;;  %v13592_v47 = vld [vmem:[#allocation5 + $0x420] sm:$0xff]  }
0x1c31   :  { %9415 = vmatprep.subr.bf16.mxu1 %v11960_v60  ;;  %v11962_v60 = vcombine.high %v8255_v20, %v8263_v49 }
0x1c32   :  { %9365 = vmatpush1.bf16.msra.mxu0 %v11941_v42  ;;  %v8239_v42 = vld [vmem:[#allocation2 + $0x438] sm:$0xff] }
0x1c33   :  { %9456 = vmatprep.subr.bf16.mxu0 %v12058_v27  ;;  %v13595_v27 = vld [vmem:[#allocation5 + $0x450] sm:$0xff]   ;;  %v11946_v15 = vcombine.high %v8239_v42, %v8247_v6 }
0x1c34   :  { %9416 = vmatpush1.bf16.msra.mxu1 %v11959_v24  ;;  %v11961_v24 = vcombine.low %v8255_v20, %v8263_v49 }
0x1c35   :  { %9383 = vmatmul.mubr.bf16.vlgmr.msra.gmra.mxu0 %v15710_v63  ;;  %9417 = vmatprep.subr.bf16.mxu1 %v11944_v17  ;;  %v13597_v17 = vld [vmem:[#allocation5 + $0x448] sm:$0xff]  }
0x1c36   :  { %9457 = vmatpush1.bf16.msra.mxu0 %v12057_v9  ;;  %9392 = vmatprep.mubr.bf16.mxu0 %v16758_v37  ;;  %v11945_v9 = vcombine.low %v8239_v42, %v8247_v6  ;;  %v16819_v6 = vmov 1  }
0x1c37   :  { %9458 = vmatprep.subr.bf16.mxu0 %v12042_v13  ;;  %v13601_v13 = vld [vmem:[#allocation5 + $0x4f8] sm:$0xff]  }
0x1c38   :  { %9418 = vmatpush1.bf16.msra.mxu1 %v11943_v5  ;;  %v13598_v5 = vld [vmem:[#allocation5 + $0x408] sm:$0xff]  }
0x1c39   :  { %12609 = vmatprep.subr.bf16.mxu1 %v13585_v21  ;;  %v13603_v21 = vld [vmem:[#allocation5 + $0x4f0] sm:$0xff]  }
0x1c3a   :  { %9459 = vmatpush1.bf16.msra.mxu0 %v12041_v34  ;;  %v13600_v34 = vld [vmem:[#allocation5 + $0x400] sm:$0xff]  }
0x1c3b   :  { %9436 = vmatmul.mubr.bf16.vlgmr.msra.gmra.mxu1 %v15710_v63  ;;  %9460 = vmatprep.subr.bf16.mxu0 %v12026_v51  ;;  %v13605_v51 = vld [vmem:[#allocation5 + $0x578] sm:$0xff]  }
0x1c3c   :  { %9445 = vmatprep.mubr.bf16.mxu1 %v16758_v37  ;;  %12610 = vmatpush3.bf16.msra.mxu1 %v13586_v57  ;;  %v13608_v57 = vld [vmem:[#allocation5 + $0x4a8] sm:$0xff]  }
0x1c3d   :  { %9393 = vmatmul.mubr.bf16.gmra.mxu0 %v15720_v26  ;;  %12611 = vmatprep.subr.bf16.mxu1 %v13587_v10  ;;  %v13611_v10 = vld [vmem:[#allocation5 + $0x4e0] sm:$0xff]  }
0x1c3e   :  { %9461 = vmatpush1.bf16.msra.mxu0 %v12025_v62  ;;  %9488 = vmatprep.mubr.bf16.mxu0 %v16758_v37  ;;  %v13612_v62 = vld [vmem:[#allocation5 + $0x4a0] sm:$0xff]  }
0x1c3f   :  { %9462 = vmatprep.subr.bf16.mxu0 %v12010_v35  ;;  %v13616_v35 = vld [vmem:[#allocation5 + $0x498] sm:$0xff]  }
0x1c40   :  { %12612 = vmatpush3.bf16.msra.mxu1 %v13588_v14  ;;  %v13623_v14 = vld [vmem:[#allocation5 + $0x4c8] sm:$0xff]  }
0x1c41   :  { %12613 = vmatprep.subr.bf16.mxu1 %v13589_v30  ;;  %v13624_v30 = vld [vmem:[#allocation5 + $0x488] sm:$0xff]  }
0x1c42   :  { %9463 = vmatpush1.bf16.msra.mxu0 %v12009_v61  ;;  %v13627_v61 = vld [vmem:[#allocation5 + $0x4c0] sm:$0xff]  }
0x1c43   :  { %9446 = vmatmul.mubr.bf16.gmra.mxu1 %v15720_v26  ;;  %9464 = vmatprep.subr.bf16.mxu0 %v11994_v50  ;;  %v13631_v50 = vld [vmem:[#allocation5 + $0x5f8] sm:$0xff]  }
0x1c44   :  { %12614 = vmatpush3.bf16.msra.mxu1 %v13590_v58 }
0x1c45   :  { %12615 = vmatprep.subr.bf16.mxu1 %v13591_v55  ;;  %v15758_v55 = vld [vmem:[%s16760_s3 + $0x10] sm:$0xff] }
0x1c46   :  { %9465 = vmatpush1.bf16.msra.mxu0 %v11993_v43  ;;  %v15764_v20 = vrot.slane %v15758_v55, %v14365_v31  ;;  %v15768_v49 = vrot.slane %v15758_v55, %v14351_v1 }
0x1c47   :  { %9466 = vmatprep.subr.bf16.mxu0 %v11978_v52 }
0x1c48   :  { %12616 = vmatpush3.bf16.msra.mxu1 %v13592_v47 }
0x1c49   :  { %12617 = vmatprep.subr.bf16.mxu1 %v13593_v8 }
0x1c4a   :  { %9467 = vmatpush1.bf16.msra.mxu0 %v11977_v46 }
0x1c4b   :  { %9468 = vmatprep.subr.bf16.mxu0 %v11962_v60 }
0x1c4c   :  { %12618 = vmatpush3.bf16.msra.mxu1 %v13594_v59 }
0x1c4d   :  { %12619 = vmatprep.subr.bf16.mxu1 %v13595_v27 }
0x1c4e   :  { %9469 = vmatpush1.bf16.msra.mxu0 %v11961_v24 }
0x1c4f   :  { %9470 = vmatprep.subr.bf16.mxu0 %v11946_v15 }
0x1c50   :  { %12620 = vmatpush3.bf16.msra.mxu1 %v13596_v32 }
0x1c51   :  { %12621 = vmatprep.subr.bf16.mxu1 %v13597_v17 }
0x1c52   :  { %9471 = vmatpush1.bf16.msra.mxu0 %v11945_v9 }
0x1c53   :  { %12637 = vmatprep.subr.bf16.mxu0 %v13601_v13 }
0x1c54   :  { %12622 = vmatpush3.bf16.msra.mxu1 %v13598_v5  ;;  %v13606_v5 = vld [vmem:[#allocation5 + $0x538] sm:$0xff]  }
0x1c55   :  { %9489 = vmatmul.mubr.bf16.vlgmr.msra.gmra.mxu0 %v15710_v63  ;;  %12623 = vmatprep.subr.bf16.mxu1 %v13599_v22  ;;  %v13615_v63 = vld [vmem:[#allocation5 + $0x4d8] sm:$0xff]  }
0x1c56   :  { %9498 = vmatprep.mubr.bf16.mxu0 %v16758_v37  ;;  %12638 = vmatpush3.bf16.msra.mxu0 %v13602_v36  ;;  %v13609_v36 = vld [vmem:[#allocation5 + $0x570] sm:$0xff]  }
0x1c57   :  { %12639 = vmatprep.subr.bf16.mxu0 %v13603_v21  ;;  %v16820_v21 = vmov 2  }
0x1c58   :  { %12624 = vmatpush3.bf16.msra.mxu1 %v13600_v34  ;;  %v13610_v34 = vld [vmem:[#allocation5 + $0x530] sm:$0xff]  }
0x1c59   :  { %12665 = vmatprep.subr.bf16.mxu1 %v13605_v51  ;;  %v13613_v51 = vld [vmem:[#allocation5 + $0x568] sm:$0xff]  }
0x1c5a   :  { %12640 = vmatpush3.bf16.msra.mxu0 %v13604_v44  ;;  %v13614_v44 = vld [vmem:[#allocation5 + $0x528] sm:$0xff]  }
0x1c5b   :  { %12641 = vmatprep.subr.bf16.mxu0 %v13607_v23  ;;  %v13617_v23 = vld [vmem:[#allocation5 + $0x560] sm:$0xff]  }
0x1c5d   :  { %9499 = vmatmul.mubr.bf16.gmra.mxu0 %v15720_v26  ;;  %v13628_v26 = vld [vmem:[#allocation5 + $0x480] sm:$0xff]  }
0x1c5e   :  { %12642 = vmatpush3.bf16.msra.mxu0 %v13608_v57  ;;  %v13618_v57 = vld [vmem:[#allocation5 + $0x520] sm:$0xff]  }
0x1c5f   :  { %12643 = vmatprep.subr.bf16.mxu0 %v13611_v10  ;;  %v13621_v10 = vld [vmem:[#allocation5 + $0x558] sm:$0xff]  }
0x1c62   :  { %12644 = vmatpush3.bf16.msra.mxu0 %v13612_v62 }
0x1c63   :  { %12645 = vmatprep.subr.bf16.mxu0 %v13615_v63  ;;  %v13622_v63 = vld [vmem:[#allocation5 + $0x518] sm:$0xff]  }
0x1c66   :  { %12646 = vmatpush3.bf16.msra.mxu0 %v13616_v35 }
0x1c67   :  { %12647 = vmatprep.subr.bf16.mxu0 %v13619_v4  ;;  %v13625_v4 = vld [vmem:[#allocation5 + $0x550] sm:$0xff]  }
0x1c6a   :  { %12648 = vmatpush3.bf16.msra.mxu0 %v13620_v18 }
0x1c6b   :  { %12649 = vmatprep.subr.bf16.mxu0 %v13623_v14 }
0x1c6e   :  { %12650 = vmatpush3.bf16.msra.mxu0 %v13624_v30 }
0x1c6f   :  { %12651 = vmatprep.subr.bf16.mxu0 %v13627_v61 }
0x1c72   :  { %12652 = vmatpush3.bf16.msra.mxu0 %v13628_v26  ;;  %v15792_v26 = vrot.slane %v15758_v55, %v15210_v40 }
0x1c73   :  { %12693 = vmatprep.subr.bf16.mxu0 %v13631_v50  ;;  %v13626_v50 = vld [vmem:[#allocation5 + $0x510] sm:$0xff]  }
0x1c94   :  { %v13191_v11 = vpop.f32.mrf.mxu0 }
0x1c95   :  { %v15755_v58 = vadd.f32 %v13191_v11, %v15752_v19  ;;  %v15796_v11 = vrot.slane %v15758_v55, %v14368_v25 }
0x1c96   :  { %v9119_v43 = vpop.f32.mrf.mxu1  ;;  %v7887_v52 = vpop.f32.mrf.mxu0 }
0x1c97   :  { %16817 = vst [vmem:[#allocation84_spill] sm:$0xff] %v15755_v58  ;;  %8047 = vperm.xlu0 %13387, %v15755_v58   ;;  %7957 = vperm.xlu1 %13392, %v15755_v58   ;;  %v15771_v8 = vadd.f32 %v15752_v19, %v7887_v52  ;;  %v9120_v59 = vadd.f32 %v9119_v43, %v15768_v49 }
0x1c98   :  { %v9121_v47 = vpop.f32.mrf.mxu1 }
0x1c99   :  { %16818 = vst [vmem:[#allocation85_spill] sm:$0xff] %v15771_v8  ;;  %v9122_v60 = vadd.f32 %v9121_v47, %v15764_v20  ;;  %v9509_v9 = vmax.f32 %v9120_v59, 0.0  ;;  %v13629_v47 = vld [vmem:[#allocation5 + $0x548] sm:$0xff]  }
0x1c9a   :  { %v9123_v46 = vpop.f32.mrf.mxu1 }
0x1c9b   :  { %v9124_v42 = vadd.f32 %v9123_v46, %v15768_v49  ;;  %13394 = vset.pattern.permute.xlu0 %v16758_v37  ;;  %13393 = vset.pattern.permute.xlu1 %v16819_v6  ;;  %v9510_v32 = vmax.f32 %v9122_v60, 0.0 }
0x1c9c   :  { %v9125_v27 = vpop.f32.mrf.mxu1  ;;  %8003 = vperm.xlu1 %13393, %v15755_v58   ;;  %7952 = vperm.xlu0 %13394, %v15771_v8  }
0x1c9d   :  { %v9126_v24 = vadd.f32 %v9125_v27, %v15764_v20  ;;  %v9525_v15 = vmax.f32 %v9124_v42, 0.0  ;;  %v16822_v42 = vmov 3  }
0x1c9f   :  { %v9526_v17 = vmax.f32 %v9126_v24, 0.0  ;;  %v9573_v22 = vpack.c.bf16 %v9525_v15, %v9509_v9  ;;  %v13630_v9 = vld [vmem:[#allocation5 + $0x508] sm:$0xff]  }
0x1ca0   :  { %7999 = vperm.xlu1 %13393, %v15771_v8  }
0x1ca1   :  { %v9574_v13 = vpack.c.bf16 %v9526_v17, %v9510_v32 }
0x1ca3   :  { %9902 = vmatprep.mubr.bf16.mxu1 %v9574_v13 }
0x1ca4   :  { %13395 = vset.pattern.permute.xlu1 %v16820_v21  ;;  %9903 = vmatmul.mubr.bf16.vlgmr.msra.gmra.mxu1 %v9573_v22 }
0x1ca5   :  { %8043 = vperm.xlu1 %13395, %v15771_v8   ;;  %12666 = vmatpush3.bf16.msra.mxu1 %v13606_v5 }
0x1ca6   :  { %12667 = vmatprep.subr.bf16.mxu1 %v13609_v36 }
0x1ca9   :  { %12668 = vmatpush3.bf16.msra.mxu1 %v13610_v34  ;;  %13397 = vset.pattern.permute.xlu1 %v16819_v6 }
0x1caa   :  { %12669 = vmatprep.subr.bf16.mxu1 %v13613_v51 }
0x1cad   :  { %12670 = vmatpush3.bf16.msra.mxu1 %v13614_v44 }
0x1cae   :  { %12671 = vmatprep.subr.bf16.mxu1 %v13617_v23  ;;  %v15812_v23 = vrot.slane %v15758_v55, %v15217_v45 }
0x1cb1   :  { %v13194_v62 = vpop.f32.mrf.mxu0  ;;  %12672 = vmatpush3.bf16.msra.mxu1 %v13618_v57 }
0x1cb2   :  { %v15786_v35 = vadd.f32 %v13194_v62, %v15752_v19  ;;  %12673 = vmatprep.subr.bf16.mxu1 %v13621_v10  ;;  %v15816_v10 = vrot.slane %v15758_v55, %v15214_v56 }
0x1cb3   :  { %v7897_v18 = vpop.f32.mrf.mxu0  ;;  %v9129_v14 = vpop.f32.mrf.mxu1 }
0x1cb4   :  { %16821 = vst [vmem:[#allocation86_spill] sm:$0xff] %v15786_v35  ;;  %8011 = vperm.xlu1 %13397, %v15786_v35   ;;  %7967 = vperm.xlu0 %13394, %v15786_v35   ;;  %v9130_v59 = vadd.f32 %v9129_v14, %v15768_v49 }
0x1cb5   :  { %v9131_v30 = vpop.f32.mrf.mxu1  ;;  %v9172_v61 = vpop.f32.mrf.mxu0  ;;  %12674 = vmatpush3.bf16.msra.mxu1 %v13622_v63 }
0x1cb6   :  { %12675 = vmatprep.subr.bf16.mxu1 %v13625_v4  ;;  %v9132_v46 = vadd.f32 %v9131_v30, %v15764_v20  ;;  %v9173_v13 = vadd.f32 %v9172_v61, %v15796_v11 }
0x1cb7   :  { %v9133_v43 = vpop.f32.mrf.mxu1  ;;  %v9174_v52 = vpop.f32.mrf.mxu0 }
0x1cb8   :  { %v9134_v60 = vadd.f32 %v9133_v43, %v15768_v49  ;;  %13398 = vset.pattern.permute.xlu1 %v16820_v21  ;;  %13396 = vset.pattern.permute.xlu0 %v16822_v42  ;;  %v9175_v15 = vadd.f32 %v9174_v52, %v15792_v26  ;;  %v13633_v49 = vld [vmem:[#allocation5 + $0x540] sm:$0xff]   ;;  %v9542_v34 = vmax.f32 %v9132_v46, 0.0  ;;  %v9511_v61 = vmax.f32 %v9173_v13, 0.0  ;;  %v13635_v13 = vld [vmem:[#allocation5 + $0x5f0] sm:$0xff]  }
0x1cb9   :  { %v9135_v27 = vpop.f32.mrf.mxu1  ;;  %8055 = vperm.xlu1 %13398, %v15786_v35   ;;  %8091 = vperm.xlu0 %13396, %v15755_v58   ;;  %v9176_v24 = vpop.f32.mrf.mxu0 }
0x1cba   :  { %v9136_v32 = vadd.f32 %v9135_v27, %v15764_v20  ;;  %v9177_v17 = vadd.f32 %v9176_v24, %v15796_v11  ;;  %12676 = vmatpush3.bf16.msra.mxu1 %v13626_v50  ;;  %v9557_v5 = vmax.f32 %v9134_v60, 0.0  ;;  %v9541_v20 = vmax.f32 %v9130_v59, 0.0  ;;  %v13632_v59 = vld [vmem:[#allocation5 + $0x5b8] sm:$0xff]   ;;  %v13634_v27 = vld [vmem:[#allocation5 + $0x500] sm:$0xff]  }
0x1cbb   :  { %v9178_v22 = vpop.f32.mrf.mxu0  ;;  %v9225_v36 = vpop.f32.mrf.mxu1  ;;  %12677 = vmatprep.subr.bf16.mxu1 %v13629_v47  ;;  %v9512_v4 = vmax.f32 %v9175_v15, 0.0  ;;  %v15824_v24 = vadd.f32 %v15752_v19, %v7897_v18 }
0x1cbc   :  { %v9558_v51 = vmax.f32 %v9136_v32, 0.0  ;;  %v9179_v44 = vadd.f32 %v9178_v22, %v15792_v26  ;;  %v9527_v57 = vmax.f32 %v9177_v17, 0.0  ;;  %v9589_v50 = vpack.c.bf16 %v9557_v5, %v9541_v20  ;;  %v13637_v5 = vld [vmem:[#allocation5 + $0x678] sm:$0xff]  }
0x1cbd   :  { %v9227_v62 = vpop.f32.mrf.mxu1  ;;  %13399 = vset.pattern.permute.xlu1 %v16822_v42  ;;  %v9182_v63 = vpop.f32.mrf.mxu0  ;;  %13406 = vset.pattern.permute.xlu0 %v16820_v21  ;;  %16823 = vst [vmem:[#allocation87_spill] sm:$0xff] %v15824_v24  ;;  %v9226_v32 = vadd.f32 %v9225_v36, %v15816_v10 }
0x1cbe   :  { %v9590_v14 = vpack.c.bf16 %v9558_v51, %v9542_v34  ;;  %v9528_v30 = vmax.f32 %v9179_v44, 0.0  ;;  %8099 = vperm.xlu1 %13399, %v15786_v35   ;;  %12678 = vmatpush3.bf16.msra.mxu1 %v13630_v9  ;;  %v9228_v46 = vadd.f32 %v9227_v62, %v15812_v23  ;;  %v9575_v15 = vpack.c.bf16 %v9527_v57, %v9511_v61  ;;  %v13636_v62 = vld [vmem:[#allocation5 + $0x5b0] sm:$0xff]  }
0x1cbf   :  { %v9184_v43 = vpop.f32.mrf.mxu0  ;;  %v9229_v52 = vpop.f32.mrf.mxu1  ;;  %12679 = vmatprep.subr.bf16.mxu1 %v13633_v49  ;;  %v9183_v19 = vadd.f32 %v9182_v63, %v15796_v11 }
0x1cc0   :  { %v9576_v47 = vpack.c.bf16 %v9528_v30, %v9512_v4  ;;  %v9230_v60 = vadd.f32 %v9229_v52, %v15816_v10  ;;  %9910 = vmatprep.mubr.bf16.mxu1 %v9590_v14  ;;  %v9185_v22 = vadd.f32 %v9184_v43, %v15792_v26  ;;  %v9514_v36 = vmax.f32 %v9228_v46, 0.0  ;;  %v13639_v46 = vld [vmem:[#allocation5 + $0x5e8] sm:$0xff]  }
0x1cc1   :  { %v9186_v17 = vpop.f32.mrf.mxu0  ;;  %v9231_v9 = vpop.f32.mrf.mxu1  ;;  %9911 = vmatmul.mubr.bf16.gmra.mxu1 %v9589_v50  ;;  %v9513_v4 = vmax.f32 %v9226_v32, 0.0  ;;  %v13638_v50 = vld [vmem:[#allocation5 + $0x638] sm:$0xff]   ;;  %v9543_v43 = vmax.f32 %v9183_v19, 0.0 }
0x1cc2   :  { %v9187_v49 = vadd.f32 %v9186_v17, %v15796_v11  ;;  %v9232_v34 = vadd.f32 %v9231_v9, %v15812_v23  ;;  %13400 = vset.pattern.permute.xlu1 %v16758_v37  ;;  %9951 = vmatprep.mubr.bf16.mxu0 %v9576_v47  ;;  %v9529_v18 = vmax.f32 %v9230_v60, 0.0  ;;  %v9544_v61 = vmax.f32 %v9185_v22, 0.0  ;;  %v13642_v22 = vld [vmem:[#allocation5 + $0x630] sm:$0xff]  }
0x1cc3   :  { %v9188_v51 = vpop.f32.mrf.mxu0  ;;  %v9235_v44 = vpop.f32.mrf.mxu1  ;;  %9952 = vmatmul.mubr.bf16.vlgmr.msra.gmra.mxu0 %v9575_v15  ;;  %7962 = vperm.xlu1 %13400, %v15824_v24   ;;  %v13641_v15 = vld [vmem:[#allocation5 + $0x670] sm:$0xff]  }
0x1cc4   :  { %v9530_v20 = vmax.f32 %v9232_v34, 0.0  ;;  %v9189_v57 = vadd.f32 %v9188_v51, %v15792_v26  ;;  %12694 = vmatpush3.bf16.msra.mxu0 %v13632_v59  ;;  %12680 = vmatpush3.bf16.msra.mxu1 %v13634_v27  ;;  %v9559_v14 = vmax.f32 %v9187_v49, 0.0  ;;  %v9577_v52 = vpack.c.bf16 %v9529_v18, %v9513_v4  ;;  %v13640_v27 = vld [vmem:[#allocation5 + $0x5a8] sm:$0xff]   ;;  %v13644_v51 = vld [vmem:[#allocation5 + $0x5a0] sm:$0xff]   ;;  %v13651_v4 = vld [vmem:[#allocation5 + $0x5d0] sm:$0xff]  }
0x1cc5   :  { %v9237_v30 = vpop.f32.mrf.mxu1  ;;  %12695 = vmatprep.subr.bf16.mxu0 %v13635_v13  ;;  %12721 = vmatprep.subr.bf16.mxu1 %v13637_v5  ;;  %v9236_v17 = vadd.f32 %v9235_v44, %v15816_v10  ;;  %v13643_v13 = vld [vmem:[#allocation5 + $0x5e0] sm:$0xff]   ;;  %v13645_v34 = vld [vmem:[#allocation5 + $0x668] sm:$0xff]   ;;  %v13647_v44 = vld [vmem:[#allocation5 + $0x5d8] sm:$0xff]  }
0x1cc6   :  { %v9578_v11 = vpack.c.bf16 %v9530_v20, %v9514_v36  ;;  %v9560_v63 = vmax.f32 %v9189_v57, 0.0  ;;  %v9238_v26 = vadd.f32 %v9237_v30, %v15812_v23  ;;  %v9591_v32 = vpack.c.bf16 %v9559_v14, %v9543_v43  ;;  %v13649_v57 = vld [vmem:[#allocation5 + $0x660] sm:$0xff]   ;;  %v13653_v30 = vld [vmem:[#allocation5 + $0x658] sm:$0xff]  }
0x1cc7   :  { %v9239_v47 = vpop.f32.mrf.mxu1  ;;  %13401 = vset.pattern.permute.xlu1 %v16819_v6  ;;  %v13650_v14 = vld [vmem:[#allocation5 + $0x620] sm:$0xff]   ;;  %v13654_v43 = vld [vmem:[#allocation5 + $0x618] sm:$0xff]  }
0x1cc8   :  { %v9592_v60 = vpack.c.bf16 %v9560_v63, %v9544_v61  ;;  %v9240_v59 = vadd.f32 %v9239_v47, %v15816_v10  ;;  %12696 = vmatpush3.bf16.msra.mxu0 %v13636_v62  ;;  %10297 = vmatprep.mubr.bf16.mxu1 %v9578_v11  ;;  %v9546_v19 = vmax.f32 %v9238_v26, 0.0  ;;  %v9545_v10 = vmax.f32 %v9236_v17, 0.0  ;;  %v13648_v62 = vld [vmem:[#allocation5 + $0x598] sm:$0xff]   ;;  %v13652_v61 = vld [vmem:[#allocation5 + $0x590] sm:$0xff]   ;;  %v13655_v63 = vld [vmem:[#allocation5 + $0x5c8] sm:$0xff]  }
0x1cc9   :  { %8007 = vperm.xlu1 %13401, %v15824_v24   ;;  %v9241_v9 = vpop.f32.mrf.mxu1  ;;  %10298 = vmatmul.mubr.bf16.vlgmr.msra.gmra.mxu1 %v9577_v52  ;;  %v8392_v52 = vrot.slane %v15758_v55, %v15247_v54  ;;  %v13658_v17 = vld [vmem:[#allocation5 + $0x610] sm:$0xff]  }
0x1cca   :  { %v9242_v5 = vadd.f32 %v9241_v9, %v15812_v23  ;;  %12722 = vmatpush3.bf16.msra.mxu1 %v13638_v50  ;;  %9959 = vmatprep.mubr.bf16.mxu0 %v9592_v60  ;;  %v9561_v49 = vmax.f32 %v9240_v59, 0.0  ;;  %v13646_v23 = vld [vmem:[#allocation5 + $0x628] sm:$0xff]   ;;  %v15846_v50 = vrot.slane %v15758_v55, %v15244_v29  ;;  %v13659_v59 = vld [vmem:[#allocation5 + $0x5c0] sm:$0xff]  }
0x1ccb   :  { %12697 = vmatprep.subr.bf16.mxu0 %v13639_v46  ;;  %9960 = vmatmul.mubr.bf16.gmra.mxu0 %v9591_v32  ;;  %v13657_v46 = vld [vmem:[#allocation5 + $0x650] sm:$0xff]   ;;  %v13656_v60 = vld [vmem:[#allocation5 + $0x588] sm:$0xff]   ;;  %v15853_v32 = vld [vmem:[%s16760_s3 + $0x18] sm:$0xff] }
0x1ccc   :  { %v9562_v18 = vmax.f32 %v9242_v5, 0.0  ;;  %12698 = vmatpush3.bf16.msra.mxu0 %v13640_v27  ;;  %12723 = vmatprep.subr.bf16.mxu1 %v13641_v15  ;;  %v9593_v20 = vpack.c.bf16 %v9561_v49, %v9545_v10  ;;  %v13661_v5 = vld [vmem:[#allocation5 + $0x648] sm:$0xff]   ;;  %v15859_v49 = vrot.slane %v15853_v32, %v14365_v31  ;;  %v13665_v31 = vld [vmem:[#allocation5 + $0x640] sm:$0xff]  }
0x1ccd   :  { %13402 = vset.pattern.permute.xlu1 %v16820_v21  ;;  %12699 = vmatprep.subr.bf16.mxu0 %v13643_v13 }
0x1cce   :  { %v9594_v36 = vpack.c.bf16 %v9562_v18, %v9546_v19  ;;  %12724 = vmatpush3.bf16.msra.mxu1 %v13642_v22  ;;  %8051 = vperm.xlu1 %13402, %v15824_v24   ;;  %v15863_v18 = vrot.slane %v15853_v32, %v14351_v1  ;;  %v13664_v1 = vld [vmem:[#allocation5 + $0x6b8] sm:$0xff]  }
0x1ccf   :  { %12725 = vmatprep.subr.bf16.mxu1 %v13645_v34  ;;  %v13660_v34 = vld [vmem:[#allocation5 + $0x580] sm:$0xff]  }
0x1cd0   :  { %12700 = vmatpush3.bf16.msra.mxu0 %v13644_v51  ;;  %10305 = vmatprep.mubr.bf16.mxu1 %v9594_v36 }
0x1cd1   :  { %10306 = vmatmul.mubr.bf16.gmra.mxu1 %v9593_v20  ;;  %12701 = vmatprep.subr.bf16.mxu0 %v13647_v44  ;;  %v13663_v44 = vld [vmem:[#allocation5 + $0x6f8] sm:$0xff]   ;;  %v13662_v20 = vld [vmem:[#allocation5 + $0x608] sm:$0xff]  }
0x1cd2   :  { %12726 = vmatpush3.bf16.msra.mxu1 %v13646_v23  ;;  %13403 = vset.pattern.permute.xlu1 %v16822_v42 }
0x1cd3   :  { %8095 = vperm.xlu1 %13403, %v15824_v24   ;;  %12727 = vmatprep.subr.bf16.mxu1 %v13649_v57 }
0x1cd4   :  { %12702 = vmatpush3.bf16.msra.mxu0 %v13648_v62 }
0x1cd5   :  { %v9278_v11 = vpop.f32.mrf.mxu0  ;;  %12703 = vmatprep.subr.bf16.mxu0 %v13651_v4 }
0x1cd6   :  { %12728 = vmatpush3.bf16.msra.mxu1 %v13650_v14  ;;  %v9279_v9 = vadd.f32 %v9278_v11, %v8392_v52 }
0x1cd7   :  { %v9280_v47 = vpop.f32.mrf.mxu0  ;;  %8087 = vperm.xlu1 %13403, %v15771_v8   ;;  %12729 = vmatprep.subr.bf16.mxu1 %v13653_v30 }
0x1cd8   :  { %12704 = vmatpush3.bf16.msra.mxu0 %v13652_v61  ;;  %v9281_v27 = vadd.f32 %v9280_v47, %v15846_v50  ;;  %v9515_v57 = vmax.f32 %v9279_v9, 0.0 }
0x1cd9   :  { %v9282_v26 = vpop.f32.mrf.mxu0  ;;  %12705 = vmatprep.subr.bf16.mxu0 %v13655_v63 }
0x1cda   :  { %v9283_v15 = vadd.f32 %v9282_v26, %v8392_v52  ;;  %12730 = vmatpush3.bf16.msra.mxu1 %v13654_v43  ;;  %v9516_v36 = vmax.f32 %v9281_v27, 0.0  ;;  %v13666_v27 = vld [vmem:[#allocation5 + $0x600] sm:$0xff]  }
0x1cdb   :  { %v9284_v13 = vpop.f32.mrf.mxu0  ;;  %v9331_v55 = vpop.f32.mrf.mxu1  ;;  %12731 = vmatprep.subr.bf16.mxu1 %v13657_v46  ;;  %13404 = vset.pattern.permute.xlu1 %v16758_v37  ;;  %v13667_v46 = vld [vmem:[#allocation5 + $0x6f0] sm:$0xff]  }
0x1cdc   :  { %v9285_v22 = vadd.f32 %v9284_v13, %v15846_v50  ;;  %12706 = vmatpush3.bf16.msra.mxu0 %v13656_v60  ;;  %v9531_v19 = vmax.f32 %v9283_v15, 0.0  ;;  %v9332_v63 = vadd.f32 %v9331_v55, %v15863_v18 }
0x1cdd   :  { %v9288_v51 = vpop.f32.mrf.mxu0  ;;  %v9333_v10 = vpop.f32.mrf.mxu1  ;;  %12707 = vmatprep.subr.bf16.mxu0 %v13659_v59 }
0x1cde   :  { %v9532_v23 = vmax.f32 %v9285_v22, 0.0  ;;  %12732 = vmatpush3.bf16.msra.mxu1 %v13658_v17  ;;  %v9334_v30 = vadd.f32 %v9333_v10, %v15859_v49  ;;  %v9579_v11 = vpack.c.bf16 %v9531_v19, %v9515_v57  ;;  %v9289_v15 = vadd.f32 %v9288_v51, %v8392_v52  ;;  %v13668_v19 = vld [vmem:[#allocation5 + $0x6b0] sm:$0xff]   ;;  %v13670_v51 = vld [vmem:[#allocation5 + $0x738] sm:$0xff]  }
0x1cdf   :  { %v9290_v62 = vpop.f32.mrf.mxu0  ;;  %v9335_v4 = vpop.f32.mrf.mxu1  ;;  %12733 = vmatprep.subr.bf16.mxu1 %v13661_v5  ;;  %v13669_v5 = vld [vmem:[#allocation5 + $0x778] sm:$0xff]   ;;  %v9517_v10 = vmax.f32 %v9332_v63, 0.0 }
0x1ce0   :  { %v9580_v14 = vpack.c.bf16 %v9532_v23, %v9516_v36  ;;  %v9336_v61 = vadd.f32 %v9335_v4, %v15863_v18  ;;  %12708 = vmatpush3.bf16.msra.mxu0 %v13660_v34  ;;  %v9291_v60 = vadd.f32 %v9290_v62, %v15846_v50  ;;  %v9518_v55 = vmax.f32 %v9334_v30, 0.0  ;;  %v13671_v23 = vld [vmem:[#allocation5 + $0x6e8] sm:$0xff]  }
0x1ce1   :  { %v9292_v43 = vpop.f32.mrf.mxu0  ;;  %v9337_v47 = vpop.f32.mrf.mxu1  ;;  %12749 = vmatprep.subr.bf16.mxu0 %v13663_v44  ;;  %v9547_v62 = vmax.f32 %v9289_v15, 0.0 }
0x1ce2   :  { %v9293_v26 = vadd.f32 %v9292_v43, %v8392_v52  ;;  %v9338_v59 = vadd.f32 %v9337_v47, %v15859_v49  ;;  %10346 = vmatprep.mubr.bf16.mxu0 %v9580_v14  ;;  %12734 = vmatpush3.bf16.msra.mxu1 %v13662_v20  ;;  %v9533_v17 = vmax.f32 %v9336_v61, 0.0  ;;  %v9548_v20 = vmax.f32 %v9291_v60, 0.0  ;;  %v13673_v14 = vld [vmem:[#allocation5 + $0x770] sm:$0xff]   ;;  %v13675_v47 = vld [vmem:[#allocation5 + $0x6e0] sm:$0xff]  }
0x1ce3   :  { %v9294_v9 = vpop.f32.mrf.mxu0  ;;  %v9341_v13 = vpop.f32.mrf.mxu1  ;;  %10347 = vmatmul.mubr.bf16.vlgmr.msra.gmra.mxu0 %v9579_v11  ;;  %12735 = vmatprep.subr.bf16.mxu1 %v13665_v31  ;;  %v13674_v60 = vld [vmem:[#allocation5 + $0x730] sm:$0xff]  }
0x1ce4   :  { %v9534_v22 = vmax.f32 %v9338_v59, 0.0  ;;  %v9295_v34 = vadd.f32 %v9294_v9, %v15846_v50  ;;  %12750 = vmatpush3.bf16.msra.mxu0 %v13664_v1  ;;  %v9563_v44 = vmax.f32 %v9293_v26, 0.0  ;;  %v9581_v4 = vpack.c.bf16 %v9533_v17, %v9517_v10  ;;  %v13672_v1 = vld [vmem:[#allocation5 + $0x6a8] sm:$0xff]   ;;  %v13676_v17 = vld [vmem:[#allocation5 + $0x6a0] sm:$0xff]   ;;  %v13685_v10 = vld [vmem:[#allocation5 + $0x758] sm:$0xff]  }
0x1ce5   :  { %v9343_v36 = vpop.f32.mrf.mxu1  ;;  %12751 = vmatprep.subr.bf16.mxu0 %v13667_v46  ;;  %v9342_v63 = vadd.f32 %v9341_v13, %v15863_v18  ;;  %v13677_v59 = vld [vmem:[#allocation5 + $0x768] sm:$0xff]  }
0x1ce6   :  { %v9582_v57 = vpack.c.bf16 %v9534_v22, %v9518_v55  ;;  %v9564_v52 = vmax.f32 %v9295_v34, 0.0  ;;  %12736 = vmatpush3.bf16.msra.mxu1 %v13666_v27  ;;  %v9344_v50 = vadd.f32 %v9343_v36, %v15859_v49  ;;  %v9595_v11 = vpack.c.bf16 %v9563_v44, %v9547_v62  ;;  %v13680_v22 = vld [vmem:[#allocation5 + $0x698] sm:$0xff]   ;;  %v13683_v34 = vld [vmem:[#allocation5 + $0x6d0] sm:$0xff]  }
0x1ce7   :  { %v9345_v31 = vpop.f32.mrf.mxu1  ;;  %12777 = vmatprep.subr.bf16.mxu1 %v13669_v5  ;;  %v9549_v9 = vmax.f32 %v9342_v63, 0.0  ;;  %v13678_v5 = vld [vmem:[#allocation5 + $0x728] sm:$0xff]   ;;  %v13684_v44 = vld [vmem:[#allocation5 + $0x690] sm:$0xff]  }
0x1ce8   :  { %v9596_v30 = vpack.c.bf16 %v9564_v52, %v9548_v20  ;;  %v9346_v61 = vadd.f32 %v9345_v31, %v15863_v18  ;;  %10689 = vmatprep.mubr.bf16.mxu1 %v9582_v57  ;;  %12752 = vmatpush3.bf16.msra.mxu0 %v13668_v19  ;;  %v9550_v27 = vmax.f32 %v9344_v50, 0.0  ;;  %v13679_v18 = vld [vmem:[#allocation5 + $0x6d8] sm:$0xff]   ;;  %v13682_v19 = vld [vmem:[#allocation5 + $0x720] sm:$0xff]   ;;  %v15877_v20 = vrot.slane %v15853_v32, %v15210_v40  ;;  %v13689_v62 = vld [vmem:[#allocation5 + $0x750] sm:$0xff]  }
0x1ce9   :  { %v9347_v43 = vpop.f32.mrf.mxu1  ;;  %10690 = vmatmul.mubr.bf16.vlgmr.msra.gmra.mxu1 %v9581_v4  ;;  %12753 = vmatprep.subr.bf16.mxu0 %v13671_v23  ;;  %v13687_v23 = vld [vmem:[#allocation5 + $0x6c8] sm:$0xff]   ;;  %v13686_v57 = vld [vmem:[#allocation5 + $0x718] sm:$0xff]   ;;  %v8408_v52 = vrot.slane %v15853_v32, %v14368_v25 }
0x1cea   :  { %v9348_v46 = vadd.f32 %v9347_v43, %v15859_v49  ;;  %10354 = vmatprep.mubr.bf16.mxu0 %v9596_v30  ;;  %12778 = vmatpush3.bf16.msra.mxu1 %v13670_v51  ;;  %v9565_v26 = vmax.f32 %v9346_v61, 0.0  ;;  %v13681_v49 = vld [vmem:[#allocation5 + $0x760] sm:$0xff]   ;;  %v13688_v4 = vld [vmem:[#allocation5 + $0x688] sm:$0xff]   ;;  %v13690_v61 = vld [vmem:[#allocation5 + $0x710] sm:$0xff]   ;;  %v15885_v43 = vrot.slane %v15853_v32, %v15217_v45 }
0x1ceb   :  { %10355 = vmatmul.mubr.bf16.gmra.mxu0 %v9595_v11  ;;  %12779 = vmatprep.subr.bf16.mxu1 %v13673_v14  ;;  %v13691_v14 = vld [vmem:[#allocation5 + $0x6c0] sm:$0xff]   ;;  %v13693_v63 = vld [vmem:[#allocation5 + $0x748] sm:$0xff]  }
0x1cec   :  { %v9566_v15 = vmax.f32 %v9348_v46, 0.0  ;;  %12754 = vmatpush3.bf16.msra.mxu0 %v13672_v1  ;;  %v9597_v55 = vpack.c.bf16 %v9565_v26, %v9549_v9  ;;  %v13694_v9 = vld [vmem:[#allocation5 + $0x708] sm:$0xff]  }
0x1ced   :  { %12755 = vmatprep.subr.bf16.mxu0 %v13675_v47  ;;  %v13692_v47 = vld [vmem:[#allocation5 + $0x680] sm:$0xff]  }
0x1cee   :  { %v9598_v13 = vpack.c.bf16 %v9566_v15, %v9550_v27  ;;  %12780 = vmatpush3.bf16.msra.mxu1 %v13674_v60  ;;  %v8416_v60 = vrot.slane %v15853_v32, %v15214_v56  ;;  %v13695_v27 = vld [vmem:[#allocation5 + $0x7f8] sm:$0xff]  }
0x1cef   :  { %12781 = vmatprep.subr.bf16.mxu1 %v13677_v59 }
0x1cf0   :  { %10697 = vmatprep.mubr.bf16.mxu1 %v9598_v13  ;;  %12756 = vmatpush3.bf16.msra.mxu0 %v13676_v17 }
0x1cf1   :  { %10698 = vmatmul.mubr.bf16.gmra.mxu1 %v9597_v55  ;;  %12757 = vmatprep.subr.bf16.mxu0 %v13679_v18  ;;  %v13697_v55 = vld [vmem:[#allocation5 + $0x740] sm:$0xff]  }
0x1cf2   :  { %12782 = vmatpush3.bf16.msra.mxu1 %v13678_v5 }
0x1cf3   :  { %12783 = vmatprep.subr.bf16.mxu1 %v13681_v49 }
0x1cf4   :  { %12758 = vmatpush3.bf16.msra.mxu0 %v13680_v22 }
0x1cf5   :  { %v9384_v36 = vpop.f32.mrf.mxu0  ;;  %12759 = vmatprep.subr.bf16.mxu0 %v13683_v34  ;;  %v13696_v34 = vld [vmem:[#allocation5 + $0x7b8] sm:$0xff]  }
0x1cf6   :  { %12784 = vmatpush3.bf16.msra.mxu1 %v13682_v19  ;;  %v9385_v1 = vadd.f32 %v9384_v36, %v8408_v52  ;;  %v13699_v36 = vld [vmem:[#allocation5 + $0x7f0] sm:$0xff]  }
0x1cf7   :  { %v9386_v51 = vpop.f32.mrf.mxu0  ;;  %12785 = vmatprep.subr.bf16.mxu1 %v13685_v10 }
0x1cf8   :  { %12760 = vmatpush3.bf16.msra.mxu0 %v13684_v44  ;;  %v9387_v30 = vadd.f32 %v9386_v51, %v15877_v20  ;;  %v9519_v18 = vmax.f32 %v9385_v1, 0.0 }
0x1cf9   :  { %v9388_v31 = vpop.f32.mrf.mxu0  ;;  %12761 = vmatprep.subr.bf16.mxu0 %v13687_v23 }
0x1cfa   :  { %v9389_v50 = vadd.f32 %v9388_v31, %v8408_v52  ;;  %12786 = vmatpush3.bf16.msra.mxu1 %v13686_v57  ;;  %v9520_v15 = vmax.f32 %v9387_v30, 0.0 }
0x1cfb   :  { %v9390_v40 = vpop.f32.mrf.mxu0  ;;  %v9437_v11 = vpop.f32.mrf.mxu1  ;;  %12787 = vmatprep.subr.bf16.mxu1 %v13689_v62  ;;  %v13698_v62 = vld [vmem:[#allocation5 + $0x700] sm:$0xff]  }
0x1cfc   :  { %v9391_v25 = vadd.f32 %v9390_v40, %v15877_v20  ;;  %12762 = vmatpush3.bf16.msra.mxu0 %v13688_v4  ;;  %v9535_v46 = vmax.f32 %v9389_v50, 0.0  ;;  %v9438_v19 = vadd.f32 %v9437_v11, %v8416_v60  ;;  %v13700_v40 = vld [vmem:[#allocation5 + $0x7b0] sm:$0xff]  }
0x1cfd   :  { %v9394_v26 = vpop.f32.mrf.mxu0  ;;  %v9439_v59 = vpop.f32.mrf.mxu1  ;;  %12763 = vmatprep.subr.bf16.mxu0 %v13691_v14 }
0x1cfe   :  { %v9536_v17 = vmax.f32 %v9391_v25, 0.0  ;;  %12788 = vmatpush3.bf16.msra.mxu1 %v13690_v61  ;;  %v9440_v49 = vadd.f32 %v9439_v59, %v15885_v43  ;;  %v9583_v56 = vpack.c.bf16 %v9535_v46, %v9519_v18  ;;  %v9395_v4 = vadd.f32 %v9394_v26, %v8408_v52 }
0x1cff   :  { %v9396_v13 = vpop.f32.mrf.mxu0  ;;  %v9441_v5 = vpop.f32.mrf.mxu1  ;;  %12789 = vmatprep.subr.bf16.mxu1 %v13693_v63  ;;  %v9521_v11 = vmax.f32 %v9438_v19, 0.0 }
0x1d00   :  { %v9584_v45 = vpack.c.bf16 %v9536_v17, %v9520_v15  ;;  %v9442_v22 = vadd.f32 %v9441_v5, %v8416_v60  ;;  %12764 = vmatpush3.bf16.msra.mxu0 %v13692_v47  ;;  %v9397_v23 = vadd.f32 %v9396_v13, %v15877_v20  ;;  %v9522_v50 = vmax.f32 %v9440_v49, 0.0  ;;  %v13701_v47 = vld [vmem:[#allocation5 + $0x7e8] sm:$0xff]   ;;  %v13703_v49 = vld [vmem:[#allocation5 + $0x7e0] sm:$0xff]  }
0x1d01   :  { %v9398_v10 = vpop.f32.mrf.mxu0  ;;  %v9443_v44 = vpop.f32.mrf.mxu1  ;;  %12805 = vmatprep.subr.bf16.mxu0 %v13695_v27  ;;  %v16824_v17 = vmov 0.0   ;;  %v13702_v13 = vld [vmem:[#allocation5 + $0x7a8] sm:$0xff]  }
0x1d02   :  { %v9399_v57 = vadd.f32 %v9398_v10, %v8408_v52  ;;  %v9444_v51 = vadd.f32 %v9443_v44, %v15885_v43  ;;  %10738 = vmatprep.mubr.bf16.mxu0 %v9584_v45  ;;  %12790 = vmatpush3.bf16.msra.mxu1 %v13694_v9  ;;  %v9537_v31 = vmax.f32 %v9442_v22, 0.0  ;;  %v9552_v46 = vmax.f32 %v9397_v23, 0.0  ;;  %v13704_v10 = vld [vmem:[#allocation5 + $0x7a0] sm:$0xff]  }
0x1d03   :  { %v9400_v14 = vpop.f32.mrf.mxu0  ;;  %v9447_v30 = vpop.f32.mrf.mxu1  ;;  %10739 = vmatmul.mubr.bf16.vlgmr.msra.gmra.mxu0 %v9583_v56  ;;  %12791 = vmatprep.subr.bf16.mxu1 %v13697_v55  ;;  %v9551_v52 = vmax.f32 %v9395_v4, 0.0  ;;  %v13709_v4 = vld [vmem:[#allocation5 + $0x7c8] sm:$0xff]  }
0x1d04   :  { %v9538_v61 = vmax.f32 %v9444_v51, 0.0  ;;  %v9401_v1 = vadd.f32 %v9400_v14, %v15877_v20  ;;  %12806 = vmatpush3.bf16.msra.mxu0 %v13696_v34  ;;  %v9567_v63 = vmax.f32 %v9399_v57, 0.0  ;;  %v9585_v26 = vpack.c.bf16 %v9537_v31, %v9521_v11  ;;  %v13707_v51 = vld [vmem:[#allocation5 + $0x7d0] sm:$0xff]  }
0x1d05   :  { %v9449_v25 = vpop.f32.mrf.mxu1  ;;  %12807 = vmatprep.subr.bf16.mxu0 %v13699_v36  ;;  %v9448_v55 = vadd.f32 %v9447_v30, %v8416_v60  ;;  %v13705_v36 = vld [vmem:[#allocation5 + $0x7d8] sm:$0xff]   ;;  %v8428_v31 = vrot.slane %v15853_v32, %v15244_v29  ;;  %v8424_v14 = vrot.slane %v15853_v32, %v15247_v54 }
0x1d06   :  { %v9586_v59 = vpack.c.bf16 %v9538_v61, %v9522_v50  ;;  %v9568_v27 = vmax.f32 %v9401_v1, 0.0  ;;  %12792 = vmatpush3.bf16.msra.mxu1 %v13698_v62  ;;  %v9450_v18 = vadd.f32 %v9449_v25, %v15885_v43  ;;  %v9599_v5 = vpack.c.bf16 %v9567_v63, %v9551_v52  ;;  %v13710_v50 = vld [vmem:[#allocation5 + $0x788] sm:$0xff]  }
0x1d07   :  { %v9451_v15 = vpop.f32.mrf.mxu1  ;;  %13195 = vmatprep.subr.mxu1 %v16824_v17  ;;  %v9553_v44 = vmax.f32 %v9448_v55, 0.0 }
0x1d08   :  { %v9600_v9 = vpack.c.bf16 %v9568_v27, %v9552_v46  ;;  %v9452_v20 = vadd.f32 %v9451_v15, %v8416_v60  ;;  %11081 = vmatprep.mubr.bf16.mxu1 %v9586_v59  ;;  %12808 = vmatpush3.bf16.msra.mxu0 %v13700_v40  ;;  %v9554_v56 = vmax.f32 %v9450_v18, 0.0  ;;  %v13706_v60 = vld [vmem:[#allocation5 + $0x798] sm:$0xff]   ;;  %v13711_v40 = vld [vmem:[#allocation5 + $0x7c0] sm:$0xff]  }
0x1d09   :  { %v9453_v45 = vpop.f32.mrf.mxu1  ;;  %11082 = vmatmul.mubr.bf16.vlgmr.msra.gmra.mxu1 %v9585_v26  ;;  %12809 = vmatprep.subr.bf16.mxu0 %v13701_v47  ;;  %v13712_v59 = vld [vmem:[#allocation5 + $0x780] sm:$0xff]  }
0x1d0a   :  { %v9454_v22 = vadd.f32 %v9453_v45, %v15885_v43  ;;  %10746 = vmatprep.mubr.bf16.mxu0 %v9600_v9  ;;  %v9569_v34 = vmax.f32 %v9452_v20, 0.0  ;;  %v13708_v43 = vld [vmem:[#allocation5 + $0x790] sm:$0xff]  }
0x1d0b   :  { %10747 = vmatmul.mubr.bf16.gmra.mxu0 %v9599_v5 }
0x1d0c   :  { %v9570_v19 = vmax.f32 %v9454_v22, 0.0  ;;  %12810 = vmatpush3.bf16.msra.mxu0 %v13702_v13  ;;  %v9601_v57 = vpack.c.bf16 %v9569_v34, %v9553_v44 }
0x1d0d   :  { %12811 = vmatprep.subr.bf16.mxu0 %v13703_v49 }
0x1d0e   :  { %v9602_v23 = vpack.c.bf16 %v9570_v19, %v9554_v56 }
0x1d10   :  { %11089 = vmatprep.mubr.bf16.mxu1 %v9602_v23  ;;  %12812 = vmatpush3.bf16.msra.mxu0 %v13704_v10 }
0x1d11   :  { %11090 = vmatmul.mubr.bf16.gmra.mxu1 %v9601_v57  ;;  %12813 = vmatprep.subr.bf16.mxu0 %v13705_v36 }
0x1d12   :  { %v15900_v61 = vpop.permute.xlu1 %7957  ;;  %v8048_v22 = vpop.permute.xlu0 %8047 }
0x1d14   :  { %12814 = vmatpush3.bf16.msra.mxu0 %v13706_v60 }
0x1d15   :  { %v9490_v62 = vpop.f32.mrf.mxu0  ;;  %12815 = vmatprep.subr.bf16.mxu0 %v13707_v51 }
0x1d16   :  { %v9491_v25 = vadd.f32 %v9490_v62, %v8424_v14  ;;  %v16825_v62 = vld [vmem:[#allocation31_spill] sm:$0xff] }
0x1d17   :  { %v9492_v30 = vpop.f32.mrf.mxu0  ;;  %v15902_v26 = vpop.permute.xlu1 %8003  ;;  %vm16826_vm12 = vcmp.gt.s32.totalorder %v16825_v62, 1  ;;  %vm16827_vm9 = vcmp.gt.s32.totalorder %v16825_v62, 0  ;;  %vm16828_vm10 = vcmp.gt.s32.totalorder %v16825_v62, 2 }
0x1d18   :  { %12816 = vmatpush3.bf16.msra.mxu0 %v13708_v43  ;;  %v9493_v11 = vadd.f32 %v9492_v30, %v8428_v31  ;;  %v9523_v32 = vmax.f32 %v9491_v25, 0.0  ;;  %v15906_v57 = vpop.permute.xlu0 %7952 }
0x1d19   :  { %v9494_v1 = vpop.f32.mrf.mxu0  ;;  %12817 = vmatprep.subr.bf16.mxu0 %v13709_v4 }
0x1d1a   :  { %v9495_v63 = vadd.f32 %v9494_v1, %v8424_v14  ;;  %v9524_v52 = vmax.f32 %v9493_v11, 0.0 }
0x1d1b   :  { %v9496_v47 = vpop.f32.mrf.mxu0  ;;  %v15904_v34 = vpop.permute.xlu1 %7999 }
0x1d1c   :  { %v9497_v46 = vadd.f32 %v9496_v47, %v8428_v31  ;;  %12818 = vmatpush3.bf16.msra.mxu0 %v13710_v50  ;;  %v9539_v27 = vmax.f32 %v9495_v63, 0.0 }
0x1d1d   :  { %v9500_v29 = vpop.f32.mrf.mxu0  ;;  %12819 = vmatprep.subr.bf16.mxu0 %v13711_v40 }
0x1d1e   :  { %v9540_v54 = vmax.f32 %v9497_v46, 0.0  ;;  %v9587_v18 = vpack.c.bf16 %v9539_v27, %v9523_v32  ;;  %v9501_v55 = vadd.f32 %v9500_v29, %v8424_v14  ;;  %v16837_v29 = vmov 0 }
0x1d1f   :  { %v9502_v15 = vpop.f32.mrf.mxu0  ;;  %v16846_v32 = vmov 0 }
0x1d20   :  { %v9588_v9 = vpack.c.bf16 %v9540_v54, %v9524_v52  ;;  %12820 = vmatpush3.bf16.msra.mxu0 %v13712_v59  ;;  %v9503_v13 = vadd.f32 %v9502_v15, %v8428_v31  ;;  %v9555_v44 = vmax.f32 %v9501_v55, 0.0  ;;  %v15908_v60 = vpop.permute.xlu1 %8043  ;;  %v16840_v52 = vmov 0 }
0x1d21   :  { %v9504_v20 = vpop.f32.mrf.mxu0 }
0x1d22   :  { %v9505_v5 = vadd.f32 %v9504_v20, %v8424_v14  ;;  %11130 = vmatprep.mubr.bf16.mxu0 %v9588_v9  ;;  %v9556_v19 = vmax.f32 %v9503_v13, 0.0 }
0x1d23   :  { %v9506_v45 = vpop.f32.mrf.mxu0  ;;  %11131 = vmatmul.mubr.bf16.vlgmr.msra.gmra.mxu0 %v9587_v18 }
0x1d24   :  { %v9507_v49 = vadd.f32 %v9506_v45, %v8428_v31  ;;  %v9571_v56 = vmax.f32 %v9505_v5, 0.0 }
0x1d26   :  { %v9572_v10 = vmax.f32 %v9507_v49, 0.0  ;;  %v9603_v23 = vpack.c.bf16 %v9571_v56, %v9555_v44 }
0x1d28   :  { %v9604_v36 = vpack.c.bf16 %v9572_v10, %v9556_v19 }
0x1d2a   :  { %11138 = vmatprep.mubr.bf16.mxu0 %v9604_v36 }
0x1d2b   :  { %11139 = vmatmul.mubr.bf16.gmra.mxu0 %v9603_v23 }
0x1d2f   :  { %v8012_v51 = vpop.permute.xlu1 %8011  ;;  %v7968_v43 = vpop.permute.xlu0 %7967 }
0x1d30   :  { %vm8017_vm2 = vcmp.gt.f32.partialorder %v8012_v51, %v15786_v35  ;;  %vm8021_vm0 = vcmp.eq.f32.partialorder %v8012_v51, %v15786_v35  ;;  %vm7977_vm11 = vcmp.eq.f32.partialorder %v7968_v43, %v15786_v35  ;;  %vm7973_vm15 = vcmp.gt.f32.partialorder %v7968_v43, %v15786_v35 }
0x1d31   :  { %vm8025_vm5 = vmand %vm8021_vm0, %vm16826_vm12 }
0x1d32   :  { %vm8029_vm7 = vmor %vm8017_vm2, %vm8025_vm5  ;;  %vm8019_vm5 = vcmp.eq.f32.partialorder %v15902_v26, %v15755_v58 }
0x1d33   :  { %vm7981_vm6 = vmand %vm7977_vm11, %vm16827_vm9  ;;  %v11915_v31 = vsel %vm8029_vm7, 1.0, %v16824_v17  ;;  %vm7975_vm11 = vcmp.eq.f32.partialorder %v15900_v61, %v15755_v58  ;;  %vm8063_vm7 = vcmp.eq.f32.partialorder %v8048_v22, %v15755_v58  ;;  %vm7971_vm9 = vcmp.gt.f32.partialorder %v15900_v61, %v15755_v58 }
0x1d34   :  { %vm7985_vm8 = vmor %vm7973_vm15, %vm7981_vm6  ;;  %v8056_v4 = vpop.permute.xlu1 %8055  ;;  %vm16829_vm6 = vcmp.gt.s32.totalorder %v16825_v62, 0  ;;  %v8092_v47 = vpop.permute.xlu0 %8091 }
0x1d35   :  { %vm8061_vm1 = vcmp.gt.f32.partialorder %v8056_v4, %v15786_v35  ;;  %vm8065_vm4 = vcmp.eq.f32.partialorder %v8056_v4, %v15786_v35  ;;  %v11911_v14 = vsel %vm7985_vm8, 1.0, %v16824_v17  ;;  %vm7979_vm8 = vmand %vm7975_vm11, %vm16829_vm6  ;;  %vm8018_vm11 = vcmp.eq.f32.partialorder %v15904_v34, %v15771_v8 }
0x1d36   :  { %vm8069_vm13 = vmand %vm8065_vm4, %vm16828_vm10  ;;  %v8041_v1 = vadd.f32 %v11915_v31, %v11911_v14  ;;  %vm16830_vm4 = vcmp.gt.s32.totalorder %v16825_v62, 1  ;;  %vm8107_vm6 = vcmp.eq.f32.partialorder %v8092_v47, %v15755_v58 }
0x1d37   :  { %vm8073_vm14 = vmor %vm8061_vm1, %vm8069_vm13  ;;  %vm8015_vm1 = vcmp.gt.f32.partialorder %v15902_v26, %v15755_v58  ;;  %vm8059_vm13 = vcmp.gt.f32.partialorder %v8048_v22, %v15755_v58 }
0x1d38   :  { %v11919_v30 = vsel %vm8073_vm14, 1.0, %v16824_v17  ;;  %vm8023_vm10 = vmand %vm8019_vm5, %vm16830_vm4  ;;  %vm16831_vm14 = vcmp.gt.s32.totalorder %v16825_v62, 2  ;;  %vm8062_vm5 = vcmp.eq.f32.partialorder %v15908_v60, %v15771_v8  ;;  %vm16836_vm4 = vcmask 31744  }
0x1d39   :  { %v8100_v50 = vpop.permute.xlu1 %8099  ;;  %v8085_v40 = vadd.f32 %v11919_v30, %v8041_v1 }
0x1d3a   :  { %vm8105_vm2 = vcmp.gt.f32.partialorder %v8100_v50, %v15786_v35  ;;  %vm8109_vm0 = vcmp.eq.f32.partialorder %v8100_v50, %v15786_v35 }
0x1d3b   :  { %vm8113_vm12 = vmand %vm8109_vm0, %vm16692_vm3  ;;  %vm7974_vm0 = vcmp.eq.f32.partialorder %v15906_v57, %v15771_v8 }
0x1d3c   :  { %vm8117_vm15 = vmor %vm8105_vm2, %vm8113_vm12 }
0x1d3d   :  { %v11923_v11 = vsel %vm8117_vm15, 1.0, %v16824_v17  ;;  %vm8067_vm2 = vmand %vm8063_vm7, %vm16831_vm14 }
0x1d3e   :  { %v7963_v63 = vpop.permute.xlu1 %7962  ;;  %v15939_v25 = vadd.f32 %v11923_v11, %v8085_v40  ;;  %vm15953_vm15 = vmor %vm7971_vm9, %vm7979_vm8  ;;  %vm16839_vm8 = vcmp.gt.s32.totalorder %v16825_v62, 0 }
0x1d3f   :  { %vm15964_vm7 = vmor %vm8015_vm1, %vm8023_vm10  ;;  %vm16842_vm1 = vcmp.gt.s32.totalorder %v16825_v62, 1  ;;  %v11909_v20 = vsel %vm15953_vm15, 1.0, %v16824_v17 }
0x1d40   :  { %vm16691_vm12 = vcmp.lt.f32.partialorder %v15939_v25, 2.0  ;;  %vm15971_vm9 = vmor %vm8059_vm13, %vm8067_vm2  ;;  %vm7976_vm13 = vcmp.eq.f32.partialorder %v7963_v63, %v15824_v24  ;;  %vm8103_vm2 = vcmp.gt.f32.partialorder %v8092_v47, %v15755_v58  ;;  %v11913_v15 = vsel %vm15964_vm7, 1.0, %v16824_v17 }
0x1d41   :  { %v15962_v46 = vsel %vm16691_vm12, %v15786_v35, -1e+09  ;;  %v16838_v29 = vsel %vm15971_vm9, 4294967295, %v16837_v29  ;;  %vm15977_vm14 = vmand %vm7974_vm0, %vm16839_vm8  ;;  %vm16845_vm12 = vcmp.gt.s32.totalorder %v16825_v62, 2  ;;  %v8039_v13 = vadd.f32 %v11913_v15, %v11909_v20 }
0x1d42   :  { %v8147_v27 = vsel %vm16836_vm4, %v15962_v46, -inf  ;;  %v16841_v52 = vsel %vm15977_vm14, 4294967295, %v16840_v52  ;;  %vm15983_vm10 = vmand %vm8018_vm11, %vm16842_vm1  ;;  %vm7970_vm7 = vcmp.gt.f32.partialorder %v15906_v57, %v15771_v8 }
0x1d43   :  { %8148 = vmax.xlane.f32.xlu1 %v8147_v27  ;;  %vm15989_vm4 = vmand %vm8062_vm5, %vm16845_vm12  ;;  %vm7972_vm12 = vcmp.gt.f32.partialorder %v7963_v63, %v15824_v24  ;;  %vm16848_vm5 = vcmp.gt.s32.totalorder %v16825_v62, 0 }
0x1d44   :  { %v16847_v32 = vsel %vm15989_vm4, 4294967295, %v16846_v32  ;;  %v8008_v26 = vpop.permute.xlu1 %8007  ;;  %vm8111_vm0 = vmand %vm8107_vm6, %vm16692_vm3 }
0x1d45   :  { %vm8020_vm11 = vcmp.eq.f32.partialorder %v8008_v26, %v15824_v24  ;;  %vm8016_vm8 = vcmp.gt.f32.partialorder %v8008_v26, %v15824_v24  ;;  %vm7980_vm4 = vmand %vm7976_vm13, %vm16848_vm5 }
0x1d46   :  { %vm8024_vm14 = vmand %vm8020_vm11, %vm16842_vm1  ;;  %vm8014_vm11 = vcmp.gt.f32.partialorder %v15904_v34, %v15771_v8 }
0x1d47   :  { %vm16007_vm9 = vmor %vm8103_vm2, %vm8111_vm0  ;;  %vm16851_vm2 = vcmp.gt.s32.totalorder %v16825_v62, 2  ;;  %vm8058_vm0 = vcmp.gt.f32.partialorder %v15908_v60, %v15771_v8 }
0x1d48   :  { %vm8028_vm6 = vmor %vm8016_vm8, %vm8024_vm14  ;;  %vm16852_vm8 = vnez %v16838_v29  ;;  %v11921_v45 = vsel %vm16007_vm9, 1.0, %v16824_v17 }
0x1d49   :  { %v8052_v18 = vpop.permute.xlu1 %8051  ;;  %vm7984_vm1 = vmor %vm7972_vm12, %vm7980_vm4  ;;  %v11914_v5 = vsel %vm8028_vm6, 1.0, %v16824_v17  ;;  %v11917_v55 = vsel %vm16852_vm8, 1.0, %v16824_v17  ;;  %vm16853_vm12 = vnez %v16841_v52  ;;  %vm16854_vm6 = vnez %v16847_v32 }
0x1d4a   :  { %vm8060_vm13 = vcmp.gt.f32.partialorder %v8052_v18, %v15824_v24  ;;  %vm8064_vm5 = vcmp.eq.f32.partialorder %v8052_v18, %v15824_v24  ;;  %vm8026_vm4 = vmor %vm8014_vm11, %vm15983_vm10  ;;  %v11910_v49 = vsel %vm7984_vm1, 1.0, %v16824_v17  ;;  %v8083_v19 = vadd.f32 %v11917_v55, %v8039_v13 }
0x1d4b   :  { %vm8068_vm14 = vmand %vm8064_vm5, %vm16851_vm2  ;;  %v8040_v56 = vadd.f32 %v11914_v5, %v11910_v49  ;;  %v11912_v10 = vsel %vm8026_vm4, 1.0, %v16824_v17  ;;  %vm16855_vm5 = vcmp.gt.s32.totalorder %v16825_v62, 3 }
0x1d4c   :  { %vm8072_vm15 = vmor %vm8060_vm13, %vm8068_vm14  ;;  %v8127_v36 = vadd.f32 %v11921_v45, %v8083_v19 }
0x1d4d   :  { %vm7982_vm3 = vmor %vm7970_vm7, %vm16853_vm12  ;;  %v11918_v22 = vsel %vm8072_vm15, 1.0, %v16824_v17 }
0x1d4e   :  { %v8096_v34 = vpop.permute.xlu1 %8095  ;;  %vm8070_vm13 = vmor %vm8058_vm0, %vm16854_vm6  ;;  %v8084_v44 = vadd.f32 %v11918_v22, %v8040_v56  ;;  %v11908_v23 = vsel %vm7982_vm3, 1.0, %v16824_v17  ;;  %vm8131_vm8 = vcmp.lt.f32.partialorder %v8127_v36, 2.0  ;;  %vm16857_vm3 = vcmask 31744  }
0x1d4f   :  { %vm8104_vm10 = vcmp.gt.f32.partialorder %v8096_v34, %v15824_v24  ;;  %vm8108_vm11 = vcmp.eq.f32.partialorder %v8096_v34, %v15824_v24  ;;  %v11916_v57 = vsel %vm8070_vm13, 1.0, %v16824_v17  ;;  %v8038_v43 = vadd.f32 %v11912_v10, %v11908_v23  ;;  %vm16856_vm14 = vmmov %vm16855_vm5  ;;  %v16087_v10 = vld [vmem:[%s16801_s2 + $0x4] ss:$0 sm:$0xff] }
0x1d50   :  { %vm8112_vm7 = vmand %vm8108_vm11, %vm16855_vm5  ;;  %v8135_v40 = vsel %vm8131_vm8, %v15755_v58, -1e+09  ;;  %v11925_v11 = vsel %vm8131_vm8, 1.0, %v16824_v17  ;;  %vm16862_vm5 = vcmp.lt.f32.partialorder %v15939_v25, 2.0 }
0x1d51   :  { %vm8116_vm9 = vmor %vm8104_vm10, %vm8112_vm7  ;;  %v8082_v31 = vadd.f32 %v11916_v57, %v8038_v43  ;;  %v11927_v52 = vsel %vm16862_vm5, 1.0, %v16824_v17 }
0x1d52   :  { %v11922_v60 = vsel %vm8116_vm9, 1.0, %v16824_v17  ;;  %v8088_v51 = vpop.permute.xlu1 %8087  ;;  %vm16858_vm6 = vmmov %vm16857_vm3 }
0x1d53   :  { %vm8102_vm1 = vcmp.gt.f32.partialorder %v8088_v51, %v15771_v8  ;;  %vm8106_vm2 = vcmp.eq.f32.partialorder %v8088_v51, %v15771_v8  ;;  %v8128_v4 = vadd.f32 %v11922_v60, %v8084_v44  ;;  %vm16859_vm13 = vmmov %vm16857_vm3 }
0x1d54   :  { %vm8110_vm0 = vmand %vm8106_vm2, %vm16856_vm14 }
0x1d55   :  { %vm8114_vm15 = vmor %vm8102_vm1, %vm8110_vm0  ;;  %vm8132_vm4 = vcmp.lt.f32.partialorder %v8128_v4, 2.0 }
0x1d56   :  { %v11920_v14 = vsel %vm8114_vm15, 1.0, %v16824_v17  ;;  %v8136_v30 = vsel %vm8132_vm4, %v15824_v24, -1e+09  ;;  %v11926_v62 = vsel %vm8132_vm4, 1.0, %v16824_v17  ;;  %vm16860_vm10 = vmmov %vm16857_vm3 }
0x1d57   :  { %v8144_v50 = vsel %vm16857_vm3, %v8136_v30, -inf  ;;  %v8126_v1 = vadd.f32 %v11920_v14, %v8082_v31  ;;  %v8141_v27 = vsel %vm16860_vm10, %v8135_v40, -inf  ;;  %vm16861_vm11 = vmmov %vm16857_vm3 }
0x1d58   :  { %8145 = vmax.xlane.f32.xlu0 %v8144_v50  ;;  %v8205_v29 = vsel %vm16861_vm11, %v11925_v11, 0.0  ;;  %vm16863_vm7 = vmmov %vm16857_vm3 }
0x1d59   :  { %vm8130_vm12 = vcmp.lt.f32.partialorder %v8126_v1, 2.0  ;;  %v8207_v32 = vsel %vm16863_vm7, %v11926_v62, 0.0  ;;  %vm16864_vm9 = vmmov %vm16857_vm3 }
0x1d5a   :  { %v8134_v63 = vsel %vm8130_vm12, %v15771_v8, -1e+09  ;;  %v11924_v47 = vsel %vm8130_vm12, 1.0, %v16824_v17  ;;  %v8209_v15 = vsel %vm16864_vm9, %v11927_v52, 0.0  ;;  %vm16866_vm1 = vmmov %vm16857_vm3  ;;  %vm14111_vm12 = vmmov 0  }
0x1d5b   :  { %v8138_v61 = vsel %vm16858_vm6, %v8134_v63, -inf  ;;  %v8204_v59 = vsel %vm16859_vm13, %v11924_v47, 0.0  ;;  %vm16868_vm2 = vmmov %vm16866_vm1  ;;  %13203 = vmatprep.mubr.msk.f32.mxu1 %vm14111_vm12, %v16824_v17 }
0x1d5c   :  { %8139 = vmax.xlane.f32.xlu1 %v8138_v61  ;;  %v8206_v54 = vadd.f32 %v8205_v29, %v8204_v59  ;;  %8142 = vmax.xlane.f32.xlu0 %v8141_v27  ;;  %vm16869_vm14 = vmmov %vm16866_vm1 }
0x1d5d   :  { %vm16870_vm0 = vmmov %vm16866_vm1 }
0x1d5e   :  { %v8208_v26 = vadd.f32 %v8207_v32, %v8206_v54  ;;  %vm16871_vm15 = vmmov %vm16870_vm0 }
0x1d5f   :  { %vm16872_vm4 = vmmov %vm16870_vm0 }
0x1d60   :  { %v16068_v9 = vadd.f32 %v8209_v15, %v8208_v26  ;;  %vm16873_vm8 = vmmov %vm16870_vm0 }
0x1d61   :  { %vm16874_vm3 = vmmov %vm16870_vm0 }
0x1d62   :  { %16865 = vst [vmem:[#allocation31_spill] sm:$0xff] %v16068_v9  ;;  %vm16881_vm6 = vmmov %vm16870_vm0 }
0x1d63   :  { %vm16883_vm13 = vmmov %vm16870_vm0 }
0x1d64   :  { %v16070_v18 = vpop.f32.mrf.mxu1  ;;  %vm16885_vm10 = vmmov %vm16870_vm0 }
0x1d65   :  { %vm16888_vm11 = vmmov %vm16870_vm0 }
0x1d66   :  { %v16072_v20 = vpop.f32.mrf.mxu1  ;;  %vm16891_vm5 = vmmov %vm16870_vm0 }
0x1d67   :  { %vm16896_vm7 = vmmov %vm16870_vm0 }
0x1d68   :  { %v16074_v13 = vpop.f32.mrf.mxu1  ;;  %vm16898_vm9 = vmmov %vm16870_vm0 }
0x1d69   :  { %v7912_v53 = vsel %vm16898_vm9, %v15824_v24, -inf }
0x1d6a   :  { %v16076_v5 = vpop.f32.mrf.mxu1 }
0x1d81   :  { %v12631_v25 = vpop.f32.mrf.mxu1 }
0x1d83   :  { %v12632_v55 = vpop.f32.mrf.mxu1  ;;  %v16078_v45 = vpop.f32.mrf.mxu0 }
0x1d84   :  { %v12633_v49 = vadd.f32 %v12632_v55, %v12631_v25 }
0x1d85   :  { %v16080_v22 = vpop.f32.mrf.mxu0 }
0x1d86   :  { %v9913_v36 = vadd.f32 %v12633_v49, %v16087_v10 }
0x1d87   :  { %v16082_v34 = vpop.f32.mrf.mxu0 }
0x1d89   :  { %v16084_v56 = vpop.f32.mrf.mxu0 }
0x1d8b   :  { %v12659_v19 = vpop.f32.mrf.mxu0 }
0x1d8d   :  { %v12660_v44 = vpop.f32.mrf.mxu0 }
0x1d8e   :  { %v12661_v23 = vadd.f32 %v12660_v44, %v12659_v19 }
0x1d90   :  { %v16090_v57 = vadd.f32 %v12661_v23, %v9913_v36 }
0x1dcc   :  { %v8149_v60 = vpop.xlane.xlu1 %8148 }
0x1dcd   :  { %v8153_v51 = vsub.f32 %v15962_v46, %v8149_v60 }
0x1dcf   :  { %v8160_v43 = vmul.f32 1.442695, %v8153_v51  ;;  %v16875_v51 = vld [vmem:[#allocation37_spill] sm:$0xff] }
0x1dd1   :  { %13881 = vpow2.f32 %v8160_v43  ;;  %v16876_v43 = vld [vmem:[#allocation39_spill] sm:$0xff] }
0x1dde   :  { %v13882_v4 = vpop.eup %13881 }
0x1ddf   :  { %v8171_v31 = vsel %vm16866_vm1, %v13882_v4, 0.0  ;;  %vm16900_vm1 = vmmov %vm16870_vm0 }
0x1de0   :  { %8172 = vadd.xlane.f32.xlu0 %v8171_v31  ;;  %v16878_v31 = vld [vmem:[#allocation43_spill] sm:$0xff]  ;;  %v7915_v12 = vsel %vm16900_vm1, %v15786_v35, -inf }
0x1de1   :  { %v8146_v14 = vpop.xlane.xlu0 %8145 }
0x1de2   :  { %v8152_v50 = vsub.f32 %v8136_v30, %v8146_v14  ;;  %v16123_v14 = vpop.f32.mrf.mxu1 }
0x1de4   :  { %v8158_v1 = vmul.f32 1.442695, %v8152_v50  ;;  %v16125_v50 = vpop.f32.mrf.mxu0 }
0x1de5   :  { %v8140_v11 = vpop.xlane.xlu1 %8139  ;;  %v8143_v47 = vpop.xlane.xlu0 %8142 }
0x1de6   :  { %13883 = vpow2.f32 %v8158_v1  ;;  %v8150_v62 = vsub.f32 %v8134_v63, %v8140_v11  ;;  %v8151_v61 = vsub.f32 %v8135_v40, %v8143_v47  ;;  %v16128_v1 = vpop.f32.mrf.mxu1  ;;  %v16130_v11 = vpop.f32.mrf.mxu0  ;;  %v16880_v47 = vld [vmem:[#allocation65_spill] sm:$0xff] }
0x1de8   :  { %v8154_v59 = vmul.f32 1.442695, %v8150_v62  ;;  %v8156_v27 = vmul.f32 1.442695, %v8151_v61  ;;  %v16134_v62 = vpop.f32.mrf.mxu0  ;;  %v4397_v61 = vsel %vm16881_vm6, %v16880_v47, -inf  ;;  %vm16928_vm6 = vcmask 392192  }
0x1dea   :  { %13885 = vpow2.f32 %v8154_v59  ;;  %v16882_v59 = vld [vmem:[#allocation38_spill] sm:$0xff] }
0x1deb   :  { %13887 = vpow2.f32 %v8156_v27 }
0x1df3   :  { %v13884_v46 = vpop.eup %13883 }
0x1df4   :  { %v8168_v29 = vsel %vm16868_vm2, %v13884_v46, 0.0  ;;  %vm16911_vm2 = vcmask 130048  }
0x1df5   :  { %8169 = vadd.xlane.f32.xlu1 %v8168_v29  ;;  %v7906_v29 = vsel %vm16883_vm13, %v15771_v8, -inf  ;;  %v16237_v8 = vld [vmem:[%s16801_s2 + $0x6] ss:$0 sm:$0xff]  ;;  %vm16929_vm13 = vcmask 523264  }
0x1df6   :  { %vm16945_vm9 = vmmov %vm16929_vm13 }
0x1df7   :  { %v13886_v52 = vpop.eup %13885 }
0x1df8   :  { %v13888_v54 = vpop.eup %13887  ;;  %v8162_v32 = vsel %vm16869_vm14, %v13886_v52, 0.0  ;;  %vm16912_vm14 = vcmask 261120  }
0x1df9   :  { %8163 = vadd.xlane.f32.xlu1 %v8162_v32  ;;  %v8165_v30 = vsel %vm16870_vm0, %v13888_v54, 0.0  ;;  %vm16920_vm0 = vmmov %vm16912_vm14 }
0x1dfa   :  { %8166 = vadd.xlane.f32.xlu0 %v8165_v30  ;;  %v7909_v30 = vsel %vm16885_vm10, %v15755_v58, -inf  ;;  %v12658_v58 = vadd.f32 %v16084_v56, %v16082_v34  ;;  %vm16932_vm10 = vcmask 654336  }
0x1e69   :  { %v8173_v63 = vpop.xlane.xlu0 %8172 }
0x1e6a   :  { %13889 = vrcp.f32 %v8173_v63  ;;  %v16886_v63 = vld [vmem:[#allocation42_spill] sm:$0xff] }
0x1e77   :  { %v13890_v40 = vpop.eup %13889 }
0x1e78   :  { %v8181_v26 = vmul.f32 %v13890_v40, %v13882_v4  ;;  %v16877_v4 = vld [vmem:[#allocation41_spill] sm:$0xff] }
0x1e7a   :  { %8224 = vst.msk [vmem:[%s16867_s13 + $0x18] sm:$0xff] %vm16871_vm15, %v8181_v26  ;;  %vm16921_vm15 = vmmov %vm16900_vm1 }
0x1e7e   :  { %v8170_v15 = vpop.xlane.xlu1 %8169 }
0x1e7f   :  { %13891 = vrcp.f32 %v8170_v15  ;;  %v16887_v15 = vld [vmem:[#allocation66_spill] sm:$0xff] }
0x1e82   :  { %v8164_v25 = vpop.xlane.xlu1 %8163 }
0x1e83   :  { %13893 = vrcp.f32 %v8164_v25  ;;  %v8167_v55 = vpop.xlane.xlu0 %8166  ;;  %v4403_v25 = vsel %vm16888_vm11, %v16887_v15, -inf  ;;  %vm16933_vm11 = vcmask 785408  }
0x1e84   :  { %13895 = vrcp.f32 %v8167_v55  ;;  %v16889_v55 = vld [vmem:[#allocation44_spill] sm:$0xff] }
0x1e8c   :  { %v13892_v49 = vpop.eup %13891 }
0x1e8d   :  { %v8179_v19 = vmul.f32 %v13892_v49, %v13884_v46 }
0x1e8f   :  { %8223 = vst.msk [vmem:[%s16867_s13 + $0x10] sm:$0xff] %vm16872_vm4, %v8179_v19  ;;  %vm16922_vm4 = vmmov %vm16900_vm1 }
0x1e90   :  { %v13894_v44 = vpop.eup %13893 }
0x1e91   :  { %v13896_v36 = vpop.eup %13895  ;;  %v8175_v23 = vmul.f32 %v13894_v44, %v13886_v52  ;;  %v16884_v52 = vld [vmem:[#allocation40_spill] sm:$0xff]  ;;  %v16890_v44 = vld [vmem:[#allocation67_spill] sm:$0xff] }
0x1e92   :  { %v8177_v60 = vmul.f32 %v13896_v36, %v13888_v54  ;;  %v4406_v36 = vsel %vm16891_vm5, %v16890_v44, -inf  ;;  %vm16935_vm5 = vcmask 916480  }
0x1e93   :  { %8221 = vst.msk [vmem:[%s16867_s13] sm:$0xff] %vm16873_vm8, %v8175_v23  ;;  %vm16923_vm8 = vmmov %vm16900_vm1 }
0x1e94   :  { %10760 = vperm.xlu0 %13406, %v8177_v60   ;;  %8222 = vst.msk [vmem:[%s16867_s13 + $0x8] sm:$0xff] %vm16874_vm3, %v8177_v60  ;;  %9975 = vperm.xlu1 %13404, %v8177_v60   ;;  %vm16925_vm3 = vmmov %vm16911_vm2 }
0x1e95   :  { %vm16946_vm1 = vmmov %vm16932_vm10 }
0x1e98   :  { %13407 = vset.pattern.permute.xlu0 %v16758_v37  ;;  %13405 = vset.pattern.permute.xlu1 %v16819_v6 }
0x1e99   :  { %9970 = vperm.xlu0 %13407, %v8175_v23   ;;  %10368 = vperm.xlu1 %13405, %v8177_v60  }
0x1e9d   :  { %9985 = vperm.xlu0 %13407, %v8181_v26   ;;  %10364 = vperm.xlu1 %13405, %v8175_v23  }
0x1ea1   :  { %13409 = vset.pattern.permute.xlu0 %v16822_v42  ;;  %13408 = vset.pattern.permute.xlu1 %v16820_v21 }
0x1ea2   :  { %11152 = vperm.xlu0 %13409, %v8177_v60   ;;  %10756 = vperm.xlu1 %13408, %v8175_v23  }
0x1ea6   :  { %3842 = vrot.lane.b32.xlu0 %v16875_v51, %s14106_s20  ;;  %13410 = vset.pattern.permute.xlu1 %v16819_v6 }
0x1ea7   :  { %10376 = vperm.xlu1 %13410, %v8181_v26  }
0x1eaa   :  { %3846 = vrot.lane.b32.xlu0 %v16876_v43, %s14106_s20 }
0x1eab   :  { %13411 = vset.pattern.permute.xlu1 %v16820_v21 }
0x1eac   :  { %10768 = vperm.xlu1 %13411, %v8181_v26  }
0x1eae   :  { %3854 = vrot.lane.b32.xlu0 %v16877_v4, %s14105_s6 }
0x1eb0   :  { %13412 = vset.pattern.permute.xlu1 %v16822_v42 }
0x1eb1   :  { %11160 = vperm.xlu1 %13412, %v8181_v26  }
0x1eb2   :  { %3858 = vrot.lane.b32.xlu0 %v16878_v31, %s14105_s6 }
0x1eb5   :  { %13413 = vset.pattern.permute.xlu1 %v16758_v37  ;;  %v16132_v37 = vpop.f32.mrf.mxu1 }
0x1eb6   :  { %9980 = vperm.xlu1 %13413, %v8179_v19  }
0x1eba   :  { %13414 = vset.pattern.permute.xlu1 %v16819_v6  ;;  %v16879_v6 = vld [vmem:[#allocation36_spill] sm:$0xff] }
0x1ebb   :  { %10372 = vperm.xlu1 %13414, %v8179_v19  }
0x1ebf   :  { %13415 = vset.pattern.permute.xlu1 %v16820_v21  ;;  %v16140_v21 = vpop.f32.mrf.mxu1 }
0x1ec0   :  { %10764 = vperm.xlu1 %13415, %v8179_v19  }
0x1ec1   :  { %v16148_v27 = vpop.f32.mrf.mxu1 }
0x1ec3   :  { %v12685_v54 = vpop.f32.mrf.mxu1 }
0x1ec4   :  { %13416 = vset.pattern.permute.xlu1 %v16822_v42  ;;  %v16142_v42 = vpop.f32.mrf.mxu0  ;;  %v12686_v34 = vadd.f32 %v12685_v54, %v16148_v27 }
0x1ec5   :  { %11156 = vperm.xlu1 %13416, %v8179_v19   ;;  %v16162_v40 = vpop.f32.mrf.mxu1  ;;  %v12711_v54 = vadd.f32 %v16142_v42, %v16134_v62 }
0x1ec6   :  { %v16150_v46 = vpop.f32.mrf.mxu0 }
0x1ec7   :  { %v16170_v49 = vpop.f32.mrf.mxu1 }
0x1ec8   :  { %v16156_v32 = vpop.f32.mrf.mxu0 }
0x1ec9   :  { %11148 = vperm.xlu1 %13416, %v8175_v23   ;;  %v16176_v23 = vpop.f32.mrf.mxu1  ;;  %v12714_v35 = vadd.f32 %v16156_v32, %v16150_v46  ;;  %v12664_v46 = vadd.f32 %v16130_v11, %v16125_v50 }
0x1eca   :  { %v16164_v26 = vpop.f32.mrf.mxu0 }
0x1ecb   :  { %v16180_v51 = vpop.f32.mrf.mxu1 }
0x1ecc   :  { %v16172_v19 = vpop.f32.mrf.mxu0 }
0x1ecd   :  { %3840 = vrot.lane.b32.xlu1 %v16879_v6, %s14106_s20  ;;  %v16184_v4 = vpop.f32.mrf.mxu1 }
0x1ece   :  { %v16178_v60 = vpop.f32.mrf.mxu0 }
0x1ecf   :  { %v16188_v6 = vpop.f32.mrf.mxu1 }
0x1ed0   :  { %v16182_v43 = vpop.f32.mrf.mxu0  ;;  %v12739_v50 = vadd.f32 %v16188_v6, %v16184_v4  ;;  %v16292_v6 = vld [vmem:[%s16801_s2 + $0x7] ss:$0 sm:$0xff] }
0x1ed1   :  { %4398 = vmax.xlane.f32.xlu0 %v4397_v61  ;;  %3844 = vrot.lane.b32.xlu1 %v16882_v59, %s14106_s20  ;;  %v12740_v59 = vpop.f32.mrf.mxu1 }
0x1ed2   :  { %v16186_v31 = vpop.f32.mrf.mxu0 }
0x1ed4   :  { %v16190_v61 = vpop.f32.mrf.mxu0 }
0x1ed5   :  { %7907 = vmax.xlane.f32.xlu0 %v7906_v29  ;;  %3852 = vrot.lane.b32.xlu1 %v16884_v52, %s14105_s6  ;;  %v12741_v52 = vpop.f32.mrf.mxu1 }
0x1ed6   :  { %v12768_v29 = vpop.f32.mrf.mxu0 }
0x1ed9   :  { %7910 = vmax.xlane.f32.xlu0 %v7909_v30  ;;  %3856 = vrot.lane.b32.xlu1 %v16886_v63, %s14105_s6  ;;  %v12769_v30 = vpop.f32.mrf.mxu0  ;;  %v16892_v63 = vld [vmem:[#allocation45_spill] sm:$0xff] }
0x1eda   :  { %v12770_v24 = vadd.f32 %v12769_v30, %v12768_v29  ;;  %v12655_v30 = vadd.f32 %v16080_v22, %v16078_v45  ;;  %v12683_v45 = vadd.f32 %v16140_v21, %v16132_v37  ;;  %v10303_v22 = vadd.f32 %v12686_v34, %v16253_v2 }
0x1edd   :  { %4404 = vmax.xlane.f32.xlu0 %v4403_v25  ;;  %3864 = vrot.lane.b32.xlu1 %v16889_v55, %s14104_s14  ;;  %v16194_v25 = vpop.f32.mrf.mxu1  ;;  %v16196_v55 = vpop.f32.mrf.mxu0 }
0x1edf   :  { %v16200_v9 = vpop.f32.mrf.mxu1  ;;  %v16202_v3 = vpop.f32.mrf.mxu0 }
0x1ee1   :  { %4407 = vmax.xlane.f32.xlu0 %v4406_v36  ;;  %v16893_v36 = vld [vmem:[#allocation49_spill] sm:$0xff]  ;;  %v16206_v38 = vpop.f32.mrf.mxu1  ;;  %v16208_v0 = vpop.f32.mrf.mxu0 }
0x1ee3   :  { %v16216_v41 = vpop.f32.mrf.mxu0 }
0x1ee5   :  { %v16222_v33 = vpop.f32.mrf.mxu0 }
0x1ef7   :  { %3866 = vrot.lane.b32.xlu0 %v16892_v63, %s14104_s14  ;;  %v4400_v63 = vsel %vm16896_vm7, %v16895_v16, -inf  ;;  %v16234_v16 = vpop.f32.mrf.mxu0  ;;  %vm16944_vm7 = vmmov %vm16928_vm6 }
0x1efb   :  { %3878 = vrot.lane.b32.xlu0 %v16893_v36, %s14095_s23  ;;  %v16214_v36 = vpop.f32.mrf.mxu1 }
0x1eff   :  { %3882 = vrot.lane.b32.xlu0 %v16894_v28, %s14095_s23  ;;  %v16220_v28 = vpop.f32.mrf.mxu1 }
0x1f01   :  { %4401 = vmax.xlane.f32.xlu1 %v4400_v63  ;;  %v12630_v63 = vadd.f32 %v16076_v5, %v16074_v13 }
0x1f03   :  { %3890 = vrot.lane.b32.xlu0 %v16897_v7, %s14103_s8  ;;  %v12742_v7 = vadd.f32 %v12741_v52, %v12740_v59  ;;  %v9908_v13 = vadd.f32 %v12630_v63, %v16087_v10  ;;  %v12824_v59 = vpop.f32.mrf.mxu0 }
0x1f05   :  { %7913 = vmax.xlane.f32.xlu1 %v7912_v53  ;;  %v16232_v53 = vpop.f32.mrf.mxu1  ;;  %v10695_v5 = vadd.f32 %v12742_v7, %v16237_v8  ;;  %v9957_v52 = vadd.f32 %v12658_v58, %v9908_v13  ;;  %v12636_v58 = vadd.f32 %v16128_v1, %v16123_v14  ;;  %v12825_v32 = vpop.f32.mrf.mxu0  ;;  %v16903_v13 = vld [vmem:[#allocation61_spill] sm:$0xff]  ;;  %v10352_v1 = vadd.f32 %v12714_v35, %v10303_v22  ;;  %v16904_v35 = vld [vmem:[#allocation63_spill] sm:$0xff]  ;;  %v16905_v22 = vld [vmem:[#allocation46_spill] sm:$0xff] }
0x1f07   :  { %3894 = vrot.lane.b32.xlu0 %v16899_v48, %s14103_s8  ;;  %v16901_v48 = vld [vmem:[#allocation57_spill] sm:$0xff]  ;;  %v12796_v56 = vpop.f32.mrf.mxu1  ;;  %v10744_v29 = vadd.f32 %v12770_v24, %v10695_v5  ;;  %v9916_v5 = vadd.f32 %v12636_v58, %v16087_v10  ;;  %v16283_v42 = vpop.f32.mrf.mxu0 }
0x1f09   :  { %7916 = vmax.xlane.f32.xlu1 %v7915_v12  ;;  %v12627_v12 = vadd.f32 %v16072_v20, %v16070_v18  ;;  %v12797_v27 = vpop.f32.mrf.mxu1 }
0x1f0a   :  { %v12798_v11 = vadd.f32 %v12797_v27, %v12796_v56 }
0x1f0b   :  { %3902 = vrot.lane.b32.xlu0 %v16901_v48, %s14102_s25  ;;  %v16902_v48 = vld [vmem:[#allocation59_spill] sm:$0xff]  ;;  %v9905_v24 = vadd.f32 %v12627_v12, %v16087_v10  ;;  %v10300_v12 = vadd.f32 %v12683_v45, %v16253_v2  ;;  %v16281_v62 = vpop.f32.mrf.mxu1  ;;  %v9965_v10 = vadd.f32 %v12664_v46, %v9916_v5  ;;  %v12720_v46 = vadd.f32 %v16182_v43, %v16178_v60 }
0x1f0c   :  { %v11087_v58 = vadd.f32 %v12798_v11, %v16292_v6  ;;  %v12776_v5 = vadd.f32 %v16216_v41, %v16208_v0 }
0x1f0d   :  { %v9954_v14 = vadd.f32 %v12655_v30, %v9905_v24  ;;  %v12767_v30 = vadd.f32 %v16190_v61, %v16186_v31  ;;  %v10692_v24 = vadd.f32 %v12739_v50, %v16237_v8  ;;  %v16298_v45 = vpop.f32.mrf.mxu1  ;;  %v12692_v31 = vadd.f32 %v16180_v51, %v16176_v23  ;;  %v16305_v61 = vpop.f32.mrf.mxu0  ;;  %v16907_v50 = vld [vmem:[#allocation48_spill] sm:$0xff] }
0x1f0e   :  { %v12748_v51 = vadd.f32 %v16214_v36, %v16206_v38 }
0x1f0f   :  { %3906 = vrot.lane.b32.xlu0 %v16902_v48, %s14102_s25  ;;  %v10761_v63 = vpop.permute.xlu0 %10760  ;;  %v9976_v7 = vpop.permute.xlu1 %9975  ;;  %v12826_v48 = vadd.f32 %v12825_v32, %v12824_v59  ;;  %v10741_v27 = vadd.f32 %v12767_v30, %v10692_v24  ;;  %v10311_v23 = vadd.f32 %v12692_v31, %v16253_v2  ;;  %v16908_v30 = vld [vmem:[#allocation50_spill] sm:$0xff] }
0x1f10   :  { %v16255_v18 = vmul.f32 %v10761_v63, %v10744_v29  ;;  %v16257_v20 = vmul.f32 %v9976_v7, %v9957_v52  ;;  %v10349_v52 = vadd.f32 %v12711_v54, %v10300_v12 }
0x1f11   :  { %v11136_v59 = vadd.f32 %v12826_v48, %v11087_v58  ;;  %v10360_v43 = vadd.f32 %v12720_v46, %v10311_v23  ;;  %v16909_v58 = vld [vmem:[#allocation52_spill] sm:$0xff]  ;;  %v16913_v23 = vld [vmem:[#allocation54_spill] sm:$0xff] }
0x1f12   :  { %10777 = vst [vmem:[#allocation8 + $0x48] sm:$0xff] %v16255_v18  ;;  %9993 = vst [vmem:[#allocation8 + $0x8] sm:$0xff] %v16257_v20 }
0x1f13   :  { %3914 = vrot.lane.b32.xlu0 %v16903_v13, %s14101_s21  ;;  %v12802_v13 = vpop.f32.mrf.mxu1 }
0x1f14   :  { %v9971_v37 = vpop.permute.xlu0 %9970  ;;  %v10369_v21 = vpop.permute.xlu1 %10368 }
0x1f15   :  { %v16275_v34 = vmul.f32 %v9971_v37, %v9954_v14  ;;  %v16277_v29 = vmul.f32 %v10369_v21, %v10352_v1  ;;  %v16906_v37 = vld [vmem:[#allocation47_spill] sm:$0xff]  ;;  %v12830_v21 = vpop.f32.mrf.mxu0  ;;  %v12803_v12 = vpop.f32.mrf.mxu1 }
0x1f16   :  { %v12804_v36 = vadd.f32 %v12803_v12, %v12802_v13  ;;  %v16914_v12 = vld [vmem:[#allocation56_spill] sm:$0xff] }
0x1f17   :  { %9992 = vst [vmem:[#allocation8] sm:$0xff] %v16275_v34  ;;  %10385 = vst [vmem:[#allocation8 + $0x28] sm:$0xff] %v16277_v29  ;;  %3918 = vrot.lane.b32.xlu0 %v16904_v35, %s14101_s21  ;;  %v12831_v38 = vpop.f32.mrf.mxu0 }
0x1f18   :  { %v9986_v63 = vpop.permute.xlu0 %9985  ;;  %v10365_v4 = vpop.permute.xlu1 %10364  ;;  %v11095_v0 = vadd.f32 %v12804_v36, %v16292_v6 }
0x1f19   :  { %v9991_v56 = vmul.f32 %v9986_v63, %v9965_v10  ;;  %v16294_v7 = vmul.f32 %v10365_v4, %v10349_v52  ;;  %v10703_v10 = vadd.f32 %v12748_v51, %v16237_v8  ;;  %v12832_v63 = vadd.f32 %v12831_v38, %v12830_v21 }
0x1f1a   :  { %3868 = vrot.lane.b32.xlu1 %v16905_v22, %s14104_s14  ;;  %v12689_v51 = vadd.f32 %v16170_v49, %v16162_v40  ;;  %v12773_v49 = vadd.f32 %v16202_v3, %v16196_v55  ;;  %v12795_v55 = vadd.f32 %v16232_v53, %v16220_v28 }
0x1f1b   :  { %9995 = vst [vmem:[#allocation8 + $0x18] sm:$0xff] %v9991_v56  ;;  %10384 = vst [vmem:[#allocation8 + $0x20] sm:$0xff] %v16294_v7  ;;  %v10752_v48 = vadd.f32 %v12776_v5, %v10703_v10  ;;  %v11144_v31 = vadd.f32 %v12832_v63, %v11095_v0  ;;  %v12801_v10 = vadd.f32 %v16298_v45, %v16281_v62 }
0x1f1c   :  { %v12823_v62 = vadd.f32 %v16234_v16, %v16222_v33  ;;  %v10389_v45 = vadd.f32 %v16277_v29, %v16257_v20  ;;  %v10388_v53 = vadd.f32 %v16294_v7, %v16275_v34  ;;  %v11176_v34 = vld [vmem:[%s16918_s17] sm:$0x3]  ;;  %v11265_v7 = vld [vmem:[%s16919_s24 + $0x70] sm:$0xff] }
0x1f1d   :  { %v11153_v54 = vpop.permute.xlu0 %11152  ;;  %v10757_v32 = vpop.permute.xlu1 %10756  ;;  %v11092_v36 = vadd.f32 %v12801_v10, %v16292_v6 }
0x1f1e   :  { %v16309_v14 = vmul.f32 %v11153_v54, %v11136_v59  ;;  %v16311_v1 = vmul.f32 %v10757_v32, %v10741_v27  ;;  %3870 = vrot.lane.b32.xlu1 %v16906_v37, %s14104_s14  ;;  %v16910_v27 = vld [vmem:[#allocation35_spill] sm:$0xff]  ;;  %v10781_v63 = vadd.f32 %v16255_v18, %v10389_v45  ;;  %v11266_v18 = vld [vmem:[%s16919_s24 + $0x78] sm:$0xff] }
0x1f20   :  { %11169 = vst [vmem:[#allocation8 + $0x68] sm:$0xff] %v16309_v14  ;;  %10776 = vst [vmem:[#allocation8 + $0x40] sm:$0xff] %v16311_v1  ;;  %v11173_v33 = vadd.f32 %v16309_v14, %v10781_v63  ;;  %v10780_v20 = vadd.f32 %v16311_v1, %v10388_v53  ;;  %v11264_v14 = vld [vmem:[%s16919_s24 + $0x68] sm:$0xff] }
0x1f21   :  { %v16320_v60 = vpop.permute.xlu0 %3842 }
0x1f22   :  { %3876 = vrot.lane.b32.xlu1 %v16907_v50, %s14095_s23  ;;  %v10377_v11 = vpop.permute.xlu1 %10376  ;;  %v10308_v50 = vadd.f32 %v12689_v51, %v16253_v2  ;;  %v16916_v2 = vld [vmem:[#allocation60_spill] sm:$0xff] }
0x1f23   :  { %v10382_v35 = vmul.f32 %v10377_v11, %v10360_v43  ;;  %v12745_v11 = vadd.f32 %v16200_v9, %v16194_v25  ;;  %v12829_v25 = vadd.f32 %v16305_v61, %v16283_v42  ;;  %v11084_v61 = vadd.f32 %v12795_v55, %v16292_v6  ;;  %v11255_v55 = vld [vmem:[%s16919_s24 + $0x20] sm:$0xff] }
0x1f25   :  { %10387 = vst [vmem:[#allocation8 + $0x38] sm:$0xff] %v10382_v35  ;;  %v3847_v52 = vpop.permute.xlu0 %3846  ;;  %v10391_v22 = vadd.f32 %v10382_v35, %v9991_v56  ;;  %v12717_v56 = vadd.f32 %v16172_v19, %v16164_v26  ;;  %v16915_v26 = vld [vmem:[#allocation58_spill] sm:$0xff]  ;;  %v10700_v35 = vadd.f32 %v12745_v11, %v16237_v8  ;;  %v11260_v11 = vld [vmem:[%s16919_s24 + $0x48] sm:$0xff] }
0x1f26   :  { %3880 = vrot.lane.b32.xlu1 %v16908_v30, %s14095_s23  ;;  %v3927_v46 = vsel %vm16911_vm2, %v16910_v27, %v3847_v52  ;;  %v16917_v8 = vld [vmem:[#allocation62_spill] sm:$0xff]  ;;  %v11141_v30 = vadd.f32 %v12829_v25, %v11092_v36  ;;  %vm16947_vm2 = vmmov %vm16922_vm4 }
0x1f27   :  { %v10769_v4 = vpop.permute.xlu1 %10768  ;;  %v10357_v40 = vadd.f32 %v12717_v56, %v10308_v50  ;;  %v10749_v9 = vadd.f32 %v12773_v49, %v10700_v35  ;;  %v11263_v56 = vld [vmem:[%s16919_s24 + $0x60] sm:$0xff]  ;;  %v11258_v35 = vld [vmem:[%s16919_s24 + $0x38] sm:$0xff] }
0x1f28   :  { %v10774_v24 = vmul.f32 %v10769_v4, %v10752_v48  ;;  %v11254_v36 = vld [vmem:[%s16919_s24 + $0x18] sm:$0xff] }
0x1f29   :  { %v16330_v41 = vpop.permute.xlu0 %3854 }
0x1f2a   :  { %10779 = vst [vmem:[#allocation8 + $0x58] sm:$0xff] %v10774_v24  ;;  %3888 = vrot.lane.b32.xlu1 %v16909_v58, %s14103_s8  ;;  %v10783_v54 = vadd.f32 %v10774_v24, %v10391_v22  ;;  %v11133_v24 = vadd.f32 %v12823_v62, %v11084_v61 }
0x1f2c   :  { %v11161_v59 = vpop.permute.xlu1 %11160 }
0x1f2d   :  { %v11166_v32 = vmul.f32 %v11161_v59, %v11144_v31  ;;  %v3859_v13 = vpop.permute.xlu0 %3858 }
0x1f2e   :  { %v16337_v37 = vsel %vm16912_vm14, %v3927_v46, %v3859_v13  ;;  %3892 = vrot.lane.b32.xlu1 %v16913_v23, %s14103_s8  ;;  %vm16948_vm14 = vmmov %vm16933_vm11 }
0x1f2f   :  { %11171 = vst [vmem:[#allocation8 + $0x78] sm:$0xff] %v11166_v32  ;;  %v11175_v21 = vadd.f32 %v11166_v32, %v10783_v54 }
0x1f31   :  { %13196 = vmatpush3.msra.mxu1 %v11175_v21  ;;  %v9981_v43 = vpop.permute.xlu1 %9980 }
0x1f32   :  { %v9990_v5 = vmul.f32 %v9981_v43, %v16090_v57  ;;  %3900 = vrot.lane.b32.xlu1 %v16914_v12, %s14102_s25  ;;  %13197 = vmatprep.subr.mxu1 %v16824_v17  ;;  %v11261_v12 = vld [vmem:[%s16919_s24 + $0x50] sm:$0xff] }
0x1f34   :  { %9994 = vst [vmem:[#allocation8 + $0x10] sm:$0xff] %v9990_v5 }
0x1f36   :  { %3904 = vrot.lane.b32.xlu1 %v16915_v26, %s14102_s25  ;;  %v10373_v19 = vpop.permute.xlu1 %10372 }
0x1f37   :  { %v10381_v57 = vmul.f32 %v10373_v19, %v10357_v40  ;;  %v11259_v19 = vld [vmem:[%s16919_s24 + $0x40] sm:$0xff] }
0x1f39   :  { %10386 = vst [vmem:[#allocation8 + $0x30] sm:$0xff] %v10381_v57  ;;  %v10390_v52 = vadd.f32 %v10381_v57, %v9990_v5 }
0x1f3a   :  { %3912 = vrot.lane.b32.xlu1 %v16916_v2, %s14101_s21 }
0x1f3b   :  { %v10765_v38 = vpop.permute.xlu1 %10764 }
0x1f3c   :  { %v10773_v3 = vmul.f32 %v10765_v38, %v10749_v9  ;;  %v11257_v9 = vld [vmem:[%s16919_s24 + $0x30] sm:$0xff]  ;;  %v11256_v38 = vld [vmem:[%s16919_s24 + $0x28] sm:$0xff] }
0x1f3e   :  { %10778 = vst [vmem:[#allocation8 + $0x50] sm:$0xff] %v10773_v3  ;;  %3916 = vrot.lane.b32.xlu1 %v16917_v8, %s14101_s21  ;;  %v10782_v48 = vadd.f32 %v10773_v3, %v10390_v52  ;;  %v16924_v8 = vld [vmem:[#allocation33_spill] sm:$0xff] }
0x1f3f   :  { %v3925_v62 = vsel %vm16925_vm3, %v16924_v8, %v16320_v60  ;;  %v11252_v60 = vld [vmem:[%s16919_s24 + $0x8] sm:$0xff]  ;;  %vm16954_vm3 = vmmov %vm16947_vm2 }
0x1f40   :  { %v11157_v42 = vpop.permute.xlu1 %11156 }
0x1f41   :  { %v11165_v28 = vmul.f32 %v11157_v42, %v11141_v30  ;;  %v11253_v42 = vld [vmem:[%s16919_s24 + $0x10] sm:$0xff] }
0x1f43   :  { %11170 = vst [vmem:[#allocation8 + $0x70] sm:$0xff] %v11165_v28  ;;  %v11174_v4 = vadd.f32 %v11165_v28, %v10782_v48 }
0x1f44   :  { %v11149_v16 = vpop.permute.xlu1 %11148 }
0x1f45   :  { %v11163_v29 = vmul.f32 %v11149_v16, %v11133_v24  ;;  %13198 = vmatpush3.msra.mxu1 %v11174_v4  ;;  %v16934_v24 = vld [vmem:[#allocation69_spill] sm:$0xff] }
0x1f46   :  { %13199 = vmatprep.subr.mxu1 %v16824_v17 }
0x1f47   :  { %11168 = vst [vmem:[#allocation8 + $0x60] sm:$0xff] %v11163_v29  ;;  %v11172_v6 = vadd.f32 %v11163_v29, %v10780_v20  ;;  %13200 = vmatpush3.msra.mxu1 %v11173_v33  ;;  %v11251_v33 = vld [vmem:[%s16919_s24] sm:$0xff]  ;;  %v16936_v29 = vld [vmem:[#allocation64_spill] sm:$0xff] }
0x1f48   :  { %13201 = vmatprep.subr.mxu1 %v16824_v17  ;;  %v16402_v51 = vpop.permute.xlu1 %3840 }
0x1f49   :  { %13202 = vmatpush3.msra.mxu1 %v11172_v6 }
0x1f4a   :  { %13204 = vmatmul.mubr.msk.f32.vlgmr.msra.gmra.mxu1 %vm16920_vm0, %v11176_v34  ;;  %13206 = vmatprep.subr.mxu1 %v16824_v17 }
0x1f4b   :  { %13238 = vmatprep.mubr.msk.f32.mxu1 %vm14111_vm12, %v16824_v17  ;;  %13207 = vmatpush3.msra.mxu1 %v11266_v18  ;;  %vm16926_vm12 = vmmov %vm16920_vm0  ;;  %v16937_v18 = vld [vmem:[#allocation84_spill] sm:$0xff] }
0x1f4c   :  { %13208 = vmatprep.subr.mxu1 %v16824_v17  ;;  %v16405_v43 = vpop.permute.xlu1 %3844  ;;  %v3930_v45 = vsel %vm16926_vm12, %v3925_v62, %v16330_v41  ;;  %v16931_v41 = vld [vmem:[#allocation85_spill] sm:$0xff]  ;;  %vm16950_vm0 = vmmov %vm16935_vm5  ;;  %vm16956_vm12 = vcmask 130048  }
0x1f4d   :  { %13209 = vmatpush3.msra.mxu1 %v11265_v7 }
0x1f4e   :  { %13210 = vmatprep.subr.mxu1 %v16824_v17 }
0x1f4f   :  { %13211 = vmatpush3.msra.mxu1 %v11264_v14 }
0x1f50   :  { %13212 = vmatprep.subr.mxu1 %v16824_v17  ;;  %v16419_v49 = vpop.permute.xlu1 %3852 }
0x1f51   :  { %13213 = vmatpush3.msra.mxu1 %v11263_v56 }
0x1f52   :  { %13214 = vmatprep.subr.mxu1 %v16824_v17 }
0x1f54   :  { %v16433_v25 = vpop.permute.xlu1 %3856 }
0x1f58   :  { %v16447_v52 = vpop.permute.xlu1 %3864 }
0x1f5a   :  { %v4399_v1 = vpop.xlane.xlu0 %4398 }
0x1f5b   :  { %v4409_v0 = vsub.f32 %v16880_v47, %v4399_v1  ;;  %v16938_v1 = vld [vmem:[#allocation80_spill] sm:$0xff] }
0x1f5d   :  { %v4413_v58 = vmul.f32 1.442695, %v4409_v0 }
0x1f5e   :  { %v16392_v22 = vpop.xlane.xlu0 %7907 }
0x1f5f   :  { %13897 = vpow2.f32 %v4413_v58  ;;  %v7918_v28 = vsub.f32 %v16931_v41, %v16392_v22  ;;  %v16939_v22 = vld [vmem:[#allocation87_spill] sm:$0xff] }
0x1f61   :  { %v7922_v34 = vmul.f32 1.442695, %v7918_v28 }
0x1f62   :  { %v16394_v31 = vpop.xlane.xlu0 %7910 }
0x1f63   :  { %v7919_v7 = vsub.f32 %v16937_v18, %v16394_v31 }
0x1f65   :  { %v7924_v58 = vmul.f32 1.442695, %v7919_v7  ;;  %v16975_v7 = vld [vmem:[#allocation78_spill] sm:$0xff] }
0x1f66   :  { %v4405_v59 = vpop.xlane.xlu0 %4404 }
0x1f67   :  { %v4411_v27 = vsub.f32 %v16887_v15, %v4405_v59  ;;  %v16940_v59 = vld [vmem:[#allocation73_spill] sm:$0xff] }
0x1f69   :  { %v4417_v46 = vmul.f32 1.442695, %v4411_v27 }
0x1f6a   :  { %v4408_v54 = vpop.xlane.xlu0 %4407 }
0x1f6b   :  { %13899 = vpow2.f32 %v4417_v46  ;;  %v4412_v32 = vsub.f32 %v16890_v44, %v4408_v54  ;;  %v11262_v44 = vld [vmem:[%s16919_s24 + $0x58] sm:$0xff] }
0x1f6c   :  { %v16398_v13 = vpop.eup %13897  ;;  %13215 = vmatpush3.msra.mxu1 %v11262_v44  ;;  %v16941_v54 = vld [vmem:[#allocation86_spill] sm:$0xff] }
0x1f6d   :  { %v4419_v47 = vmul.f32 1.442695, %v4412_v32  ;;  %v4421_v23 = vsel %vm16921_vm15, %v16398_v13, 0.0  ;;  %13216 = vmatprep.subr.mxu1 %v16824_v17  ;;  %vm16951_vm15 = vmmov %vm16947_vm2 }
0x1f6e   :  { %v3867_v21 = vpop.permute.xlu0 %3866  ;;  %4422 = vadd.xlane.f32.xlu1 %v4421_v23  ;;  %13217 = vmatpush3.msra.mxu1 %v11261_v12 }
0x1f6f   :  { %13901 = vpow2.f32 %v4419_v47  ;;  %13218 = vmatprep.subr.mxu1 %v16824_v17  ;;  %v3935_v61 = vsel %vm16928_vm6, %v3930_v45, %v3867_v21  ;;  %v16942_v47 = vld [vmem:[#allocation81_spill] sm:$0xff]  ;;  %v16943_v21 = vld [vmem:[#allocation75_spill] sm:$0xff]  ;;  %vm16957_vm6 = vcmask 261120  }
0x1f70   :  { %13219 = vmatpush3.msra.mxu1 %v11260_v11 }
0x1f71   :  { %13220 = vmatprep.subr.mxu1 %v16824_v17 }
0x1f72   :  { %v3879_v15 = vpop.permute.xlu0 %3878  ;;  %13221 = vmatpush3.msra.mxu1 %v11259_v19 }
0x1f73   :  { %13222 = vmatprep.subr.mxu1 %v16824_v17  ;;  %v3940_v48 = vsel %vm16929_vm13, %v3935_v61, %v3879_v15  ;;  %vm16959_vm13 = vmmov %vm16944_vm7 }
0x1f74   :  { %13223 = vmatpush3.msra.mxu1 %v11258_v35 }
0x1f75   :  { %13224 = vmatprep.subr.mxu1 %v16824_v17 }
0x1f76   :  { %v16409_v5 = vpop.permute.xlu0 %3882  ;;  %13225 = vmatpush3.msra.mxu1 %v11257_v9 }
0x1f77   :  { %13226 = vmatprep.subr.mxu1 %v16824_v17 }
0x1f78   :  { %v16413_v50 = vpop.eup %13899  ;;  %13227 = vmatpush3.msra.mxu1 %v11256_v38 }
0x1f79   :  { %v4427_v40 = vsel %vm16922_vm4, %v16413_v50, 0.0  ;;  %13228 = vmatprep.subr.mxu1 %v16824_v17  ;;  %vm16952_vm4 = vmmov %vm16947_vm2 }
0x1f7a   :  { %v3891_v26 = vpop.permute.xlu0 %3890  ;;  %4428 = vadd.xlane.f32.xlu1 %v4427_v40  ;;  %13229 = vmatpush3.msra.mxu1 %v11255_v55 }
0x1f7b   :  { %13230 = vmatprep.subr.mxu1 %v16824_v17  ;;  %v3945_v53 = vsel %vm16932_vm10, %v3940_v48, %v3891_v26  ;;  %vm16960_vm10 = vmmov %vm16945_vm9 }
0x1f7c   :  { %v16423_v57 = vpop.eup %13901  ;;  %13231 = vmatpush3.msra.mxu1 %v11254_v36 }
0x1f7d   :  { %v4430_v10 = vsel %vm16923_vm8, %v16423_v57, 0.0  ;;  %13232 = vmatprep.subr.mxu1 %v16824_v17  ;;  %vm16953_vm8 = vmmov %vm16947_vm2 }
0x1f7e   :  { %v16429_v2 = vpop.permute.xlu0 %3894  ;;  %4431 = vadd.xlane.f32.xlu1 %v4430_v10  ;;  %13233 = vmatpush3.msra.mxu1 %v11253_v42  ;;  %v16949_v10 = vld [vmem:[#allocation82_spill] sm:$0xff]  ;;  %v16955_v42 = vld [vmem:[#allocation32_spill] sm:$0xff] }
0x1f7f   :  { %13234 = vmatprep.subr.mxu1 %v16824_v17  ;;  %v3924_v61 = vsel %vm16956_vm12, %v16955_v42, %v16402_v51 }
0x1f80   :  { %13235 = vmatpush3.msra.mxu1 %v11252_v60  ;;  %v3929_v48 = vsel %vm16957_vm6, %v3924_v61, %v16419_v49  ;;  %v16958_v60 = vld [vmem:[#allocation70_spill] sm:$0xff] }
0x1f81   :  { %13236 = vmatprep.subr.mxu1 %v16824_v17  ;;  %v3934_v28 = vsel %vm16959_vm13, %v3929_v48, %v16447_v52 }
0x1f82   :  { %v3903_v3 = vpop.permute.xlu0 %3902  ;;  %6488 = vadd.xlane.f32.xlu1 %v15556_v39  ;;  %v16927_v39 = vld [vmem:[#allocation79_spill] sm:$0xff]  ;;  %13237 = vmatpush3.msra.mxu1 %v11251_v33 }
0x1f83   :  { %v3950_v63 = vsel %vm16933_vm11, %v3945_v53, %v3903_v3  ;;  %vm16962_vm11 = vmmov %vm16956_vm12 }
0x1f86   :  { %v3907_v30 = vpop.permute.xlu0 %3906  ;;  %6492 = vadd.xlane.f32.xlu1 %v16927_v39 }
0x1f8a   :  { %v3915_v4 = vpop.permute.xlu0 %3914  ;;  %6897 = vadd.xlane.f32.xlu1 %v16934_v24  ;;  %v4402_v16 = vpop.xlane.xlu1 %4401 }
0x1f8b   :  { %v3955_v20 = vsel %vm16935_vm5, %v3950_v63, %v3915_v4  ;;  %v4410_v6 = vsub.f32 %v16936_v29, %v4402_v16  ;;  %v16961_v63 = vld [vmem:[#allocation34_spill] sm:$0xff]  ;;  %vm16963_vm5 = vmmov %vm16946_vm1 }
0x1f8c   :  { %3959 = vst [vmem:[%s16930_s7 + $0x8] sm:$0xff] %v3955_v20  ;;  %v3926_v4 = vsel %vm16962_vm11, %v16961_v63, %v16405_v43  ;;  %v16966_v16 = vld [vmem:[#allocation74_spill] sm:$0xff] }
0x1f8d   :  { %v4415_v14 = vmul.f32 1.442695, %v4410_v6 }
0x1f8e   :  { %6901 = vadd.xlane.f32.xlu1 %v16938_v1  ;;  %v7914_v0 = vpop.xlane.xlu1 %7913  ;;  %v3919_v19 = vpop.permute.xlu0 %3918  ;;  %v16977_v1 = vld [vmem:[#allocation77_spill] sm:$0xff] }
0x1f8f   :  { %13903 = vpow2.f32 %v4415_v14  ;;  %v7920_v17 = vsub.f32 %v16939_v22, %v7914_v0  ;;  %v16976_v14 = vld [vmem:[#allocation72_spill] sm:$0xff] }
0x1f90   :  { %13905 = vpow2.f32 %v7922_v34  ;;  %v16972_v34 = vld [vmem:[#allocation71_spill] sm:$0xff]  ;;  %v16978_v0 = vld [vmem:[#allocation76_spill] sm:$0xff] }
0x1f91   :  { %13907 = vpow2.f32 %v7924_v58  ;;  %v7926_v46 = vmul.f32 1.442695, %v7920_v17  ;;  %v16979_v58 = vld [vmem:[#allocation83_spill] sm:$0xff] }
0x1f92   :  { %7306 = vadd.xlane.f32.xlu1 %v16940_v59  ;;  %v7917_v27 = vpop.xlane.xlu1 %7916 }
0x1f93   :  { %v7921_v32 = vsub.f32 %v16941_v54, %v7917_v27  ;;  %13909 = vpow2.f32 %v7926_v46 }
0x1f95   :  { %v7928_v31 = vmul.f32 1.442695, %v7921_v32 }
0x1f96   :  { %7310 = vadd.xlane.f32.xlu1 %v16942_v47  ;;  %v3869_v23 = vpop.permute.xlu1 %3868 }
0x1f97   :  { %13911 = vpow2.f32 %v7928_v31 }
0x1f9a   :  { %7715 = vadd.xlane.f32.xlu1 %v16943_v21  ;;  %v3871_v15 = vpop.permute.xlu1 %3870 }
0x1f9b   :  { %v3937_v56 = vsel %vm16944_vm7, %v16337_v37, %v3871_v15  ;;  %vm16964_vm7 = vmmov %vm16957_vm6 }
0x1f9c   :  { %v16476_v44 = vpop.eup %13903  ;;  %v3942_v12 = vsel %vm16945_vm9, %v3937_v56, %v16409_v5  ;;  %v3931_v51 = vsel %vm16964_vm7, %v3926_v4, %v16433_v25  ;;  %vm16965_vm9 = vmmov %vm16948_vm14 }
0x1f9d   :  { %v3947_v11 = vsel %vm16946_vm1, %v3942_v12, %v16429_v2  ;;  %v4424_v40 = vsel %vm16947_vm2, %v16476_v44, 0.0  ;;  %v16484_v26 = vpop.eup %13905  ;;  %vm16967_vm1 = vmmov %vm16959_vm13 }
0x1f9e   :  { %v3952_v35 = vsel %vm16948_vm14, %v3947_v11, %v3907_v30  ;;  %7719 = vadd.xlane.f32.xlu1 %v16949_v10  ;;  %4425 = vadd.xlane.f32.xlu0 %v4424_v40  ;;  %v3877_v37 = vpop.permute.xlu1 %3876  ;;  %v7930_v5 = vsel %vm16951_vm15, %v16484_v26, 0.0  ;;  %v16492_v38 = vpop.eup %13907  ;;  %v3936_v20 = vsel %vm16967_vm1, %v3931_v51, %v3869_v23  ;;  %vm16968_vm2 = vmmov %vm16950_vm0 }
0x1f9f   :  { %v3957_v9 = vsel %vm16950_vm0, %v3952_v35, %v3919_v19  ;;  %v7933_v3 = vsel %vm16952_vm4, %v16492_v38, 0.0  ;;  %v3939_v53 = vsel %vm16960_vm10, %v3934_v28, %v3877_v37  ;;  %vm16969_vm14 = vmmov %vm16960_vm10 }
0x1fa0   :  { %3961 = vst [vmem:[%s16930_s7 + $0x18] sm:$0xff] %v3957_v9  ;;  %v16496_v55 = vpop.eup %13909  ;;  %vm16970_vm0 = vmmov %vm16963_vm5 }
0x1fa1   :  { %v7936_v8 = vsel %vm16953_vm8, %v16496_v55, 0.0  ;;  %vm16971_vm15 = vmmov %vm16965_vm9 }
0x1fa2   :  { %7931 = vadd.xlane.f32.xlu0 %v7930_v5  ;;  %v3881_v2 = vpop.permute.xlu1 %3880  ;;  %vm16974_vm4 = vmmov %vm16968_vm2 }
0x1fa3   :  { %v3941_v29 = vsel %vm16969_vm14, %v3936_v20, %v3881_v2  ;;  %vm16981_vm8 = vmmov %vm16954_vm3 }
0x1fa4   :  { %v16500_v62 = vpop.eup %13911  ;;  %vm16982_vm12 = vmmov %vm16981_vm8 }
0x1fa5   :  { %v7939_v30 = vsel %vm16954_vm3, %v16500_v62, 0.0  ;;  %vm6500_vm3 = vcmask 7168   ;;  %vm16983_vm6 = vmmov %vm16981_vm8 }
0x1fa6   :  { %7934 = vadd.xlane.f32.xlu0 %v7933_v3  ;;  %v3889_v36 = vpop.permute.xlu1 %3888  ;;  %vm16985_vm13 = vmmov %vm16983_vm6 }
0x1fa7   :  { %v3944_v24 = vsel %vm16963_vm5, %v3939_v53, %v3889_v36  ;;  %vm16986_vm10 = vmmov %vm16983_vm6 }
0x1fa8   :  { %vm16987_vm11 = vmmov %vm16983_vm6 }
0x1fa9   :  { %vm16988_vm5 = vmmov %vm16983_vm6 }
0x1faa   :  { %7937 = vadd.xlane.f32.xlu0 %v7936_v8  ;;  %v3893_v45 = vpop.permute.xlu1 %3892  ;;  %vm16989_vm7 = vmmov %vm16988_vm5 }
0x1fab   :  { %v3946_v6 = vsel %vm16970_vm0, %v3941_v29, %v3893_v45  ;;  %vm16992_vm1 = vmmov %vm16988_vm5 }
0x1fac   :  { %vm16994_vm14 = vmmov %vm16992_vm1 }
0x1fad   :  { %vm16995_vm0 = vmmov %vm16992_vm1 }
0x1fae   :  { %7940 = vadd.xlane.f32.xlu0 %v7939_v30  ;;  %v3901_v39 = vpop.permute.xlu1 %3900  ;;  %v16984_v30 = vld [vmem:[#allocation68_spill] sm:$0xff] }
0x1faf   :  { %v3949_v49 = vsel %vm16965_vm9, %v3944_v24, %v3901_v39  ;;  %v4707_v39 = vrot.slane %v16984_v30, 4  ;;  %vm16990_vm9 = vmmov %vm16988_vm5 }
0x1fb2   :  { %6490 = vadd.xlane.f32.xlu0 %v16958_v60  ;;  %v3905_v41 = vpop.permute.xlu1 %3904  ;;  %v4708_v60 = vadd.f32 %v4707_v39, %v16984_v30 }
0x1fb3   :  { %v3951_v43 = vsel %vm16971_vm15, %v3946_v6, %v3905_v41  ;;  %vm16996_vm15 = vmmov %vm16995_vm0 }
0x1fb6   :  { %6494 = vadd.xlane.f32.xlu0 %v16966_v16  ;;  %v3913_v33 = vpop.permute.xlu1 %3912 }
0x1fb7   :  { %v3954_v52 = vsel %vm16968_vm2, %v3949_v49, %v3913_v33  ;;  %v4709_v49 = vrot.slane %v4708_v60, 2  ;;  %vm16993_vm2 = vmmov %vm16992_vm1 }
0x1fb8   :  { %3958 = vst [vmem:[%s16930_s7] sm:$0xff] %v3954_v52 }
0x1fba   :  { %6899 = vadd.xlane.f32.xlu0 %v16972_v34  ;;  %v3917_v25 = vpop.permute.xlu1 %3916  ;;  %v16991_v34 = vld [vmem:[#allocation31_spill] sm:$0xff] }
0x1fbb   :  { %v3956_v18 = vsel %vm16974_vm4, %v3951_v43, %v3917_v25  ;;  %v4710_v43 = vadd.f32 %v4709_v49, %v4708_v60  ;;  %v8211_v25 = vrot.slane %v16991_v34, 4  ;;  %vm16997_vm4 = vmmov %vm16995_vm0 }
0x1fbc   :  { %3960 = vst [vmem:[%s16930_s7 + $0x10] sm:$0xff] %v3956_v18 }
0x1fbe   :  { %6903 = vadd.xlane.f32.xlu0 %v16975_v7 }
0x1fc2   :  { %7308 = vadd.xlane.f32.xlu0 %v16976_v14 }
0x1fc6   :  { %7312 = vadd.xlane.f32.xlu0 %v16977_v1 }
0x1fca   :  { %7717 = vadd.xlane.f32.xlu0 %v16978_v0 }
0x1fce   :  { %7721 = vadd.xlane.f32.xlu0 %v16979_v58 }
0x1ff7   :  { %v4423_v22 = vpop.xlane.xlu1 %4422 }
0x1ff8   :  { %13913 = vrcp.f32 %v4423_v22  ;;  %v8212_v22 = vadd.f32 %v8211_v25, %v16991_v34 }
0x2003   :  { %v4429_v17 = vpop.xlane.xlu1 %4428 }
0x2004   :  { %13915 = vrcp.f32 %v4429_v17 }
0x2005   :  { %v13914_v59 = vpop.eup %13913 }
0x2006   :  { %v4434_v27 = vmul.f32 %v13914_v59, %v16398_v13 }
0x2007   :  { %v4432_v46 = vpop.xlane.xlu1 %4431 }
0x2008   :  { %4721 = vst.msk [vmem:[%s16973_s10] sm:$0xff] %vm16981_vm8, %v4434_v27  ;;  %13917 = vrcp.f32 %v4432_v46  ;;  %v4677_v28 = vsel %vm16985_vm13, %v4434_v27, 0.0  ;;  %vm16998_vm8 = vmmov %vm16995_vm0 }
0x200a   :  { %v11246_v54 = vpop.f32.mrf.mxu1 }
0x200b   :  { %v6489_v32 = vpop.xlane.xlu1 %6488  ;;  %11250 = vst [vmem:[#allocation10] sm:$0x3] %v11246_v54  ;;  %13239 = vmatmul.mubr.f32.vlgmr.msra.gmra.mxu1 %v11246_v54 }
0x200c   :  { %v6496_v47 = vmul.f32 0.0078125, %v6489_v32  ;;  %v13205_v23 = vpop.f32.mrf.mxu1 }
0x200e   :  { %6501 = vst.msk [vmem:[%s16980_s11] sm:$0xff] %vm6500_vm3, %v6496_v47 }
0x200f   :  { %v6493_v31 = vpop.xlane.xlu1 %6492 }
0x2010   :  { %v6498_v13 = vmul.f32 0.0078125, %v6493_v31 }
0x2011   :  { %v13916_v21 = vpop.eup %13915 }
0x2012   :  { %v4438_v15 = vmul.f32 %v13916_v21, %v16413_v50  ;;  %6503 = vst.msk [vmem:[%s16980_s11 + $0x10] sm:$0xff] %vm6500_vm3, %v6498_v13  ;;  %v8213_v13 = vrot.slane %v8212_v22, 2 }
0x2013   :  { %v6898_v56 = vpop.xlane.xlu1 %6897 }
0x2014   :  { %4723 = vst.msk [vmem:[%s16973_s10 + $0x10] sm:$0xff] %vm16982_vm12, %v4438_v15  ;;  %v6905_v12 = vmul.f32 0.0078125, %v6898_v56  ;;  %v4680_v24 = vsel %vm16988_vm5, %v4438_v15, 0.0  ;;  %vm4715_vm12 = vcmask 24576  }
0x2015   :  { %v13918_v11 = vpop.eup %13917 }
0x2016   :  { %v4440_v40 = vmul.f32 %v13918_v11, %v16423_v57  ;;  %11810 = vst.msk [vmem:[%s16980_s11 + $0x20] sm:$0xff] %vm6500_vm3, %v6905_v12 }
0x2017   :  { %v6902_v19 = vpop.xlane.xlu1 %6901 }
0x2018   :  { %4724 = vst.msk [vmem:[%s16973_s10 + $0x18] sm:$0xff] %vm16983_vm6, %v4440_v40  ;;  %v6907_v35 = vmul.f32 0.0078125, %v6902_v19  ;;  %v4682_v33 = vsel %vm16989_vm7, %v4440_v40, 0.0 }
0x201a   :  { %11812 = vst.msk [vmem:[%s16980_s11 + $0x30] sm:$0xff] %vm6500_vm3, %v6907_v35 }
0x201b   :  { %v7307_v50 = vpop.xlane.xlu1 %7306 }
0x201c   :  { %v7314_v10 = vmul.f32 0.0078125, %v7307_v50 }
0x201e   :  { %11848 = vst.msk [vmem:[%s16980_s11 + $0x40] sm:$0xff] %vm6500_vm3, %v7314_v10 }
0x201f   :  { %v7311_v37 = vpop.xlane.xlu1 %7310 }
0x2020   :  { %v7316_v9 = vmul.f32 0.0078125, %v7311_v37 }
0x2022   :  { %11850 = vst.msk [vmem:[%s16980_s11 + $0x50] sm:$0xff] %vm6500_vm3, %v7316_v9 }
0x2023   :  { %v7716_v5 = vpop.xlane.xlu1 %7715 }
0x2024   :  { %v7723_v2 = vmul.f32 0.0078125, %v7716_v5 }
0x2026   :  { %11886 = vst.msk [vmem:[%s16980_s11 + $0x60] sm:$0xff] %vm6500_vm3, %v7723_v2 }
0x2027   :  { %v4426_v57 = vpop.xlane.xlu0 %4425  ;;  %v7720_v3 = vpop.xlane.xlu1 %7719 }
0x2028   :  { %13919 = vrcp.f32 %v4426_v57  ;;  %v7725_v36 = vmul.f32 0.0078125, %v7720_v3 }
0x202a   :  { %11888 = vst.msk [vmem:[%s16980_s11 + $0x70] sm:$0xff] %vm6500_vm3, %v7725_v36 }
0x202b   :  { %v7932_v8 = vpop.xlane.xlu0 %7931 }
0x202c   :  { %13921 = vrcp.f32 %v7932_v8 }
0x202f   :  { %v7935_v45 = vpop.xlane.xlu0 %7934 }
0x2030   :  { %13923 = vrcp.f32 %v7935_v45 }
0x2033   :  { %v7938_v42 = vpop.xlane.xlu0 %7937 }
0x2034   :  { %13925 = vrcp.f32 %v7938_v42 }
0x2035   :  { %v13920_v61 = vpop.eup %13919 }
0x2036   :  { %v4436_v48 = vmul.f32 %v13920_v61, %v16476_v44 }
0x2037   :  { %v7941_v41 = vpop.xlane.xlu0 %7940 }
0x2038   :  { %v4678_v53 = vsel %vm16986_vm10, %v4436_v48, 0.0  ;;  %4722 = vst.msk [vmem:[%s16973_s10 + $0x8] sm:$0xff] %vm16987_vm11, %v4436_v48  ;;  %13927 = vrcp.f32 %v7941_v41 }
0x2039   :  { %v13922_v63 = vpop.eup %13921  ;;  %v4679_v4 = vadd.f32 %v4678_v53, %v4677_v28 }
0x203a   :  { %v7943_v51 = vmul.f32 %v13922_v63, %v16484_v26 }
0x203b   :  { %v4681_v44 = vadd.f32 %v4680_v24, %v4679_v4  ;;  %v6491_v16 = vpop.xlane.xlu0 %6490 }
0x203c   :  { %8225 = vst.msk [vmem:[%s14260_s30] sm:$0xff] %vm16990_vm9, %v7943_v51  ;;  %v6497_v20 = vmul.f32 0.0078125, %v6491_v16  ;;  %v8182_v27 = vsel %vm16994_vm14, %v7943_v51, 0.0 }
0x203d   :  { %v13924_v52 = vpop.eup %13923  ;;  %v4683_v29 = vadd.f32 %v4682_v33, %v4681_v44 }
0x203e   :  { %v7945_v6 = vmul.f32 %v13924_v52, %v16492_v38  ;;  %6502 = vst.msk [vmem:[%s16980_s11 + $0x8] sm:$0xff] %vm6500_vm3, %v6497_v20  ;;  %v4711_v38 = vrot.slane %v4710_v43, 1 }
0x203f   :  { %v4684_v26 = vrot.slane %v4683_v29, 4  ;;  %v6495_v18 = vpop.xlane.xlu0 %6494 }
0x2040   :  { %8226 = vst.msk [vmem:[%s14260_s30 + $0x8] sm:$0xff] %vm16992_vm1, %v7945_v6  ;;  %v6499_v7 = vmul.f32 0.0078125, %v6495_v18  ;;  %v8183_v0 = vsel %vm16993_vm2, %v7945_v6, 0.0  ;;  %v4712_v31 = vadd.f32 %v4711_v38, %v4710_v43 }
0x2041   :  { %v13926_v14 = vpop.eup %13925  ;;  %v4685_v1 = vadd.f32 %v4684_v26, %v4683_v29  ;;  %v8184_v23 = vadd.f32 %v8183_v0, %v8182_v27 }
0x2042   :  { %v7947_v58 = vmul.f32 %v13926_v14, %v16496_v55  ;;  %6504 = vst.msk [vmem:[%s16980_s11 + $0x18] sm:$0xff] %vm6500_vm3, %v6499_v7  ;;  %v4713_v35 = vmul.f32 0.03125, %v4712_v31 }
0x2043   :  { %v4686_v17 = vrot.slane %v4685_v1, 2  ;;  %v6900_v59 = vpop.xlane.xlu0 %6899 }
0x2044   :  { %v8185_v46 = vsel %vm16995_vm0, %v7947_v58, 0.0  ;;  %8227 = vst.msk [vmem:[%s14260_s30 + $0x10] sm:$0xff] %vm16996_vm15, %v7947_v58  ;;  %v6906_v54 = vmul.f32 0.0078125, %v6900_v59 }
0x2045   :  { %v13928_v32 = vpop.eup %13927  ;;  %v4687_v47 = vadd.f32 %v4686_v17, %v4685_v1  ;;  %v8186_v15 = vadd.f32 %v8185_v46, %v8184_v23 }
0x2046   :  { %v7949_v55 = vmul.f32 %v13928_v32, %v16500_v62  ;;  %11811 = vst.msk [vmem:[%s16980_s11 + $0x28] sm:$0xff] %vm6500_vm3, %v6906_v54  ;;  %v8214_v62 = vadd.f32 %v8213_v13, %v8212_v22 }
0x2047   :  { %v4688_v21 = vrot.slane %v4687_v47, 1  ;;  %v6904_v56 = vpop.xlane.xlu0 %6903 }
0x2048   :  { %v8187_v12 = vsel %vm16997_vm4, %v7949_v55, 0.0  ;;  %8228 = vst.msk [vmem:[%s14260_s30 + $0x18] sm:$0xff] %vm16998_vm8, %v7949_v55  ;;  %v6908_v11 = vmul.f32 0.0078125, %v6904_v56  ;;  %v8215_v57 = vrot.slane %v8214_v62, 1  ;;  %s13973_s30 = scalar_lea.vmem %s11372_s16, 2048 }
0x2049   :  { %v4689_v40 = vadd.f32 %v4688_v21, %v4687_v47  ;;  %v8188_v19 = vadd.f32 %v8187_v12, %v8186_v15  ;;  %p13974_p10 = scmp.ne.s32.totalorder %s11372_s16, %s13973_s30  ;;  %p13979_p12 = scmp.lt.s32.totalorder %s13973_s30, %s13973_s30 }
0x204a   :  { %11813 = vst.msk [vmem:[%s16980_s11 + $0x38] sm:$0xff] %vm6500_vm3, %v6908_v11 }
0x204b   :  { %v4691_v50 = vmul.f32 0.03125, %v4689_v40  ;;  %v8189_v10 = vrot.slane %v8188_v19, 4  ;;  %v7309_v37 = vpop.xlane.xlu0 %7308  ;;  %p13980_p13 = por %p13979_p12, %p13978_p11 }
0x204c   :  { %v7315_v9 = vmul.f32 0.0078125, %v7309_v37 }
0x204d   :  { %v4714_v5 = vmul.f32 %v4713_v35, %v4691_v50  ;;  %v8190_v2 = vadd.f32 %v8189_v10, %v8188_v19  ;;  %p13981_p0 = pnand %p13980_p13, %p13974_p10 }
0x204e   :  { %11849 = vst.msk [vmem:[%s16980_s11 + $0x48] sm:$0xff] %vm6500_vm3, %v7315_v9 }
0x204f   :  { %4716 = vst.msk [vmem:[%s14265_s27] sm:$0x1] %vm4715_vm12, %v4714_v5  ;;  %v8191_v3 = vrot.slane %v8190_v2, 2  ;;  %v7313_v36 = vpop.xlane.xlu0 %7312 }
0x2050   :  { %13984 = shalt.err (!%p13981_p0)
}
0x2051   :  { %s14113_s18 = smov 128   ;;  %s16999_s22 = sld [smem:[#allocation29_spill]]  ;;  %v7317_v8 = vmul.f32 0.0078125, %v7313_v36  ;;  %v8192_v45 = vadd.f32 %v8191_v3, %v8190_v2 }
0x2052   :  { %s14114_s23 = smov [#allocation7]   ;;  %s14115_s26 = smov [#allocation10]  }
0x2053   :  { %s11353_s0 = sshll.u32 %s14114_s23, 4  ;;  %s11390_s28 = sshll.u32 %s14115_s26, 4  ;;  %11851 = vst.msk [vmem:[%s16980_s11 + $0x58] sm:$0xff] %vm6500_vm3, %v7317_v8  ;;  %s11354_s0 = int_to_ptr.vmem [resolvable:$true] %s11353_s0  ;;  %s11391_s28 = int_to_ptr.vmem [resolvable:$true] %s11390_s28 }
0x2054   :  { %s13993_s1 = scalar_lea.vmem %s11354_s0, 2048  ;;  %p13998_p2 = scmp.lt.s32.totalorder %s11354_s0, %s11354_s0 }
0x2055   :  { %p13994_p1 = scmp.ne.s32.totalorder %s11354_s0, %s13993_s1  ;;  %p13999_p3 = scmp.lt.s32.totalorder %s13993_s1, %s13993_s1 }
0x2057   :  { %11377 = dma.vmem_to_hbm [thread:$0]  %s11372_s16, 2048, %s16999_s22, [#allocation9], %s14113_s18, %s14113_s18, %s14099_s5  }
0x2058   :  { %p14000_p4 = por %p13999_p3, %p13998_p2 }
0x205a   :  { %p14001_p5 = pnand %p14000_p4, %p13994_p1 }
0x205c   :  { %14004 = shalt.err (!%p14001_p5)
}
0x205d   :  { %s17000_s9 = sld [smem:[#allocation25_spill]]  ;;  %v8216_v30 = vadd.f32 %v8215_v57, %v8214_v62  ;;  %v8193_v39 = vrot.slane %v8192_v45, 1  ;;  %v7718_v42 = vpop.xlane.xlu0 %7717  ;;  %s14013_s21 = scalar_lea.vmem %s11391_s28, 32 }
0x205e   :  { %v7724_v61 = vmul.f32 0.0078125, %v7718_v42  ;;  %p14014_p6 = scmp.ne.s32.totalorder %s11391_s28, %s14013_s21  ;;  %p14018_p7 = scmp.lt.s32.totalorder %s11391_s28, %s11391_s28 }
0x205f   :  { %p14019_p8 = scmp.lt.s32.totalorder %s14013_s21, %s14013_s21 }
0x2061   :  { %p14020_p9 = por %p14019_p8, %p14018_p7 }
0x2063   :  { %11359 = dma.vmem_to_hbm [thread:$0]  %s11354_s0, 2048, %s17000_s9, [#allocation4], %s14113_s18, %s14113_s18, %s14099_s5  }
0x2064   :  { %p14021_p10 = pnand %p14020_p9, %p14014_p6 }
0x2066   :  { %14024 = shalt.err (!%p14021_p10)
}
0x2067   :  { %s17001_s25 = sld [smem:[#allocation23_spill]]  ;;  %v8194_v48 = vadd.f32 %v8193_v39, %v8192_v45  ;;  %11887 = vst.msk [vmem:[%s16980_s11 + $0x68] sm:$0xff] %vm6500_vm3, %v7724_v61  ;;  %v8217_v60 = vmul.f32 0.03125, %v8216_v30  ;;  %v7722_v28 = vpop.xlane.xlu0 %7721  ;;  %s14116_s5 = smov [#allocation11]   ;;  %vm11344_vm6 = vcmask 74752  }
0x2068   :  { %11393 = dma.vmem_to_hbm [thread:$0]  %s11391_s28, 32, %s14270_s4, [#allocation9]   ;;  %v7726_v53 = vmul.f32 0.0078125, %v7722_v28 }
0x2069   :  { %v8195_v41 = vmul.f32 0.03125, %v8194_v48  ;;  %s11400_s8 = sshll.u32 %s14116_s5, 4  ;;  %s11401_s8 = int_to_ptr.vmem [resolvable:$true] %s11400_s8 }
0x206a   :  { %11889 = vst.msk [vmem:[%s16980_s11 + $0x78] sm:$0xff] %vm6500_vm3, %v7726_v53  ;;  %s14033_s4 = scalar_lea.vmem %s11401_s8, 32  ;;  %p14038_p12 = scmp.lt.s32.totalorder %s11401_s8, %s11401_s8 }
0x206b   :  { %v8218_v63 = vmul.f32 %v8217_v60, %v8195_v41  ;;  %p14034_p11 = scmp.ne.s32.totalorder %s11401_s8, %s14033_s4  ;;  %p14039_p13 = scmp.lt.s32.totalorder %s14033_s4, %s14033_s4 }
0x206d   :  { %11928 = vst.msk [vmem:[%s14265_s27 + $0x1] sm:$0x1] %vm4715_vm12, %v8218_v63  ;;  %v12196_v4 = vld [vmem:[%s17001_s25] ss:$0 sm:$0xff]  ;;  %p14040_p0 = por %p14039_p13, %p14038_p12 }
0x206f   :  { %p14041_p1 = pnand %p14040_p0, %p14034_p11 }
0x20cb   :  { %v11340_v24 = vpop.f32.mrf.mxu1 }
0x20cc   :  { %v11341_v51 = vadd.f32 %v12196_v4, %v11340_v24 }
0x20cd   :  { %v13240_v49 = vpop.f32.mrf.mxu1 }
0x20ce   :  { %11345 = vst.msk [vmem:[#allocation11] sm:$0x3] %vm11344_vm6, %v11341_v51 }
0x20cf   :  { %14044 = shalt.err (!%p14041_p1)
}
0x20d0   :  { %11403 = dma.vmem_to_hbm [thread:$0]  %s11401_s8, 32, %s14275_s12, [#allocation12]  }
0x20d1   :  { %14057 = dma.done.wait [#allocation4], 2048  }
0x20d2   :  { %14058 = vsyncadd [#allocation4], 4294965248 }
0x20d3   :  { %14059 = dma.done.wait [#allocation9], 2080  }
0x20d4   :  { %14060 = vsyncadd [#allocation9], 4294965216 }
0x20d5   :  { %14061 = dma.done.wait [#allocation12], 32  }
0x20d6   :  { %14062 = vsyncadd [#allocation12], 4294967264 }
0x20d7   :  { %11430 = vsyncpa [#allocation3], 1 }
0x20d8   :  { %11431 = vsyncpa [#allocation6], 1 }
0x20d9   :  { %11432 = vsyncpa [#allocation4], 1 }
0x20da   :  { %11433 = vsyncpa [#allocation9], 1 }
0x20db   :  { %11434 = vsyncpa [#allocation12], 1 }

</bundles_post_ra>
